<compile_context>
chip_gen: v7x
topology: tpu7x:2x2x1
jax: 0.10.0
libtpu: 0.0.40
codegen_flags: <defaults>
</compile_context>

<pallas_src>
import jax
import jax.numpy as jnp
from jax.experimental import pallas as pl
from jax.experimental.pallas import tpu as pltpu

K_IN = 72 * 100   # fc1 input width (7200)
HID = 300         # hidden width of fc1/fc2/fc3 (lanes pad to 384 in VMEM)


def _round_up(n, m):
    return ((n + m - 1) // m) * m


def _batch_tile(B):
    if B <= 128:
        return _round_up(B, 8)
    # 256-row tiles feed the 256-wide MXU on v6e/v7x; fine on v5e's VMEM too.
    return 256 if B >= 256 else 128


def mlp_kernel(x_ref, w1_ref, w2_ref, w3_ref, c_ref, o_ref):
    # c_ref rows: 0 = b1, 1 = b2, 2 = b3, 3 = w4 (as a row), 4 = [b4, 0, ...]
    # fc1 on the MXU: cast x to bf16 in-kernel (no host-side pad/cast pass).
    x = x_ref[...].astype(jnp.bfloat16)
    h = jnp.dot(x, w1_ref[...], preferred_element_type=jnp.float32)
    h = jnp.maximum(h + c_ref[0:1, :], 0.0)                       # bias1 + relu
    # fc2 + relu
    h = jnp.dot(h.astype(jnp.bfloat16), w2_ref[...],
                preferred_element_type=jnp.float32)
    h = jnp.maximum(h + c_ref[1:2, :], 0.0)
    # fc3 + relu
    h = jnp.dot(h.astype(jnp.bfloat16), w3_ref[...],
                preferred_element_type=jnp.float32)
    h = jnp.maximum(h + c_ref[2:3, :], 0.0)
    # fc4 (300 -> 1): f32 VPU multiply + lane reduction; b4 lives at c_ref[4, 0].
    logit = jnp.sum(h * c_ref[3:4, :], axis=-1, keepdims=True) + c_ref[4:5, 0:1]
    o_ref[...] = jax.nn.sigmoid(logit)


def prepare_params(params):
    """One-time (load-time) conversion to kernel-ready layout.

    Returns (w1_bf16, w2_bf16, w3_bf16, consts) where consts is a packed
    (5, HID) f32 block holding b1/b2/b3/w4 and b4.  Doing this OUTSIDE the
    per-call path removes the dominant extra HBM pass of the old version.
    """
    w1, b1, w2, b2, w3, b3, w4, b4 = params
    w1b = w1.astype(jnp.bfloat16)            # (7200, 300)
    w2b = w2.astype(jnp.bfloat16)            # (300, 300)
    w3b = w3.astype(jnp.bfloat16)            # (300, 300)
    consts = jnp.zeros((5, HID), jnp.float32)
    consts = (consts.at[0].set(b1[0])
                    .at[1].set(b2[0])
                    .at[2].set(b3[0])
                    .at[3].set(w4[0])        # w4 stored as (1, 300)
                    .at[4, 0].set(b4[0, 0]))
    return w1b, w2b, w3b, consts


@jax.jit
def mlp_forward(x, prep):
    w1b, w2b, w3b, consts = prep
    B, K = x.shape
    assert K == K_IN

    Bt = _batch_tile(B)
    B_pad = _round_up(B, Bt)
    if B_pad != B:
        # Only the batch dim is padded (cheap); padded rows are sliced off.
        x = jnp.pad(x, ((0, B_pad - B), (0, 0)))
    nb = B_pad // Bt

    # TODO(synk): on v7x with nb == 1 only one of the two TensorCores runs;
    # a K-split across cores (core_map / CORE_PARALLEL + tiny combine epilogue)
    # would roughly double small-batch HBM bandwidth there.
    out = pl.pallas_call(
        mlp_kernel,
        out_shape=jax.ShapeDtypeStruct((B_pad, 1), jnp.float32),
        grid_spec=pltpu.PrefetchScalarGridSpec(
            num_scalar_prefetch=0,
            grid=(nb,),
            in_specs=[
                pl.BlockSpec((Bt, K), lambda b: (b, 0)),      # x (f32, full-K block)
                pl.BlockSpec((K, HID), lambda b: (0, 0)),     # W1 bf16, resident
                pl.BlockSpec((HID, HID), lambda b: (0, 0)),   # W2 bf16, resident
                pl.BlockSpec((HID, HID), lambda b: (0, 0)),   # W3 bf16, resident
                pl.BlockSpec((5, HID), lambda b: (0, 0)),     # packed b1/b2/b3/w4/b4
            ],
            out_specs=pl.BlockSpec((Bt, 1), lambda b: (b, 0)),
        ),
        compiler_params=pltpu.CompilerParams(
            dimension_semantics=("parallel",),
            # Worst case (Bt=256): 2x f32 x blocks (~14.8 MB) + resident bf16
            # weights (~9.5 MB) + intermediates -> ~26 MB; 40 MiB leaves
            # headroom and is within v7x's 64 MiB physical VMEM.
            vmem_limit_bytes=40 << 20,
        ),
    )(x, w1b, w2b, w3b, consts)
    return out[:B]


def init_params(key):
    # Deterministic synthetic parameters (shapes match nn.Linear sizes,
    # stored as (in_features, out_features); fc4 weight stored as (1, 300)).
    dims = [(K_IN, HID), (HID, HID), (HID, HID), (HID, 1)]
    params = []
    for din, dout in dims:
        kw, kb, key = jax.random.split(key, 3)
        scale = 1.0 / jnp.sqrt(jnp.float32(din))
        w = jax.random.uniform(kw, (din, dout), jnp.float32, -scale, scale)
        b = jax.random.uniform(kb, (1, dout), jnp.float32, -scale, scale)
        params += [w, b]
    w1, b1, w2, b2, w3, b3, w4, b4 = params
    return (w1, b1, w2, b2, w3, b3, w4.T, b4)  # w4 as (1, 300)


def reference_forward(x, params):
    # Same dtype flow as the kernel (bf16 matmul operands, f32 accumulation).
    w1, b1, w2, b2, w3, b3, w4, b4 = params
    h = jnp.dot(x.astype(jnp.bfloat16), w1.astype(jnp.bfloat16),
                preferred_element_type=jnp.float32) + b1
    h = jnp.maximum(h, 0.0)
    h = jnp.dot(h.astype(jnp.bfloat16), w2.astype(jnp.bfloat16),
                preferred_element_type=jnp.float32) + b2
    h = jnp.maximum(h, 0.0)
    h = jnp.dot(h.astype(jnp.bfloat16), w3.astype(jnp.bfloat16),
                preferred_element_type=jnp.float32) + b3
    h = jnp.maximum(h, 0.0)
    logit = jnp.sum(h * w4, axis=-1, keepdims=True) + b4
    return jax.nn.sigmoid(logit)


if __name__ == "__main__":
    key = jax.random.PRNGKey(0)
    kx, kp = jax.random.split(key)
    B = 8
    x = jax.random.normal(kx, (B, K_IN), jnp.float32)
    params = init_params(kp)

    # One-time weight preparation (outside the per-call path).
    prep = jax.block_until_ready(prepare_params(params))

    out = mlp_forward(x, prep)
    out = jax.block_until_ready(out)

    ref = reference_forward(x, params)
    assert out.shape == (B, 1)
    assert jnp.allclose(out, ref, atol=2e-3, rtol=2e-3)
    print("KERNEL_OK")
</pallas_src>

<mosaic_0001>
module attributes {stable_mosaic.version = 11 : i64} {
  func.func @mlp_kernel(%arg0: i32, %arg1: memref<8x7200xf32, #tpu.memory_space<vmem>>, %arg2: memref<7200x300xbf16, #tpu.memory_space<vmem>>, %arg3: memref<300x300xbf16, #tpu.memory_space<vmem>>, %arg4: memref<300x300xbf16, #tpu.memory_space<vmem>>, %arg5: memref<5x300xf32, #tpu.memory_space<vmem>>, %arg6: memref<8x1xf32, #tpu.memory_space<vmem>>) attributes {dimension_semantics = [#tpu.dimension_semantics<parallel>], iteration_bounds = array<i64: 1>, scalar_prefetch = 0 : i64, scratch_operands = 0 : i64, tpu.core_type = #tpu.core_type<tc>, window_params = [{transform_indices = @transform_0, window_bounds = array<i64: 8, 7200>}, {pipeline_mode = #tpu.pipeline_mode<synchronous>, transform_indices = @transform_1, window_bounds = array<i64: 7200, 300>}, {pipeline_mode = #tpu.pipeline_mode<synchronous>, transform_indices = @transform_2, window_bounds = array<i64: 300, 300>}, {pipeline_mode = #tpu.pipeline_mode<synchronous>, transform_indices = @transform_3, window_bounds = array<i64: 300, 300>}, {pipeline_mode = #tpu.pipeline_mode<synchronous>, transform_indices = @transform_4, window_bounds = array<i64: 5, 300>}, {transform_indices = @transform_5, window_bounds = array<i64: 8, 1>}]} {
    %c0 = arith.constant 0 : index
    %c0_0 = arith.constant 0 : index
    %0 = vector.load %arg1[%c0, %c0_0] : memref<8x7200xf32, #tpu.memory_space<vmem>>, vector<8x7200xf32>
    %1 = arith.truncf %0 : vector<8x7200xf32> to vector<8x7200xbf16>
    %c0_1 = arith.constant 0 : index
    %c0_2 = arith.constant 0 : index
    %2 = vector.load %arg2[%c0_1, %c0_2] : memref<7200x300xbf16, #tpu.memory_space<vmem>>, vector<7200x300xbf16>
    %cst = arith.constant dense<0.000000e+00> : vector<8x300xf32>
    %3 = tpu.matmul %1, %2, %cst {dimension_numbers = #tpu.dot_dimension_numbers<[1], [0], [0], [1], [0, 0, 1, 1], [], []>} : vector<8x7200xbf16>, vector<7200x300xbf16>, vector<8x300xf32> -> vector<8x300xf32>
    %c0_3 = arith.constant 0 : index
    %c0_4 = arith.constant 0 : index
    %4 = vector.load %arg5[%c0_3, %c0_4] : memref<5x300xf32, #tpu.memory_space<vmem>>, vector<1x300xf32>
    %5 = vector.broadcast %4 : vector<1x300xf32> to vector<8x300xf32>
    %6 = arith.addf %3, %5 : vector<8x300xf32>
    %cst_5 = arith.constant 0.000000e+00 : f32
    %7 = vector.broadcast %cst_5 : f32 to vector<8x300xf32>
    %8 = arith.maximumf %6, %7 : vector<8x300xf32>
    %9 = arith.truncf %8 : vector<8x300xf32> to vector<8x300xbf16>
    %c0_6 = arith.constant 0 : index
    %c0_7 = arith.constant 0 : index
    %10 = vector.load %arg3[%c0_6, %c0_7] : memref<300x300xbf16, #tpu.memory_space<vmem>>, vector<300x300xbf16>
    %cst_8 = arith.constant dense<0.000000e+00> : vector<8x300xf32>
    %11 = tpu.matmul %9, %10, %cst_8 {dimension_numbers = #tpu.dot_dimension_numbers<[1], [0], [0], [1], [0, 0, 1, 1], [], []>} : vector<8x300xbf16>, vector<300x300xbf16>, vector<8x300xf32> -> vector<8x300xf32>
    %c1 = arith.constant 1 : index
    %c0_9 = arith.constant 0 : index
    %12 = vector.load %arg5[%c1, %c0_9] : memref<5x300xf32, #tpu.memory_space<vmem>>, vector<1x300xf32>
    %13 = vector.broadcast %12 : vector<1x300xf32> to vector<8x300xf32>
    %14 = arith.addf %11, %13 : vector<8x300xf32>
    %cst_10 = arith.constant 0.000000e+00 : f32
    %15 = vector.broadcast %cst_10 : f32 to vector<8x300xf32>
    %16 = arith.maximumf %14, %15 : vector<8x300xf32>
    %17 = arith.truncf %16 : vector<8x300xf32> to vector<8x300xbf16>
    %c0_11 = arith.constant 0 : index
    %c0_12 = arith.constant 0 : index
    %18 = vector.load %arg4[%c0_11, %c0_12] : memref<300x300xbf16, #tpu.memory_space<vmem>>, vector<300x300xbf16>
    %cst_13 = arith.constant dense<0.000000e+00> : vector<8x300xf32>
    %19 = tpu.matmul %17, %18, %cst_13 {dimension_numbers = #tpu.dot_dimension_numbers<[1], [0], [0], [1], [0, 0, 1, 1], [], []>} : vector<8x300xbf16>, vector<300x300xbf16>, vector<8x300xf32> -> vector<8x300xf32>
    %c2 = arith.constant 2 : index
    %c0_14 = arith.constant 0 : index
    %20 = vector.load %arg5[%c2, %c0_14] : memref<5x300xf32, #tpu.memory_space<vmem>>, vector<1x300xf32>
    %21 = vector.broadcast %20 : vector<1x300xf32> to vector<8x300xf32>
    %22 = arith.addf %19, %21 : vector<8x300xf32>
    %cst_15 = arith.constant 0.000000e+00 : f32
    %23 = vector.broadcast %cst_15 : f32 to vector<8x300xf32>
    %24 = arith.maximumf %22, %23 : vector<8x300xf32>
    %c3 = arith.constant 3 : index
    %c0_16 = arith.constant 0 : index
    %25 = vector.load %arg5[%c3, %c0_16] : memref<5x300xf32, #tpu.memory_space<vmem>>, vector<1x300xf32>
    %26 = vector.broadcast %25 : vector<1x300xf32> to vector<8x300xf32>
    %27 = arith.mulf %24, %26 : vector<8x300xf32>
    %cst_17 = arith.constant dense<0.000000e+00> : vector<8xf32>
    %28 = vector.multi_reduction <add>, %27, %cst_17 [1] : vector<8x300xf32> to vector<8xf32>
    %29 = vector.shape_cast %28 : vector<8xf32> to vector<8x1xf32>
    %c4 = arith.constant 4 : index
    %c0_18 = arith.constant 0 : index
    %30 = vector.load %arg5[%c4, %c0_18] : memref<5x300xf32, #tpu.memory_space<vmem>>, vector<1x1xf32>
    %31 = vector.broadcast %30 : vector<1x1xf32> to vector<8x1xf32>
    %32 = arith.addf %29, %31 : vector<8x1xf32>
    %33 = arith.negf %32 : vector<8x1xf32>
    %34 = math.exp %33 : vector<8x1xf32>
    %cst_19 = arith.constant 1.000000e+00 : f32
    %35 = vector.broadcast %cst_19 : f32 to vector<8x1xf32>
    %36 = arith.addf %35, %34 : vector<8x1xf32>
    %37 = arith.divf %35, %36 : vector<8x1xf32>
    %c0_20 = arith.constant 0 : index
    %c0_21 = arith.constant 0 : index
    %38 = vector.load %arg6[%c0_20, %c0_21] : memref<8x1xf32, #tpu.memory_space<vmem>>, vector<8x1xf32>
    tpu.vector_store %arg6[%c0_20, %c0_21], %37 {strides = array<i32>} : memref<8x1xf32, #tpu.memory_space<vmem>>, vector<8x1xf32>,
    return
  }
  func.func @transform_0(%arg0: i32) -> (i32, i32) {
    %c0_i32 = arith.constant 0 : i32
    %c0_i32_0 = arith.constant 0 : i32
    return %arg0, %c0_i32 : i32, i32
  }
  func.func @transform_1(%arg0: i32) -> (i32, i32) {
    %c0_i32 = arith.constant 0 : i32
    %c0_i32_0 = arith.constant 0 : i32
    %c0_i32_1 = arith.constant 0 : i32
    return %c0_i32, %c0_i32_0 : i32, i32
  }
  func.func @transform_2(%arg0: i32) -> (i32, i32) {
    %c0_i32 = arith.constant 0 : i32
    %c0_i32_0 = arith.constant 0 : i32
    %c0_i32_1 = arith.constant 0 : i32
    return %c0_i32, %c0_i32_0 : i32, i32
  }
  func.func @transform_3(%arg0: i32) -> (i32, i32) {
    %c0_i32 = arith.constant 0 : i32
    %c0_i32_0 = arith.constant 0 : i32
    %c0_i32_1 = arith.constant 0 : i32
    return %c0_i32, %c0_i32_0 : i32, i32
  }
  func.func @transform_4(%arg0: i32) -> (i32, i32) {
    %c0_i32 = arith.constant 0 : i32
    %c0_i32_0 = arith.constant 0 : i32
    %c0_i32_1 = arith.constant 0 : i32
    return %c0_i32, %c0_i32_0 : i32, i32
  }
  func.func @transform_5(%arg0: i32) -> (i32, i32) {
    %c0_i32 = arith.constant 0 : i32
    %c0_i32_0 = arith.constant 0 : i32
    return %arg0, %c0_i32 : i32, i32
  }
}

</mosaic_0001>

<bundles_post_ra>
// kernel: mlp_forward.1
= control target key start
LH: loop header
LB: loop body
LE: loop exit
PB: predicated region body
PF: predicated region fallthrough
CT: control target
= control target key end

     0   :  { %vm9152_vm0 = vcmask 261120   ;;  %vm16959_vm1 = vmmov 0   ;;  %vm11910_vm2 = vcmask 1045504   ;;  %vm11906_vm3 = vcmask 359424   ;;  %s21917_s1 = inlined_call_operand.vmem [shape: bf16[7200,300], index: 1, kind: input, shape index: {}]   ;;  %s21918_s0 = inlined_call_operand.vmem [shape: f32[8,7200], index: 0, kind: input, shape index: {}]   ;;  %s21919_s4 = inlined_call_operand.vmem [shape: f32[5,300], index: 4, kind: input, shape index: {}]   ;;  %s21920_s2 = inlined_call_operand.vmem [shape: bf16[300,300], index: 2, kind: input, shape index: {}]   ;;  %s21921_s3 = inlined_call_operand.vmem [shape: bf16[300,300], index: 3, kind: input, shape index: {}]   ;;  %s21922_s5 = inlined_call_operand.vmem [shape: f32[8,1], index: 5, kind: output, shape index: {}]  }
   0x1   :  { %v15000_v0 = vld [vmem:[%s21917_s1 + $0x4] ss:$12 sps:$4 sm:$0xff]   ;;  %v15004_v2 = vld [vmem:[%s21917_s1] ss:$12 sps:$4 sm:$0xff]   ;;  %v15006_v4 = vld [vmem:[%s21917_s1 + $0x1c] ss:$12 sps:$4 sm:$0xff]  }
   0x2   :  { %v15002_v1 = vld [vmem:[%s21917_s1 + $0x784] ss:$12 sps:$4 sm:$0xff]   ;;  %9156 = vmatprep.subr.bf16.mxu1 %v15000_v0  ;;  %v15005_v3 = vld [vmem:[%s21917_s1 + $0x780] ss:$12 sps:$4 sm:$0xff]   ;;  %v15008_v5 = vld [vmem:[%s21917_s1 + $0x79c] ss:$12 sps:$4 sm:$0xff]  }
   0x3   :  { %9361 = vmatprep.subr.bf16.mxu0 %v15002_v1  ;;  %9157 = vmatpush1.bf16.msra.mxu1 %v15004_v2  ;;  %v15010_v6 = vld [vmem:[%s21917_s1 + $0x18] ss:$12 sps:$4 sm:$0xff]   ;;  %v15012_v8 = vld [vmem:[%s21917_s1 + $0x34] ss:$12 sps:$4 sm:$0xff]   ;;  %v15016_v10 = vld [vmem:[%s21917_s1 + $0x30] ss:$12 sps:$4 sm:$0xff]  }
   0x4   :  { %9362 = vmatpush1.bf16.msra.mxu0 %v15005_v3  ;;  %9158 = vmatprep.subr.bf16.mxu1 %v15006_v4  ;;  %v15011_v7 = vld [vmem:[%s21917_s1 + $0x798] ss:$12 sps:$4 sm:$0xff]   ;;  %v15014_v9 = vld [vmem:[%s21917_s1 + $0x7b4] ss:$12 sps:$4 sm:$0xff]   ;;  %v15017_v11 = vld [vmem:[%s21917_s1 + $0x7b0] ss:$12 sps:$4 sm:$0xff]  }
   0x5   :  { %9363 = vmatprep.subr.bf16.mxu0 %v15008_v5  ;;  %v15018_v12 = vld [vmem:[%s21917_s1 + $0x4c] ss:$12 sps:$4 sm:$0xff]   ;;  %v15022_v14 = vld [vmem:[%s21917_s1 + $0x48] ss:$12 sps:$4 sm:$0xff]   ;;  %v15024_v16 = vld [vmem:[%s21917_s1 + $0x64] ss:$12 sps:$4 sm:$0xff]  }
   0x6   :  { %v15020_v13 = vld [vmem:[%s21917_s1 + $0x7cc] ss:$12 sps:$4 sm:$0xff]   ;;  %v15023_v15 = vld [vmem:[%s21917_s1 + $0x7c8] ss:$12 sps:$4 sm:$0xff]   ;;  %v15026_v17 = vld [vmem:[%s21917_s1 + $0x7e4] ss:$12 sps:$4 sm:$0xff]  }
   0x7   :  { %9159 = vmatpush1.bf16.msra.mxu1 %v15010_v6  ;;  %v15028_v18 = vld [vmem:[%s21917_s1 + $0x60] ss:$12 sps:$4 sm:$0xff]   ;;  %v15030_v20 = vld [vmem:[%s21917_s1 + $0x7c] ss:$12 sps:$4 sm:$0xff]   ;;  %v15034_v22 = vld [vmem:[%s21917_s1 + $0x78] ss:$12 sps:$4 sm:$0xff]  }
   0x8   :  { %9364 = vmatpush1.bf16.msra.mxu0 %v15011_v7  ;;  %9160 = vmatprep.subr.bf16.mxu1 %v15012_v8  ;;  %v15029_v19 = vld [vmem:[%s21917_s1 + $0x7e0] ss:$12 sps:$4 sm:$0xff]   ;;  %v15032_v21 = vld [vmem:[%s21917_s1 + $0x7fc] ss:$12 sps:$4 sm:$0xff]   ;;  %v15035_v23 = vld [vmem:[%s21917_s1 + $0x7f8] ss:$12 sps:$4 sm:$0xff]  }
   0x9   :  { %9365 = vmatprep.subr.bf16.mxu0 %v15014_v9  ;;  %v15036_v24 = vld [vmem:[%s21917_s1 + $0x94] ss:$12 sps:$4 sm:$0xff]   ;;  %v15040_v26 = vld [vmem:[%s21917_s1 + $0x90] ss:$12 sps:$4 sm:$0xff]   ;;  %v15042_v28 = vld [vmem:[%s21917_s1 + $0xac] ss:$12 sps:$4 sm:$0xff]  }
   0xa   :  { %v15038_v25 = vld [vmem:[%s21917_s1 + $0x814] ss:$12 sps:$4 sm:$0xff]   ;;  %v15041_v27 = vld [vmem:[%s21917_s1 + $0x810] ss:$12 sps:$4 sm:$0xff]   ;;  %v15044_v29 = vld [vmem:[%s21917_s1 + $0x82c] ss:$12 sps:$4 sm:$0xff]  }
   0xb   :  { %9161 = vmatpush1.bf16.msra.mxu1 %v15016_v10  ;;  %v15046_v30 = vld [vmem:[%s21917_s1 + $0xa8] ss:$12 sps:$4 sm:$0xff]   ;;  %v15048_v32 = vld [vmem:[%s21917_s1 + $0xc4] ss:$12 sps:$4 sm:$0xff]   ;;  %v15052_v34 = vld [vmem:[%s21917_s1 + $0xc0] ss:$12 sps:$4 sm:$0xff]  }
   0xc   :  { %9366 = vmatpush1.bf16.msra.mxu0 %v15017_v11  ;;  %9162 = vmatprep.subr.bf16.mxu1 %v15018_v12  ;;  %v15047_v31 = vld [vmem:[%s21917_s1 + $0x828] ss:$12 sps:$4 sm:$0xff]   ;;  %v15050_v33 = vld [vmem:[%s21917_s1 + $0x844] ss:$12 sps:$4 sm:$0xff]   ;;  %v15053_v35 = vld [vmem:[%s21917_s1 + $0x840] ss:$12 sps:$4 sm:$0xff]  }
   0xd   :  { %9367 = vmatprep.subr.bf16.mxu0 %v15020_v13  ;;  %v15054_v36 = vld [vmem:[%s21917_s1 + $0xdc] ss:$12 sps:$4 sm:$0xff]   ;;  %v15058_v38 = vld [vmem:[%s21917_s1 + $0xd8] ss:$12 sps:$4 sm:$0xff]   ;;  %v15060_v40 = vld [vmem:[%s21917_s1 + $0xf4] ss:$12 sps:$4 sm:$0xff]  }
   0xe   :  { %v15056_v37 = vld [vmem:[%s21917_s1 + $0x85c] ss:$12 sps:$4 sm:$0xff]   ;;  %v15059_v39 = vld [vmem:[%s21917_s1 + $0x858] ss:$12 sps:$4 sm:$0xff]   ;;  %v15062_v41 = vld [vmem:[%s21917_s1 + $0x874] ss:$12 sps:$4 sm:$0xff]  }
   0xf   :  { %9163 = vmatpush1.bf16.msra.mxu1 %v15022_v14  ;;  %v15064_v42 = vld [vmem:[%s21917_s1 + $0xf0] ss:$12 sps:$4 sm:$0xff]   ;;  %v15066_v44 = vld [vmem:[%s21917_s1 + $0x10c] ss:$12 sps:$4 sm:$0xff]   ;;  %v15070_v47 = vld [vmem:[%s21917_s1 + $0x108] ss:$12 sps:$4 sm:$0xff]  }
  0x10   :  { %9368 = vmatpush1.bf16.msra.mxu0 %v15023_v15  ;;  %9164 = vmatprep.subr.bf16.mxu1 %v15024_v16  ;;  %v15065_v43 = vld [vmem:[%s21917_s1 + $0x870] ss:$12 sps:$4 sm:$0xff]   ;;  %v15068_v45 = vld [vmem:[%s21917_s1 + $0x88c] ss:$12 sps:$4 sm:$0xff]   ;;  %v15071_v49 = vld [vmem:[%s21917_s1 + $0x888] ss:$12 sps:$4 sm:$0xff]  }
  0x11   :  { %9369 = vmatprep.subr.bf16.mxu0 %v15026_v17  ;;  %v22_v46 = vld [vmem:[%s21918_s0 + $0x8] sm:$0xff]  ;;  %v32_v50 = vld [vmem:[%s21918_s0 + $0x58] sm:$0xff]  ;;  %v15072_v51 = vld [vmem:[%s21917_s1 + $0x124] ss:$12 sps:$4 sm:$0xff]   ;;  %vm12694_vm4 = vcmask 7168  }
  0x12   :  { %v17134_v48 = vpack.c.bf16 %v22_v46, %v22_v46  ;;  %v15074_v52 = vld [vmem:[%s21917_s1 + $0x8a4] ss:$12 sps:$4 sm:$0xff]   ;;  %v17148_v53 = vpack.c.bf16 %v32_v50, %v32_v50  ;;  %v15076_v54 = vld [vmem:[%s21917_s1 + $0x120] ss:$12 sps:$4 sm:$0xff]   ;;  %v15078_v56 = vld [vmem:[%s21917_s1 + $0x13c] ss:$12 sps:$4 sm:$0xff]  }
  0x13   :  { %9165 = vmatpush1.bf16.msra.mxu1 %v15028_v18  ;;  %v15077_v55 = vld [vmem:[%s21917_s1 + $0x8a0] ss:$12 sps:$4 sm:$0xff]   ;;  %v15080_v57 = vld [vmem:[%s21917_s1 + $0x8bc] ss:$12 sps:$4 sm:$0xff]   ;;  %v15082_v58 = vld [vmem:[%s21917_s1 + $0x138] ss:$12 sps:$4 sm:$0xff]  }
  0x14   :  { %9370 = vmatpush1.bf16.msra.mxu0 %v15029_v19  ;;  %9166 = vmatprep.subr.bf16.mxu1 %v15030_v20  ;;  %v15083_v59 = vld [vmem:[%s21917_s1 + $0x8b8] ss:$12 sps:$4 sm:$0xff]   ;;  %v15084_v60 = vld [vmem:[%s21917_s1 + $0x154] ss:$12 sps:$4 sm:$0xff]   ;;  %v15088_v62 = vld [vmem:[%s21917_s1 + $0x150] ss:$12 sps:$4 sm:$0xff]  }
  0x15   :  { %9371 = vmatprep.subr.bf16.mxu0 %v15032_v21  ;;  %9188 = vmatprep.mubr.bf16.mxu1 %v17134_v48  ;;  %v15086_v61 = vld [vmem:[%s21917_s1 + $0x8d4] ss:$12 sps:$4 sm:$0xff]   ;;  %v15089_v63 = vld [vmem:[%s21917_s1 + $0x8d0] ss:$12 sps:$4 sm:$0xff]   ;;  %v15090_v0 = vld [vmem:[%s21917_s1 + $0x16c] ss:$12 sps:$4 sm:$0xff]  }
  0x16   :  { %9393 = vmatprep.mubr.bf16.mxu0 %v17148_v53  ;;  %v15092_v1 = vld [vmem:[%s21917_s1 + $0x8ec] ss:$12 sps:$4 sm:$0xff]   ;;  %v15094_v2 = vld [vmem:[%s21917_s1 + $0x168] ss:$12 sps:$4 sm:$0xff]   ;;  %v15098_v4 = vld [vmem:[%s21917_s1 + $0x184] ss:$12 sps:$4 sm:$0xff]  }
  0x17   :  { %9167 = vmatpush1.bf16.msra.mxu1 %v15034_v22  ;;  %v15095_v3 = vld [vmem:[%s21917_s1 + $0x8e8] ss:$12 sps:$4 sm:$0xff]   ;;  %v21_v5 = vld [vmem:[%s21918_s0] sm:$0xff]  ;;  %v15108_v18 = vld [vmem:[%s21917_s1 + $0x1b0] ss:$12 sps:$4 sm:$0xff]  }
  0x18   :  { %9372 = vmatpush1.bf16.msra.mxu0 %v15035_v23  ;;  %9168 = vmatprep.subr.bf16.mxu1 %v15036_v24  ;;  %v31_v6 = vld [vmem:[%s21918_s0 + $0x50] sm:$0xff]  ;;  %v15096_v8 = vld [vmem:[%s21917_s1 + $0x180] ss:$12 sps:$4 sm:$0xff]   ;;  %v17212_v10 = vpack.c.bf16 %v21_v5, %v21_v5  ;;  %v15104_v12 = vld [vmem:[%s21917_s1 + $0x19c] ss:$12 sps:$4 sm:$0xff]  }
  0x19   :  { %9373 = vmatprep.subr.bf16.mxu0 %v15038_v25  ;;  %v15101_v7 = vld [vmem:[%s21917_s1 + $0x904] ss:$12 sps:$4 sm:$0xff]   ;;  %v15099_v9 = vld [vmem:[%s21917_s1 + $0x900] ss:$12 sps:$4 sm:$0xff]   ;;  %v17214_v11 = vpack.c.bf16 %v31_v6, %v31_v6  ;;  %v15107_v13 = vld [vmem:[%s21917_s1 + $0x91c] ss:$12 sps:$4 sm:$0xff]  }
  0x1a   :  { %v15102_v14 = vld [vmem:[%s21917_s1 + $0x198] ss:$12 sps:$4 sm:$0xff]   ;;  %v15110_v16 = vld [vmem:[%s21917_s1 + $0x1b4] ss:$12 sps:$4 sm:$0xff]   ;;  %v15111_v19 = vld [vmem:[%s21917_s1 + $0x930] ss:$12 sps:$4 sm:$0xff]  }
  0x1b   :  { %9169 = vmatpush1.bf16.msra.mxu1 %v15040_v26  ;;  %v15105_v15 = vld [vmem:[%s21917_s1 + $0x918] ss:$12 sps:$4 sm:$0xff]   ;;  %v15113_v17 = vld [vmem:[%s21917_s1 + $0x934] ss:$12 sps:$4 sm:$0xff]   ;;  %v15155_v50 = vld [vmem:[%s21917_s1 + $0x9dc] ss:$12 sps:$4 sm:$0xff]  }
  0x1c   :  { %9374 = vmatpush1.bf16.msra.mxu0 %v15041_v27  ;;  %9170 = vmatprep.subr.bf16.mxu1 %v15042_v28  ;;  %v15116_v20 = vld [vmem:[%s21917_s1 + $0x1cc] ss:$12 sps:$4 sm:$0xff]   ;;  %v15114_v22 = vld [vmem:[%s21917_s1 + $0x1c8] ss:$12 sps:$4 sm:$0xff]   ;;  %v15122_v24 = vld [vmem:[%s21917_s1 + $0x1e4] ss:$12 sps:$4 sm:$0xff]  }
  0x1d   :  { %9375 = vmatprep.subr.bf16.mxu0 %v15044_v29  ;;  %v15119_v21 = vld [vmem:[%s21917_s1 + $0x94c] ss:$12 sps:$4 sm:$0xff]   ;;  %v15117_v23 = vld [vmem:[%s21917_s1 + $0x948] ss:$12 sps:$4 sm:$0xff]   ;;  %v15125_v25 = vld [vmem:[%s21917_s1 + $0x964] ss:$12 sps:$4 sm:$0xff]  }
  0x1e   :  { %v15120_v26 = vld [vmem:[%s21917_s1 + $0x1e0] ss:$12 sps:$4 sm:$0xff]   ;;  %v15128_v28 = vld [vmem:[%s21917_s1 + $0x1fc] ss:$12 sps:$4 sm:$0xff]   ;;  %v15177_v5 = vld [vmem:[%s21917_s1 + $0xa38] ss:$12 sps:$4 sm:$0xff]  }
  0x1f   :  { %9171 = vmatpush1.bf16.msra.mxu1 %v15046_v30  ;;  %v15123_v27 = vld [vmem:[%s21917_s1 + $0x960] ss:$12 sps:$4 sm:$0xff]   ;;  %v15131_v29 = vld [vmem:[%s21917_s1 + $0x97c] ss:$12 sps:$4 sm:$0xff]   ;;  %v15126_v30 = vld [vmem:[%s21917_s1 + $0x1f8] ss:$12 sps:$4 sm:$0xff]  }
  0x20   :  { %9376 = vmatpush1.bf16.msra.mxu0 %v15047_v31  ;;  %9172 = vmatprep.subr.bf16.mxu1 %v15048_v32  ;;  %v15129_v31 = vld [vmem:[%s21917_s1 + $0x978] ss:$12 sps:$4 sm:$0xff]   ;;  %v15134_v32 = vld [vmem:[%s21917_s1 + $0x214] ss:$12 sps:$4 sm:$0xff]  }
  0x21   :  { %9377 = vmatprep.subr.bf16.mxu0 %v15050_v33  ;;  %v15137_v33 = vld [vmem:[%s21917_s1 + $0x994] ss:$12 sps:$4 sm:$0xff]  }
  0x22   :  { %v15144_v46 = vld [vmem:[%s21917_s1 + $0x240] ss:$12 sps:$4 sm:$0xff]  }
  0x23   :  { %9173 = vmatpush1.bf16.msra.mxu1 %v15052_v34  ;;  %v24_v34 = vld [vmem:[%s21918_s0 + $0x18] sm:$0xff]  ;;  %v15182_v6 = vld [vmem:[%s21917_s1 + $0x2d4] ss:$12 sps:$4 sm:$0xff]  }
  0x24   :  { %9378 = vmatpush1.bf16.msra.mxu0 %v15053_v35  ;;  %9174 = vmatprep.subr.bf16.mxu1 %v15054_v36  ;;  %v15132_v35 = vld [vmem:[%s21917_s1 + $0x210] ss:$12 sps:$4 sm:$0xff]   ;;  %v17290_v36 = vpack.c.bf16 %v24_v34, %v24_v34 }
  0x25   :  { %9379 = vmatprep.subr.bf16.mxu0 %v15056_v37  ;;  %v15135_v37 = vld [vmem:[%s21917_s1 + $0x990] ss:$12 sps:$4 sm:$0xff]  }
  0x26   :  { %v15204_v34 = vld [vmem:[%s21917_s1 + $0x330] ss:$12 sps:$4 sm:$0xff]  }
  0x27   :  { %9175 = vmatpush1.bf16.msra.mxu1 %v15058_v38  ;;  %v34_v38 = vld [vmem:[%s21918_s0 + $0x68] sm:$0xff] }
  0x28   :  { %9380 = vmatpush1.bf16.msra.mxu0 %v15059_v39  ;;  %9176 = vmatprep.subr.bf16.mxu1 %v15060_v40  ;;  %v15140_v39 = vld [vmem:[%s21917_s1 + $0x22c] ss:$12 sps:$4 sm:$0xff]  }
  0x29   :  { %9381 = vmatprep.subr.bf16.mxu0 %v15062_v41  ;;  %v15143_v40 = vld [vmem:[%s21917_s1 + $0x9ac] ss:$12 sps:$4 sm:$0xff]   ;;  %v17304_v41 = vpack.c.bf16 %v34_v38, %v34_v38 }
  0x2a   :  { %v15215_v38 = vld [vmem:[%s21917_s1 + $0xacc] ss:$12 sps:$4 sm:$0xff]  }
  0x2b   :  { %9177 = vmatpush1.bf16.msra.mxu1 %v15064_v42  ;;  %v15138_v42 = vld [vmem:[%s21917_s1 + $0x228] ss:$12 sps:$4 sm:$0xff]  }
  0x2c   :  { %9382 = vmatpush1.bf16.msra.mxu0 %v15065_v43  ;;  %9178 = vmatprep.subr.bf16.mxu1 %v15066_v44  ;;  %v15141_v43 = vld [vmem:[%s21917_s1 + $0x9a8] ss:$12 sps:$4 sm:$0xff]   ;;  %v15146_v44 = vld [vmem:[%s21917_s1 + $0x244] ss:$12 sps:$4 sm:$0xff]  }
  0x2d   :  { %9383 = vmatprep.subr.bf16.mxu0 %v15068_v45  ;;  %v15149_v45 = vld [vmem:[%s21917_s1 + $0x9c4] ss:$12 sps:$4 sm:$0xff]  }
  0x2f   :  { %9179 = vmatpush1.bf16.msra.mxu1 %v15070_v47  ;;  %v15147_v47 = vld [vmem:[%s21917_s1 + $0x9c0] ss:$12 sps:$4 sm:$0xff]  }
  0x30   :  { %9384 = vmatpush1.bf16.msra.mxu0 %v15071_v49  ;;  %9180 = vmatprep.subr.bf16.mxu1 %v15072_v51  ;;  %v15152_v49 = vld [vmem:[%s21917_s1 + $0x25c] ss:$12 sps:$4 sm:$0xff]   ;;  %v15150_v51 = vld [vmem:[%s21917_s1 + $0x258] ss:$12 sps:$4 sm:$0xff]  }
  0x31   :  { %9385 = vmatprep.subr.bf16.mxu0 %v15074_v52  ;;  %v15153_v52 = vld [vmem:[%s21917_s1 + $0x9d8] ss:$12 sps:$4 sm:$0xff]  }
  0x33   :  { %9181 = vmatpush1.bf16.msra.mxu1 %v15076_v54  ;;  %v15158_v54 = vld [vmem:[%s21917_s1 + $0x274] ss:$12 sps:$4 sm:$0xff]  }
  0x34   :  { %9386 = vmatpush1.bf16.msra.mxu0 %v15077_v55  ;;  %9182 = vmatprep.subr.bf16.mxu1 %v15078_v56  ;;  %v15161_v55 = vld [vmem:[%s21917_s1 + $0x9f4] ss:$12 sps:$4 sm:$0xff]   ;;  %v15156_v56 = vld [vmem:[%s21917_s1 + $0x270] ss:$12 sps:$4 sm:$0xff]  }
  0x35   :  { %9387 = vmatprep.subr.bf16.mxu0 %v15080_v57  ;;  %v15159_v57 = vld [vmem:[%s21917_s1 + $0x9f0] ss:$12 sps:$4 sm:$0xff]  }
  0x37   :  { %9183 = vmatpush1.bf16.msra.mxu1 %v15082_v58  ;;  %v15164_v58 = vld [vmem:[%s21917_s1 + $0x28c] ss:$12 sps:$4 sm:$0xff]  }
  0x38   :  { %9388 = vmatpush1.bf16.msra.mxu0 %v15083_v59  ;;  %9184 = vmatprep.subr.bf16.mxu1 %v15084_v60  ;;  %v15167_v59 = vld [vmem:[%s21917_s1 + $0xa0c] ss:$12 sps:$4 sm:$0xff]   ;;  %v15162_v60 = vld [vmem:[%s21917_s1 + $0x288] ss:$12 sps:$4 sm:$0xff]  }
  0x39   :  { %9389 = vmatprep.subr.bf16.mxu0 %v15086_v61  ;;  %v15165_v61 = vld [vmem:[%s21917_s1 + $0xa08] ss:$12 sps:$4 sm:$0xff]  }
  0x3b   :  { %9185 = vmatpush1.bf16.msra.mxu1 %v15088_v62  ;;  %v15170_v62 = vld [vmem:[%s21917_s1 + $0x2a4] ss:$12 sps:$4 sm:$0xff]  }
  0x3c   :  { %9390 = vmatpush1.bf16.msra.mxu0 %v15089_v63  ;;  %9186 = vmatprep.subr.bf16.mxu1 %v15090_v0  ;;  %v15173_v63 = vld [vmem:[%s21917_s1 + $0xa24] ss:$12 sps:$4 sm:$0xff]   ;;  %v15168_v0 = vld [vmem:[%s21917_s1 + $0x2a0] ss:$12 sps:$4 sm:$0xff]  }
  0x3d   :  { %9391 = vmatprep.subr.bf16.mxu0 %v15092_v1  ;;  %v15171_v1 = vld [vmem:[%s21917_s1 + $0xa20] ss:$12 sps:$4 sm:$0xff]  }
  0x3f   :  { %9187 = vmatpush1.bf16.msra.mxu1 %v15094_v2  ;;  %v15176_v2 = vld [vmem:[%s21917_s1 + $0x2bc] ss:$12 sps:$4 sm:$0xff]  }
  0x40   :  { %9392 = vmatpush1.bf16.msra.mxu0 %v15095_v3  ;;  %9197 = vmatprep.subr.bf16.mxu1 %v15098_v4  ;;  %v15179_v3 = vld [vmem:[%s21917_s1 + $0xa3c] ss:$12 sps:$4 sm:$0xff]   ;;  %v15174_v4 = vld [vmem:[%s21917_s1 + $0x2b8] ss:$12 sps:$4 sm:$0xff]  }
  0x41   :  { %9402 = vmatprep.subr.bf16.mxu0 %v15101_v7  ;;  %v15185_v7 = vld [vmem:[%s21917_s1 + $0xa54] ss:$12 sps:$4 sm:$0xff]  }
  0x42   :  { %9189 = vmatmul.mubr.bf16.vlgmr.msra.gmra.mrb[0].mxu1 %v17212_v10 }
  0x43   :  { %9394 = vmatmul.mubr.bf16.vlgmr.msra.gmra.mrb[0].mxu0 %v17214_v11  ;;  %9198 = vmatpush1.bf16.msra.mxu1 %v15096_v8  ;;  %v15180_v8 = vld [vmem:[%s21917_s1 + $0x2d0] ss:$12 sps:$4 sm:$0xff]  }
  0x44   :  { %9403 = vmatpush1.bf16.msra.mxu0 %v15099_v9  ;;  %9199 = vmatprep.subr.bf16.mxu1 %v15104_v12  ;;  %v15183_v9 = vld [vmem:[%s21917_s1 + $0xa50] ss:$12 sps:$4 sm:$0xff]   ;;  %v15188_v12 = vld [vmem:[%s21917_s1 + $0x2ec] ss:$12 sps:$4 sm:$0xff]  }
  0x45   :  { %9404 = vmatprep.subr.bf16.mxu0 %v15107_v13  ;;  %9229 = vmatprep.mubr.bf16.mxu1 %v17290_v36  ;;  %v15191_v13 = vld [vmem:[%s21917_s1 + $0xa6c] ss:$12 sps:$4 sm:$0xff]  }
  0x46   :  { %9434 = vmatprep.mubr.bf16.mxu0 %v17304_v41 }
  0x47   :  { %9200 = vmatpush1.bf16.msra.mxu1 %v15102_v14  ;;  %v15186_v14 = vld [vmem:[%s21917_s1 + $0x2e8] ss:$12 sps:$4 sm:$0xff]  }
  0x48   :  { %9405 = vmatpush1.bf16.msra.mxu0 %v15105_v15  ;;  %9201 = vmatprep.subr.bf16.mxu1 %v15110_v16  ;;  %v15189_v15 = vld [vmem:[%s21917_s1 + $0xa68] ss:$12 sps:$4 sm:$0xff]   ;;  %v15194_v16 = vld [vmem:[%s21917_s1 + $0x304] ss:$12 sps:$4 sm:$0xff]  }
  0x49   :  { %9406 = vmatprep.subr.bf16.mxu0 %v15113_v17  ;;  %v23_v17 = vld [vmem:[%s21918_s0 + $0x10] sm:$0xff] }
  0x4b   :  { %9202 = vmatpush1.bf16.msra.mxu1 %v15108_v18  ;;  %v33_v18 = vld [vmem:[%s21918_s0 + $0x60] sm:$0xff] }
  0x4c   :  { %9407 = vmatpush1.bf16.msra.mxu0 %v15111_v19  ;;  %9203 = vmatprep.subr.bf16.mxu1 %v15116_v20  ;;  %v15197_v19 = vld [vmem:[%s21917_s1 + $0xa84] ss:$12 sps:$4 sm:$0xff]   ;;  %v15192_v20 = vld [vmem:[%s21917_s1 + $0x300] ss:$12 sps:$4 sm:$0xff]  }
  0x4d   :  { %9408 = vmatprep.subr.bf16.mxu0 %v15119_v21  ;;  %v15195_v21 = vld [vmem:[%s21917_s1 + $0xa80] ss:$12 sps:$4 sm:$0xff]  }
  0x4f   :  { %9204 = vmatpush1.bf16.msra.mxu1 %v15114_v22  ;;  %v17428_v22 = vpack.c.bf16 %v23_v17, %v23_v17  ;;  %v15267_v17 = vld [vmem:[%s21917_s1 + $0xba0] ss:$12 sps:$4 sm:$0xff]  }
  0x50   :  { %9409 = vmatpush1.bf16.msra.mxu0 %v15117_v23  ;;  %9205 = vmatprep.subr.bf16.mxu1 %v15122_v24  ;;  %v17430_v23 = vpack.c.bf16 %v33_v18, %v33_v18  ;;  %v15200_v24 = vld [vmem:[%s21917_s1 + $0x31c] ss:$12 sps:$4 sm:$0xff]  }
  0x51   :  { %9410 = vmatprep.subr.bf16.mxu0 %v15125_v25  ;;  %v15203_v25 = vld [vmem:[%s21917_s1 + $0xa9c] ss:$12 sps:$4 sm:$0xff]  }
  0x52   :  { %v15272_v18 = vld [vmem:[%s21917_s1 + $0x43c] ss:$12 sps:$4 sm:$0xff]  }
  0x53   :  { %9206 = vmatpush1.bf16.msra.mxu1 %v15120_v26  ;;  %v26_v26 = vld [vmem:[%s21918_s0 + $0x28] sm:$0xff] }
  0x54   :  { %9411 = vmatpush1.bf16.msra.mxu0 %v15123_v27  ;;  %9207 = vmatprep.subr.bf16.mxu1 %v15128_v28  ;;  %v15198_v27 = vld [vmem:[%s21917_s1 + $0x318] ss:$12 sps:$4 sm:$0xff]   ;;  %v17446_v28 = vpack.c.bf16 %v26_v26, %v26_v26  ;;  %v15276_v26 = vld [vmem:[%s21917_s1 + $0x450] ss:$12 sps:$4 sm:$0xff]  }
  0x55   :  { %9412 = vmatprep.subr.bf16.mxu0 %v15131_v29  ;;  %v15201_v29 = vld [vmem:[%s21917_s1 + $0xa98] ss:$12 sps:$4 sm:$0xff]  }
  0x57   :  { %9208 = vmatpush1.bf16.msra.mxu1 %v15126_v30  ;;  %v36_v30 = vld [vmem:[%s21918_s0 + $0x78] sm:$0xff] }
  0x58   :  { %9413 = vmatpush1.bf16.msra.mxu0 %v15129_v31  ;;  %9209 = vmatprep.subr.bf16.mxu1 %v15134_v32  ;;  %v15206_v31 = vld [vmem:[%s21917_s1 + $0x334] ss:$12 sps:$4 sm:$0xff]  }
  0x59   :  { %9414 = vmatprep.subr.bf16.mxu0 %v15137_v33  ;;  %v15209_v32 = vld [vmem:[%s21917_s1 + $0xab4] ss:$12 sps:$4 sm:$0xff]   ;;  %v17460_v33 = vpack.c.bf16 %v36_v30, %v36_v30  ;;  %v15287_v30 = vld [vmem:[%s21917_s1 + $0xbec] ss:$12 sps:$4 sm:$0xff]  }
  0x5b   :  { %9210 = vmatpush1.bf16.msra.mxu1 %v15132_v35  ;;  %v15207_v35 = vld [vmem:[%s21917_s1 + $0xab0] ss:$12 sps:$4 sm:$0xff]  }
  0x5c   :  { %9415 = vmatpush1.bf16.msra.mxu0 %v15135_v37  ;;  %9211 = vmatprep.subr.bf16.mxu1 %v15140_v39  ;;  %v15212_v37 = vld [vmem:[%s21917_s1 + $0x34c] ss:$12 sps:$4 sm:$0xff]   ;;  %v15210_v39 = vld [vmem:[%s21917_s1 + $0x348] ss:$12 sps:$4 sm:$0xff]  }
  0x5d   :  { %9416 = vmatprep.subr.bf16.mxu0 %v15143_v40  ;;  %v15213_v40 = vld [vmem:[%s21917_s1 + $0xac8] ss:$12 sps:$4 sm:$0xff]  }
  0x5f   :  { %9212 = vmatpush1.bf16.msra.mxu1 %v15138_v42  ;;  %v15218_v42 = vld [vmem:[%s21917_s1 + $0x364] ss:$12 sps:$4 sm:$0xff]  }
  0x60   :  { %9417 = vmatpush1.bf16.msra.mxu0 %v15141_v43  ;;  %9213 = vmatprep.subr.bf16.mxu1 %v15146_v44  ;;  %v15221_v43 = vld [vmem:[%s21917_s1 + $0xae4] ss:$12 sps:$4 sm:$0xff]   ;;  %v15216_v44 = vld [vmem:[%s21917_s1 + $0x360] ss:$12 sps:$4 sm:$0xff]  }
  0x61   :  { %9418 = vmatprep.subr.bf16.mxu0 %v15149_v45  ;;  %v15219_v45 = vld [vmem:[%s21917_s1 + $0xae0] ss:$12 sps:$4 sm:$0xff]  }
  0x63   :  { %9214 = vmatpush1.bf16.msra.mxu1 %v15144_v46  ;;  %v15224_v46 = vld [vmem:[%s21917_s1 + $0x37c] ss:$12 sps:$4 sm:$0xff]  }
  0x64   :  { %9419 = vmatpush1.bf16.msra.mxu0 %v15147_v47  ;;  %9215 = vmatprep.subr.bf16.mxu1 %v15152_v49  ;;  %v15227_v47 = vld [vmem:[%s21917_s1 + $0xafc] ss:$12 sps:$4 sm:$0xff]   ;;  %v15222_v49 = vld [vmem:[%s21917_s1 + $0x378] ss:$12 sps:$4 sm:$0xff]  }
  0x65   :  { %9420 = vmatprep.subr.bf16.mxu0 %v15155_v50  ;;  %v15225_v50 = vld [vmem:[%s21917_s1 + $0xaf8] ss:$12 sps:$4 sm:$0xff]  }
  0x67   :  { %9216 = vmatpush1.bf16.msra.mxu1 %v15150_v51  ;;  %v15230_v51 = vld [vmem:[%s21917_s1 + $0x394] ss:$12 sps:$4 sm:$0xff]  }
  0x68   :  { %9421 = vmatpush1.bf16.msra.mxu0 %v15153_v52  ;;  %9217 = vmatprep.subr.bf16.mxu1 %v15158_v54  ;;  %v15233_v52 = vld [vmem:[%s21917_s1 + $0xb14] ss:$12 sps:$4 sm:$0xff]   ;;  %v15228_v54 = vld [vmem:[%s21917_s1 + $0x390] ss:$12 sps:$4 sm:$0xff]  }
  0x69   :  { %9422 = vmatprep.subr.bf16.mxu0 %v15161_v55  ;;  %v15231_v55 = vld [vmem:[%s21917_s1 + $0xb10] ss:$12 sps:$4 sm:$0xff]  }
  0x6b   :  { %9218 = vmatpush1.bf16.msra.mxu1 %v15156_v56  ;;  %v15236_v56 = vld [vmem:[%s21917_s1 + $0x3ac] ss:$12 sps:$4 sm:$0xff]  }
  0x6c   :  { %9423 = vmatpush1.bf16.msra.mxu0 %v15159_v57  ;;  %9219 = vmatprep.subr.bf16.mxu1 %v15164_v58  ;;  %v15239_v57 = vld [vmem:[%s21917_s1 + $0xb2c] ss:$12 sps:$4 sm:$0xff]   ;;  %v15234_v58 = vld [vmem:[%s21917_s1 + $0x3a8] ss:$12 sps:$4 sm:$0xff]  }
  0x6d   :  { %9424 = vmatprep.subr.bf16.mxu0 %v15167_v59  ;;  %v15237_v59 = vld [vmem:[%s21917_s1 + $0xb28] ss:$12 sps:$4 sm:$0xff]  }
  0x6f   :  { %9220 = vmatpush1.bf16.msra.mxu1 %v15162_v60  ;;  %v15242_v60 = vld [vmem:[%s21917_s1 + $0x3c4] ss:$12 sps:$4 sm:$0xff]  }
  0x70   :  { %9425 = vmatpush1.bf16.msra.mxu0 %v15165_v61  ;;  %9221 = vmatprep.subr.bf16.mxu1 %v15170_v62  ;;  %v15245_v61 = vld [vmem:[%s21917_s1 + $0xb44] ss:$12 sps:$4 sm:$0xff]   ;;  %v15240_v62 = vld [vmem:[%s21917_s1 + $0x3c0] ss:$12 sps:$4 sm:$0xff]  }
  0x71   :  { %9426 = vmatprep.subr.bf16.mxu0 %v15173_v63  ;;  %v15243_v63 = vld [vmem:[%s21917_s1 + $0xb40] ss:$12 sps:$4 sm:$0xff]  }
  0x73   :  { %9222 = vmatpush1.bf16.msra.mxu1 %v15168_v0  ;;  %v15248_v0 = vld [vmem:[%s21917_s1 + $0x3dc] ss:$12 sps:$4 sm:$0xff]  }
  0x74   :  { %9427 = vmatpush1.bf16.msra.mxu0 %v15171_v1  ;;  %9223 = vmatprep.subr.bf16.mxu1 %v15176_v2  ;;  %v15251_v1 = vld [vmem:[%s21917_s1 + $0xb5c] ss:$12 sps:$4 sm:$0xff]   ;;  %v15246_v2 = vld [vmem:[%s21917_s1 + $0x3d8] ss:$12 sps:$4 sm:$0xff]  }
  0x75   :  { %9428 = vmatprep.subr.bf16.mxu0 %v15179_v3  ;;  %v15249_v3 = vld [vmem:[%s21917_s1 + $0xb58] ss:$12 sps:$4 sm:$0xff]  }
  0x77   :  { %9224 = vmatpush1.bf16.msra.mxu1 %v15174_v4  ;;  %v15254_v4 = vld [vmem:[%s21917_s1 + $0x3f4] ss:$12 sps:$4 sm:$0xff]  }
  0x78   :  { %9429 = vmatpush1.bf16.msra.mxu0 %v15177_v5  ;;  %9225 = vmatprep.subr.bf16.mxu1 %v15182_v6  ;;  %v15257_v5 = vld [vmem:[%s21917_s1 + $0xb74] ss:$12 sps:$4 sm:$0xff]   ;;  %v15252_v6 = vld [vmem:[%s21917_s1 + $0x3f0] ss:$12 sps:$4 sm:$0xff]  }
  0x79   :  { %9430 = vmatprep.subr.bf16.mxu0 %v15185_v7  ;;  %v15255_v7 = vld [vmem:[%s21917_s1 + $0xb70] ss:$12 sps:$4 sm:$0xff]  }
  0x7b   :  { %9226 = vmatpush1.bf16.msra.mxu1 %v15180_v8  ;;  %v15260_v8 = vld [vmem:[%s21917_s1 + $0x40c] ss:$12 sps:$4 sm:$0xff]  }
  0x7c   :  { %9431 = vmatpush1.bf16.msra.mxu0 %v15183_v9  ;;  %9227 = vmatprep.subr.bf16.mxu1 %v15188_v12  ;;  %v15263_v9 = vld [vmem:[%s21917_s1 + $0xb8c] ss:$12 sps:$4 sm:$0xff]   ;;  %v15258_v12 = vld [vmem:[%s21917_s1 + $0x408] ss:$12 sps:$4 sm:$0xff]  }
  0x7d   :  { %9432 = vmatprep.subr.bf16.mxu0 %v15191_v13  ;;  %v15261_v13 = vld [vmem:[%s21917_s1 + $0xb88] ss:$12 sps:$4 sm:$0xff]  }
  0x7f   :  { %9228 = vmatpush1.bf16.msra.mxu1 %v15186_v14  ;;  %v15266_v14 = vld [vmem:[%s21917_s1 + $0x424] ss:$12 sps:$4 sm:$0xff]  }
  0x80   :  { %9433 = vmatpush1.bf16.msra.mxu0 %v15189_v15  ;;  %9238 = vmatprep.subr.bf16.mxu1 %v15194_v16  ;;  %v15269_v15 = vld [vmem:[%s21917_s1 + $0xba4] ss:$12 sps:$4 sm:$0xff]   ;;  %v15264_v16 = vld [vmem:[%s21917_s1 + $0x420] ss:$12 sps:$4 sm:$0xff]  }
  0x81   :  { %9443 = vmatprep.subr.bf16.mxu0 %v15197_v19  ;;  %v15275_v19 = vld [vmem:[%s21917_s1 + $0xbbc] ss:$12 sps:$4 sm:$0xff]  }
  0x82   :  { %9230 = vmatmul.mubr.bf16.vlgmr.msra.gmra.mrb[0].mxu1 %v17428_v22 }
  0x83   :  { %9435 = vmatmul.mubr.bf16.vlgmr.msra.gmra.mrb[0].mxu0 %v17430_v23  ;;  %9239 = vmatpush1.bf16.msra.mxu1 %v15192_v20  ;;  %v15270_v20 = vld [vmem:[%s21917_s1 + $0x438] ss:$12 sps:$4 sm:$0xff]  }
  0x84   :  { %9444 = vmatpush1.bf16.msra.mxu0 %v15195_v21  ;;  %9240 = vmatprep.subr.bf16.mxu1 %v15200_v24  ;;  %v15273_v21 = vld [vmem:[%s21917_s1 + $0xbb8] ss:$12 sps:$4 sm:$0xff]   ;;  %v15278_v24 = vld [vmem:[%s21917_s1 + $0x454] ss:$12 sps:$4 sm:$0xff]  }
  0x85   :  { %9445 = vmatprep.subr.bf16.mxu0 %v15203_v25  ;;  %9270 = vmatprep.mubr.bf16.mxu1 %v17446_v28  ;;  %v15281_v25 = vld [vmem:[%s21917_s1 + $0xbd4] ss:$12 sps:$4 sm:$0xff]  }
  0x86   :  { %9475 = vmatprep.mubr.bf16.mxu0 %v17460_v33 }
  0x87   :  { %9241 = vmatpush1.bf16.msra.mxu1 %v15198_v27  ;;  %v15279_v27 = vld [vmem:[%s21917_s1 + $0xbd0] ss:$12 sps:$4 sm:$0xff]  }
  0x88   :  { %9446 = vmatpush1.bf16.msra.mxu0 %v15201_v29  ;;  %9242 = vmatprep.subr.bf16.mxu1 %v15206_v31  ;;  %v15284_v29 = vld [vmem:[%s21917_s1 + $0x46c] ss:$12 sps:$4 sm:$0xff]   ;;  %v15282_v31 = vld [vmem:[%s21917_s1 + $0x468] ss:$12 sps:$4 sm:$0xff]  }
  0x89   :  { %9447 = vmatprep.subr.bf16.mxu0 %v15209_v32  ;;  %v15285_v32 = vld [vmem:[%s21917_s1 + $0xbe8] ss:$12 sps:$4 sm:$0xff]  }
  0x8b   :  { %9243 = vmatpush1.bf16.msra.mxu1 %v15204_v34  ;;  %v15290_v34 = vld [vmem:[%s21917_s1 + $0x484] ss:$12 sps:$4 sm:$0xff]  }
  0x8c   :  { %9448 = vmatpush1.bf16.msra.mxu0 %v15207_v35  ;;  %9244 = vmatprep.subr.bf16.mxu1 %v15212_v37  ;;  %v25_v35 = vld [vmem:[%s21918_s0 + $0x20] sm:$0xff]  ;;  %v35_v37 = vld [vmem:[%s21918_s0 + $0x70] sm:$0xff] }
  0x8d   :  { %9449 = vmatprep.subr.bf16.mxu0 %v15215_v38  ;;  %v15293_v38 = vld [vmem:[%s21917_s1 + $0xc04] ss:$12 sps:$4 sm:$0xff]  }
  0x8f   :  { %9245 = vmatpush1.bf16.msra.mxu1 %v15210_v39  ;;  %v15288_v39 = vld [vmem:[%s21917_s1 + $0x480] ss:$12 sps:$4 sm:$0xff]  }
  0x90   :  { %9450 = vmatpush1.bf16.msra.mxu0 %v15213_v40  ;;  %9246 = vmatprep.subr.bf16.mxu1 %v15218_v42  ;;  %v15291_v40 = vld [vmem:[%s21917_s1 + $0xc00] ss:$12 sps:$4 sm:$0xff]   ;;  %v17644_v42 = vpack.c.bf16 %v25_v35, %v25_v35  ;;  %v15357_v35 = vld [vmem:[%s21917_s1 + $0xd08] ss:$12 sps:$4 sm:$0xff]  }
  0x91   :  { %9451 = vmatprep.subr.bf16.mxu0 %v15221_v43  ;;  %v17646_v43 = vpack.c.bf16 %v35_v37, %v35_v37  ;;  %v15362_v37 = vld [vmem:[%s21917_s1 + $0x5a4] ss:$12 sps:$4 sm:$0xff]  }
  0x93   :  { %9247 = vmatpush1.bf16.msra.mxu1 %v15216_v44  ;;  %v28_v44 = vld [vmem:[%s21918_s0 + $0x38] sm:$0xff] }
  0x94   :  { %9452 = vmatpush1.bf16.msra.mxu0 %v15219_v45  ;;  %9248 = vmatprep.subr.bf16.mxu1 %v15224_v46  ;;  %v38_v45 = vld [vmem:[%s21918_s0 + $0x88] sm:$0xff] }
  0x95   :  { %9453 = vmatprep.subr.bf16.mxu0 %v15227_v47  ;;  %v15296_v46 = vld [vmem:[%s21917_s1 + $0x49c] ss:$12 sps:$4 sm:$0xff]  }
  0x96   :  { %v15299_v47 = vld [vmem:[%s21917_s1 + $0xc1c] ss:$12 sps:$4 sm:$0xff]  }
  0x97   :  { %9249 = vmatpush1.bf16.msra.mxu1 %v15222_v49  ;;  %v17660_v49 = vpack.c.bf16 %v28_v44, %v28_v44  ;;  %v15368_v44 = vld [vmem:[%s21917_s1 + $0x5bc] ss:$12 sps:$4 sm:$0xff]  }
  0x98   :  { %9454 = vmatpush1.bf16.msra.mxu0 %v15225_v50  ;;  %9250 = vmatprep.subr.bf16.mxu1 %v15230_v51  ;;  %v17662_v50 = vpack.c.bf16 %v38_v45, %v38_v45  ;;  %v15294_v51 = vld [vmem:[%s21917_s1 + $0x498] ss:$12 sps:$4 sm:$0xff]   ;;  %v15371_v45 = vld [vmem:[%s21917_s1 + $0xd3c] ss:$12 sps:$4 sm:$0xff]  }
  0x99   :  { %9455 = vmatprep.subr.bf16.mxu0 %v15233_v52  ;;  %v15297_v52 = vld [vmem:[%s21917_s1 + $0xc18] ss:$12 sps:$4 sm:$0xff]  }
  0x9b   :  { %9251 = vmatpush1.bf16.msra.mxu1 %v15228_v54  ;;  %v15302_v54 = vld [vmem:[%s21917_s1 + $0x4b4] ss:$12 sps:$4 sm:$0xff]  }
  0x9c   :  { %9456 = vmatpush1.bf16.msra.mxu0 %v15231_v55  ;;  %9252 = vmatprep.subr.bf16.mxu1 %v15236_v56  ;;  %v15305_v55 = vld [vmem:[%s21917_s1 + $0xc34] ss:$12 sps:$4 sm:$0xff]   ;;  %v15300_v56 = vld [vmem:[%s21917_s1 + $0x4b0] ss:$12 sps:$4 sm:$0xff]  }
  0x9d   :  { %9457 = vmatprep.subr.bf16.mxu0 %v15239_v57  ;;  %v15303_v57 = vld [vmem:[%s21917_s1 + $0xc30] ss:$12 sps:$4 sm:$0xff]  }
  0x9f   :  { %9253 = vmatpush1.bf16.msra.mxu1 %v15234_v58  ;;  %v15308_v58 = vld [vmem:[%s21917_s1 + $0x4cc] ss:$12 sps:$4 sm:$0xff]  }
  0xa0   :  { %9458 = vmatpush1.bf16.msra.mxu0 %v15237_v59  ;;  %9254 = vmatprep.subr.bf16.mxu1 %v15242_v60  ;;  %v15311_v59 = vld [vmem:[%s21917_s1 + $0xc4c] ss:$12 sps:$4 sm:$0xff]   ;;  %v15306_v60 = vld [vmem:[%s21917_s1 + $0x4c8] ss:$12 sps:$4 sm:$0xff]  }
  0xa1   :  { %9459 = vmatprep.subr.bf16.mxu0 %v15245_v61  ;;  %v15309_v61 = vld [vmem:[%s21917_s1 + $0xc48] ss:$12 sps:$4 sm:$0xff]  }
  0xa3   :  { %9255 = vmatpush1.bf16.msra.mxu1 %v15240_v62  ;;  %v15314_v62 = vld [vmem:[%s21917_s1 + $0x4e4] ss:$12 sps:$4 sm:$0xff]  }
  0xa4   :  { %9460 = vmatpush1.bf16.msra.mxu0 %v15243_v63  ;;  %9256 = vmatprep.subr.bf16.mxu1 %v15248_v0  ;;  %v15317_v63 = vld [vmem:[%s21917_s1 + $0xc64] ss:$12 sps:$4 sm:$0xff]   ;;  %v15312_v0 = vld [vmem:[%s21917_s1 + $0x4e0] ss:$12 sps:$4 sm:$0xff]  }
  0xa5   :  { %9461 = vmatprep.subr.bf16.mxu0 %v15251_v1  ;;  %v15315_v1 = vld [vmem:[%s21917_s1 + $0xc60] ss:$12 sps:$4 sm:$0xff]  }
  0xa7   :  { %9257 = vmatpush1.bf16.msra.mxu1 %v15246_v2  ;;  %v15320_v2 = vld [vmem:[%s21917_s1 + $0x4fc] ss:$12 sps:$4 sm:$0xff]  }
  0xa8   :  { %9462 = vmatpush1.bf16.msra.mxu0 %v15249_v3  ;;  %9258 = vmatprep.subr.bf16.mxu1 %v15254_v4  ;;  %v15323_v3 = vld [vmem:[%s21917_s1 + $0xc7c] ss:$12 sps:$4 sm:$0xff]   ;;  %v15318_v4 = vld [vmem:[%s21917_s1 + $0x4f8] ss:$12 sps:$4 sm:$0xff]  }
  0xa9   :  { %9463 = vmatprep.subr.bf16.mxu0 %v15257_v5  ;;  %v15321_v5 = vld [vmem:[%s21917_s1 + $0xc78] ss:$12 sps:$4 sm:$0xff]  }
  0xab   :  { %9259 = vmatpush1.bf16.msra.mxu1 %v15252_v6  ;;  %v15326_v6 = vld [vmem:[%s21917_s1 + $0x514] ss:$12 sps:$4 sm:$0xff]  }
  0xac   :  { %9464 = vmatpush1.bf16.msra.mxu0 %v15255_v7  ;;  %9260 = vmatprep.subr.bf16.mxu1 %v15260_v8  ;;  %v15329_v7 = vld [vmem:[%s21917_s1 + $0xc94] ss:$12 sps:$4 sm:$0xff]   ;;  %v15324_v8 = vld [vmem:[%s21917_s1 + $0x510] ss:$12 sps:$4 sm:$0xff]  }
  0xad   :  { %9465 = vmatprep.subr.bf16.mxu0 %v15263_v9  ;;  %v15327_v9 = vld [vmem:[%s21917_s1 + $0xc90] ss:$12 sps:$4 sm:$0xff]  }
  0xaf   :  { %9261 = vmatpush1.bf16.msra.mxu1 %v15258_v12  ;;  %v15332_v12 = vld [vmem:[%s21917_s1 + $0x52c] ss:$12 sps:$4 sm:$0xff]  }
  0xb0   :  { %9466 = vmatpush1.bf16.msra.mxu0 %v15261_v13  ;;  %9262 = vmatprep.subr.bf16.mxu1 %v15266_v14  ;;  %v15335_v13 = vld [vmem:[%s21917_s1 + $0xcac] ss:$12 sps:$4 sm:$0xff]   ;;  %v15330_v14 = vld [vmem:[%s21917_s1 + $0x528] ss:$12 sps:$4 sm:$0xff]  }
  0xb1   :  { %9467 = vmatprep.subr.bf16.mxu0 %v15269_v15  ;;  %v15333_v15 = vld [vmem:[%s21917_s1 + $0xca8] ss:$12 sps:$4 sm:$0xff]  }
  0xb3   :  { %9263 = vmatpush1.bf16.msra.mxu1 %v15264_v16  ;;  %v15338_v16 = vld [vmem:[%s21917_s1 + $0x544] ss:$12 sps:$4 sm:$0xff]  }
  0xb4   :  { %9468 = vmatpush1.bf16.msra.mxu0 %v15267_v17  ;;  %9264 = vmatprep.subr.bf16.mxu1 %v15272_v18  ;;  %v15341_v17 = vld [vmem:[%s21917_s1 + $0xcc4] ss:$12 sps:$4 sm:$0xff]   ;;  %v15336_v18 = vld [vmem:[%s21917_s1 + $0x540] ss:$12 sps:$4 sm:$0xff]  }
  0xb5   :  { %9469 = vmatprep.subr.bf16.mxu0 %v15275_v19  ;;  %v15339_v19 = vld [vmem:[%s21917_s1 + $0xcc0] ss:$12 sps:$4 sm:$0xff]  }
  0xb7   :  { %9265 = vmatpush1.bf16.msra.mxu1 %v15270_v20  ;;  %v15344_v20 = vld [vmem:[%s21917_s1 + $0x55c] ss:$12 sps:$4 sm:$0xff]  }
  0xb8   :  { %9470 = vmatpush1.bf16.msra.mxu0 %v15273_v21  ;;  %9266 = vmatprep.subr.bf16.mxu1 %v15278_v24  ;;  %v15347_v21 = vld [vmem:[%s21917_s1 + $0xcdc] ss:$12 sps:$4 sm:$0xff]   ;;  %v15342_v24 = vld [vmem:[%s21917_s1 + $0x558] ss:$12 sps:$4 sm:$0xff]  }
  0xb9   :  { %9471 = vmatprep.subr.bf16.mxu0 %v15281_v25  ;;  %v15345_v25 = vld [vmem:[%s21917_s1 + $0xcd8] ss:$12 sps:$4 sm:$0xff]  }
  0xbb   :  { %9267 = vmatpush1.bf16.msra.mxu1 %v15276_v26  ;;  %v15350_v26 = vld [vmem:[%s21917_s1 + $0x574] ss:$12 sps:$4 sm:$0xff]  }
  0xbc   :  { %9472 = vmatpush1.bf16.msra.mxu0 %v15279_v27  ;;  %9268 = vmatprep.subr.bf16.mxu1 %v15284_v29  ;;  %v15353_v27 = vld [vmem:[%s21917_s1 + $0xcf4] ss:$12 sps:$4 sm:$0xff]   ;;  %v15348_v29 = vld [vmem:[%s21917_s1 + $0x570] ss:$12 sps:$4 sm:$0xff]  }
  0xbd   :  { %9473 = vmatprep.subr.bf16.mxu0 %v15287_v30  ;;  %v15351_v30 = vld [vmem:[%s21917_s1 + $0xcf0] ss:$12 sps:$4 sm:$0xff]  }
  0xbf   :  { %9269 = vmatpush1.bf16.msra.mxu1 %v15282_v31  ;;  %v15356_v31 = vld [vmem:[%s21917_s1 + $0x58c] ss:$12 sps:$4 sm:$0xff]  }
  0xc0   :  { %9474 = vmatpush1.bf16.msra.mxu0 %v15285_v32  ;;  %9279 = vmatprep.subr.bf16.mxu1 %v15290_v34  ;;  %v15359_v32 = vld [vmem:[%s21917_s1 + $0xd0c] ss:$12 sps:$4 sm:$0xff]   ;;  %v15354_v34 = vld [vmem:[%s21917_s1 + $0x588] ss:$12 sps:$4 sm:$0xff]  }
  0xc1   :  { %9484 = vmatprep.subr.bf16.mxu0 %v15293_v38  ;;  %v15365_v38 = vld [vmem:[%s21917_s1 + $0xd24] ss:$12 sps:$4 sm:$0xff]  }
  0xc2   :  { %9271 = vmatmul.mubr.bf16.vlgmr.msra.gmra.mrb[0].mxu1 %v17644_v42 }
  0xc3   :  { %9476 = vmatmul.mubr.bf16.vlgmr.msra.gmra.mrb[0].mxu0 %v17646_v43  ;;  %9280 = vmatpush1.bf16.msra.mxu1 %v15288_v39  ;;  %v15360_v39 = vld [vmem:[%s21917_s1 + $0x5a0] ss:$12 sps:$4 sm:$0xff]  }
  0xc4   :  { %9485 = vmatpush1.bf16.msra.mxu0 %v15291_v40  ;;  %9281 = vmatprep.subr.bf16.mxu1 %v15296_v46  ;;  %v15363_v40 = vld [vmem:[%s21917_s1 + $0xd20] ss:$12 sps:$4 sm:$0xff]   ;;  %v15366_v46 = vld [vmem:[%s21917_s1 + $0x5b8] ss:$12 sps:$4 sm:$0xff]  }
  0xc5   :  { %9486 = vmatprep.subr.bf16.mxu0 %v15299_v47  ;;  %9311 = vmatprep.mubr.bf16.mxu1 %v17660_v49  ;;  %v15369_v47 = vld [vmem:[%s21917_s1 + $0xd38] ss:$12 sps:$4 sm:$0xff]  }
  0xc6   :  { %9516 = vmatprep.mubr.bf16.mxu0 %v17662_v50 }
  0xc7   :  { %9282 = vmatpush1.bf16.msra.mxu1 %v15294_v51  ;;  %v15374_v51 = vld [vmem:[%s21917_s1 + $0x5d4] ss:$12 sps:$4 sm:$0xff]  }
  0xc8   :  { %9487 = vmatpush1.bf16.msra.mxu0 %v15297_v52  ;;  %9283 = vmatprep.subr.bf16.mxu1 %v15302_v54  ;;  %v15377_v52 = vld [vmem:[%s21917_s1 + $0xd54] ss:$12 sps:$4 sm:$0xff]   ;;  %v15372_v54 = vld [vmem:[%s21917_s1 + $0x5d0] ss:$12 sps:$4 sm:$0xff]  }
  0xc9   :  { %9488 = vmatprep.subr.bf16.mxu0 %v15305_v55  ;;  %v15375_v55 = vld [vmem:[%s21917_s1 + $0xd50] ss:$12 sps:$4 sm:$0xff]  }
  0xcb   :  { %9284 = vmatpush1.bf16.msra.mxu1 %v15300_v56  ;;  %v15380_v56 = vld [vmem:[%s21917_s1 + $0x5ec] ss:$12 sps:$4 sm:$0xff]  }
  0xcc   :  { %9489 = vmatpush1.bf16.msra.mxu0 %v15303_v57  ;;  %9285 = vmatprep.subr.bf16.mxu1 %v15308_v58  ;;  %v15383_v57 = vld [vmem:[%s21917_s1 + $0xd6c] ss:$12 sps:$4 sm:$0xff]   ;;  %v15378_v58 = vld [vmem:[%s21917_s1 + $0x5e8] ss:$12 sps:$4 sm:$0xff]  }
  0xcd   :  { %9490 = vmatprep.subr.bf16.mxu0 %v15311_v59  ;;  %v15381_v59 = vld [vmem:[%s21917_s1 + $0xd68] ss:$12 sps:$4 sm:$0xff]  }
  0xcf   :  { %9286 = vmatpush1.bf16.msra.mxu1 %v15306_v60  ;;  %v27_v60 = vld [vmem:[%s21918_s0 + $0x30] sm:$0xff] }
  0xd0   :  { %9491 = vmatpush1.bf16.msra.mxu0 %v15309_v61  ;;  %9287 = vmatprep.subr.bf16.mxu1 %v15314_v62  ;;  %v37_v61 = vld [vmem:[%s21918_s0 + $0x80] sm:$0xff] }
  0xd1   :  { %9492 = vmatprep.subr.bf16.mxu0 %v15317_v63  ;;  %v15386_v62 = vld [vmem:[%s21917_s1 + $0x604] ss:$12 sps:$4 sm:$0xff]  }
  0xd2   :  { %v15389_v63 = vld [vmem:[%s21917_s1 + $0xd84] ss:$12 sps:$4 sm:$0xff]  }
  0xd3   :  { %9288 = vmatpush1.bf16.msra.mxu1 %v15312_v0  ;;  %v15384_v0 = vld [vmem:[%s21917_s1 + $0x600] ss:$12 sps:$4 sm:$0xff]  }
  0xd4   :  { %9493 = vmatpush1.bf16.msra.mxu0 %v15315_v1  ;;  %9289 = vmatprep.subr.bf16.mxu1 %v15320_v2  ;;  %v30_v1 = vld [vmem:[%s21918_s0 + $0x48] sm:$0xff]  ;;  %v17860_v2 = vpack.c.bf16 %v27_v60, %v27_v60  ;;  %v15444_v60 = vld [vmem:[%s21917_s1 + $0x6f0] ss:$12 sps:$4 sm:$0xff]  }
  0xd5   :  { %9494 = vmatprep.subr.bf16.mxu0 %v15323_v3  ;;  %v17862_v3 = vpack.c.bf16 %v37_v61, %v37_v61  ;;  %v15447_v61 = vld [vmem:[%s21917_s1 + $0xe70] ss:$12 sps:$4 sm:$0xff]  }
  0xd7   :  { %9290 = vmatpush1.bf16.msra.mxu1 %v15318_v4  ;;  %v40_v4 = vld [vmem:[%s21918_s0 + $0x98] sm:$0xff] }
  0xd8   :  { %9495 = vmatpush1.bf16.msra.mxu0 %v15321_v5  ;;  %9291 = vmatprep.subr.bf16.mxu1 %v15326_v6  ;;  %v15387_v5 = vld [vmem:[%s21917_s1 + $0xd80] ss:$12 sps:$4 sm:$0xff]   ;;  %v15392_v6 = vld [vmem:[%s21917_s1 + $0x61c] ss:$12 sps:$4 sm:$0xff]  }
  0xd9   :  { %9496 = vmatprep.subr.bf16.mxu0 %v15329_v7  ;;  %v15395_v7 = vld [vmem:[%s21917_s1 + $0xd9c] ss:$12 sps:$4 sm:$0xff]  }
  0xdb   :  { %9292 = vmatpush1.bf16.msra.mxu1 %v15324_v8  ;;  %v15390_v8 = vld [vmem:[%s21917_s1 + $0x618] ss:$12 sps:$4 sm:$0xff]  }
  0xdc   :  { %9497 = vmatpush1.bf16.msra.mxu0 %v15327_v9  ;;  %9293 = vmatprep.subr.bf16.mxu1 %v15332_v12  ;;  %v17879_v9 = vpack.c.bf16 %v30_v1, %v30_v1  ;;  %v17881_v12 = vpack.c.bf16 %v40_v4, %v40_v4  ;;  %v15453_v1 = vld [vmem:[%s21917_s1 + $0xe88] ss:$12 sps:$4 sm:$0xff]   ;;  %v15458_v4 = vld [vmem:[%s21917_s1 + $0x724] ss:$12 sps:$4 sm:$0xff]  }
  0xdd   :  { %9498 = vmatprep.subr.bf16.mxu0 %v15335_v13  ;;  %v15393_v13 = vld [vmem:[%s21917_s1 + $0xd98] ss:$12 sps:$4 sm:$0xff]  }
  0xdf   :  { %9294 = vmatpush1.bf16.msra.mxu1 %v15330_v14  ;;  %v15398_v14 = vld [vmem:[%s21917_s1 + $0x634] ss:$12 sps:$4 sm:$0xff]  }
  0xe0   :  { %9499 = vmatpush1.bf16.msra.mxu0 %v15333_v15  ;;  %9295 = vmatprep.subr.bf16.mxu1 %v15338_v16  ;;  %v15401_v15 = vld [vmem:[%s21917_s1 + $0xdb4] ss:$12 sps:$4 sm:$0xff]   ;;  %v15396_v16 = vld [vmem:[%s21917_s1 + $0x630] ss:$12 sps:$4 sm:$0xff]  }
  0xe1   :  { %9500 = vmatprep.subr.bf16.mxu0 %v15341_v17  ;;  %v15399_v17 = vld [vmem:[%s21917_s1 + $0xdb0] ss:$12 sps:$4 sm:$0xff]  }
  0xe3   :  { %9296 = vmatpush1.bf16.msra.mxu1 %v15336_v18  ;;  %v15404_v18 = vld [vmem:[%s21917_s1 + $0x64c] ss:$12 sps:$4 sm:$0xff]  }
  0xe4   :  { %9501 = vmatpush1.bf16.msra.mxu0 %v15339_v19  ;;  %9297 = vmatprep.subr.bf16.mxu1 %v15344_v20  ;;  %v15407_v19 = vld [vmem:[%s21917_s1 + $0xdcc] ss:$12 sps:$4 sm:$0xff]   ;;  %v15402_v20 = vld [vmem:[%s21917_s1 + $0x648] ss:$12 sps:$4 sm:$0xff]  }
  0xe5   :  { %9502 = vmatprep.subr.bf16.mxu0 %v15347_v21  ;;  %v15405_v21 = vld [vmem:[%s21917_s1 + $0xdc8] ss:$12 sps:$4 sm:$0xff]  }
  0xe7   :  { %9298 = vmatpush1.bf16.msra.mxu1 %v15342_v24  ;;  %v15410_v24 = vld [vmem:[%s21917_s1 + $0x664] ss:$12 sps:$4 sm:$0xff]  }
  0xe8   :  { %9503 = vmatpush1.bf16.msra.mxu0 %v15345_v25  ;;  %9299 = vmatprep.subr.bf16.mxu1 %v15350_v26  ;;  %v15413_v25 = vld [vmem:[%s21917_s1 + $0xde4] ss:$12 sps:$4 sm:$0xff]   ;;  %v15408_v26 = vld [vmem:[%s21917_s1 + $0x660] ss:$12 sps:$4 sm:$0xff]  }
  0xe9   :  { %9504 = vmatprep.subr.bf16.mxu0 %v15353_v27  ;;  %v15411_v27 = vld [vmem:[%s21917_s1 + $0xde0] ss:$12 sps:$4 sm:$0xff]  }
  0xeb   :  { %9300 = vmatpush1.bf16.msra.mxu1 %v15348_v29  ;;  %v15416_v29 = vld [vmem:[%s21917_s1 + $0x67c] ss:$12 sps:$4 sm:$0xff]  }
  0xec   :  { %9505 = vmatpush1.bf16.msra.mxu0 %v15351_v30  ;;  %9301 = vmatprep.subr.bf16.mxu1 %v15356_v31  ;;  %v15419_v30 = vld [vmem:[%s21917_s1 + $0xdfc] ss:$12 sps:$4 sm:$0xff]   ;;  %v15414_v31 = vld [vmem:[%s21917_s1 + $0x678] ss:$12 sps:$4 sm:$0xff]  }
  0xed   :  { %9506 = vmatprep.subr.bf16.mxu0 %v15359_v32  ;;  %v15417_v32 = vld [vmem:[%s21917_s1 + $0xdf8] ss:$12 sps:$4 sm:$0xff]  }
  0xef   :  { %9302 = vmatpush1.bf16.msra.mxu1 %v15354_v34  ;;  %v15422_v34 = vld [vmem:[%s21917_s1 + $0x694] ss:$12 sps:$4 sm:$0xff]  }
  0xf0   :  { %9507 = vmatpush1.bf16.msra.mxu0 %v15357_v35  ;;  %9303 = vmatprep.subr.bf16.mxu1 %v15362_v37  ;;  %v15425_v35 = vld [vmem:[%s21917_s1 + $0xe14] ss:$12 sps:$4 sm:$0xff]   ;;  %v15420_v37 = vld [vmem:[%s21917_s1 + $0x690] ss:$12 sps:$4 sm:$0xff]  }
  0xf1   :  { %9508 = vmatprep.subr.bf16.mxu0 %v15365_v38  ;;  %v15423_v38 = vld [vmem:[%s21917_s1 + $0xe10] ss:$12 sps:$4 sm:$0xff]  }
  0xf3   :  { %9304 = vmatpush1.bf16.msra.mxu1 %v15360_v39  ;;  %v15428_v39 = vld [vmem:[%s21917_s1 + $0x6ac] ss:$12 sps:$4 sm:$0xff]  }
  0xf4   :  { %9509 = vmatpush1.bf16.msra.mxu0 %v15363_v40  ;;  %9305 = vmatprep.subr.bf16.mxu1 %v15368_v44  ;;  %v15431_v40 = vld [vmem:[%s21917_s1 + $0xe2c] ss:$12 sps:$4 sm:$0xff]   ;;  %v15426_v44 = vld [vmem:[%s21917_s1 + $0x6a8] ss:$12 sps:$4 sm:$0xff]  }
  0xf5   :  { %9510 = vmatprep.subr.bf16.mxu0 %v15371_v45  ;;  %v15429_v45 = vld [vmem:[%s21917_s1 + $0xe28] ss:$12 sps:$4 sm:$0xff]  }
  0xf7   :  { %9306 = vmatpush1.bf16.msra.mxu1 %v15366_v46  ;;  %v15434_v46 = vld [vmem:[%s21917_s1 + $0x6c4] ss:$12 sps:$4 sm:$0xff]  }
  0xf8   :  { %9511 = vmatpush1.bf16.msra.mxu0 %v15369_v47  ;;  %9307 = vmatprep.subr.bf16.mxu1 %v15374_v51  ;;  %v15437_v47 = vld [vmem:[%s21917_s1 + $0xe44] ss:$12 sps:$4 sm:$0xff]   ;;  %v15432_v51 = vld [vmem:[%s21917_s1 + $0x6c0] ss:$12 sps:$4 sm:$0xff]  }
  0xf9   :  { %9512 = vmatprep.subr.bf16.mxu0 %v15377_v52  ;;  %v15435_v52 = vld [vmem:[%s21917_s1 + $0xe40] ss:$12 sps:$4 sm:$0xff]  }
  0xfb   :  { %9308 = vmatpush1.bf16.msra.mxu1 %v15372_v54  ;;  %v15440_v54 = vld [vmem:[%s21917_s1 + $0x6dc] ss:$12 sps:$4 sm:$0xff]  }
  0xfc   :  { %9513 = vmatpush1.bf16.msra.mxu0 %v15375_v55  ;;  %9309 = vmatprep.subr.bf16.mxu1 %v15380_v56  ;;  %v15443_v55 = vld [vmem:[%s21917_s1 + $0xe5c] ss:$12 sps:$4 sm:$0xff]   ;;  %v15438_v56 = vld [vmem:[%s21917_s1 + $0x6d8] ss:$12 sps:$4 sm:$0xff]  }
  0xfd   :  { %9514 = vmatprep.subr.bf16.mxu0 %v15383_v57  ;;  %v15441_v57 = vld [vmem:[%s21917_s1 + $0xe58] ss:$12 sps:$4 sm:$0xff]  }
  0xff   :  { %9310 = vmatpush1.bf16.msra.mxu1 %v15378_v58  ;;  %v15446_v58 = vld [vmem:[%s21917_s1 + $0x6f4] ss:$12 sps:$4 sm:$0xff]  }
 0x100   :  { %9515 = vmatpush1.bf16.msra.mxu0 %v15381_v59  ;;  %9320 = vmatprep.subr.bf16.mxu1 %v15386_v62  ;;  %v15449_v59 = vld [vmem:[%s21917_s1 + $0xe74] ss:$12 sps:$4 sm:$0xff]   ;;  %v15452_v62 = vld [vmem:[%s21917_s1 + $0x70c] ss:$12 sps:$4 sm:$0xff]  }
 0x101   :  { %9525 = vmatprep.subr.bf16.mxu0 %v15389_v63  ;;  %v15455_v63 = vld [vmem:[%s21917_s1 + $0xe8c] ss:$12 sps:$4 sm:$0xff]  }
 0x102   :  { %9312 = vmatmul.mubr.bf16.vlgmr.msra.gmra.mrb[0].mxu1 %v17860_v2 }
 0x103   :  { %9517 = vmatmul.mubr.bf16.vlgmr.msra.gmra.mrb[0].mxu0 %v17862_v3  ;;  %9321 = vmatpush1.bf16.msra.mxu1 %v15384_v0  ;;  %v15450_v0 = vld [vmem:[%s21917_s1 + $0x708] ss:$12 sps:$4 sm:$0xff]  }
 0x104   :  { %9526 = vmatpush1.bf16.msra.mxu0 %v15387_v5  ;;  %9322 = vmatprep.subr.bf16.mxu1 %v15392_v6  ;;  %v15461_v5 = vld [vmem:[%s21917_s1 + $0xea4] ss:$12 sps:$4 sm:$0xff]   ;;  %v15456_v6 = vld [vmem:[%s21917_s1 + $0x720] ss:$12 sps:$4 sm:$0xff]  }
 0x105   :  { %9527 = vmatprep.subr.bf16.mxu0 %v15395_v7  ;;  %9352 = vmatprep.mubr.bf16.mxu1 %v17879_v9  ;;  %v15459_v7 = vld [vmem:[%s21917_s1 + $0xea0] ss:$12 sps:$4 sm:$0xff]  }
 0x106   :  { %9557 = vmatprep.mubr.bf16.mxu0 %v17881_v12 }
 0x107   :  { %9323 = vmatpush1.bf16.msra.mxu1 %v15390_v8  ;;  %v15464_v8 = vld [vmem:[%s21917_s1 + $0x73c] ss:$12 sps:$4 sm:$0xff]  }
 0x108   :  { %9528 = vmatpush1.bf16.msra.mxu0 %v15393_v13  ;;  %9324 = vmatprep.subr.bf16.mxu1 %v15398_v14  ;;  %v15467_v13 = vld [vmem:[%s21917_s1 + $0xebc] ss:$12 sps:$4 sm:$0xff]   ;;  %v15462_v14 = vld [vmem:[%s21917_s1 + $0x738] ss:$12 sps:$4 sm:$0xff]  }
 0x109   :  { %9529 = vmatprep.subr.bf16.mxu0 %v15401_v15  ;;  %v15465_v15 = vld [vmem:[%s21917_s1 + $0xeb8] ss:$12 sps:$4 sm:$0xff]  }
 0x10b   :  { %9325 = vmatpush1.bf16.msra.mxu1 %v15396_v16  ;;  %v15470_v16 = vld [vmem:[%s21917_s1 + $0x754] ss:$12 sps:$4 sm:$0xff]  }
 0x10c   :  { %9530 = vmatpush1.bf16.msra.mxu0 %v15399_v17  ;;  %9326 = vmatprep.subr.bf16.mxu1 %v15404_v18  ;;  %v15473_v17 = vld [vmem:[%s21917_s1 + $0xed4] ss:$12 sps:$4 sm:$0xff]   ;;  %v15468_v18 = vld [vmem:[%s21917_s1 + $0x750] ss:$12 sps:$4 sm:$0xff]  }
 0x10d   :  { %9531 = vmatprep.subr.bf16.mxu0 %v15407_v19  ;;  %v15471_v19 = vld [vmem:[%s21917_s1 + $0xed0] ss:$12 sps:$4 sm:$0xff]  }
 0x10f   :  { %9327 = vmatpush1.bf16.msra.mxu1 %v15402_v20  ;;  %v15476_v20 = vld [vmem:[%s21917_s1 + $0x76c] ss:$12 sps:$4 sm:$0xff]  }
 0x110   :  { %9532 = vmatpush1.bf16.msra.mxu0 %v15405_v21  ;;  %9328 = vmatprep.subr.bf16.mxu1 %v15410_v24  ;;  %v15479_v21 = vld [vmem:[%s21917_s1 + $0xeec] ss:$12 sps:$4 sm:$0xff]   ;;  %v15474_v24 = vld [vmem:[%s21917_s1 + $0x768] ss:$12 sps:$4 sm:$0xff]  }
 0x111   :  { %9533 = vmatprep.subr.bf16.mxu0 %v15413_v25  ;;  %v15477_v25 = vld [vmem:[%s21917_s1 + $0xee8] ss:$12 sps:$4 sm:$0xff]  }
 0x113   :  { %9329 = vmatpush1.bf16.msra.mxu1 %v15408_v26  ;;  %v29_v26 = vld [vmem:[%s21918_s0 + $0x40] sm:$0xff] }
 0x114   :  { %9534 = vmatpush1.bf16.msra.mxu0 %v15411_v27  ;;  %9330 = vmatprep.subr.bf16.mxu1 %v15416_v29  ;;  %v39_v27 = vld [vmem:[%s21918_s0 + $0x90] sm:$0xff] }
 0x115   :  { %9535 = vmatprep.subr.bf16.mxu0 %v15419_v30  ;;  %v15482_v29 = vld [vmem:[%s21917_s1 + $0xf04] ss:$12 sps:$4 sm:$0xff]  }
 0x116   :  { %v15485_v30 = vld [vmem:[%s21917_s1 + $0x2a04] ss:$12 sps:$4 sm:$0xff]  }
 0x117   :  { %9331 = vmatpush1.bf16.msra.mxu1 %v15414_v31  ;;  %v15480_v31 = vld [vmem:[%s21917_s1 + $0xf00] ss:$12 sps:$4 sm:$0xff]  }
 0x118   :  { %9536 = vmatpush1.bf16.msra.mxu0 %v15417_v32  ;;  %9332 = vmatprep.subr.bf16.mxu1 %v15422_v34  ;;  %v18073_v32 = vpack.c.bf16 %v29_v26, %v29_v26  ;;  %v18075_v34 = vpack.c.bf16 %v39_v27, %v39_v27  ;;  %v15527_v26 = vld [vmem:[%s21917_s1 + $0xfd8] ss:$12 sps:$4 sm:$0xff]   ;;  %v15531_v27 = vld [vmem:[%s21917_s1 + $0xb0] ss:$12 sps:$4 sm:$0xff]  }
 0x119   :  { %9537 = vmatprep.subr.bf16.mxu0 %v15425_v35  ;;  %v42_v35 = vld [vmem:[%s21918_s0 + $0xa8] sm:$0xff] }
 0x11b   :  { %9333 = vmatpush1.bf16.msra.mxu1 %v15420_v37  ;;  %v15483_v37 = vld [vmem:[%s21917_s1 + $0x2a00] ss:$12 sps:$4 sm:$0xff]  }
 0x11c   :  { %9538 = vmatpush1.bf16.msra.mxu0 %v15423_v38  ;;  %9334 = vmatprep.subr.bf16.mxu1 %v15428_v39  ;;  %v15488_v38 = vld [vmem:[%s21917_s1 + $0xf1c] ss:$12 sps:$4 sm:$0xff]  }
 0x11d   :  { %9539 = vmatprep.subr.bf16.mxu0 %v15431_v40  ;;  %v15491_v39 = vld [vmem:[%s21917_s1 + $0x2a1c] ss:$12 sps:$4 sm:$0xff]   ;;  %v15486_v40 = vld [vmem:[%s21917_s1 + $0xf18] ss:$12 sps:$4 sm:$0xff]  }
 0x11f   :  { %9335 = vmatpush1.bf16.msra.mxu1 %v15426_v44  ;;  %v15489_v44 = vld [vmem:[%s21917_s1 + $0x2a18] ss:$12 sps:$4 sm:$0xff]  }
 0x120   :  { %9540 = vmatpush1.bf16.msra.mxu0 %v15429_v45  ;;  %9336 = vmatprep.subr.bf16.mxu1 %v15434_v46  ;;  %v18095_v45 = vpack.c.bf16 %v42_v35, %v42_v35  ;;  %v15494_v46 = vld [vmem:[%s21917_s1 + $0xf34] ss:$12 sps:$4 sm:$0xff]  }
 0x121   :  { %9541 = vmatprep.subr.bf16.mxu0 %v15437_v47  ;;  %v77_v47 = vld [vmem:[%s21918_s0 + $0x1c0] sm:$0xff]  ;;  %v15536_v35 = vld [vmem:[%s21917_s1 + $0x188] ss:$12 sps:$4 sm:$0xff]  }
 0x123   :  { %9337 = vmatpush1.bf16.msra.mxu1 %v15432_v51  ;;  %v15495_v51 = vld [vmem:[%s21917_s1 + $0xc8] ss:$12 sps:$4 sm:$0xff]  }
 0x124   :  { %9542 = vmatpush1.bf16.msra.mxu0 %v15435_v52  ;;  %9338 = vmatprep.subr.bf16.mxu1 %v15440_v54  ;;  %v16957_v52 = vmov 0   ;;  %v15492_v54 = vld [vmem:[%s21917_s1 + $0xf30] ss:$12 sps:$4 sm:$0xff]  }
 0x125   :  { %9543 = vmatprep.subr.bf16.mxu0 %v15443_v55  ;;  %v18113_v55 = vpack.c.bf16 %v77_v47, %v77_v47  ;;  %v15546_v47 = vld [vmem:[%s21917_s1 + $0x1b8] ss:$12 sps:$4 sm:$0xff]  }
 0x127   :  { %9339 = vmatpush1.bf16.msra.mxu1 %v15438_v56  ;;  %v15496_v56 = vld [vmem:[%s21917_s1 + $0x8] ss:$12 sps:$4 sm:$0xff]  }
 0x128   :  { %9544 = vmatpush1.bf16.msra.mxu0 %v15441_v57  ;;  %9340 = vmatprep.subr.bf16.mxu1 %v15446_v58  ;;  %v15499_v57 = vld [vmem:[%s21917_s1 + $0xf4c] ss:$12 sps:$4 sm:$0xff]  }
 0x129   :  { %9545 = vmatprep.subr.bf16.mxu0 %v15449_v59  ;;  %v15500_v58 = vld [vmem:[%s21917_s1 + $0xe0] ss:$12 sps:$4 sm:$0xff]   ;;  %v15497_v59 = vld [vmem:[%s21917_s1 + $0xf48] ss:$12 sps:$4 sm:$0xff]  }
 0x12b   :  { %9341 = vmatpush1.bf16.msra.mxu1 %v15444_v60  ;;  %v15501_v60 = vld [vmem:[%s21917_s1 + $0x20] ss:$12 sps:$4 sm:$0xff]  }
 0x12c   :  { %9546 = vmatpush1.bf16.msra.mxu0 %v15447_v61  ;;  %9342 = vmatprep.subr.bf16.mxu1 %v15452_v62  ;;  %v15504_v61 = vld [vmem:[%s21917_s1 + $0xf64] ss:$12 sps:$4 sm:$0xff]  }
 0x12d   :  { %9547 = vmatprep.subr.bf16.mxu0 %v15455_v63  ;;  %v15505_v62 = vld [vmem:[%s21917_s1 + $0xf8] ss:$12 sps:$4 sm:$0xff]   ;;  %v15502_v63 = vld [vmem:[%s21917_s1 + $0xf60] ss:$12 sps:$4 sm:$0xff]  }
 0x12f   :  { %9343 = vmatpush1.bf16.msra.mxu1 %v15450_v0  ;;  %v15506_v0 = vld [vmem:[%s21917_s1 + $0x38] ss:$12 sps:$4 sm:$0xff]  }
 0x130   :  { %9548 = vmatpush1.bf16.msra.mxu0 %v15453_v1  ;;  %9344 = vmatprep.subr.bf16.mxu1 %v15458_v4  ;;  %v15509_v1 = vld [vmem:[%s21917_s1 + $0xf7c] ss:$12 sps:$4 sm:$0xff]  }
 0x131   :  { %9549 = vmatprep.subr.bf16.mxu0 %v15461_v5  ;;  %v15510_v4 = vld [vmem:[%s21917_s1 + $0x110] ss:$12 sps:$4 sm:$0xff]  }
 0x132   :  { %v15511_v5 = vld [vmem:[%s21917_s1 + $0x50] ss:$12 sps:$4 sm:$0xff]  }
 0x133   :  { %9345 = vmatpush1.bf16.msra.mxu1 %v15456_v6  ;;  %v15514_v6 = vld [vmem:[%s21917_s1 + $0xf94] ss:$12 sps:$4 sm:$0xff]  }
 0x134   :  { %9550 = vmatpush1.bf16.msra.mxu0 %v15459_v7  ;;  %9346 = vmatprep.subr.bf16.mxu1 %v15464_v8  ;;  %v15515_v7 = vld [vmem:[%s21917_s1 + $0x128] ss:$12 sps:$4 sm:$0xff]   ;;  %v15512_v8 = vld [vmem:[%s21917_s1 + $0xf90] ss:$12 sps:$4 sm:$0xff]  }
 0x135   :  { %9551 = vmatprep.subr.bf16.mxu0 %v15467_v13  ;;  %v15516_v13 = vld [vmem:[%s21917_s1 + $0x68] ss:$12 sps:$4 sm:$0xff]  }
 0x137   :  { %9347 = vmatpush1.bf16.msra.mxu1 %v15462_v14  ;;  %v15519_v14 = vld [vmem:[%s21917_s1 + $0xfac] ss:$12 sps:$4 sm:$0xff]  }
 0x138   :  { %9552 = vmatpush1.bf16.msra.mxu0 %v15465_v15  ;;  %9348 = vmatprep.subr.bf16.mxu1 %v15470_v16  ;;  %v15520_v15 = vld [vmem:[%s21917_s1 + $0x140] ss:$12 sps:$4 sm:$0xff]   ;;  %v15517_v16 = vld [vmem:[%s21917_s1 + $0xfa8] ss:$12 sps:$4 sm:$0xff]  }
 0x139   :  { %9553 = vmatprep.subr.bf16.mxu0 %v15473_v17  ;;  %v15521_v17 = vld [vmem:[%s21917_s1 + $0x80] ss:$12 sps:$4 sm:$0xff]  }
 0x13b   :  { %9349 = vmatpush1.bf16.msra.mxu1 %v15468_v18  ;;  %v15524_v18 = vld [vmem:[%s21917_s1 + $0xfc4] ss:$12 sps:$4 sm:$0xff]  }
 0x13c   :  { %9554 = vmatpush1.bf16.msra.mxu0 %v15471_v19  ;;  %9350 = vmatprep.subr.bf16.mxu1 %v15476_v20  ;;  %v15525_v19 = vld [vmem:[%s21917_s1 + $0x158] ss:$12 sps:$4 sm:$0xff]   ;;  %v15522_v20 = vld [vmem:[%s21917_s1 + $0xfc0] ss:$12 sps:$4 sm:$0xff]  }
 0x13d   :  { %9555 = vmatprep.subr.bf16.mxu0 %v15479_v21  ;;  %v15526_v21 = vld [vmem:[%s21917_s1 + $0x98] ss:$12 sps:$4 sm:$0xff]  }
 0x13f   :  { %9351 = vmatpush1.bf16.msra.mxu1 %v15474_v24  ;;  %v15529_v24 = vld [vmem:[%s21917_s1 + $0xfdc] ss:$12 sps:$4 sm:$0xff]  }
 0x140   :  { %9556 = vmatpush1.bf16.msra.mxu0 %v15477_v25  ;;  %10304 = vmatprep.subr.bf16.mxu1 %v15485_v30  ;;  %v15530_v25 = vld [vmem:[%s21917_s1 + $0x170] ss:$12 sps:$4 sm:$0xff]   ;;  %v15535_v30 = vld [vmem:[%s21917_s1 + $0x248] ss:$12 sps:$4 sm:$0xff]  }
 0x141   :  { %9566 = vmatprep.subr.bf16.mxu0 %v15482_v29  ;;  %v15534_v29 = vld [vmem:[%s21917_s1 + $0xff4] ss:$12 sps:$4 sm:$0xff]  }
 0x142   :  { %9353 = vmatmul.mubr.bf16.vlgmr.msra.gmra.mrb[0].mxu1 %v18073_v32 }
 0x143   :  { %9558 = vmatmul.mubr.bf16.vlgmr.msra.gmra.mrb[0].mxu0 %v18075_v34  ;;  %10305 = vmatpush1.bf16.msra.mxu1 %v15483_v37  ;;  %v15539_v37 = vld [vmem:[%s21917_s1 + $0x100c] ss:$12 sps:$4 sm:$0xff]  }
 0x144   :  { %9567 = vmatpush1.bf16.msra.mxu0 %v15480_v31  ;;  %10306 = vmatprep.subr.bf16.mxu1 %v15491_v39  ;;  %v15532_v31 = vld [vmem:[%s21917_s1 + $0xff0] ss:$12 sps:$4 sm:$0xff]   ;;  %v15537_v39 = vld [vmem:[%s21917_s1 + $0x1008] ss:$12 sps:$4 sm:$0xff]  }
 0x145   :  { %9568 = vmatprep.subr.bf16.mxu0 %v15488_v38  ;;  %10336 = vmatprep.mubr.bf16.mxu1 %v16957_v52  ;;  %v15540_v38 = vld [vmem:[%s21917_s1 + $0x260] ss:$12 sps:$4 sm:$0xff]  }
 0x146   :  { %9598 = vmatprep.mubr.bf16.mxu0 %v18095_v45 }
 0x147   :  { %10307 = vmatpush1.bf16.msra.mxu1 %v15489_v44  ;;  %v15544_v44 = vld [vmem:[%s21917_s1 + $0x1024] ss:$12 sps:$4 sm:$0xff]  }
 0x148   :  { %9569 = vmatpush1.bf16.msra.mxu0 %v15486_v40  ;;  %14176 = vmatprep.subr.bf16.mxu1 %v15495_v51  ;;  %v15541_v40 = vld [vmem:[%s21917_s1 + $0x1a0] ss:$12 sps:$4 sm:$0xff]   ;;  %v15549_v51 = vld [vmem:[%s21917_s1 + $0x103c] ss:$12 sps:$4 sm:$0xff]  }
 0x149   :  { %9570 = vmatprep.subr.bf16.mxu0 %v15494_v46  ;;  %v15542_v46 = vld [vmem:[%s21917_s1 + $0x1020] ss:$12 sps:$4 sm:$0xff]  }
 0x14a   :  { %14050 = vmatmul.mubr.msk.bf16.vlgmr.msra.gmra.mrb[4].mxu1 %vm9152_vm0, %v18113_v55 }
 0x14b   :  { %14177 = vmatpush3.bf16.msra.mxu1 %v15496_v56  ;;  %10377 = vmatprep.mubr.bf16.mxu1 %v17134_v48  ;;  %v15507_v48 = vld [vmem:[%s21917_s1 + $0xf78] ss:$12 sps:$4 sm:$0xff]   ;;  %v15551_v56 = vld [vmem:[%s21917_s1 + $0x1d0] ss:$12 sps:$4 sm:$0xff]  }
 0x14c   :  { %9571 = vmatpush1.bf16.msra.mxu0 %v15492_v54  ;;  %14178 = vmatprep.subr.bf16.mxu1 %v15500_v58  ;;  %v15550_v54 = vld [vmem:[%s21917_s1 + $0x290] ss:$12 sps:$4 sm:$0xff]   ;;  %v15555_v58 = vld [vmem:[%s21917_s1 + $0x2a8] ss:$12 sps:$4 sm:$0xff]  }
 0x14d   :  { %9572 = vmatprep.subr.bf16.mxu0 %v15499_v57  ;;  %v15554_v57 = vld [vmem:[%s21917_s1 + $0x1054] ss:$12 sps:$4 sm:$0xff]  }
 0x14f   :  { %14179 = vmatpush3.bf16.msra.mxu1 %v15501_v60  ;;  %v15556_v60 = vld [vmem:[%s21917_s1 + $0x1e8] ss:$12 sps:$4 sm:$0xff]  }
 0x150   :  { %9573 = vmatpush1.bf16.msra.mxu0 %v15497_v59  ;;  %14180 = vmatprep.subr.bf16.mxu1 %v15505_v62  ;;  %v15552_v59 = vld [vmem:[%s21917_s1 + $0x1050] ss:$12 sps:$4 sm:$0xff]   ;;  %v15560_v62 = vld [vmem:[%s21917_s1 + $0x2c0] ss:$12 sps:$4 sm:$0xff]  }
 0x151   :  { %9574 = vmatprep.subr.bf16.mxu0 %v15504_v61  ;;  %v15559_v61 = vld [vmem:[%s21917_s1 + $0x106c] ss:$12 sps:$4 sm:$0xff]  }
 0x153   :  { %14181 = vmatpush3.bf16.msra.mxu1 %v15506_v0  ;;  %v15561_v0 = vld [vmem:[%s21917_s1 + $0x200] ss:$12 sps:$4 sm:$0xff]  }
 0x154   :  { %9575 = vmatpush1.bf16.msra.mxu0 %v15502_v63  ;;  %14182 = vmatprep.subr.bf16.mxu1 %v15510_v4  ;;  %v15557_v63 = vld [vmem:[%s21917_s1 + $0x1068] ss:$12 sps:$4 sm:$0xff]   ;;  %v41_v4 = vld [vmem:[%s21918_s0 + $0xa0] sm:$0xff] }
 0x155   :  { %9576 = vmatprep.subr.bf16.mxu0 %v15509_v1  ;;  %v15564_v1 = vld [vmem:[%s21917_s1 + $0x1084] ss:$12 sps:$4 sm:$0xff]  }
 0x157   :  { %14183 = vmatpush3.bf16.msra.mxu1 %v15511_v5  ;;  %v44_v5 = vld [vmem:[%s21918_s0 + $0xb8] sm:$0xff] }
 0x158   :  { %9577 = vmatpush1.bf16.msra.mxu0 %v15507_v48  ;;  %14184 = vmatprep.subr.bf16.mxu1 %v15515_v7  ;;  %v15565_v48 = vld [vmem:[%s21917_s1 + $0x2d8] ss:$12 sps:$4 sm:$0xff]   ;;  %v15562_v7 = vld [vmem:[%s21917_s1 + $0x1080] ss:$12 sps:$4 sm:$0xff]  }
 0x159   :  { %9578 = vmatprep.subr.bf16.mxu0 %v15514_v6  ;;  %v18291_v6 = vpack.c.bf16 %v41_v4, %v41_v4  ;;  %v15616_v4 = vld [vmem:[%s21917_s1 + $0x488] ss:$12 sps:$4 sm:$0xff]  }
 0x15b   :  { %14185 = vmatpush3.bf16.msra.mxu1 %v15516_v13  ;;  %v15569_v13 = vld [vmem:[%s21917_s1 + $0x109c] ss:$12 sps:$4 sm:$0xff]  }
 0x15c   :  { %9579 = vmatpush1.bf16.msra.mxu0 %v15512_v8  ;;  %14186 = vmatprep.subr.bf16.mxu1 %v15520_v15  ;;  %v15566_v8 = vld [vmem:[%s21917_s1 + $0x218] ss:$12 sps:$4 sm:$0xff]  }
 0x15d   :  { %9580 = vmatprep.subr.bf16.mxu0 %v15519_v14  ;;  %v15570_v14 = vld [vmem:[%s21917_s1 + $0x2f0] ss:$12 sps:$4 sm:$0xff]   ;;  %v15567_v15 = vld [vmem:[%s21917_s1 + $0x1098] ss:$12 sps:$4 sm:$0xff]  }
 0x15f   :  { %14187 = vmatpush3.bf16.msra.mxu1 %v15521_v17  ;;  %v15571_v17 = vld [vmem:[%s21917_s1 + $0x230] ss:$12 sps:$4 sm:$0xff]  }
 0x160   :  { %9581 = vmatpush1.bf16.msra.mxu0 %v15517_v16  ;;  %14188 = vmatprep.subr.bf16.mxu1 %v15525_v19  ;;  %v18308_v16 = vpack.c.bf16 %v44_v5, %v44_v5  ;;  %v15575_v19 = vld [vmem:[%s21917_s1 + $0x3c8] ss:$12 sps:$4 sm:$0xff]   ;;  %v15620_v5 = vld [vmem:[%s21917_s1 + $0x560] ss:$12 sps:$4 sm:$0xff]  }
 0x161   :  { %9582 = vmatprep.subr.bf16.mxu0 %v15524_v18  ;;  %v15574_v18 = vld [vmem:[%s21917_s1 + $0x10b4] ss:$12 sps:$4 sm:$0xff]  }
 0x163   :  { %14189 = vmatpush3.bf16.msra.mxu1 %v15526_v21  ;;  %v15576_v21 = vld [vmem:[%s21917_s1 + $0x308] ss:$12 sps:$4 sm:$0xff]  }
 0x164   :  { %9583 = vmatpush1.bf16.msra.mxu0 %v15522_v20  ;;  %14190 = vmatprep.subr.bf16.mxu1 %v15530_v25  ;;  %v15572_v20 = vld [vmem:[%s21917_s1 + $0x10b0] ss:$12 sps:$4 sm:$0xff]   ;;  %v15580_v25 = vld [vmem:[%s21917_s1 + $0x3e0] ss:$12 sps:$4 sm:$0xff]  }
 0x165   :  { %9584 = vmatprep.subr.bf16.mxu0 %v15529_v24  ;;  %v15579_v24 = vld [vmem:[%s21917_s1 + $0x10cc] ss:$12 sps:$4 sm:$0xff]  }
 0x167   :  { %14191 = vmatpush3.bf16.msra.mxu1 %v15531_v27  ;;  %v15581_v27 = vld [vmem:[%s21917_s1 + $0x320] ss:$12 sps:$4 sm:$0xff]  }
 0x168   :  { %9585 = vmatpush1.bf16.msra.mxu0 %v15527_v26  ;;  %14198 = vmatprep.subr.bf16.mxu1 %v15535_v30  ;;  %v15577_v26 = vld [vmem:[%s21917_s1 + $0x10c8] ss:$12 sps:$4 sm:$0xff]   ;;  %v15585_v30 = vld [vmem:[%s21917_s1 + $0x3f8] ss:$12 sps:$4 sm:$0xff]  }
 0x169   :  { %9586 = vmatprep.subr.bf16.mxu0 %v15534_v29  ;;  %v15584_v29 = vld [vmem:[%s21917_s1 + $0x10e4] ss:$12 sps:$4 sm:$0xff]  }
 0x16a   :  { %10378 = vmatmul.mubr.bf16.vlgmr.msra.gmra.mrb[8].mxu1 %v17212_v10  ;;  %v15545_v10 = vld [vmem:[%s21917_s1 + $0x278] ss:$12 sps:$4 sm:$0xff]  }
 0x16b   :  { %14199 = vmatpush3.bf16.msra.mxu1 %v15536_v35  ;;  %10417 = vmatprep.mubr.bf16.mxu1 %v17290_v36  ;;  %v15547_v36 = vld [vmem:[%s21917_s1 + $0x1038] ss:$12 sps:$4 sm:$0xff]   ;;  %v15589_v35 = vld [vmem:[%s21917_s1 + $0x10fc] ss:$12 sps:$4 sm:$0xff]  }
 0x16c   :  { %9587 = vmatpush1.bf16.msra.mxu0 %v15532_v31  ;;  %14200 = vmatprep.subr.bf16.mxu1 %v15540_v38  ;;  %v15586_v31 = vld [vmem:[%s21917_s1 + $0x338] ss:$12 sps:$4 sm:$0xff]   ;;  %v15591_v38 = vld [vmem:[%s21917_s1 + $0x350] ss:$12 sps:$4 sm:$0xff]  }
 0x16d   :  { %9588 = vmatprep.subr.bf16.mxu0 %v15539_v37  ;;  %v15590_v37 = vld [vmem:[%s21917_s1 + $0x410] ss:$12 sps:$4 sm:$0xff]  }
 0x16f   :  { %14201 = vmatpush3.bf16.msra.mxu1 %v15541_v40  ;;  %v15595_v40 = vld [vmem:[%s21917_s1 + $0x428] ss:$12 sps:$4 sm:$0xff]  }
 0x170   :  { %9589 = vmatpush1.bf16.msra.mxu0 %v15537_v39  ;;  %14202 = vmatprep.subr.bf16.mxu1 %v15545_v10  ;;  %v15594_v39 = vld [vmem:[%s21917_s1 + $0x1114] ss:$12 sps:$4 sm:$0xff]  }
 0x171   :  { %9590 = vmatprep.subr.bf16.mxu0 %v15544_v44  ;;  %v15592_v44 = vld [vmem:[%s21917_s1 + $0x1110] ss:$12 sps:$4 sm:$0xff]   ;;  %v15596_v10 = vld [vmem:[%s21917_s1 + $0x368] ss:$12 sps:$4 sm:$0xff]  }
 0x173   :  { %14203 = vmatpush3.bf16.msra.mxu1 %v15546_v47  ;;  %v15600_v47 = vld [vmem:[%s21917_s1 + $0x440] ss:$12 sps:$4 sm:$0xff]  }
 0x174   :  { %9591 = vmatpush1.bf16.msra.mxu0 %v15542_v46  ;;  %14204 = vmatprep.subr.bf16.mxu1 %v15550_v54  ;;  %v15599_v46 = vld [vmem:[%s21917_s1 + $0x112c] ss:$12 sps:$4 sm:$0xff]  }
 0x175   :  { %9592 = vmatprep.subr.bf16.mxu0 %v15549_v51  ;;  %v15597_v51 = vld [vmem:[%s21917_s1 + $0x1128] ss:$12 sps:$4 sm:$0xff]   ;;  %v15601_v54 = vld [vmem:[%s21917_s1 + $0x380] ss:$12 sps:$4 sm:$0xff]  }
 0x177   :  { %14205 = vmatpush3.bf16.msra.mxu1 %v15551_v56  ;;  %v15605_v56 = vld [vmem:[%s21917_s1 + $0x458] ss:$12 sps:$4 sm:$0xff]  }
 0x178   :  { %9593 = vmatpush1.bf16.msra.mxu0 %v15547_v36  ;;  %14206 = vmatprep.subr.bf16.mxu1 %v15555_v58  ;;  %v15604_v36 = vld [vmem:[%s21917_s1 + $0x1144] ss:$12 sps:$4 sm:$0xff]  }
 0x179   :  { %9594 = vmatprep.subr.bf16.mxu0 %v15554_v57  ;;  %v15602_v57 = vld [vmem:[%s21917_s1 + $0x1140] ss:$12 sps:$4 sm:$0xff]   ;;  %v15606_v58 = vld [vmem:[%s21917_s1 + $0x398] ss:$12 sps:$4 sm:$0xff]  }
 0x17b   :  { %14207 = vmatpush3.bf16.msra.mxu1 %v15556_v60  ;;  %v15610_v60 = vld [vmem:[%s21917_s1 + $0x470] ss:$12 sps:$4 sm:$0xff]  }
 0x17c   :  { %9595 = vmatpush1.bf16.msra.mxu0 %v15552_v59  ;;  %14208 = vmatprep.subr.bf16.mxu1 %v15560_v62  ;;  %v15609_v59 = vld [vmem:[%s21917_s1 + $0x115c] ss:$12 sps:$4 sm:$0xff]  }
 0x17d   :  { %9596 = vmatprep.subr.bf16.mxu0 %v15559_v61  ;;  %v15607_v61 = vld [vmem:[%s21917_s1 + $0x1158] ss:$12 sps:$4 sm:$0xff]   ;;  %v15611_v62 = vld [vmem:[%s21917_s1 + $0x3b0] ss:$12 sps:$4 sm:$0xff]  }
 0x17f   :  { %14209 = vmatpush3.bf16.msra.mxu1 %v15561_v0  ;;  %v15615_v0 = vld [vmem:[%s21917_s1 + $0x548] ss:$12 sps:$4 sm:$0xff]  }
 0x180   :  { %9597 = vmatpush1.bf16.msra.mxu0 %v15557_v63  ;;  %14210 = vmatprep.subr.bf16.mxu1 %v15565_v48  ;;  %v15614_v63 = vld [vmem:[%s21917_s1 + $0x1174] ss:$12 sps:$4 sm:$0xff]   ;;  %v15619_v48 = vld [vmem:[%s21917_s1 + $0x118c] ss:$12 sps:$4 sm:$0xff]  }
 0x181   :  { %9607 = vmatprep.subr.bf16.mxu0 %v15564_v1  ;;  %v15612_v1 = vld [vmem:[%s21917_s1 + $0x1170] ss:$12 sps:$4 sm:$0xff]  }
 0x183   :  { %9599 = vmatmul.mubr.bf16.vlgmr.msra.gmra.mrb[0].mxu0 %v18291_v6  ;;  %14211 = vmatpush3.bf16.msra.mxu1 %v15566_v8  ;;  %v15621_v8 = vld [vmem:[%s21917_s1 + $0x4a0] ss:$12 sps:$4 sm:$0xff]  }
 0x184   :  { %9608 = vmatpush1.bf16.msra.mxu0 %v15562_v7  ;;  %14212 = vmatprep.subr.bf16.mxu1 %v15570_v14  ;;  %v15617_v7 = vld [vmem:[%s21917_s1 + $0x1188] ss:$12 sps:$4 sm:$0xff]   ;;  %v15625_v14 = vld [vmem:[%s21917_s1 + $0x578] ss:$12 sps:$4 sm:$0xff]  }
 0x185   :  { %9609 = vmatprep.subr.bf16.mxu0 %v15569_v13  ;;  %9639 = vmatprep.mubr.bf16.mxu0 %v18308_v16  ;;  %v15624_v13 = vld [vmem:[%s21917_s1 + $0x11a4] ss:$12 sps:$4 sm:$0xff]  }
 0x187   :  { %14213 = vmatpush3.bf16.msra.mxu1 %v15571_v17  ;;  %v15629_v17 = vld [vmem:[%s21917_s1 + $0x11bc] ss:$12 sps:$4 sm:$0xff]  }
 0x188   :  { %9610 = vmatpush1.bf16.msra.mxu0 %v15567_v15  ;;  %14220 = vmatprep.subr.bf16.mxu1 %v15575_v19  ;;  %v15626_v15 = vld [vmem:[%s21917_s1 + $0x4b8] ss:$12 sps:$4 sm:$0xff]   ;;  %v15631_v19 = vld [vmem:[%s21917_s1 + $0x4d0] ss:$12 sps:$4 sm:$0xff]  }
 0x189   :  { %9611 = vmatprep.subr.bf16.mxu0 %v15574_v18  ;;  %v15630_v18 = vld [vmem:[%s21917_s1 + $0x590] ss:$12 sps:$4 sm:$0xff]  }
 0x18a   :  { %10418 = vmatmul.mubr.bf16.vlgmr.msra.gmra.mrb[12].mxu1 %v17428_v22  ;;  %v15582_v22 = vld [vmem:[%s21917_s1 + $0x10e0] ss:$12 sps:$4 sm:$0xff]  }
 0x18b   :  { %14221 = vmatpush3.bf16.msra.mxu1 %v15576_v21  ;;  %10457 = vmatprep.mubr.bf16.mxu1 %v17446_v28  ;;  %v15587_v28 = vld [vmem:[%s21917_s1 + $0x10f8] ss:$12 sps:$4 sm:$0xff]   ;;  %v15635_v21 = vld [vmem:[%s21917_s1 + $0x5a8] ss:$12 sps:$4 sm:$0xff]  }
 0x18c   :  { %9612 = vmatpush1.bf16.msra.mxu0 %v15572_v20  ;;  %14222 = vmatprep.subr.bf16.mxu1 %v15580_v25  ;;  %v15634_v20 = vld [vmem:[%s21917_s1 + $0x11d4] ss:$12 sps:$4 sm:$0xff]  }
 0x18d   :  { %9613 = vmatprep.subr.bf16.mxu0 %v15579_v24  ;;  %v15632_v24 = vld [vmem:[%s21917_s1 + $0x11d0] ss:$12 sps:$4 sm:$0xff]   ;;  %v15636_v25 = vld [vmem:[%s21917_s1 + $0x4e8] ss:$12 sps:$4 sm:$0xff]  }
 0x18f   :  { %14223 = vmatpush3.bf16.msra.mxu1 %v15581_v27  ;;  %v15640_v27 = vld [vmem:[%s21917_s1 + $0x5c0] ss:$12 sps:$4 sm:$0xff]  }
 0x190   :  { %9614 = vmatpush1.bf16.msra.mxu0 %v15577_v26  ;;  %14224 = vmatprep.subr.bf16.mxu1 %v15585_v30  ;;  %v15639_v26 = vld [vmem:[%s21917_s1 + $0x11ec] ss:$12 sps:$4 sm:$0xff]  }
 0x191   :  { %9615 = vmatprep.subr.bf16.mxu0 %v15584_v29  ;;  %v15637_v29 = vld [vmem:[%s21917_s1 + $0x11e8] ss:$12 sps:$4 sm:$0xff]   ;;  %v15641_v30 = vld [vmem:[%s21917_s1 + $0x500] ss:$12 sps:$4 sm:$0xff]  }
 0x193   :  { %14225 = vmatpush3.bf16.msra.mxu1 %v15586_v31  ;;  %v43_v31 = vld [vmem:[%s21918_s0 + $0xb0] sm:$0xff] }
 0x194   :  { %9616 = vmatpush1.bf16.msra.mxu0 %v15582_v22  ;;  %14226 = vmatprep.subr.bf16.mxu1 %v15590_v37  ;;  %v15644_v22 = vld [vmem:[%s21917_s1 + $0x1204] ss:$12 sps:$4 sm:$0xff]   ;;  %v46_v37 = vld [vmem:[%s21918_s0 + $0xc8] sm:$0xff] }
 0x195   :  { %9617 = vmatprep.subr.bf16.mxu0 %v15589_v35  ;;  %v15645_v35 = vld [vmem:[%s21917_s1 + $0x5d8] ss:$12 sps:$4 sm:$0xff]  }
 0x197   :  { %14227 = vmatpush3.bf16.msra.mxu1 %v15591_v38  ;;  %v15642_v38 = vld [vmem:[%s21917_s1 + $0x1200] ss:$12 sps:$4 sm:$0xff]  }
 0x198   :  { %9618 = vmatpush1.bf16.msra.mxu0 %v15587_v28  ;;  %14228 = vmatprep.subr.bf16.mxu1 %v15595_v40  ;;  %v18499_v28 = vpack.c.bf16 %v43_v31, %v43_v31  ;;  %v15649_v40 = vld [vmem:[%s21917_s1 + $0x121c] ss:$12 sps:$4 sm:$0xff]   ;;  %v15700_v31 = vld [vmem:[%s21917_s1 + $0x860] ss:$12 sps:$4 sm:$0xff]  }
 0x199   :  { %9619 = vmatprep.subr.bf16.mxu0 %v15594_v39  ;;  %v15646_v39 = vld [vmem:[%s21917_s1 + $0x518] ss:$12 sps:$4 sm:$0xff]  }
 0x19b   :  { %14229 = vmatpush3.bf16.msra.mxu1 %v15596_v10  ;;  %v15647_v10 = vld [vmem:[%s21917_s1 + $0x1218] ss:$12 sps:$4 sm:$0xff]  }
 0x19c   :  { %9620 = vmatpush1.bf16.msra.mxu0 %v15592_v44  ;;  %14230 = vmatprep.subr.bf16.mxu1 %v15600_v47  ;;  %v15650_v44 = vld [vmem:[%s21917_s1 + $0x5f0] ss:$12 sps:$4 sm:$0xff]  }
 0x19d   :  { %9621 = vmatprep.subr.bf16.mxu0 %v15599_v46  ;;  %v18516_v46 = vpack.c.bf16 %v46_v37, %v46_v37  ;;  %v15651_v47 = vld [vmem:[%s21917_s1 + $0x530] ss:$12 sps:$4 sm:$0xff]   ;;  %v15701_v37 = vld [vmem:[%s21917_s1 + $0x7a0] ss:$12 sps:$4 sm:$0xff]  }
 0x19f   :  { %14231 = vmatpush3.bf16.msra.mxu1 %v15601_v54  ;;  %v15655_v54 = vld [vmem:[%s21917_s1 + $0x6c8] ss:$12 sps:$4 sm:$0xff]  }
 0x1a0   :  { %9622 = vmatpush1.bf16.msra.mxu0 %v15597_v51  ;;  %14232 = vmatprep.subr.bf16.mxu1 %v15605_v56  ;;  %v15654_v51 = vld [vmem:[%s21917_s1 + $0x1234] ss:$12 sps:$4 sm:$0xff]  }
 0x1a1   :  { %9623 = vmatprep.subr.bf16.mxu0 %v15604_v36  ;;  %v15652_v36 = vld [vmem:[%s21917_s1 + $0x1230] ss:$12 sps:$4 sm:$0xff]   ;;  %v15656_v56 = vld [vmem:[%s21917_s1 + $0x608] ss:$12 sps:$4 sm:$0xff]  }
 0x1a3   :  { %14233 = vmatpush3.bf16.msra.mxu1 %v15606_v58  ;;  %v15660_v58 = vld [vmem:[%s21917_s1 + $0x6e0] ss:$12 sps:$4 sm:$0xff]  }
 0x1a4   :  { %9624 = vmatpush1.bf16.msra.mxu0 %v15602_v57  ;;  %14234 = vmatprep.subr.bf16.mxu1 %v15610_v60  ;;  %v15659_v57 = vld [vmem:[%s21917_s1 + $0x124c] ss:$12 sps:$4 sm:$0xff]  }
 0x1a5   :  { %9625 = vmatprep.subr.bf16.mxu0 %v15609_v59  ;;  %v15657_v59 = vld [vmem:[%s21917_s1 + $0x1248] ss:$12 sps:$4 sm:$0xff]   ;;  %v15661_v60 = vld [vmem:[%s21917_s1 + $0x620] ss:$12 sps:$4 sm:$0xff]  }
 0x1a7   :  { %14235 = vmatpush3.bf16.msra.mxu1 %v15611_v62  ;;  %v15665_v62 = vld [vmem:[%s21917_s1 + $0x6f8] ss:$12 sps:$4 sm:$0xff]  }
 0x1a8   :  { %9626 = vmatpush1.bf16.msra.mxu0 %v15607_v61  ;;  %14242 = vmatprep.subr.bf16.mxu1 %v15615_v0  ;;  %v15664_v61 = vld [vmem:[%s21917_s1 + $0x1264] ss:$12 sps:$4 sm:$0xff]   ;;  %v15669_v0 = vld [vmem:[%s21917_s1 + $0x127c] ss:$12 sps:$4 sm:$0xff]  }
 0x1a9   :  { %9627 = vmatprep.subr.bf16.mxu0 %v15614_v63  ;;  %v15666_v63 = vld [vmem:[%s21917_s1 + $0x638] ss:$12 sps:$4 sm:$0xff]  }
 0x1aa   :  { %10458 = vmatmul.mubr.bf16.vlgmr.msra.gmra.mrb[16].mxu1 %v17644_v42  ;;  %v15622_v42 = vld [vmem:[%s21917_s1 + $0x11a0] ss:$12 sps:$4 sm:$0xff]  }
 0x1ab   :  { %14243 = vmatpush3.bf16.msra.mxu1 %v15616_v4  ;;  %10497 = vmatprep.mubr.bf16.mxu1 %v17660_v49  ;;  %v15627_v49 = vld [vmem:[%s21917_s1 + $0x11b8] ss:$12 sps:$4 sm:$0xff]   ;;  %v15671_v4 = vld [vmem:[%s21917_s1 + $0x650] ss:$12 sps:$4 sm:$0xff]  }
 0x1ac   :  { %9628 = vmatpush1.bf16.msra.mxu0 %v15612_v1  ;;  %14244 = vmatprep.subr.bf16.mxu1 %v15620_v5  ;;  %v15670_v1 = vld [vmem:[%s21917_s1 + $0x710] ss:$12 sps:$4 sm:$0xff]   ;;  %v15675_v5 = vld [vmem:[%s21917_s1 + $0x728] ss:$12 sps:$4 sm:$0xff]  }
 0x1ad   :  { %9629 = vmatprep.subr.bf16.mxu0 %v15619_v48  ;;  %v15674_v48 = vld [vmem:[%s21917_s1 + $0x1294] ss:$12 sps:$4 sm:$0xff]  }
 0x1af   :  { %14245 = vmatpush3.bf16.msra.mxu1 %v15621_v8  ;;  %v15676_v8 = vld [vmem:[%s21917_s1 + $0x668] ss:$12 sps:$4 sm:$0xff]  }
 0x1b0   :  { %9630 = vmatpush1.bf16.msra.mxu0 %v15617_v7  ;;  %14246 = vmatprep.subr.bf16.mxu1 %v15625_v14  ;;  %v15672_v7 = vld [vmem:[%s21917_s1 + $0x1290] ss:$12 sps:$4 sm:$0xff]   ;;  %v15680_v14 = vld [vmem:[%s21917_s1 + $0x740] ss:$12 sps:$4 sm:$0xff]  }
 0x1b1   :  { %9631 = vmatprep.subr.bf16.mxu0 %v15624_v13  ;;  %v15679_v13 = vld [vmem:[%s21917_s1 + $0x12ac] ss:$12 sps:$4 sm:$0xff]  }
 0x1b3   :  { %14247 = vmatpush3.bf16.msra.mxu1 %v15626_v15  ;;  %v15681_v15 = vld [vmem:[%s21917_s1 + $0x680] ss:$12 sps:$4 sm:$0xff]  }
 0x1b4   :  { %9632 = vmatpush1.bf16.msra.mxu0 %v15622_v42  ;;  %14248 = vmatprep.subr.bf16.mxu1 %v15630_v18  ;;  %v15677_v42 = vld [vmem:[%s21917_s1 + $0x12a8] ss:$12 sps:$4 sm:$0xff]   ;;  %v15685_v18 = vld [vmem:[%s21917_s1 + $0x758] ss:$12 sps:$4 sm:$0xff]  }
 0x1b5   :  { %9633 = vmatprep.subr.bf16.mxu0 %v15629_v17  ;;  %v15684_v17 = vld [vmem:[%s21917_s1 + $0x12c4] ss:$12 sps:$4 sm:$0xff]  }
 0x1b7   :  { %14249 = vmatpush3.bf16.msra.mxu1 %v15631_v19  ;;  %v15686_v19 = vld [vmem:[%s21917_s1 + $0x698] ss:$12 sps:$4 sm:$0xff]  }
 0x1b8   :  { %9634 = vmatpush1.bf16.msra.mxu0 %v15627_v49  ;;  %14250 = vmatprep.subr.bf16.mxu1 %v15635_v21  ;;  %v15682_v49 = vld [vmem:[%s21917_s1 + $0x12c0] ss:$12 sps:$4 sm:$0xff]   ;;  %v15690_v21 = vld [vmem:[%s21917_s1 + $0x770] ss:$12 sps:$4 sm:$0xff]  }
 0x1b9   :  { %9635 = vmatprep.subr.bf16.mxu0 %v15634_v20  ;;  %v15689_v20 = vld [vmem:[%s21917_s1 + $0x12dc] ss:$12 sps:$4 sm:$0xff]  }
 0x1bb   :  { %14251 = vmatpush3.bf16.msra.mxu1 %v15636_v25  ;;  %v15691_v25 = vld [vmem:[%s21917_s1 + $0x6b0] ss:$12 sps:$4 sm:$0xff]  }
 0x1bc   :  { %9636 = vmatpush1.bf16.msra.mxu0 %v15632_v24  ;;  %14252 = vmatprep.subr.bf16.mxu1 %v15640_v27  ;;  %v15687_v24 = vld [vmem:[%s21917_s1 + $0x12d8] ss:$12 sps:$4 sm:$0xff]   ;;  %v15695_v27 = vld [vmem:[%s21917_s1 + $0x848] ss:$12 sps:$4 sm:$0xff]  }
 0x1bd   :  { %9637 = vmatprep.subr.bf16.mxu0 %v15639_v26  ;;  %v15694_v26 = vld [vmem:[%s21917_s1 + $0x12f4] ss:$12 sps:$4 sm:$0xff]  }
 0x1bf   :  { %14253 = vmatpush3.bf16.msra.mxu1 %v15641_v30  ;;  %v15696_v30 = vld [vmem:[%s21917_s1 + $0x788] ss:$12 sps:$4 sm:$0xff]  }
 0x1c0   :  { %9638 = vmatpush1.bf16.msra.mxu0 %v15637_v29  ;;  %14254 = vmatprep.subr.bf16.mxu1 %v15645_v35  ;;  %v15692_v29 = vld [vmem:[%s21917_s1 + $0x12f0] ss:$12 sps:$4 sm:$0xff]   ;;  %v15697_v35 = vld [vmem:[%s21917_s1 + $0x1308] ss:$12 sps:$4 sm:$0xff]  }
 0x1c1   :  { %9648 = vmatprep.subr.bf16.mxu0 %v15644_v22  ;;  %v15699_v22 = vld [vmem:[%s21917_s1 + $0x130c] ss:$12 sps:$4 sm:$0xff]  }
 0x1c3   :  { %9640 = vmatmul.mubr.bf16.vlgmr.msra.gmra.mrb[0].mxu0 %v18499_v28  ;;  %14255 = vmatpush3.bf16.msra.mxu1 %v15646_v39  ;;  %v15705_v39 = vld [vmem:[%s21917_s1 + $0x878] ss:$12 sps:$4 sm:$0xff]  }
 0x1c4   :  { %9649 = vmatpush1.bf16.msra.mxu0 %v15642_v38  ;;  %14256 = vmatprep.subr.bf16.mxu1 %v15650_v44  ;;  %v15704_v38 = vld [vmem:[%s21917_s1 + $0x1324] ss:$12 sps:$4 sm:$0xff]   ;;  %v15709_v44 = vld [vmem:[%s21917_s1 + $0x133c] ss:$12 sps:$4 sm:$0xff]  }
 0x1c5   :  { %9650 = vmatprep.subr.bf16.mxu0 %v15649_v40  ;;  %9680 = vmatprep.mubr.bf16.mxu0 %v18516_v46  ;;  %v15706_v40 = vld [vmem:[%s21917_s1 + $0x7b8] ss:$12 sps:$4 sm:$0xff]  }
 0x1c7   :  { %14257 = vmatpush3.bf16.msra.mxu1 %v15651_v47  ;;  %v15711_v47 = vld [vmem:[%s21917_s1 + $0x7d0] ss:$12 sps:$4 sm:$0xff]  }
 0x1c8   :  { %9651 = vmatpush1.bf16.msra.mxu0 %v15647_v10  ;;  %14264 = vmatprep.subr.bf16.mxu1 %v15655_v54  ;;  %v15710_v10 = vld [vmem:[%s21917_s1 + $0x890] ss:$12 sps:$4 sm:$0xff]   ;;  %v15715_v54 = vld [vmem:[%s21917_s1 + $0x8a8] ss:$12 sps:$4 sm:$0xff]  }
 0x1c9   :  { %9652 = vmatprep.subr.bf16.mxu0 %v15654_v51  ;;  %v15714_v51 = vld [vmem:[%s21917_s1 + $0x1354] ss:$12 sps:$4 sm:$0xff]  }
 0x1ca   :  { %10498 = vmatmul.mubr.bf16.vlgmr.msra.gmra.mrb[20].mxu1 %v17860_v2  ;;  %v15662_v2 = vld [vmem:[%s21917_s1 + $0x1260] ss:$12 sps:$4 sm:$0xff]  }
 0x1cb   :  { %14265 = vmatpush3.bf16.msra.mxu1 %v15656_v56  ;;  %10537 = vmatprep.mubr.bf16.mxu1 %v17879_v9  ;;  %v15667_v9 = vld [vmem:[%s21917_s1 + $0x1278] ss:$12 sps:$4 sm:$0xff]   ;;  %v15716_v56 = vld [vmem:[%s21917_s1 + $0x7e8] ss:$12 sps:$4 sm:$0xff]  }
 0x1cc   :  { %9653 = vmatpush1.bf16.msra.mxu0 %v15652_v36  ;;  %14266 = vmatprep.subr.bf16.mxu1 %v15660_v58  ;;  %v15712_v36 = vld [vmem:[%s21917_s1 + $0x1350] ss:$12 sps:$4 sm:$0xff]   ;;  %v15720_v58 = vld [vmem:[%s21917_s1 + $0x8c0] ss:$12 sps:$4 sm:$0xff]  }
 0x1cd   :  { %9654 = vmatprep.subr.bf16.mxu0 %v15659_v57  ;;  %v15719_v57 = vld [vmem:[%s21917_s1 + $0x136c] ss:$12 sps:$4 sm:$0xff]  }
 0x1cf   :  { %14267 = vmatpush3.bf16.msra.mxu1 %v15661_v60  ;;  %v15721_v60 = vld [vmem:[%s21917_s1 + $0x800] ss:$12 sps:$4 sm:$0xff]  }
 0x1d0   :  { %9655 = vmatpush1.bf16.msra.mxu0 %v15657_v59  ;;  %14268 = vmatprep.subr.bf16.mxu1 %v15665_v62  ;;  %v15717_v59 = vld [vmem:[%s21917_s1 + $0x1368] ss:$12 sps:$4 sm:$0xff]   ;;  %v45_v62 = vld [vmem:[%s21918_s0 + $0xc0] sm:$0xff] }
 0x1d1   :  { %9656 = vmatprep.subr.bf16.mxu0 %v15664_v61  ;;  %v15724_v61 = vld [vmem:[%s21917_s1 + $0x1384] ss:$12 sps:$4 sm:$0xff]  }
 0x1d3   :  { %14269 = vmatpush3.bf16.msra.mxu1 %v15666_v63  ;;  %v48_v63 = vld [vmem:[%s21918_s0 + $0xd8] sm:$0xff] }
 0x1d4   :  { %9657 = vmatpush1.bf16.msra.mxu0 %v15662_v2  ;;  %14270 = vmatprep.subr.bf16.mxu1 %v15670_v1  ;;  %v15725_v2 = vld [vmem:[%s21917_s1 + $0x8d8] ss:$12 sps:$4 sm:$0xff]   ;;  %v15722_v1 = vld [vmem:[%s21917_s1 + $0x1380] ss:$12 sps:$4 sm:$0xff]  }
 0x1d5   :  { %9658 = vmatprep.subr.bf16.mxu0 %v15669_v0  ;;  %v18707_v0 = vpack.c.bf16 %v45_v62, %v45_v62  ;;  %v15776_v62 = vld [vmem:[%s21917_s1 + $0xa88] ss:$12 sps:$4 sm:$0xff]  }
 0x1d7   :  { %14271 = vmatpush3.bf16.msra.mxu1 %v15671_v4  ;;  %v15729_v4 = vld [vmem:[%s21917_s1 + $0x139c] ss:$12 sps:$4 sm:$0xff]  }
 0x1d8   :  { %9659 = vmatpush1.bf16.msra.mxu0 %v15667_v9  ;;  %14272 = vmatprep.subr.bf16.mxu1 %v15675_v5  ;;  %v15726_v9 = vld [vmem:[%s21917_s1 + $0x818] ss:$12 sps:$4 sm:$0xff]  }
 0x1d9   :  { %9660 = vmatprep.subr.bf16.mxu0 %v15674_v48  ;;  %v15730_v48 = vld [vmem:[%s21917_s1 + $0x8f0] ss:$12 sps:$4 sm:$0xff]   ;;  %v15727_v5 = vld [vmem:[%s21917_s1 + $0x1398] ss:$12 sps:$4 sm:$0xff]  }
 0x1db   :  { %14273 = vmatpush3.bf16.msra.mxu1 %v15676_v8  ;;  %v15731_v8 = vld [vmem:[%s21917_s1 + $0x830] ss:$12 sps:$4 sm:$0xff]  }
 0x1dc   :  { %9661 = vmatpush1.bf16.msra.mxu0 %v15672_v7  ;;  %14274 = vmatprep.subr.bf16.mxu1 %v15680_v14  ;;  %v18724_v7 = vpack.c.bf16 %v48_v63, %v48_v63  ;;  %v15735_v14 = vld [vmem:[%s21917_s1 + $0x9c8] ss:$12 sps:$4 sm:$0xff]   ;;  %v15780_v63 = vld [vmem:[%s21917_s1 + $0xb60] ss:$12 sps:$4 sm:$0xff]  }
 0x1dd   :  { %9662 = vmatprep.subr.bf16.mxu0 %v15679_v13  ;;  %v15734_v13 = vld [vmem:[%s21917_s1 + $0x13b4] ss:$12 sps:$4 sm:$0xff]  }
 0x1df   :  { %14275 = vmatpush3.bf16.msra.mxu1 %v15681_v15  ;;  %v15736_v15 = vld [vmem:[%s21917_s1 + $0x908] ss:$12 sps:$4 sm:$0xff]  }
 0x1e0   :  { %9663 = vmatpush1.bf16.msra.mxu0 %v15677_v42  ;;  %14276 = vmatprep.subr.bf16.mxu1 %v15685_v18  ;;  %v15732_v42 = vld [vmem:[%s21917_s1 + $0x13b0] ss:$12 sps:$4 sm:$0xff]   ;;  %v15740_v18 = vld [vmem:[%s21917_s1 + $0x9e0] ss:$12 sps:$4 sm:$0xff]  }
 0x1e1   :  { %9664 = vmatprep.subr.bf16.mxu0 %v15684_v17  ;;  %v15739_v17 = vld [vmem:[%s21917_s1 + $0x13cc] ss:$12 sps:$4 sm:$0xff]  }
 0x1e3   :  { %14277 = vmatpush3.bf16.msra.mxu1 %v15686_v19  ;;  %v15741_v19 = vld [vmem:[%s21917_s1 + $0x920] ss:$12 sps:$4 sm:$0xff]  }
 0x1e4   :  { %9665 = vmatpush1.bf16.msra.mxu0 %v15682_v49  ;;  %14278 = vmatprep.subr.bf16.mxu1 %v15690_v21  ;;  %v15737_v49 = vld [vmem:[%s21917_s1 + $0x13c8] ss:$12 sps:$4 sm:$0xff]   ;;  %v15745_v21 = vld [vmem:[%s21917_s1 + $0x9f8] ss:$12 sps:$4 sm:$0xff]  }
 0x1e5   :  { %9666 = vmatprep.subr.bf16.mxu0 %v15689_v20  ;;  %v15744_v20 = vld [vmem:[%s21917_s1 + $0x13e4] ss:$12 sps:$4 sm:$0xff]  }
 0x1e7   :  { %14279 = vmatpush3.bf16.msra.mxu1 %v15691_v25  ;;  %v15749_v25 = vld [vmem:[%s21917_s1 + $0x13fc] ss:$12 sps:$4 sm:$0xff]  }
 0x1e8   :  { %9667 = vmatpush1.bf16.msra.mxu0 %v15687_v24  ;;  %14286 = vmatprep.subr.bf16.mxu1 %v15695_v27  ;;  %v15746_v24 = vld [vmem:[%s21917_s1 + $0x938] ss:$12 sps:$4 sm:$0xff]   ;;  %v15751_v27 = vld [vmem:[%s21917_s1 + $0x950] ss:$12 sps:$4 sm:$0xff]  }
 0x1e9   :  { %9668 = vmatprep.subr.bf16.mxu0 %v15694_v26  ;;  %v15750_v26 = vld [vmem:[%s21917_s1 + $0xa10] ss:$12 sps:$4 sm:$0xff]  }
 0x1ea   :  { %10538 = vmatmul.mubr.bf16.vlgmr.msra.gmra.mrb[24].mxu1 %v18073_v32  ;;  %v15702_v32 = vld [vmem:[%s21917_s1 + $0x1320] ss:$12 sps:$4 sm:$0xff]  }
 0x1eb   :  { %14287 = vmatpush3.bf16.msra.mxu1 %v15696_v30  ;;  %10577 = vmatprep.mubr.bf16.mxu1 %v17148_v53  ;;  %v15707_v53 = vld [vmem:[%s21917_s1 + $0x1338] ss:$12 sps:$4 sm:$0xff]   ;;  %v15755_v30 = vld [vmem:[%s21917_s1 + $0xa28] ss:$12 sps:$4 sm:$0xff]  }
 0x1ec   :  { %9669 = vmatpush1.bf16.msra.mxu0 %v15692_v29  ;;  %14288 = vmatprep.subr.bf16.mxu1 %v15700_v31  ;;  %v15754_v29 = vld [vmem:[%s21917_s1 + $0x1414] ss:$12 sps:$4 sm:$0xff]   ;;  %v15752_v31 = vld [vmem:[%s21917_s1 + $0x1410] ss:$12 sps:$4 sm:$0xff]  }
 0x1ed   :  { %9670 = vmatprep.subr.bf16.mxu0 %v15699_v22 }
 0x1ef   :  { %14289 = vmatpush3.bf16.msra.mxu1 %v15701_v37 }
 0x1f0   :  { %9671 = vmatpush1.bf16.msra.mxu0 %v15697_v35  ;;  %14290 = vmatprep.subr.bf16.mxu1 %v15705_v39  ;;  %v15759_v39 = vld [vmem:[%s21917_s1 + $0x142c] ss:$12 sps:$4 sm:$0xff]  }
 0x1f1   :  { %9672 = vmatprep.subr.bf16.mxu0 %v15704_v38  ;;  %v15756_v38 = vld [vmem:[%s21917_s1 + $0x968] ss:$12 sps:$4 sm:$0xff]  }
 0x1f3   :  { %14291 = vmatpush3.bf16.msra.mxu1 %v15706_v40  ;;  %v15760_v40 = vld [vmem:[%s21917_s1 + $0xa40] ss:$12 sps:$4 sm:$0xff]  }
 0x1f4   :  { %9673 = vmatpush1.bf16.msra.mxu0 %v15702_v32  ;;  %14292 = vmatprep.subr.bf16.mxu1 %v15710_v10  ;;  %v15761_v10 = vld [vmem:[%s21917_s1 + $0x980] ss:$12 sps:$4 sm:$0xff]  }
 0x1f5   :  { %9674 = vmatprep.subr.bf16.mxu0 %v15709_v44  ;;  %v15757_v44 = vld [vmem:[%s21917_s1 + $0x1428] ss:$12 sps:$4 sm:$0xff]  }
 0x1f7   :  { %14293 = vmatpush3.bf16.msra.mxu1 %v15711_v47  ;;  %v15765_v47 = vld [vmem:[%s21917_s1 + $0xa58] ss:$12 sps:$4 sm:$0xff]  }
 0x1f8   :  { %9675 = vmatpush1.bf16.msra.mxu0 %v15707_v53  ;;  %14294 = vmatprep.subr.bf16.mxu1 %v15715_v54  ;;  %v15764_v53 = vld [vmem:[%s21917_s1 + $0x1444] ss:$12 sps:$4 sm:$0xff]  }
 0x1f9   :  { %9676 = vmatprep.subr.bf16.mxu0 %v15714_v51  ;;  %v15762_v51 = vld [vmem:[%s21917_s1 + $0x1440] ss:$12 sps:$4 sm:$0xff]   ;;  %v15766_v54 = vld [vmem:[%s21917_s1 + $0x998] ss:$12 sps:$4 sm:$0xff]  }
 0x1fb   :  { %14295 = vmatpush3.bf16.msra.mxu1 %v15716_v56  ;;  %v15770_v56 = vld [vmem:[%s21917_s1 + $0xa70] ss:$12 sps:$4 sm:$0xff]  }
 0x1fc   :  { %9677 = vmatpush1.bf16.msra.mxu0 %v15712_v36  ;;  %14296 = vmatprep.subr.bf16.mxu1 %v15720_v58  ;;  %v15769_v36 = vld [vmem:[%s21917_s1 + $0x145c] ss:$12 sps:$4 sm:$0xff]  }
 0x1fd   :  { %9678 = vmatprep.subr.bf16.mxu0 %v15719_v57  ;;  %v15767_v57 = vld [vmem:[%s21917_s1 + $0x1458] ss:$12 sps:$4 sm:$0xff]   ;;  %v15771_v58 = vld [vmem:[%s21917_s1 + $0x9b0] ss:$12 sps:$4 sm:$0xff]  }
 0x1ff   :  { %14297 = vmatpush3.bf16.msra.mxu1 %v15721_v60  ;;  %v15775_v60 = vld [vmem:[%s21917_s1 + $0xb48] ss:$12 sps:$4 sm:$0xff]  }
 0x200   :  { %9679 = vmatpush1.bf16.msra.mxu0 %v15717_v59  ;;  %14298 = vmatprep.subr.bf16.mxu1 %v15725_v2  ;;  %v15774_v59 = vld [vmem:[%s21917_s1 + $0x1474] ss:$12 sps:$4 sm:$0xff]   ;;  %v15779_v2 = vld [vmem:[%s21917_s1 + $0x148c] ss:$12 sps:$4 sm:$0xff]  }
 0x201   :  { %9689 = vmatprep.subr.bf16.mxu0 %v15724_v61  ;;  %v15772_v61 = vld [vmem:[%s21917_s1 + $0x1470] ss:$12 sps:$4 sm:$0xff]  }
 0x203   :  { %9681 = vmatmul.mubr.bf16.vlgmr.msra.gmra.mrb[0].mxu0 %v18707_v0  ;;  %14299 = vmatpush3.bf16.msra.mxu1 %v15726_v9  ;;  %v15781_v9 = vld [vmem:[%s21917_s1 + $0xaa0] ss:$12 sps:$4 sm:$0xff]  }
 0x204   :  { %9690 = vmatpush1.bf16.msra.mxu0 %v15722_v1  ;;  %14300 = vmatprep.subr.bf16.mxu1 %v15730_v48  ;;  %v15777_v1 = vld [vmem:[%s21917_s1 + $0x1488] ss:$12 sps:$4 sm:$0xff]   ;;  %v15785_v48 = vld [vmem:[%s21917_s1 + $0xb78] ss:$12 sps:$4 sm:$0xff]  }
 0x205   :  { %9691 = vmatprep.subr.bf16.mxu0 %v15729_v4  ;;  %9721 = vmatprep.mubr.bf16.mxu0 %v18724_v7  ;;  %v15784_v4 = vld [vmem:[%s21917_s1 + $0x14a4] ss:$12 sps:$4 sm:$0xff]  }
 0x207   :  { %14301 = vmatpush3.bf16.msra.mxu1 %v15731_v8  ;;  %v15789_v8 = vld [vmem:[%s21917_s1 + $0x14bc] ss:$12 sps:$4 sm:$0xff]  }
 0x208   :  { %9692 = vmatpush1.bf16.msra.mxu0 %v15727_v5  ;;  %14308 = vmatprep.subr.bf16.mxu1 %v15735_v14  ;;  %v15786_v5 = vld [vmem:[%s21917_s1 + $0xab8] ss:$12 sps:$4 sm:$0xff]   ;;  %v15791_v14 = vld [vmem:[%s21917_s1 + $0xad0] ss:$12 sps:$4 sm:$0xff]  }
 0x209   :  { %9693 = vmatprep.subr.bf16.mxu0 %v15734_v13  ;;  %v15790_v13 = vld [vmem:[%s21917_s1 + $0xb90] ss:$12 sps:$4 sm:$0xff]  }
 0x20a   :  { %10578 = vmatmul.mubr.bf16.vlgmr.msra.gmra.mrb[28].mxu1 %v17214_v11  ;;  %v15742_v11 = vld [vmem:[%s21917_s1 + $0x13e0] ss:$12 sps:$4 sm:$0xff]  }
 0x20b   :  { %14309 = vmatpush3.bf16.msra.mxu1 %v15736_v15  ;;  %10617 = vmatprep.mubr.bf16.mxu1 %v17304_v41  ;;  %v15747_v41 = vld [vmem:[%s21917_s1 + $0x13f8] ss:$12 sps:$4 sm:$0xff]   ;;  %v15795_v15 = vld [vmem:[%s21917_s1 + $0xba8] ss:$12 sps:$4 sm:$0xff]  }
 0x20c   :  { %9694 = vmatpush1.bf16.msra.mxu0 %v15732_v42  ;;  %14310 = vmatprep.subr.bf16.mxu1 %v15740_v18  ;;  %v15794_v42 = vld [vmem:[%s21917_s1 + $0x14d4] ss:$12 sps:$4 sm:$0xff]  }
 0x20d   :  { %9695 = vmatprep.subr.bf16.mxu0 %v15739_v17  ;;  %v15792_v17 = vld [vmem:[%s21917_s1 + $0x14d0] ss:$12 sps:$4 sm:$0xff]   ;;  %v15796_v18 = vld [vmem:[%s21917_s1 + $0xae8] ss:$12 sps:$4 sm:$0xff]  }
 0x20f   :  { %14311 = vmatpush3.bf16.msra.mxu1 %v15741_v19  ;;  %v15800_v19 = vld [vmem:[%s21917_s1 + $0xbc0] ss:$12 sps:$4 sm:$0xff]  }
 0x210   :  { %9696 = vmatpush1.bf16.msra.mxu0 %v15737_v49  ;;  %14312 = vmatprep.subr.bf16.mxu1 %v15745_v21  ;;  %v15799_v49 = vld [vmem:[%s21917_s1 + $0x14ec] ss:$12 sps:$4 sm:$0xff]  }
 0x211   :  { %9697 = vmatprep.subr.bf16.mxu0 %v15744_v20  ;;  %v15797_v20 = vld [vmem:[%s21917_s1 + $0x14e8] ss:$12 sps:$4 sm:$0xff]   ;;  %v15801_v21 = vld [vmem:[%s21917_s1 + $0xb00] ss:$12 sps:$4 sm:$0xff]  }
 0x213   :  { %14313 = vmatpush3.bf16.msra.mxu1 %v15746_v24  ;;  %v47_v24 = vld [vmem:[%s21918_s0 + $0xd0] sm:$0xff] }
 0x214   :  { %9698 = vmatpush1.bf16.msra.mxu0 %v15742_v11  ;;  %14314 = vmatprep.subr.bf16.mxu1 %v15750_v26  ;;  %v15804_v11 = vld [vmem:[%s21917_s1 + $0x1504] ss:$12 sps:$4 sm:$0xff]   ;;  %v50_v26 = vld [vmem:[%s21918_s0 + $0xe8] sm:$0xff] }
 0x215   :  { %9699 = vmatprep.subr.bf16.mxu0 %v15749_v25  ;;  %v18787_v22 = vpop.f32.mrb[0].mxu1  ;;  %v15805_v25 = vld [vmem:[%s21917_s1 + $0xbd8] ss:$12 sps:$4 sm:$0xff]  }
 0x216   :  { %v18792_v35 = vpop.f32.mrb[1].mxu1 }
 0x217   :  { %v9358_v37 = vpop.f32.mrb[2].mxu1  ;;  %14315 = vmatpush3.bf16.msra.mxu1 %v15751_v27  ;;  %v15802_v27 = vld [vmem:[%s21917_s1 + $0x1500] ss:$12 sps:$4 sm:$0xff]  }
 0x218   :  { %9700 = vmatpush1.bf16.msra.mxu0 %v15747_v41  ;;  %v9359_v32 = vpop.f32.mrb[3].mxu1  ;;  %14316 = vmatprep.subr.bf16.mxu1 %v15755_v30  ;;  %v18919_v41 = vpack.c.bf16 %v47_v24, %v47_v24  ;;  %v15809_v30 = vld [vmem:[%s21917_s1 + $0x151c] ss:$12 sps:$4 sm:$0xff]   ;;  %v15807_v37 = vld [vmem:[%s21917_s1 + $0x1518] ss:$12 sps:$4 sm:$0xff]  }
 0x219   :  { %9701 = vmatprep.subr.bf16.mxu0 %v15754_v29  ;;  %v15806_v29 = vld [vmem:[%s21917_s1 + $0xb18] ss:$12 sps:$4 sm:$0xff]   ;;  %v15814_v32 = vld [vmem:[%s21917_s1 + $0x1534] ss:$12 sps:$4 sm:$0xff]  }
 0x21a   :  { %v15861_v24 = vld [vmem:[%s21917_s1 + $0xda0] ss:$12 sps:$4 sm:$0xff]  }
 0x21b   :  { %14317 = vmatpush3.bf16.msra.mxu1 %v15756_v38  ;;  %v18936_v38 = vpack.c.bf16 %v50_v26, %v50_v26  ;;  %v15865_v26 = vld [vmem:[%s21917_s1 + $0xe78] ss:$12 sps:$4 sm:$0xff]  }
 0x21c   :  { %9702 = vmatpush1.bf16.msra.mxu0 %v15752_v31  ;;  %14318 = vmatprep.subr.bf16.mxu1 %v15760_v40  ;;  %v15810_v31 = vld [vmem:[%s21917_s1 + $0xbf0] ss:$12 sps:$4 sm:$0xff]   ;;  %v15815_v40 = vld [vmem:[%s21917_s1 + $0xcc8] ss:$12 sps:$4 sm:$0xff]  }
 0x21d   :  { %9703 = vmatprep.subr.bf16.mxu0 %v15759_v39  ;;  %v15811_v39 = vld [vmem:[%s21917_s1 + $0xb30] ss:$12 sps:$4 sm:$0xff]  }
 0x21f   :  { %14319 = vmatpush3.bf16.msra.mxu1 %v15761_v10  ;;  %v15816_v10 = vld [vmem:[%s21917_s1 + $0xc08] ss:$12 sps:$4 sm:$0xff]  }
 0x220   :  { %9704 = vmatpush1.bf16.msra.mxu0 %v15757_v44  ;;  %14320 = vmatprep.subr.bf16.mxu1 %v15765_v47  ;;  %v15812_v44 = vld [vmem:[%s21917_s1 + $0x1530] ss:$12 sps:$4 sm:$0xff]   ;;  %v15820_v47 = vld [vmem:[%s21917_s1 + $0xce0] ss:$12 sps:$4 sm:$0xff]  }
 0x221   :  { %9705 = vmatprep.subr.bf16.mxu0 %v15764_v53  ;;  %v15819_v53 = vld [vmem:[%s21917_s1 + $0x154c] ss:$12 sps:$4 sm:$0xff]  }
 0x223   :  { %14321 = vmatpush3.bf16.msra.mxu1 %v15766_v54  ;;  %v15821_v54 = vld [vmem:[%s21917_s1 + $0xc20] ss:$12 sps:$4 sm:$0xff]  }
 0x224   :  { %9706 = vmatpush1.bf16.msra.mxu0 %v15762_v51  ;;  %14322 = vmatprep.subr.bf16.mxu1 %v15770_v56  ;;  %v15817_v51 = vld [vmem:[%s21917_s1 + $0x1548] ss:$12 sps:$4 sm:$0xff]   ;;  %v15825_v56 = vld [vmem:[%s21917_s1 + $0xcf8] ss:$12 sps:$4 sm:$0xff]  }
 0x225   :  { %9707 = vmatprep.subr.bf16.mxu0 %v15769_v36  ;;  %v15824_v36 = vld [vmem:[%s21917_s1 + $0x1564] ss:$12 sps:$4 sm:$0xff]  }
 0x227   :  { %14323 = vmatpush3.bf16.msra.mxu1 %v15771_v58  ;;  %v15829_v58 = vld [vmem:[%s21917_s1 + $0x157c] ss:$12 sps:$4 sm:$0xff]  }
 0x228   :  { %9708 = vmatpush1.bf16.msra.mxu0 %v15767_v57  ;;  %14330 = vmatprep.subr.bf16.mxu1 %v15775_v60  ;;  %v15826_v57 = vld [vmem:[%s21917_s1 + $0xc38] ss:$12 sps:$4 sm:$0xff]   ;;  %v15831_v60 = vld [vmem:[%s21917_s1 + $0xc50] ss:$12 sps:$4 sm:$0xff]  }
 0x229   :  { %9709 = vmatprep.subr.bf16.mxu0 %v15774_v59  ;;  %v15830_v59 = vld [vmem:[%s21917_s1 + $0xd10] ss:$12 sps:$4 sm:$0xff]  }
 0x22a   :  { %10618 = vmatmul.mubr.bf16.vlgmr.msra.gmra.mrb[32].mxu1 %v17430_v23  ;;  %v15782_v23 = vld [vmem:[%s21917_s1 + $0x14a0] ss:$12 sps:$4 sm:$0xff]  }
 0x22b   :  { %14331 = vmatpush3.bf16.msra.mxu1 %v15776_v62  ;;  %10657 = vmatprep.mubr.bf16.mxu1 %v17460_v33  ;;  %v15787_v33 = vld [vmem:[%s21917_s1 + $0x14b8] ss:$12 sps:$4 sm:$0xff]   ;;  %v15835_v62 = vld [vmem:[%s21917_s1 + $0xd28] ss:$12 sps:$4 sm:$0xff]  }
 0x22c   :  { %9710 = vmatpush1.bf16.msra.mxu0 %v15772_v61  ;;  %14332 = vmatprep.subr.bf16.mxu1 %v15780_v63  ;;  %v15834_v61 = vld [vmem:[%s21917_s1 + $0x1594] ss:$12 sps:$4 sm:$0xff]  }
 0x22d   :  { %9711 = vmatprep.subr.bf16.mxu0 %v15779_v2  ;;  %v15832_v2 = vld [vmem:[%s21917_s1 + $0x1590] ss:$12 sps:$4 sm:$0xff]   ;;  %v15836_v63 = vld [vmem:[%s21917_s1 + $0xc68] ss:$12 sps:$4 sm:$0xff]  }
 0x22f   :  { %14333 = vmatpush3.bf16.msra.mxu1 %v15781_v9  ;;  %v15840_v9 = vld [vmem:[%s21917_s1 + $0xd40] ss:$12 sps:$4 sm:$0xff]  }
 0x230   :  { %9712 = vmatpush1.bf16.msra.mxu0 %v15777_v1  ;;  %14334 = vmatprep.subr.bf16.mxu1 %v15785_v48  ;;  %v15839_v1 = vld [vmem:[%s21917_s1 + $0x15ac] ss:$12 sps:$4 sm:$0xff]  }
 0x231   :  { %9713 = vmatprep.subr.bf16.mxu0 %v15784_v4  ;;  %v15837_v4 = vld [vmem:[%s21917_s1 + $0x15a8] ss:$12 sps:$4 sm:$0xff]   ;;  %v15841_v48 = vld [vmem:[%s21917_s1 + $0xc80] ss:$12 sps:$4 sm:$0xff]  }
 0x233   :  { %14335 = vmatpush3.bf16.msra.mxu1 %v15786_v5  ;;  %v15845_v5 = vld [vmem:[%s21917_s1 + $0xd58] ss:$12 sps:$4 sm:$0xff]  }
 0x234   :  { %9714 = vmatpush1.bf16.msra.mxu0 %v15782_v23  ;;  %14336 = vmatprep.subr.bf16.mxu1 %v15790_v13  ;;  %v15844_v23 = vld [vmem:[%s21917_s1 + $0x15c4] ss:$12 sps:$4 sm:$0xff]  }
 0x235   :  { %9715 = vmatprep.subr.bf16.mxu0 %v15789_v8  ;;  %v15842_v8 = vld [vmem:[%s21917_s1 + $0x15c0] ss:$12 sps:$4 sm:$0xff]   ;;  %v15846_v13 = vld [vmem:[%s21917_s1 + $0xc98] ss:$12 sps:$4 sm:$0xff]  }
 0x237   :  { %14337 = vmatpush3.bf16.msra.mxu1 %v15791_v14  ;;  %v15850_v14 = vld [vmem:[%s21917_s1 + $0xd70] ss:$12 sps:$4 sm:$0xff]  }
 0x238   :  { %9716 = vmatpush1.bf16.msra.mxu0 %v15787_v33  ;;  %14338 = vmatprep.subr.bf16.mxu1 %v15795_v15  ;;  %v15849_v33 = vld [vmem:[%s21917_s1 + $0x15dc] ss:$12 sps:$4 sm:$0xff]  }
 0x239   :  { %9717 = vmatprep.subr.bf16.mxu0 %v15794_v42  ;;  %v15847_v42 = vld [vmem:[%s21917_s1 + $0x15d8] ss:$12 sps:$4 sm:$0xff]   ;;  %v15851_v15 = vld [vmem:[%s21917_s1 + $0xcb0] ss:$12 sps:$4 sm:$0xff]  }
 0x23b   :  { %14339 = vmatpush3.bf16.msra.mxu1 %v15796_v18  ;;  %v15855_v18 = vld [vmem:[%s21917_s1 + $0xe48] ss:$12 sps:$4 sm:$0xff]  }
 0x23c   :  { %9718 = vmatpush1.bf16.msra.mxu0 %v15792_v17  ;;  %14340 = vmatprep.subr.bf16.mxu1 %v15800_v19  ;;  %v15854_v17 = vld [vmem:[%s21917_s1 + $0x15f4] ss:$12 sps:$4 sm:$0xff]  }
 0x23d   :  { %9719 = vmatprep.subr.bf16.mxu0 %v15799_v49  ;;  %v15852_v49 = vld [vmem:[%s21917_s1 + $0x15f0] ss:$12 sps:$4 sm:$0xff]   ;;  %v15856_v19 = vld [vmem:[%s21917_s1 + $0xd88] ss:$12 sps:$4 sm:$0xff]  }
 0x23f   :  { %14341 = vmatpush3.bf16.msra.mxu1 %v15801_v21  ;;  %v15860_v21 = vld [vmem:[%s21917_s1 + $0xe60] ss:$12 sps:$4 sm:$0xff]  }
 0x240   :  { %9720 = vmatpush1.bf16.msra.mxu0 %v15797_v20  ;;  %14342 = vmatprep.subr.bf16.mxu1 %v15805_v25  ;;  %v15859_v20 = vld [vmem:[%s21917_s1 + $0x160c] ss:$12 sps:$4 sm:$0xff]   ;;  %v15864_v25 = vld [vmem:[%s21917_s1 + $0x1624] ss:$12 sps:$4 sm:$0xff]  }
 0x241   :  { %9730 = vmatprep.subr.bf16.mxu0 %v15804_v11  ;;  %v15857_v11 = vld [vmem:[%s21917_s1 + $0x1608] ss:$12 sps:$4 sm:$0xff]  }
 0x243   :  { %9722 = vmatmul.mubr.bf16.vlgmr.msra.gmra.mrb[0].mxu0 %v18919_v41  ;;  %14343 = vmatpush3.bf16.msra.mxu1 %v15806_v29  ;;  %v15869_v29 = vld [vmem:[%s21917_s1 + $0x163c] ss:$12 sps:$4 sm:$0xff]  }
 0x244   :  { %9731 = vmatpush1.bf16.msra.mxu0 %v15802_v27  ;;  %14344 = vmatprep.subr.bf16.mxu1 %v15810_v31  ;;  %v15866_v27 = vld [vmem:[%s21917_s1 + $0xdb8] ss:$12 sps:$4 sm:$0xff]   ;;  %v15871_v31 = vld [vmem:[%s21917_s1 + $0xdd0] ss:$12 sps:$4 sm:$0xff]  }
 0x245   :  { %9732 = vmatprep.subr.bf16.mxu0 %v15809_v30  ;;  %9762 = vmatprep.mubr.bf16.mxu0 %v18936_v38  ;;  %v15870_v30 = vld [vmem:[%s21917_s1 + $0xe90] ss:$12 sps:$4 sm:$0xff]  }
 0x247   :  { %14345 = vmatpush3.bf16.msra.mxu1 %v15811_v39  ;;  %v15875_v39 = vld [vmem:[%s21917_s1 + $0xea8] ss:$12 sps:$4 sm:$0xff]  }
 0x248   :  { %9733 = vmatpush1.bf16.msra.mxu0 %v15807_v37  ;;  %14352 = vmatprep.subr.bf16.mxu1 %v15815_v40  ;;  %v15874_v37 = vld [vmem:[%s21917_s1 + $0x1654] ss:$12 sps:$4 sm:$0xff]  }
 0x249   :  { %9734 = vmatprep.subr.bf16.mxu0 %v15814_v32  ;;  %v15872_v32 = vld [vmem:[%s21917_s1 + $0x1650] ss:$12 sps:$4 sm:$0xff]   ;;  %v15876_v40 = vld [vmem:[%s21917_s1 + $0xde8] ss:$12 sps:$4 sm:$0xff]  }
 0x24a   :  { %10658 = vmatmul.mubr.bf16.vlgmr.msra.gmra.mrb[36].mxu1 %v17646_v43  ;;  %v15822_v43 = vld [vmem:[%s21917_s1 + $0x1560] ss:$12 sps:$4 sm:$0xff]  }
 0x24b   :  { %14353 = vmatpush3.bf16.msra.mxu1 %v15816_v10  ;;  %10697 = vmatprep.mubr.bf16.mxu1 %v17662_v50  ;;  %v15827_v50 = vld [vmem:[%s21917_s1 + $0x1578] ss:$12 sps:$4 sm:$0xff]   ;;  %v15880_v10 = vld [vmem:[%s21917_s1 + $0xec0] ss:$12 sps:$4 sm:$0xff]  }
 0x24c   :  { %9735 = vmatpush1.bf16.msra.mxu0 %v15812_v44  ;;  %14354 = vmatprep.subr.bf16.mxu1 %v15820_v47  ;;  %v15879_v44 = vld [vmem:[%s21917_s1 + $0x166c] ss:$12 sps:$4 sm:$0xff]  }
 0x24d   :  { %9736 = vmatprep.subr.bf16.mxu0 %v15819_v53  ;;  %v15877_v53 = vld [vmem:[%s21917_s1 + $0x1668] ss:$12 sps:$4 sm:$0xff]   ;;  %v15881_v47 = vld [vmem:[%s21917_s1 + $0xe00] ss:$12 sps:$4 sm:$0xff]  }
 0x24f   :  { %14355 = vmatpush3.bf16.msra.mxu1 %v15821_v54  ;;  %v49_v54 = vld [vmem:[%s21918_s0 + $0xe0] sm:$0xff] }
 0x250   :  { %9737 = vmatpush1.bf16.msra.mxu0 %v15817_v51  ;;  %14356 = vmatprep.subr.bf16.mxu1 %v15825_v56  ;;  %v15884_v51 = vld [vmem:[%s21917_s1 + $0x1684] ss:$12 sps:$4 sm:$0xff]   ;;  %v52_v56 = vld [vmem:[%s21918_s0 + $0xf8] sm:$0xff] }
 0x251   :  { %9738 = vmatprep.subr.bf16.mxu0 %v15824_v36  ;;  %v15885_v36 = vld [vmem:[%s21917_s1 + $0xed8] ss:$12 sps:$4 sm:$0xff]  }
 0x253   :  { %14357 = vmatpush3.bf16.msra.mxu1 %v15826_v57  ;;  %v15882_v57 = vld [vmem:[%s21917_s1 + $0x1680] ss:$12 sps:$4 sm:$0xff]  }
 0x254   :  { %9739 = vmatpush1.bf16.msra.mxu0 %v15822_v43  ;;  %14358 = vmatprep.subr.bf16.mxu1 %v15830_v59  ;;  %v19127_v43 = vpack.c.bf16 %v49_v54, %v49_v54  ;;  %v15889_v59 = vld [vmem:[%s21917_s1 + $0x169c] ss:$12 sps:$4 sm:$0xff]   ;;  %v15939_v54 = vld [vmem:[%s21917_s1 + $0x178c] ss:$12 sps:$4 sm:$0xff]  }
 0x255   :  { %9740 = vmatprep.subr.bf16.mxu0 %v15829_v58  ;;  %v15886_v58 = vld [vmem:[%s21917_s1 + $0xe18] ss:$12 sps:$4 sm:$0xff]  }
 0x257   :  { %14359 = vmatpush3.bf16.msra.mxu1 %v15831_v60  ;;  %v15887_v60 = vld [vmem:[%s21917_s1 + $0x1698] ss:$12 sps:$4 sm:$0xff]  }
 0x258   :  { %9741 = vmatpush1.bf16.msra.mxu0 %v15827_v50  ;;  %14360 = vmatprep.subr.bf16.mxu1 %v15835_v62  ;;  %v15890_v50 = vld [vmem:[%s21917_s1 + $0xef0] ss:$12 sps:$4 sm:$0xff]  }
 0x259   :  { %9742 = vmatprep.subr.bf16.mxu0 %v15834_v61  ;;  %v19144_v61 = vpack.c.bf16 %v52_v56, %v52_v56  ;;  %v15891_v62 = vld [vmem:[%s21917_s1 + $0xe30] ss:$12 sps:$4 sm:$0xff]  }
 0x25b   :  { %14361 = vmatpush3.bf16.msra.mxu1 %v15836_v63  ;;  %v15895_v63 = vld [vmem:[%s21917_s1 + $0xfc8] ss:$12 sps:$4 sm:$0xff]  }
 0x25c   :  { %9743 = vmatpush1.bf16.msra.mxu0 %v15832_v2  ;;  %14362 = vmatprep.subr.bf16.mxu1 %v15840_v9  ;;  %v15894_v2 = vld [vmem:[%s21917_s1 + $0x16b4] ss:$12 sps:$4 sm:$0xff]  }
 0x25d   :  { %9744 = vmatprep.subr.bf16.mxu0 %v15839_v1  ;;  %v15892_v1 = vld [vmem:[%s21917_s1 + $0x16b0] ss:$12 sps:$4 sm:$0xff]   ;;  %v15896_v9 = vld [vmem:[%s21917_s1 + $0xf08] ss:$12 sps:$4 sm:$0xff]  }
 0x25f   :  { %14363 = vmatpush3.bf16.msra.mxu1 %v15841_v48  ;;  %v15900_v48 = vld [vmem:[%s21917_s1 + $0xfe0] ss:$12 sps:$4 sm:$0xff]  }
 0x260   :  { %9745 = vmatpush1.bf16.msra.mxu0 %v15837_v4  ;;  %14364 = vmatprep.subr.bf16.mxu1 %v15845_v5  ;;  %v15899_v4 = vld [vmem:[%s21917_s1 + $0x16cc] ss:$12 sps:$4 sm:$0xff]  }
 0x261   :  { %9746 = vmatprep.subr.bf16.mxu0 %v15844_v23  ;;  %v15897_v23 = vld [vmem:[%s21917_s1 + $0x16c8] ss:$12 sps:$4 sm:$0xff]   ;;  %v15901_v5 = vld [vmem:[%s21917_s1 + $0xf20] ss:$12 sps:$4 sm:$0xff]  }
 0x263   :  { %14365 = vmatpush3.bf16.msra.mxu1 %v15846_v13  ;;  %v15905_v13 = vld [vmem:[%s21917_s1 + $0xff8] ss:$12 sps:$4 sm:$0xff]  }
 0x264   :  { %9747 = vmatpush1.bf16.msra.mxu0 %v15842_v8  ;;  %14366 = vmatprep.subr.bf16.mxu1 %v15850_v14  ;;  %v15904_v8 = vld [vmem:[%s21917_s1 + $0x16e4] ss:$12 sps:$4 sm:$0xff]   ;;  %v15909_v14 = vld [vmem:[%s21917_s1 + $0x16fc] ss:$12 sps:$4 sm:$0xff]  }
 0x265   :  { %9748 = vmatprep.subr.bf16.mxu0 %v15849_v33  ;;  %v15906_v33 = vld [vmem:[%s21917_s1 + $0xf38] ss:$12 sps:$4 sm:$0xff]  }
 0x267   :  { %14367 = vmatpush3.bf16.msra.mxu1 %v15851_v15  ;;  %v15911_v15 = vld [vmem:[%s21917_s1 + $0xf50] ss:$12 sps:$4 sm:$0xff]  }
 0x268   :  { %9749 = vmatpush1.bf16.msra.mxu0 %v15847_v42  ;;  %14374 = vmatprep.subr.bf16.mxu1 %v15855_v18  ;;  %v15910_v42 = vld [vmem:[%s21917_s1 + $0x1010] ss:$12 sps:$4 sm:$0xff]   ;;  %v15915_v18 = vld [vmem:[%s21917_s1 + $0x1028] ss:$12 sps:$4 sm:$0xff]  }
 0x269   :  { %9750 = vmatprep.subr.bf16.mxu0 %v15854_v17  ;;  %v15914_v17 = vld [vmem:[%s21917_s1 + $0x1714] ss:$12 sps:$4 sm:$0xff]  }
 0x26a   :  { %10698 = vmatmul.mubr.bf16.vlgmr.msra.gmra.mrb[40].mxu1 %v17862_v3  ;;  %v15862_v3 = vld [vmem:[%s21917_s1 + $0x1620] ss:$12 sps:$4 sm:$0xff]  }
 0x26b   :  { %14375 = vmatpush3.bf16.msra.mxu1 %v15856_v19  ;;  %10737 = vmatprep.mubr.bf16.mxu1 %v17881_v12  ;;  %v15867_v12 = vld [vmem:[%s21917_s1 + $0x1638] ss:$12 sps:$4 sm:$0xff]   ;;  %v15916_v19 = vld [vmem:[%s21917_s1 + $0xf68] ss:$12 sps:$4 sm:$0xff]  }
 0x26c   :  { %9751 = vmatpush1.bf16.msra.mxu0 %v15852_v49  ;;  %14376 = vmatprep.subr.bf16.mxu1 %v15860_v21  ;;  %v15912_v49 = vld [vmem:[%s21917_s1 + $0x1710] ss:$12 sps:$4 sm:$0xff]   ;;  %v15920_v21 = vld [vmem:[%s21917_s1 + $0x1040] ss:$12 sps:$4 sm:$0xff]  }
 0x26d   :  { %9752 = vmatprep.subr.bf16.mxu0 %v15859_v20  ;;  %v15919_v20 = vld [vmem:[%s21917_s1 + $0x172c] ss:$12 sps:$4 sm:$0xff]  }
 0x26f   :  { %14377 = vmatpush3.bf16.msra.mxu1 %v15861_v24  ;;  %v15917_v24 = vld [vmem:[%s21917_s1 + $0x1728] ss:$12 sps:$4 sm:$0xff]  }
 0x270   :  { %9753 = vmatpush1.bf16.msra.mxu0 %v15857_v11  ;;  %14378 = vmatprep.subr.bf16.mxu1 %v15865_v26  ;;  %v19219_v11 = vpop.f32.mrb[4].mxu1  ;;  %v15924_v26 = vld [vmem:[%s21917_s1 + $0x1744] ss:$12 sps:$4 sm:$0xff]  }
 0x271   :  { %9754 = vmatprep.subr.bf16.mxu0 %v15864_v25  ;;  %v15921_v25 = vld [vmem:[%s21917_s1 + $0xf80] ss:$12 sps:$4 sm:$0xff]  }
 0x273   :  { %14379 = vmatpush3.bf16.msra.mxu1 %v15866_v27  ;;  %v15925_v27 = vld [vmem:[%s21917_s1 + $0x1058] ss:$12 sps:$4 sm:$0xff]  }
 0x274   :  { %9755 = vmatpush1.bf16.msra.mxu0 %v15862_v3  ;;  %14380 = vmatprep.subr.bf16.mxu1 %v15870_v30  ;;  %v19230_v3 = vpop.f32.mrb[5].mxu1  ;;  %v15922_v30 = vld [vmem:[%s21917_s1 + $0x1740] ss:$12 sps:$4 sm:$0xff]  }
 0x275   :  { %9756 = vmatprep.subr.bf16.mxu0 %v15869_v29  ;;  %v10342_v29 = vpop.f32.mrb[6].mxu1 }
 0x276   :  { %v15959_v29 = vld [vmem:[%s21917_s1 + $0x17ec] ss:$12 sps:$4 sm:$0xff]  }
 0x277   :  { %14381 = vmatpush3.bf16.msra.mxu1 %v15871_v31  ;;  %v15926_v31 = vld [vmem:[%s21917_s1 + $0xf98] ss:$12 sps:$4 sm:$0xff]  }
 0x278   :  { %9757 = vmatpush1.bf16.msra.mxu0 %v15867_v12  ;;  %14382 = vmatprep.subr.bf16.mxu1 %v15875_v39  ;;  %v10343_v12 = vpop.f32.mrb[7].mxu1  ;;  %v15930_v39 = vld [vmem:[%s21917_s1 + $0x1070] ss:$12 sps:$4 sm:$0xff]  }
 0x279   :  { %9758 = vmatprep.subr.bf16.mxu0 %v15874_v37  ;;  %v15929_v37 = vld [vmem:[%s21917_s1 + $0x175c] ss:$12 sps:$4 sm:$0xff]  }
 0x27b   :  { %14383 = vmatpush3.bf16.msra.mxu1 %v15876_v40  ;;  %v15931_v40 = vld [vmem:[%s21917_s1 + $0xfb0] ss:$12 sps:$4 sm:$0xff]  }
 0x27c   :  { %9759 = vmatpush1.bf16.msra.mxu0 %v15872_v32  ;;  %14384 = vmatprep.subr.bf16.mxu1 %v15880_v10  ;;  %v15927_v32 = vld [vmem:[%s21917_s1 + $0x1758] ss:$12 sps:$4 sm:$0xff]   ;;  %v15935_v10 = vld [vmem:[%s21917_s1 + $0x1148] ss:$12 sps:$4 sm:$0xff]  }
 0x27d   :  { %9760 = vmatprep.subr.bf16.mxu0 %v15879_v44  ;;  %v15934_v44 = vld [vmem:[%s21917_s1 + $0x1774] ss:$12 sps:$4 sm:$0xff]  }
 0x27f   :  { %14385 = vmatpush3.bf16.msra.mxu1 %v15881_v47  ;;  %v15932_v47 = vld [vmem:[%s21917_s1 + $0x1770] ss:$12 sps:$4 sm:$0xff]  }
 0x280   :  { %9761 = vmatpush1.bf16.msra.mxu0 %v15877_v53  ;;  %14386 = vmatprep.subr.bf16.mxu1 %v15885_v36  ;;  %v1937_v53 = vlaneseq  ;;  %v15940_v36 = vld [vmem:[%s21917_s1 + $0x1160] ss:$12 sps:$4 sm:$0xff]  }
 0x281   :  { %9771 = vmatprep.subr.bf16.mxu0 %v15884_v51  ;;  %v15936_v51 = vld [vmem:[%s21917_s1 + $0x1088] ss:$12 sps:$4 sm:$0xff]  }
 0x282   :  { %v19271_v56 = vshrl.u32 %v1937_v53, 7  ;;  %v15964_v53 = vld [vmem:[%s21917_s1 + $0x1804] ss:$12 sps:$4 sm:$0xff]  }
 0x283   :  { %9763 = vmatmul.mubr.bf16.vlgmr.msra.gmra.mrb[0].mxu0 %v19127_v43  ;;  %14387 = vmatpush3.bf16.msra.mxu1 %v15886_v58  ;;  %v1935_v58 = vld [vmem:[%s21919_s4] ss:$8 sm:$0x7] }
 0x284   :  { %9772 = vmatpush1.bf16.msra.mxu0 %v15882_v57  ;;  %14388 = vmatprep.subr.bf16.mxu1 %v15890_v50  ;;  %v15937_v57 = vld [vmem:[%s21917_s1 + $0x1788] ss:$12 sps:$4 sm:$0xff]   ;;  %v15944_v50 = vld [vmem:[%s21917_s1 + $0x17a4] ss:$12 sps:$4 sm:$0xff]  }
 0x285   :  { %9773 = vmatprep.subr.bf16.mxu0 %v15889_v59  ;;  %9803 = vmatprep.mubr.bf16.mxu0 %v19144_v61  ;;  %v15941_v59 = vld [vmem:[%s21917_s1 + $0x10a0] ss:$12 sps:$4 sm:$0xff]  }
 0x287   :  { %14389 = vmatpush3.bf16.msra.mxu1 %v15891_v62  ;;  %v19287_v62 = vsub.s32 2, %v19271_v56 }
 0x288   :  { %9774 = vmatpush1.bf16.msra.mxu0 %v15887_v60  ;;  %14396 = vmatprep.subr.bf16.mxu1 %v15895_v63  ;;  %v14192_v60 = vpop.f32.mrb[8].mxu1  ;;  %v15942_v63 = vld [vmem:[%s21917_s1 + $0x17a0] ss:$12 sps:$4 sm:$0xff]  }
 0x289   :  { %9775 = vmatprep.subr.bf16.mxu0 %v15894_v2  ;;  %v14193_v2 = vpop.f32.mrb[9].mxu1 }
 0x28a   :  { %10738 = vmatmul.mubr.bf16.vlgmr.msra.gmra.mrb[44].mxu1 %v18075_v34  ;;  %v15902_v34 = vld [vmem:[%s21917_s1 + $0x16e0] ss:$12 sps:$4 sm:$0xff]  }
 0x28b   :  { %14397 = vmatpush3.bf16.msra.mxu1 %v15896_v9  ;;  %10777 = vmatprep.mubr.bf16.mxu1 %v18095_v45  ;;  %v15907_v45 = vld [vmem:[%s21917_s1 + $0x16f8] ss:$12 sps:$4 sm:$0xff]   ;;  %v14194_v9 = vadd.f32 %v14193_v2, %v14192_v60 }
 0x28c   :  { %9776 = vmatpush1.bf16.msra.mxu0 %v15892_v1  ;;  %14398 = vmatprep.subr.bf16.mxu1 %v15900_v48  ;;  %v1948_v1 = vrot.slane %v1935_v58, %v19287_v62  ;;  %v15966_v60 = vld [vmem:[%s21917_s1 + $0x1118] ss:$12 sps:$4 sm:$0xff]  }
 0x28d   :  { %9777 = vmatprep.subr.bf16.mxu0 %v15899_v4  ;;  %v14195_v4 = vpop.f32.mrb[10].mxu1 }
 0x28e   :  { %v14196_v48 = vpop.f32.mrb[11].mxu1  ;;  %v15967_v4 = vld [vmem:[%s21917_s1 + $0x1818] ss:$12 sps:$4 sm:$0xff]  }
 0x28f   :  { %14399 = vmatpush3.bf16.msra.mxu1 %v15901_v5  ;;  %v15949_v5 = vld [vmem:[%s21917_s1 + $0x17bc] ss:$12 sps:$4 sm:$0xff]  }
 0x290   :  { %9778 = vmatpush1.bf16.msra.mxu0 %v15897_v23  ;;  %14400 = vmatprep.subr.bf16.mxu1 %v15905_v13  ;;  %v15946_v23 = vld [vmem:[%s21917_s1 + $0x10b8] ss:$12 sps:$4 sm:$0xff]   ;;  %v14214_v13 = vpop.f32.mrb[12].mxu1 }
 0x291   :  { %9779 = vmatprep.subr.bf16.mxu0 %v15904_v8  ;;  %v10380_v8 = vadd.f32 %v14194_v9, %v1948_v1  ;;  %v15970_v1 = vld [vmem:[%s21917_s1 + $0x11f0] ss:$12 sps:$4 sm:$0xff]  }
 0x293   :  { %14401 = vmatpush3.bf16.msra.mxu1 %v15906_v33  ;;  %v15947_v33 = vld [vmem:[%s21917_s1 + $0x17b8] ss:$12 sps:$4 sm:$0xff]  }
 0x294   :  { %9780 = vmatpush1.bf16.msra.mxu0 %v15902_v34  ;;  %14402 = vmatprep.subr.bf16.mxu1 %v15910_v42  ;;  %v14215_v34 = vpop.f32.mrb[13].mxu1 }
 0x295   :  { %9781 = vmatprep.subr.bf16.mxu0 %v15909_v14  ;;  %v14216_v14 = vadd.f32 %v14215_v34, %v14214_v13  ;;  %v14217_v42 = vpop.f32.mrb[14].mxu1  ;;  %v15975_v13 = vld [vmem:[%s21917_s1 + $0x12c8] ss:$12 sps:$4 sm:$0xff]  }
 0x296   :  { %v15976_v34 = vld [vmem:[%s21917_s1 + $0x1208] ss:$12 sps:$4 sm:$0xff]  }
 0x297   :  { %14403 = vmatpush3.bf16.msra.mxu1 %v15911_v15  ;;  %v15951_v15 = vld [vmem:[%s21917_s1 + $0x10d0] ss:$12 sps:$4 sm:$0xff]   ;;  %v15977_v42 = vld [vmem:[%s21917_s1 + $0x1848] ss:$12 sps:$4 sm:$0xff]  }
 0x298   :  { %9782 = vmatpush1.bf16.msra.mxu0 %v15907_v45  ;;  %14404 = vmatprep.subr.bf16.mxu1 %v15915_v18  ;;  %v14218_v45 = vpop.f32.mrb[15].mxu1  ;;  %v10420_v18 = vadd.f32 %v14216_v14, %v10380_v8  ;;  %v15974_v8 = vld [vmem:[%s21917_s1 + $0x1834] ss:$12 sps:$4 sm:$0xff]  }
 0x299   :  { %9783 = vmatprep.subr.bf16.mxu0 %v15914_v17  ;;  %v15954_v17 = vld [vmem:[%s21917_s1 + $0x17d4] ss:$12 sps:$4 sm:$0xff]  }
 0x29a   :  { %v15980_v14 = vld [vmem:[%s21917_s1 + $0x12e0] ss:$12 sps:$4 sm:$0xff]  }
 0x29b   :  { %14405 = vmatpush3.bf16.msra.mxu1 %v15916_v19  ;;  %v15955_v19 = vld [vmem:[%s21917_s1 + $0x11a8] ss:$12 sps:$4 sm:$0xff]   ;;  %v15981_v45 = vld [vmem:[%s21917_s1 + $0x1220] ss:$12 sps:$4 sm:$0xff]  }
 0x29c   :  { %9784 = vmatpush1.bf16.msra.mxu0 %v15912_v49  ;;  %14406 = vmatprep.subr.bf16.mxu1 %v15920_v21  ;;  %v14236_v49 = vpop.f32.mrb[16].mxu1  ;;  %v15952_v21 = vld [vmem:[%s21917_s1 + $0x17d0] ss:$12 sps:$4 sm:$0xff]  }
 0x29d   :  { %9785 = vmatprep.subr.bf16.mxu0 %v15919_v20  ;;  %v14237_v20 = vpop.f32.mrb[17].mxu1 }
 0x29f   :  { %14407 = vmatpush3.bf16.msra.mxu1 %v15921_v25  ;;  %v14239_v25 = vpop.f32.mrb[18].mxu1 }
 0x2a0   :  { %9786 = vmatpush1.bf16.msra.mxu0 %v15917_v24  ;;  %14408 = vmatprep.subr.bf16.mxu1 %v15925_v27  ;;  %v14238_v24 = vadd.f32 %v14237_v20, %v14236_v49  ;;  %v15956_v27 = vld [vmem:[%s21917_s1 + $0x10e8] ss:$12 sps:$4 sm:$0xff]   ;;  %v15991_v20 = vld [vmem:[%s21917_s1 + $0x1250] ss:$12 sps:$4 sm:$0xff]  }
 0x2a1   :  { %9787 = vmatprep.subr.bf16.mxu0 %v15924_v26  ;;  %v14240_v26 = vpop.f32.mrb[19].mxu1  ;;  %v15989_v49 = vld [vmem:[%s21917_s1 + $0x187c] ss:$12 sps:$4 sm:$0xff]  }
 0x2a2   :  { %v14258_v12 = vpop.f32.mrb[20].mxu1  ;;  %v15992_v25 = vld [vmem:[%s21917_s1 + $0x1890] ss:$12 sps:$4 sm:$0xff]   ;;  %v15996_v26 = vld [vmem:[%s21917_s1 + $0x1268] ss:$12 sps:$4 sm:$0xff]  }
 0x2a3   :  { %14409 = vmatpush3.bf16.msra.mxu1 %v15926_v31  ;;  %v15960_v31 = vld [vmem:[%s21917_s1 + $0x11c0] ss:$12 sps:$4 sm:$0xff]  }
 0x2a4   :  { %9788 = vmatpush1.bf16.msra.mxu0 %v15922_v30  ;;  %14410 = vmatprep.subr.bf16.mxu1 %v15930_v39  ;;  %v10460_v30 = vadd.f32 %v14238_v24, %v10420_v18  ;;  %v15957_v39 = vld [vmem:[%s21917_s1 + $0x17e8] ss:$12 sps:$4 sm:$0xff]   ;;  %v15986_v18 = vld [vmem:[%s21917_s1 + $0x1238] ss:$12 sps:$4 sm:$0xff]  }
 0x2a5   :  { %9789 = vmatprep.subr.bf16.mxu0 %v15929_v37  ;;  %v14259_v37 = vpop.f32.mrb[21].mxu1  ;;  %v15995_v24 = vld [vmem:[%s21917_s1 + $0x1328] ss:$12 sps:$4 sm:$0xff]  }
 0x2a7   :  { %14411 = vmatpush3.bf16.msra.mxu1 %v15931_v40  ;;  %v14260_v40 = vadd.f32 %v14259_v37, %v14258_v12  ;;  %v16001_v12 = vld [vmem:[%s21917_s1 + $0x1280] ss:$12 sps:$4 sm:$0xff]   ;;  %v16005_v37 = vld [vmem:[%s21917_s1 + $0x1358] ss:$12 sps:$4 sm:$0xff]  }
 0x2a8   :  { %9790 = vmatpush1.bf16.msra.mxu0 %v15927_v32  ;;  %14418 = vmatprep.subr.bf16.mxu1 %v15935_v10  ;;  %v15961_v32 = vld [vmem:[%s21917_s1 + $0x1100] ss:$12 sps:$4 sm:$0xff]  }
 0x2a9   :  { %9791 = vmatprep.subr.bf16.mxu0 %v15934_v44  ;;  %v14261_v44 = vpop.f32.mrb[22].mxu1 }
 0x2aa   :  { %10778 = vmatmul.mubr.bf16.vlgmr.msra.gmra.mrb[48].mxu1 %v18291_v6  ;;  %v15945_v6 = vld [vmem:[%s21917_s1 + $0x1178] ss:$12 sps:$4 sm:$0xff]   ;;  %v14262_v10 = vpop.f32.mrb[23].mxu1 }
 0x2ab   :  { %14419 = vmatpush3.bf16.msra.mxu1 %v15936_v51  ;;  %10817 = vmatprep.mubr.bf16.mxu1 %v18308_v16  ;;  %v15950_v16 = vld [vmem:[%s21917_s1 + $0x1190] ss:$12 sps:$4 sm:$0xff]   ;;  %v10500_v51 = vadd.f32 %v14260_v40, %v10460_v30  ;;  %v15997_v30 = vld [vmem:[%s21917_s1 + $0x18a8] ss:$12 sps:$4 sm:$0xff]  }
 0x2ac   :  { %9792 = vmatpush1.bf16.msra.mxu0 %v15932_v47  ;;  %14420 = vmatprep.subr.bf16.mxu1 %v15940_v36  ;;  %v51_v47 = vld [vmem:[%s21918_s0 + $0xf0] sm:$0xff]  ;;  %v15962_v36 = vld [vmem:[%s21917_s1 + $0x1800] ss:$12 sps:$4 sm:$0xff]  }
 0x2ad   :  { %9793 = vmatprep.subr.bf16.mxu0 %v15939_v54  ;;  %v15965_v54 = vld [vmem:[%s21917_s1 + $0x11d8] ss:$12 sps:$4 sm:$0xff]  }
 0x2af   :  { %14421 = vmatpush3.bf16.msra.mxu1 %v15941_v59  ;;  %v19351_v59 = vpack.c.bf16 %v51_v47, %v51_v47  ;;  %v16009_v47 = vld [vmem:[%s21917_s1 + $0x18dc] ss:$12 sps:$4 sm:$0xff]  }
 0x2b0   :  { %9794 = vmatpush1.bf16.msra.mxu0 %v15937_v57  ;;  %14422 = vmatprep.subr.bf16.mxu1 %v15945_v6  ;;  %v54_v57 = vld [vmem:[%s21918_s0 + $0x108] sm:$0xff] }
 0x2b1   :  { %9795 = vmatprep.subr.bf16.mxu0 %v15944_v50  ;;  %v15969_v6 = vld [vmem:[%s21917_s1 + $0x181c] ss:$12 sps:$4 sm:$0xff]   ;;  %v19365_v48 = vpack.c.bf16 %v54_v57, %v54_v57 }
 0x2b3   :  { %14423 = vmatpush3.bf16.msra.mxu1 %v15946_v23 }
 0x2b4   :  { %9796 = vmatpush1.bf16.msra.mxu0 %v15942_v63  ;;  %14424 = vmatprep.subr.bf16.mxu1 %v15950_v16  ;;  %v15972_v16 = vld [vmem:[%s21917_s1 + $0x1830] ss:$12 sps:$4 sm:$0xff]  }
 0x2b5   :  { %9797 = vmatprep.subr.bf16.mxu0 %v15949_v5  ;;  %v15971_v5 = vld [vmem:[%s21917_s1 + $0x1130] ss:$12 sps:$4 sm:$0xff]  }
 0x2b7   :  { %14425 = vmatpush3.bf16.msra.mxu1 %v15951_v15  ;;  %v15984_v15 = vld [vmem:[%s21917_s1 + $0x1864] ss:$12 sps:$4 sm:$0xff]  }
 0x2b8   :  { %9798 = vmatpush1.bf16.msra.mxu0 %v15947_v33  ;;  %14426 = vmatprep.subr.bf16.mxu1 %v15955_v19  ;;  %v15979_v33 = vld [vmem:[%s21917_s1 + $0x184c] ss:$12 sps:$4 sm:$0xff]   ;;  %v15990_v19 = vld [vmem:[%s21917_s1 + $0x1310] ss:$12 sps:$4 sm:$0xff]  }
 0x2b9   :  { %9799 = vmatprep.subr.bf16.mxu0 %v15954_v17  ;;  %v15985_v17 = vld [vmem:[%s21917_s1 + $0x12f8] ss:$12 sps:$4 sm:$0xff]  }
 0x2bb   :  { %14427 = vmatpush3.bf16.msra.mxu1 %v15956_v27  ;;  %v15999_v27 = vld [vmem:[%s21917_s1 + $0x18ac] ss:$12 sps:$4 sm:$0xff]  }
 0x2bc   :  { %9800 = vmatpush1.bf16.msra.mxu0 %v15952_v21  ;;  %14428 = vmatprep.subr.bf16.mxu1 %v15960_v31  ;;  %v15994_v21 = vld [vmem:[%s21917_s1 + $0x1894] ss:$12 sps:$4 sm:$0xff]   ;;  %v16004_v31 = vld [vmem:[%s21917_s1 + $0x18c4] ss:$12 sps:$4 sm:$0xff]  }
 0x2bd   :  { %9801 = vmatprep.subr.bf16.mxu0 %v15959_v29  ;;  %v14280_v58 = vpop.f32.mrb[24].mxu1  ;;  %v16000_v29 = vld [vmem:[%s21917_s1 + $0x1340] ss:$12 sps:$4 sm:$0xff]  }
 0x2be   :  { %v14281_v50 = vpop.f32.mrb[25].mxu1 }
 0x2bf   :  { %14429 = vmatpush3.bf16.msra.mxu1 %v15961_v32  ;;  %v14282_v2 = vadd.f32 %v14281_v50, %v14280_v58  ;;  %v14283_v63 = vpop.f32.mrb[26].mxu1  ;;  %v16006_v32 = vld [vmem:[%s21917_s1 + $0x1298] ss:$12 sps:$4 sm:$0xff]   ;;  %v16011_v58 = vld [vmem:[%s21917_s1 + $0x12b0] ss:$12 sps:$4 sm:$0xff]  }
 0x2c0   :  { %9802 = vmatpush1.bf16.msra.mxu0 %v15957_v39  ;;  %14430 = vmatprep.subr.bf16.mxu1 %v15965_v54  ;;  %v14284_v9 = vpop.f32.mrb[27].mxu1  ;;  %v16002_v39 = vld [vmem:[%s21917_s1 + $0x18c0] ss:$12 sps:$4 sm:$0xff]  }
 0x2c1   :  { %9812 = vmatprep.subr.bf16.mxu0 %v15964_v53  ;;  %v19367_v23 = vadd.f32 %v14282_v2, %v10500_v51  ;;  %v16010_v51 = vld [vmem:[%s21917_s1 + $0x1370] ss:$12 sps:$4 sm:$0xff]   ;;  %v16014_v50 = vld [vmem:[%s21917_s1 + $0x18f4] ss:$12 sps:$4 sm:$0xff]   ;;  %v16019_v63 = vld [vmem:[%s21917_s1 + $0x190c] ss:$12 sps:$4 sm:$0xff]  }
 0x2c2   :  { %v16016_v2 = vld [vmem:[%s21917_s1 + $0x1388] ss:$12 sps:$4 sm:$0xff]  }
 0x2c3   :  { %9804 = vmatmul.mubr.bf16.vlgmr.msra.gmra.mrb[0].mxu0 %v19351_v59  ;;  %14431 = vmatpush3.bf16.msra.mxu1 %v15966_v60  ;;  %v16015_v60 = vld [vmem:[%s21917_s1 + $0x1448] ss:$12 sps:$4 sm:$0xff]  }
 0x2c4   :  { %9813 = vmatpush1.bf16.msra.mxu0 %v15962_v36  ;;  %14432 = vmatprep.subr.bf16.mxu1 %v15970_v1  ;;  %v16007_v36 = vld [vmem:[%s21917_s1 + $0x18d8] ss:$12 sps:$4 sm:$0xff]   ;;  %v16020_v1 = vld [vmem:[%s21917_s1 + $0x1460] ss:$12 sps:$4 sm:$0xff]   ;;  %v16017_v9 = vld [vmem:[%s21917_s1 + $0x1908] ss:$12 sps:$4 sm:$0xff]  }
 0x2c5   :  { %9814 = vmatprep.subr.bf16.mxu0 %v15969_v6  ;;  %9844 = vmatprep.mubr.bf16.mxu0 %v19365_v48  ;;  %v16012_v6 = vld [vmem:[%s21917_s1 + $0x18f0] ss:$12 sps:$4 sm:$0xff]  }
 0x2c7   :  { %14433 = vmatpush3.bf16.msra.mxu1 %v15971_v5  ;;  %v16025_v5 = vld [vmem:[%s21917_s1 + $0x1478] ss:$12 sps:$4 sm:$0xff]  }
 0x2c8   :  { %9815 = vmatpush1.bf16.msra.mxu0 %v15967_v4  ;;  %14440 = vmatprep.subr.bf16.mxu1 %v15975_v13  ;;  %v16021_v4 = vld [vmem:[%s21917_s1 + $0x13a0] ss:$12 sps:$4 sm:$0xff]   ;;  %v16029_v13 = vld [vmem:[%s21917_s1 + $0x193c] ss:$12 sps:$4 sm:$0xff]  }
 0x2c9   :  { %9816 = vmatprep.subr.bf16.mxu0 %v15974_v8  ;;  %v16026_v8 = vld [vmem:[%s21917_s1 + $0x13b8] ss:$12 sps:$4 sm:$0xff]  }
 0x2ca   :  { %10818 = vmatmul.mubr.bf16.vlgmr.msra.gmra.mrb[52].mxu1 %v18499_v28  ;;  %v15982_v28 = vld [vmem:[%s21917_s1 + $0x1860] ss:$12 sps:$4 sm:$0xff]  }
 0x2cb   :  { %14441 = vmatpush3.bf16.msra.mxu1 %v15976_v34  ;;  %10857 = vmatprep.mubr.bf16.mxu1 %v18516_v46  ;;  %v15987_v46 = vld [vmem:[%s21917_s1 + $0x1878] ss:$12 sps:$4 sm:$0xff]   ;;  %v16031_v34 = vld [vmem:[%s21917_s1 + $0x13d0] ss:$12 sps:$4 sm:$0xff]  }
 0x2cc   :  { %9817 = vmatpush1.bf16.msra.mxu0 %v15972_v16  ;;  %14442 = vmatprep.subr.bf16.mxu1 %v15980_v14  ;;  %v16030_v16 = vld [vmem:[%s21917_s1 + $0x1490] ss:$12 sps:$4 sm:$0xff]   ;;  %v16035_v14 = vld [vmem:[%s21917_s1 + $0x14a8] ss:$12 sps:$4 sm:$0xff]  }
 0x2cd   :  { %9818 = vmatprep.subr.bf16.mxu0 %v15979_v33  ;;  %v16034_v33 = vld [vmem:[%s21917_s1 + $0x1954] ss:$12 sps:$4 sm:$0xff]  }
 0x2cf   :  { %14443 = vmatpush3.bf16.msra.mxu1 %v15981_v45  ;;  %v16036_v45 = vld [vmem:[%s21917_s1 + $0x13e8] ss:$12 sps:$4 sm:$0xff]  }
 0x2d0   :  { %9819 = vmatpush1.bf16.msra.mxu0 %v15977_v42  ;;  %14444 = vmatprep.subr.bf16.mxu1 %v15985_v17  ;;  %v16032_v42 = vld [vmem:[%s21917_s1 + $0x1950] ss:$12 sps:$4 sm:$0xff]   ;;  %v16040_v17 = vld [vmem:[%s21917_s1 + $0x14c0] ss:$12 sps:$4 sm:$0xff]  }
 0x2d1   :  { %9820 = vmatprep.subr.bf16.mxu0 %v15984_v15  ;;  %v16039_v15 = vld [vmem:[%s21917_s1 + $0x196c] ss:$12 sps:$4 sm:$0xff]  }
 0x2d3   :  { %14445 = vmatpush3.bf16.msra.mxu1 %v15986_v18  ;;  %v16041_v18 = vld [vmem:[%s21917_s1 + $0x1400] ss:$12 sps:$4 sm:$0xff]  }
 0x2d4   :  { %9821 = vmatpush1.bf16.msra.mxu0 %v15982_v28  ;;  %14446 = vmatprep.subr.bf16.mxu1 %v15990_v19  ;;  %v16037_v28 = vld [vmem:[%s21917_s1 + $0x1968] ss:$12 sps:$4 sm:$0xff]   ;;  %v16044_v19 = vld [vmem:[%s21917_s1 + $0x1984] ss:$12 sps:$4 sm:$0xff]  }
 0x2d5   :  { %9822 = vmatprep.subr.bf16.mxu0 %v15989_v49  ;;  %v53_v49 = vld [vmem:[%s21918_s0 + $0x100] sm:$0xff] }
 0x2d7   :  { %14447 = vmatpush3.bf16.msra.mxu1 %v15991_v20  ;;  %v16042_v20 = vld [vmem:[%s21917_s1 + $0x1980] ss:$12 sps:$4 sm:$0xff]  }
 0x2d8   :  { %9823 = vmatpush1.bf16.msra.mxu0 %v15987_v46  ;;  %14448 = vmatprep.subr.bf16.mxu1 %v15995_v24  ;;  %v16045_v46 = vld [vmem:[%s21917_s1 + $0x14d8] ss:$12 sps:$4 sm:$0xff]  }
 0x2d9   :  { %9824 = vmatprep.subr.bf16.mxu0 %v15994_v21  ;;  %v16046_v21 = vld [vmem:[%s21917_s1 + $0x1418] ss:$12 sps:$4 sm:$0xff]  }
 0x2da   :  { %v56_v24 = vld [vmem:[%s21918_s0 + $0x118] sm:$0xff] }
 0x2db   :  { %14449 = vmatpush3.bf16.msra.mxu1 %v15996_v26  ;;  %v19567_v26 = vpack.c.bf16 %v53_v49, %v53_v49 }
 0x2dc   :  { %9825 = vmatpush1.bf16.msra.mxu0 %v15992_v25  ;;  %14450 = vmatprep.subr.bf16.mxu1 %v16000_v29 }
 0x2dd   :  { %9826 = vmatprep.subr.bf16.mxu0 %v15999_v27  ;;  %v14302_v40 = vpop.f32.mrb[28].mxu1 }
 0x2de   :  { %v14303_v44 = vpop.f32.mrb[29].mxu1 }
 0x2df   :  { %14451 = vmatpush3.bf16.msra.mxu1 %v16001_v12  ;;  %v14304_v10 = vadd.f32 %v14303_v44, %v14302_v40  ;;  %v14305_v53 = vpop.f32.mrb[30].mxu1  ;;  %v16049_v12 = vld [vmem:[%s21917_s1 + $0x199c] ss:$12 sps:$4 sm:$0xff]  }
 0x2e0   :  { %9827 = vmatpush1.bf16.msra.mxu0 %v15997_v30  ;;  %14452 = vmatprep.subr.bf16.mxu1 %v16005_v37  ;;  %v14306_v54 = vpop.f32.mrb[31].mxu1  ;;  %v16051_v44 = vld [vmem:[%s21917_s1 + $0x1430] ss:$12 sps:$4 sm:$0xff]   ;;  %v16055_v53 = vld [vmem:[%s21917_s1 + $0x15c8] ss:$12 sps:$4 sm:$0xff]  }
 0x2e1   :  { %9828 = vmatprep.subr.bf16.mxu0 %v16004_v31  ;;  %v19470_v57 = vadd.f32 %v14304_v10, %v19367_v23  ;;  %v16024_v23 = vld [vmem:[%s21917_s1 + $0x1924] ss:$12 sps:$4 sm:$0xff]   ;;  %v16054_v10 = vld [vmem:[%s21917_s1 + $0x19b4] ss:$12 sps:$4 sm:$0xff]   ;;  %v16059_v54 = vld [vmem:[%s21917_s1 + $0x19cc] ss:$12 sps:$4 sm:$0xff]  }
 0x2e2   :  { %v16050_v31 = vld [vmem:[%s21917_s1 + $0x14f0] ss:$12 sps:$4 sm:$0xff]  }
 0x2e3   :  { %14453 = vmatpush3.bf16.msra.mxu1 %v16006_v32  ;;  %v19578_v32 = vpack.c.bf16 %v56_v24, %v56_v24  ;;  %v16095_v24 = vld [vmem:[%s21917_s1 + $0x1748] ss:$12 sps:$4 sm:$0xff]  }
 0x2e4   :  { %9829 = vmatpush1.bf16.msra.mxu0 %v16002_v39  ;;  %14454 = vmatprep.subr.bf16.mxu1 %v16010_v51  ;;  %v16047_v39 = vld [vmem:[%s21917_s1 + $0x1998] ss:$12 sps:$4 sm:$0xff]   ;;  %v16056_v51 = vld [vmem:[%s21917_s1 + $0x1508] ss:$12 sps:$4 sm:$0xff]  }
 0x2e5   :  { %9830 = vmatprep.subr.bf16.mxu0 %v16009_v47  ;;  %v16052_v47 = vld [vmem:[%s21917_s1 + $0x19b0] ss:$12 sps:$4 sm:$0xff]  }
 0x2e7   :  { %14455 = vmatpush3.bf16.msra.mxu1 %v16011_v58  ;;  %v16061_v58 = vld [vmem:[%s21917_s1 + $0x1520] ss:$12 sps:$4 sm:$0xff]  }
 0x2e8   :  { %9831 = vmatpush1.bf16.msra.mxu0 %v16007_v36  ;;  %14462 = vmatprep.subr.bf16.mxu1 %v16015_v60  ;;  %v16060_v36 = vld [vmem:[%s21917_s1 + $0x15e0] ss:$12 sps:$4 sm:$0xff]   ;;  %v16065_v60 = vld [vmem:[%s21917_s1 + $0x15f8] ss:$12 sps:$4 sm:$0xff]  }
 0x2e9   :  { %9832 = vmatprep.subr.bf16.mxu0 %v16014_v50  ;;  %v16064_v50 = vld [vmem:[%s21917_s1 + $0x19e4] ss:$12 sps:$4 sm:$0xff]  }
 0x2ea   :  { %10858 = vmatmul.mubr.bf16.vlgmr.msra.gmra.mrb[56].mxu1 %v18707_v0  ;;  %v16022_v0 = vld [vmem:[%s21917_s1 + $0x1920] ss:$12 sps:$4 sm:$0xff]  }
 0x2eb   :  { %14463 = vmatpush3.bf16.msra.mxu1 %v16016_v2  ;;  %10897 = vmatprep.mubr.bf16.mxu1 %v18724_v7  ;;  %v16027_v7 = vld [vmem:[%s21917_s1 + $0x1938] ss:$12 sps:$4 sm:$0xff]   ;;  %v16069_v2 = vld [vmem:[%s21917_s1 + $0x19fc] ss:$12 sps:$4 sm:$0xff]  }
 0x2ec   :  { %9833 = vmatpush1.bf16.msra.mxu0 %v16012_v6  ;;  %14464 = vmatprep.subr.bf16.mxu1 %v16020_v1  ;;  %v16066_v6 = vld [vmem:[%s21917_s1 + $0x1538] ss:$12 sps:$4 sm:$0xff]   ;;  %v16071_v1 = vld [vmem:[%s21917_s1 + $0x1550] ss:$12 sps:$4 sm:$0xff]  }
 0x2ed   :  { %9834 = vmatprep.subr.bf16.mxu0 %v16019_v63  ;;  %v16070_v63 = vld [vmem:[%s21917_s1 + $0x1610] ss:$12 sps:$4 sm:$0xff]  }
 0x2ef   :  { %14465 = vmatpush3.bf16.msra.mxu1 %v16021_v4  ;;  %v16075_v4 = vld [vmem:[%s21917_s1 + $0x1628] ss:$12 sps:$4 sm:$0xff]  }
 0x2f0   :  { %9835 = vmatpush1.bf16.msra.mxu0 %v16017_v9  ;;  %14466 = vmatprep.subr.bf16.mxu1 %v16025_v5  ;;  %v16074_v9 = vld [vmem:[%s21917_s1 + $0x1a14] ss:$12 sps:$4 sm:$0xff]  }
 0x2f1   :  { %9836 = vmatprep.subr.bf16.mxu0 %v16024_v23  ;;  %v16072_v23 = vld [vmem:[%s21917_s1 + $0x1a10] ss:$12 sps:$4 sm:$0xff]   ;;  %v16076_v5 = vld [vmem:[%s21917_s1 + $0x1568] ss:$12 sps:$4 sm:$0xff]  }
 0x2f3   :  { %14467 = vmatpush3.bf16.msra.mxu1 %v16026_v8  ;;  %v16080_v8 = vld [vmem:[%s21917_s1 + $0x1640] ss:$12 sps:$4 sm:$0xff]  }
 0x2f4   :  { %9837 = vmatpush1.bf16.msra.mxu0 %v16022_v0  ;;  %14468 = vmatprep.subr.bf16.mxu1 %v16030_v16  ;;  %v16079_v0 = vld [vmem:[%s21917_s1 + $0x1a2c] ss:$12 sps:$4 sm:$0xff]  }
 0x2f5   :  { %9838 = vmatprep.subr.bf16.mxu0 %v16029_v13  ;;  %v16077_v13 = vld [vmem:[%s21917_s1 + $0x1a28] ss:$12 sps:$4 sm:$0xff]   ;;  %v16081_v16 = vld [vmem:[%s21917_s1 + $0x1580] ss:$12 sps:$4 sm:$0xff]  }
 0x2f7   :  { %14469 = vmatpush3.bf16.msra.mxu1 %v16031_v34  ;;  %v16085_v34 = vld [vmem:[%s21917_s1 + $0x1658] ss:$12 sps:$4 sm:$0xff]  }
 0x2f8   :  { %9839 = vmatpush1.bf16.msra.mxu0 %v16027_v7  ;;  %14470 = vmatprep.subr.bf16.mxu1 %v16035_v14  ;;  %v16084_v7 = vld [vmem:[%s21917_s1 + $0x1a44] ss:$12 sps:$4 sm:$0xff]  }
 0x2f9   :  { %9840 = vmatprep.subr.bf16.mxu0 %v16034_v33  ;;  %v16082_v33 = vld [vmem:[%s21917_s1 + $0x1a40] ss:$12 sps:$4 sm:$0xff]   ;;  %v16086_v14 = vld [vmem:[%s21917_s1 + $0x1598] ss:$12 sps:$4 sm:$0xff]  }
 0x2fb   :  { %14471 = vmatpush3.bf16.msra.mxu1 %v16036_v45 }
 0x2fc   :  { %9841 = vmatpush1.bf16.msra.mxu0 %v16032_v42  ;;  %14472 = vmatprep.subr.bf16.mxu1 %v16040_v17 }
 0x2fd   :  { %9842 = vmatprep.subr.bf16.mxu0 %v16039_v15  ;;  %v14324_v25 = vpop.f32.mrb[32].mxu1 }
 0x2fe   :  { %v14325_v27 = vpop.f32.mrb[33].mxu1 }
 0x2ff   :  { %14473 = vmatpush3.bf16.msra.mxu1 %v16041_v18  ;;  %v14326_v29 = vadd.f32 %v14325_v27, %v14324_v25  ;;  %v14327_v30 = vpop.f32.mrb[34].mxu1  ;;  %v16090_v18 = vld [vmem:[%s21917_s1 + $0x1670] ss:$12 sps:$4 sm:$0xff]   ;;  %v16096_v27 = vld [vmem:[%s21917_s1 + $0x1688] ss:$12 sps:$4 sm:$0xff]  }
 0x300   :  { %9843 = vmatpush1.bf16.msra.mxu0 %v16037_v28  ;;  %14474 = vmatprep.subr.bf16.mxu1 %v16045_v46  ;;  %v14328_v37 = vpop.f32.mrb[35].mxu1  ;;  %v16089_v28 = vld [vmem:[%s21917_s1 + $0x1a5c] ss:$12 sps:$4 sm:$0xff]   ;;  %v16100_v30 = vld [vmem:[%s21917_s1 + $0x1760] ss:$12 sps:$4 sm:$0xff]  }
 0x301   :  { %9853 = vmatprep.subr.bf16.mxu0 %v16044_v19  ;;  %v19581_v40 = vadd.f32 %v14326_v29, %v19470_v57  ;;  %v16057_v57 = vld [vmem:[%s21917_s1 + $0x19c8] ss:$12 sps:$4 sm:$0xff]   ;;  %v16087_v19 = vld [vmem:[%s21917_s1 + $0x1a58] ss:$12 sps:$4 sm:$0xff]   ;;  %v16092_v25 = vld [vmem:[%s21917_s1 + $0x1a70] ss:$12 sps:$4 sm:$0xff]  }
 0x302   :  { %v16099_v29 = vld [vmem:[%s21917_s1 + $0x1a8c] ss:$12 sps:$4 sm:$0xff]   ;;  %v16104_v37 = vld [vmem:[%s21917_s1 + $0x1aa4] ss:$12 sps:$4 sm:$0xff]  }
 0x303   :  { %9845 = vmatmul.mubr.bf16.vlgmr.msra.gmra.mrb[0].mxu0 %v19567_v26  ;;  %14475 = vmatpush3.bf16.msra.mxu1 %v16046_v21  ;;  %v16094_v21 = vld [vmem:[%s21917_s1 + $0x1a74] ss:$12 sps:$4 sm:$0xff]  }
 0x304   :  { %9854 = vmatpush1.bf16.msra.mxu0 %v16042_v20  ;;  %14476 = vmatprep.subr.bf16.mxu1 %v16050_v31  ;;  %v16091_v20 = vld [vmem:[%s21917_s1 + $0x15b0] ss:$12 sps:$4 sm:$0xff]   ;;  %v16101_v31 = vld [vmem:[%s21917_s1 + $0x16a0] ss:$12 sps:$4 sm:$0xff]  }
 0x305   :  { %9855 = vmatprep.subr.bf16.mxu0 %v16049_v12  ;;  %9885 = vmatprep.mubr.bf16.mxu0 %v19578_v32  ;;  %v16097_v12 = vld [vmem:[%s21917_s1 + $0x1a88] ss:$12 sps:$4 sm:$0xff]  }
 0x307   :  { %14477 = vmatpush3.bf16.msra.mxu1 %v16051_v44  ;;  %v16109_v44 = vld [vmem:[%s21917_s1 + $0x1abc] ss:$12 sps:$4 sm:$0xff]  }
 0x308   :  { %9856 = vmatpush1.bf16.msra.mxu0 %v16047_v39  ;;  %14484 = vmatprep.subr.bf16.mxu1 %v16055_v53  ;;  %v16105_v39 = vld [vmem:[%s21917_s1 + $0x1778] ss:$12 sps:$4 sm:$0xff]   ;;  %v16111_v53 = vld [vmem:[%s21917_s1 + $0x16d0] ss:$12 sps:$4 sm:$0xff]  }
 0x309   :  { %9857 = vmatprep.subr.bf16.mxu0 %v16054_v10  ;;  %v16110_v10 = vld [vmem:[%s21917_s1 + $0x1790] ss:$12 sps:$4 sm:$0xff]  }
 0x30a   :  { %10898 = vmatmul.mubr.bf16.vlgmr.msra.gmra.mrb[60].mxu1 %v18919_v41  ;;  %v16062_v41 = vld [vmem:[%s21917_s1 + $0x19e0] ss:$12 sps:$4 sm:$0xff]  }
 0x30b   :  { %14485 = vmatpush3.bf16.msra.mxu1 %v16056_v51  ;;  %10937 = vmatprep.mubr.bf16.mxu1 %v18936_v38  ;;  %v16067_v38 = vld [vmem:[%s21917_s1 + $0x19f8] ss:$12 sps:$4 sm:$0xff]   ;;  %v16115_v51 = vld [vmem:[%s21917_s1 + $0x17a8] ss:$12 sps:$4 sm:$0xff]  }
 0x30c   :  { %9858 = vmatpush1.bf16.msra.mxu0 %v16052_v47  ;;  %14486 = vmatprep.subr.bf16.mxu1 %v16060_v36  ;;  %v16114_v47 = vld [vmem:[%s21917_s1 + $0x1ad4] ss:$12 sps:$4 sm:$0xff]  }
 0x30d   :  { %9859 = vmatprep.subr.bf16.mxu0 %v16059_v54  ;;  %v16112_v54 = vld [vmem:[%s21917_s1 + $0x1ad0] ss:$12 sps:$4 sm:$0xff]   ;;  %v16116_v36 = vld [vmem:[%s21917_s1 + $0x16e8] ss:$12 sps:$4 sm:$0xff]  }
 0x30f   :  { %14487 = vmatpush3.bf16.msra.mxu1 %v16061_v58  ;;  %v16120_v58 = vld [vmem:[%s21917_s1 + $0x17c0] ss:$12 sps:$4 sm:$0xff]  }
 0x310   :  { %9860 = vmatpush1.bf16.msra.mxu0 %v16057_v57  ;;  %14488 = vmatprep.subr.bf16.mxu1 %v16065_v60  ;;  %v16119_v57 = vld [vmem:[%s21917_s1 + $0x1aec] ss:$12 sps:$4 sm:$0xff]  }
 0x311   :  { %9861 = vmatprep.subr.bf16.mxu0 %v16064_v50  ;;  %v16117_v50 = vld [vmem:[%s21917_s1 + $0x1ae8] ss:$12 sps:$4 sm:$0xff]   ;;  %v16121_v60 = vld [vmem:[%s21917_s1 + $0x1700] ss:$12 sps:$4 sm:$0xff]  }
 0x313   :  { %14489 = vmatpush3.bf16.msra.mxu1 %v16066_v6  ;;  %v16124_v6 = vld [vmem:[%s21917_s1 + $0x1b04] ss:$12 sps:$4 sm:$0xff]  }
 0x314   :  { %9862 = vmatpush1.bf16.msra.mxu0 %v16062_v41  ;;  %14490 = vmatprep.subr.bf16.mxu1 %v16070_v63  ;;  %v55_v41 = vld [vmem:[%s21918_s0 + $0x110] sm:$0xff]  ;;  %v16122_v63 = vld [vmem:[%s21917_s1 + $0x1b00] ss:$12 sps:$4 sm:$0xff]  }
 0x315   :  { %9863 = vmatprep.subr.bf16.mxu0 %v16069_v2  ;;  %v16125_v2 = vld [vmem:[%s21917_s1 + $0x17d8] ss:$12 sps:$4 sm:$0xff]  }
 0x317   :  { %14491 = vmatpush3.bf16.msra.mxu1 %v16071_v1 }
 0x318   :  { %9864 = vmatpush1.bf16.msra.mxu0 %v16067_v38  ;;  %14492 = vmatprep.subr.bf16.mxu1 %v16075_v4  ;;  %v16126_v38 = vld [vmem:[%s21917_s1 + $0x1718] ss:$12 sps:$4 sm:$0xff]   ;;  %v19781_v4 = vpack.c.bf16 %v55_v41, %v55_v41 }
 0x319   :  { %9865 = vmatprep.subr.bf16.mxu0 %v16074_v9  ;;  %v58_v9 = vld [vmem:[%s21918_s0 + $0x128] sm:$0xff]  ;;  %v16167_v41 = vld [vmem:[%s21917_s1 + $0x1bd8] ss:$12 sps:$4 sm:$0xff]  }
 0x31b   :  { %14493 = vmatpush3.bf16.msra.mxu1 %v16076_v5 }
 0x31c   :  { %9866 = vmatpush1.bf16.msra.mxu0 %v16072_v23  ;;  %14494 = vmatprep.subr.bf16.mxu1 %v16080_v8  ;;  %v16129_v8 = vld [vmem:[%s21917_s1 + $0x1b1c] ss:$12 sps:$4 sm:$0xff]  }
 0x31d   :  { %9867 = vmatprep.subr.bf16.mxu0 %v16079_v0  ;;  %v14346_v42 = vpop.f32.mrb[36].mxu1 }
 0x31e   :  { %v14347_v45 = vpop.f32.mrb[37].mxu1 }
 0x31f   :  { %14495 = vmatpush3.bf16.msra.mxu1 %v16081_v16  ;;  %v14348_v15 = vadd.f32 %v14347_v45, %v14346_v42  ;;  %v14349_v17 = vpop.f32.mrb[38].mxu1  ;;  %v16134_v42 = vld [vmem:[%s21917_s1 + $0x1b34] ss:$12 sps:$4 sm:$0xff]  }
 0x320   :  { %9868 = vmatpush1.bf16.msra.mxu0 %v16077_v13  ;;  %14496 = vmatprep.subr.bf16.mxu1 %v16085_v34  ;;  %v14350_v49 = vpop.f32.mrb[39].mxu1  ;;  %v16130_v13 = vld [vmem:[%s21917_s1 + $0x17f0] ss:$12 sps:$4 sm:$0xff]   ;;  %v16135_v45 = vld [vmem:[%s21917_s1 + $0x18c8] ss:$12 sps:$4 sm:$0xff]  }
 0x321   :  { %9869 = vmatprep.subr.bf16.mxu0 %v16084_v7  ;;  %v19684_v46 = vadd.f32 %v14348_v15, %v19581_v40  ;;  %v16106_v40 = vld [vmem:[%s21917_s1 + $0x16b8] ss:$12 sps:$4 sm:$0xff]   ;;  %v16132_v15 = vld [vmem:[%s21917_s1 + $0x1b30] ss:$12 sps:$4 sm:$0xff]   ;;  %v16136_v17 = vld [vmem:[%s21917_s1 + $0x1808] ss:$12 sps:$4 sm:$0xff]  }
 0x322   :  { %v16127_v7 = vld [vmem:[%s21917_s1 + $0x1b18] ss:$12 sps:$4 sm:$0xff]   ;;  %v16137_v49 = vld [vmem:[%s21917_s1 + $0x1b48] ss:$12 sps:$4 sm:$0xff]  }
 0x323   :  { %14497 = vmatpush3.bf16.msra.mxu1 %v16086_v14  ;;  %v16131_v14 = vld [vmem:[%s21917_s1 + $0x1730] ss:$12 sps:$4 sm:$0xff]  }
 0x324   :  { %9870 = vmatpush1.bf16.msra.mxu0 %v16082_v33  ;;  %14498 = vmatprep.subr.bf16.mxu1 %v16090_v18  ;;  %v19795_v33 = vpack.c.bf16 %v58_v9, %v58_v9  ;;  %v16140_v18 = vld [vmem:[%s21917_s1 + $0x18e0] ss:$12 sps:$4 sm:$0xff]  }
 0x325   :  { %9871 = vmatprep.subr.bf16.mxu0 %v16089_v28  ;;  %v16139_v28 = vld [vmem:[%s21917_s1 + $0x1b4c] ss:$12 sps:$4 sm:$0xff]  }
 0x326   :  { %v16179_v9 = vld [vmem:[%s21917_s1 + $0x1c0c] ss:$12 sps:$4 sm:$0xff]  }
 0x327   :  { %14499 = vmatpush3.bf16.msra.mxu1 %v16091_v20  ;;  %v16145_v20 = vld [vmem:[%s21917_s1 + $0x18f8] ss:$12 sps:$4 sm:$0xff]  }
 0x328   :  { %9872 = vmatpush1.bf16.msra.mxu0 %v16087_v19  ;;  %14506 = vmatprep.subr.bf16.mxu1 %v16095_v24  ;;  %v16141_v19 = vld [vmem:[%s21917_s1 + $0x1820] ss:$12 sps:$4 sm:$0xff]   ;;  %v16149_v24 = vld [vmem:[%s21917_s1 + $0x1b7c] ss:$12 sps:$4 sm:$0xff]  }
 0x329   :  { %9873 = vmatprep.subr.bf16.mxu0 %v16094_v21  ;;  %v16146_v21 = vld [vmem:[%s21917_s1 + $0x1838] ss:$12 sps:$4 sm:$0xff]  }
 0x32a   :  { %10938 = vmatmul.mubr.bf16.vlgmr.msra.gmra.mrb[64].mxu1 %v19127_v43  ;;  %v16102_v43 = vld [vmem:[%s21917_s1 + $0x1aa0] ss:$12 sps:$4 sm:$0xff]  }
 0x32b   :  { %14507 = vmatpush3.bf16.msra.mxu1 %v16096_v27  ;;  %10977 = vmatprep.mubr.bf16.mxu1 %v19144_v61  ;;  %v16107_v61 = vld [vmem:[%s21917_s1 + $0x1ab8] ss:$12 sps:$4 sm:$0xff]   ;;  %v16151_v27 = vld [vmem:[%s21917_s1 + $0x1850] ss:$12 sps:$4 sm:$0xff]  }
 0x32c   :  { %9874 = vmatpush1.bf16.msra.mxu0 %v16092_v25  ;;  %14508 = vmatprep.subr.bf16.mxu1 %v16100_v30  ;;  %v16150_v25 = vld [vmem:[%s21917_s1 + $0x1910] ss:$12 sps:$4 sm:$0xff]   ;;  %v16155_v30 = vld [vmem:[%s21917_s1 + $0x1928] ss:$12 sps:$4 sm:$0xff]  }
 0x32d   :  { %9875 = vmatprep.subr.bf16.mxu0 %v16099_v29  ;;  %v16154_v29 = vld [vmem:[%s21917_s1 + $0x1b94] ss:$12 sps:$4 sm:$0xff]  }
 0x32f   :  { %14509 = vmatpush3.bf16.msra.mxu1 %v16101_v31  ;;  %v16156_v31 = vld [vmem:[%s21917_s1 + $0x1868] ss:$12 sps:$4 sm:$0xff]  }
 0x330   :  { %9876 = vmatpush1.bf16.msra.mxu0 %v16097_v12  ;;  %14510 = vmatprep.subr.bf16.mxu1 %v16105_v39  ;;  %v16152_v12 = vld [vmem:[%s21917_s1 + $0x1b90] ss:$12 sps:$4 sm:$0xff]   ;;  %v16160_v39 = vld [vmem:[%s21917_s1 + $0x1940] ss:$12 sps:$4 sm:$0xff]  }
 0x331   :  { %9877 = vmatprep.subr.bf16.mxu0 %v16104_v37  ;;  %v16159_v37 = vld [vmem:[%s21917_s1 + $0x1bac] ss:$12 sps:$4 sm:$0xff]  }
 0x333   :  { %14511 = vmatpush3.bf16.msra.mxu1 %v16106_v40  ;;  %v16161_v40 = vld [vmem:[%s21917_s1 + $0x1880] ss:$12 sps:$4 sm:$0xff]  }
 0x334   :  { %9878 = vmatpush1.bf16.msra.mxu0 %v16102_v43  ;;  %14512 = vmatprep.subr.bf16.mxu1 %v16110_v10  ;;  %v16157_v43 = vld [vmem:[%s21917_s1 + $0x1ba8] ss:$12 sps:$4 sm:$0xff]   ;;  %v16165_v10 = vld [vmem:[%s21917_s1 + $0x1958] ss:$12 sps:$4 sm:$0xff]  }
 0x335   :  { %9879 = vmatprep.subr.bf16.mxu0 %v16109_v44  ;;  %v16164_v44 = vld [vmem:[%s21917_s1 + $0x1bc4] ss:$12 sps:$4 sm:$0xff]  }
 0x337   :  { %14513 = vmatpush3.bf16.msra.mxu1 %v16111_v53  ;;  %v16162_v53 = vld [vmem:[%s21917_s1 + $0x1bc0] ss:$12 sps:$4 sm:$0xff]  }
 0x338   :  { %9880 = vmatpush1.bf16.msra.mxu0 %v16107_v61  ;;  %14514 = vmatprep.subr.bf16.mxu1 %v16115_v51 }
 0x339   :  { %9881 = vmatprep.subr.bf16.mxu0 %v16114_v47  ;;  %v16166_v47 = vld [vmem:[%s21917_s1 + $0x1898] ss:$12 sps:$4 sm:$0xff]  }
 0x33b   :  { %14515 = vmatpush3.bf16.msra.mxu1 %v16116_v36 }
 0x33c   :  { %9882 = vmatpush1.bf16.msra.mxu0 %v16112_v54  ;;  %14516 = vmatprep.subr.bf16.mxu1 %v16120_v58  ;;  %v16170_v58 = vld [vmem:[%s21917_s1 + $0x1970] ss:$12 sps:$4 sm:$0xff]  }
 0x33d   :  { %9883 = vmatprep.subr.bf16.mxu0 %v16119_v57  ;;  %v14368_v1 = vpop.f32.mrb[40].mxu1  ;;  %v16169_v57 = vld [vmem:[%s21917_s1 + $0x1bdc] ss:$12 sps:$4 sm:$0xff]  }
 0x33e   :  { %v14369_v23 = vpop.f32.mrb[41].mxu1 }
 0x33f   :  { %14517 = vmatpush3.bf16.msra.mxu1 %v16121_v60  ;;  %v14370_v5 = vadd.f32 %v14369_v23, %v14368_v1  ;;  %v14371_v0 = vpop.f32.mrb[42].mxu1  ;;  %v16176_v1 = vld [vmem:[%s21917_s1 + $0x1988] ss:$12 sps:$4 sm:$0xff]   ;;  %v16180_v23 = vld [vmem:[%s21917_s1 + $0x1a60] ss:$12 sps:$4 sm:$0xff]  }
 0x340   :  { %9884 = vmatpush1.bf16.msra.mxu0 %v16117_v50  ;;  %14518 = vmatprep.subr.bf16.mxu1 %v16125_v2  ;;  %v14372_v16 = vpop.f32.mrb[43].mxu1  ;;  %v16174_v2 = vld [vmem:[%s21917_s1 + $0x1bf4] ss:$12 sps:$4 sm:$0xff]  }
 0x341   :  { %9894 = vmatprep.subr.bf16.mxu0 %v16124_v6  ;;  %v19793_v34 = vadd.f32 %v14370_v5, %v19684_v46  ;;  %v16144_v46 = vld [vmem:[%s21917_s1 + $0x1b64] ss:$12 sps:$4 sm:$0xff]   ;;  %v16177_v5 = vld [vmem:[%s21917_s1 + $0x1c08] ss:$12 sps:$4 sm:$0xff]   ;;  %v16181_v0 = vld [vmem:[%s21917_s1 + $0x19a0] ss:$12 sps:$4 sm:$0xff]  }
 0x342   :  { %v16171_v6 = vld [vmem:[%s21917_s1 + $0x18b0] ss:$12 sps:$4 sm:$0xff]   ;;  %v16186_v16 = vld [vmem:[%s21917_s1 + $0x19b8] ss:$12 sps:$4 sm:$0xff]  }
 0x343   :  { %9886 = vmatmul.mubr.bf16.vlgmr.msra.gmra.mrb[0].mxu0 %v19781_v4  ;;  %14519 = vmatpush3.bf16.msra.mxu1 %v16126_v38  ;;  %v16172_v38 = vld [vmem:[%s21917_s1 + $0x1bf0] ss:$12 sps:$4 sm:$0xff]  }
 0x344   :  { %9895 = vmatpush1.bf16.msra.mxu0 %v16122_v63  ;;  %14520 = vmatprep.subr.bf16.mxu1 %v16130_v13  ;;  %v16175_v63 = vld [vmem:[%s21917_s1 + $0x1a48] ss:$12 sps:$4 sm:$0xff]   ;;  %v16185_v13 = vld [vmem:[%s21917_s1 + $0x1a78] ss:$12 sps:$4 sm:$0xff]  }
 0x345   :  { %9896 = vmatprep.subr.bf16.mxu0 %v16129_v8  ;;  %9926 = vmatprep.mubr.bf16.mxu0 %v19795_v33  ;;  %v16184_v8 = vld [vmem:[%s21917_s1 + $0x1c24] ss:$12 sps:$4 sm:$0xff]  }
 0x347   :  { %14521 = vmatpush3.bf16.msra.mxu1 %v16131_v14  ;;  %v16191_v14 = vld [vmem:[%s21917_s1 + $0x19d0] ss:$12 sps:$4 sm:$0xff]  }
 0x348   :  { %9897 = vmatpush1.bf16.msra.mxu0 %v16127_v7  ;;  %14528 = vmatprep.subr.bf16.mxu1 %v16135_v45  ;;  %v16189_v7 = vld [vmem:[%s21917_s1 + $0x1c3c] ss:$12 sps:$4 sm:$0xff]  }
 0x349   :  { %9898 = vmatprep.subr.bf16.mxu0 %v16134_v42  ;;  %v16194_v42 = vld [vmem:[%s21917_s1 + $0x1c54] ss:$12 sps:$4 sm:$0xff]  }
 0x34a   :  { %10978 = vmatmul.mubr.bf16.vlgmr.msra.gmra.mrb[68].mxu1 %v19351_v59  ;;  %v16142_v59 = vld [vmem:[%s21917_s1 + $0x1b60] ss:$12 sps:$4 sm:$0xff]   ;;  %v16195_v45 = vld [vmem:[%s21917_s1 + $0x1aa8] ss:$12 sps:$4 sm:$0xff]  }
 0x34b   :  { %14529 = vmatpush3.bf16.msra.mxu1 %v16136_v17  ;;  %11017 = vmatprep.mubr.bf16.mxu1 %v19365_v48  ;;  %v16147_v48 = vld [vmem:[%s21917_s1 + $0x1b78] ss:$12 sps:$4 sm:$0xff]   ;;  %v16196_v17 = vld [vmem:[%s21917_s1 + $0x19e8] ss:$12 sps:$4 sm:$0xff]  }
 0x34c   :  { %9899 = vmatpush1.bf16.msra.mxu0 %v16132_v15  ;;  %14530 = vmatprep.subr.bf16.mxu1 %v16140_v18  ;;  %v16192_v15 = vld [vmem:[%s21917_s1 + $0x1c50] ss:$12 sps:$4 sm:$0xff]   ;;  %v16200_v18 = vld [vmem:[%s21917_s1 + $0x1ac0] ss:$12 sps:$4 sm:$0xff]  }
 0x34d   :  { %9900 = vmatprep.subr.bf16.mxu0 %v16139_v28  ;;  %v16199_v28 = vld [vmem:[%s21917_s1 + $0x1c6c] ss:$12 sps:$4 sm:$0xff]  }
 0x34f   :  { %14531 = vmatpush3.bf16.msra.mxu1 %v16141_v19  ;;  %v16201_v19 = vld [vmem:[%s21917_s1 + $0x1a00] ss:$12 sps:$4 sm:$0xff]  }
 0x350   :  { %9901 = vmatpush1.bf16.msra.mxu0 %v16137_v49  ;;  %14532 = vmatprep.subr.bf16.mxu1 %v16145_v20  ;;  %v16197_v49 = vld [vmem:[%s21917_s1 + $0x1c68] ss:$12 sps:$4 sm:$0xff]   ;;  %v16204_v20 = vld [vmem:[%s21917_s1 + $0x1c84] ss:$12 sps:$4 sm:$0xff]  }
 0x351   :  { %9902 = vmatprep.subr.bf16.mxu0 %v16144_v46  ;;  %v57_v46 = vld [vmem:[%s21918_s0 + $0x120] sm:$0xff] }
 0x353   :  { %14533 = vmatpush3.bf16.msra.mxu1 %v16146_v21 }
 0x354   :  { %9903 = vmatpush1.bf16.msra.mxu0 %v16142_v59  ;;  %14534 = vmatprep.subr.bf16.mxu1 %v16150_v25  ;;  %v16205_v59 = vld [vmem:[%s21917_s1 + $0x1ad8] ss:$12 sps:$4 sm:$0xff]  }
 0x355   :  { %9904 = vmatprep.subr.bf16.mxu0 %v16149_v24  ;;  %v16202_v24 = vld [vmem:[%s21917_s1 + $0x1c80] ss:$12 sps:$4 sm:$0xff]   ;;  %v16206_v25 = vld [vmem:[%s21917_s1 + $0x1a18] ss:$12 sps:$4 sm:$0xff]  }
 0x357   :  { %14535 = vmatpush3.bf16.msra.mxu1 %v16151_v27 }
 0x358   :  { %9905 = vmatpush1.bf16.msra.mxu0 %v16147_v48  ;;  %14536 = vmatprep.subr.bf16.mxu1 %v16155_v30  ;;  %v60_v48 = vld [vmem:[%s21918_s0 + $0x138] sm:$0xff] }
 0x359   :  { %9906 = vmatprep.subr.bf16.mxu0 %v16154_v29  ;;  %v19995_v29 = vpack.c.bf16 %v57_v46, %v57_v46  ;;  %v16254_v46 = vld [vmem:[%s21917_s1 + $0x1d74] ss:$12 sps:$4 sm:$0xff]  }
 0x35b   :  { %14537 = vmatpush3.bf16.msra.mxu1 %v16156_v31  ;;  %v16209_v31 = vld [vmem:[%s21917_s1 + $0x1c9c] ss:$12 sps:$4 sm:$0xff]  }
 0x35c   :  { %9907 = vmatpush1.bf16.msra.mxu0 %v16152_v12  ;;  %14538 = vmatprep.subr.bf16.mxu1 %v16160_v39 }
 0x35d   :  { %9908 = vmatprep.subr.bf16.mxu0 %v16159_v37  ;;  %v14390_v61 = vpop.f32.mrb[44].mxu1  ;;  %v16210_v37 = vld [vmem:[%s21917_s1 + $0x1af0] ss:$12 sps:$4 sm:$0xff]  }
 0x35e   :  { %v14391_v51 = vpop.f32.mrb[45].mxu1 }
 0x35f   :  { %v14392_v54 = vadd.f32 %v14391_v51, %v14390_v61  ;;  %14539 = vmatpush3.bf16.msra.mxu1 %v16161_v40  ;;  %v14393_v36 = vpop.f32.mrb[46].mxu1  ;;  %v16207_v40 = vld [vmem:[%s21917_s1 + $0x1c98] ss:$12 sps:$4 sm:$0xff]   ;;  %v16214_v61 = vld [vmem:[%s21917_s1 + $0x1cb4] ss:$12 sps:$4 sm:$0xff]  }
 0x360   :  { %9909 = vmatpush1.bf16.msra.mxu0 %v16157_v43  ;;  %14540 = vmatprep.subr.bf16.mxu1 %v16165_v10  ;;  %v14394_v50 = vpop.f32.mrb[47].mxu1  ;;  %v16211_v10 = vld [vmem:[%s21917_s1 + $0x1a30] ss:$12 sps:$4 sm:$0xff]   ;;  %v16216_v51 = vld [vmem:[%s21917_s1 + $0x1b08] ss:$12 sps:$4 sm:$0xff]  }
 0x361   :  { %9910 = vmatprep.subr.bf16.mxu0 %v16164_v44  ;;  %v19895_v60 = vadd.f32 %v14392_v54, %v19793_v34  ;;  %v16190_v34 = vld [vmem:[%s21917_s1 + $0x1a90] ss:$12 sps:$4 sm:$0xff]   ;;  %v20009_v44 = vpack.c.bf16 %v60_v48, %v60_v48  ;;  %v16219_v54 = vld [vmem:[%s21917_s1 + $0x1ccc] ss:$12 sps:$4 sm:$0xff]   ;;  %v16257_v48 = vld [vmem:[%s21917_s1 + $0x1d88] ss:$12 sps:$4 sm:$0xff]  }
 0x362   :  { %v16220_v36 = vld [vmem:[%s21917_s1 + $0x1be0] ss:$12 sps:$4 sm:$0xff]   ;;  %v16224_v50 = vld [vmem:[%s21917_s1 + $0x1ce4] ss:$12 sps:$4 sm:$0xff]  }
 0x363   :  { %14541 = vmatpush3.bf16.msra.mxu1 %v16166_v47  ;;  %v16212_v47 = vld [vmem:[%s21917_s1 + $0x1cb0] ss:$12 sps:$4 sm:$0xff]  }
 0x364   :  { %9911 = vmatpush1.bf16.msra.mxu0 %v16162_v53  ;;  %14542 = vmatprep.subr.bf16.mxu1 %v16170_v58  ;;  %v16215_v53 = vld [vmem:[%s21917_s1 + $0x1bc8] ss:$12 sps:$4 sm:$0xff]   ;;  %v16221_v58 = vld [vmem:[%s21917_s1 + $0x1b20] ss:$12 sps:$4 sm:$0xff]  }
 0x365   :  { %9912 = vmatprep.subr.bf16.mxu0 %v16169_v57  ;;  %v16217_v57 = vld [vmem:[%s21917_s1 + $0x1cc8] ss:$12 sps:$4 sm:$0xff]  }
 0x367   :  { %14543 = vmatpush3.bf16.msra.mxu1 %v16171_v6  ;;  %v16229_v6 = vld [vmem:[%s21917_s1 + $0x1cfc] ss:$12 sps:$4 sm:$0xff]  }
 0x368   :  { %9913 = vmatpush1.bf16.msra.mxu0 %v16167_v41  ;;  %14550 = vmatprep.subr.bf16.mxu1 %v16175_v63  ;;  %v16226_v41 = vld [vmem:[%s21917_s1 + $0x1b38] ss:$12 sps:$4 sm:$0xff]   ;;  %v16231_v63 = vld [vmem:[%s21917_s1 + $0x1b50] ss:$12 sps:$4 sm:$0xff]  }
 0x369   :  { %9914 = vmatprep.subr.bf16.mxu0 %v16174_v2  ;;  %v16230_v2 = vld [vmem:[%s21917_s1 + $0x1c10] ss:$12 sps:$4 sm:$0xff]  }
 0x36a   :  { %11018 = vmatmul.mubr.bf16.vlgmr.msra.gmra.mrb[72].mxu1 %v19567_v26  ;;  %v16182_v26 = vld [vmem:[%s21917_s1 + $0x1c20] ss:$12 sps:$4 sm:$0xff]  }
 0x36b   :  { %14551 = vmatpush3.bf16.msra.mxu1 %v16176_v1  ;;  %11057 = vmatprep.mubr.bf16.mxu1 %v19578_v32  ;;  %v16187_v32 = vld [vmem:[%s21917_s1 + $0x1c38] ss:$12 sps:$4 sm:$0xff]   ;;  %v16235_v1 = vld [vmem:[%s21917_s1 + $0x1c28] ss:$12 sps:$4 sm:$0xff]  }
 0x36c   :  { %9915 = vmatpush1.bf16.msra.mxu0 %v16172_v38  ;;  %14552 = vmatprep.subr.bf16.mxu1 %v16180_v23  ;;  %v16234_v38 = vld [vmem:[%s21917_s1 + $0x1d14] ss:$12 sps:$4 sm:$0xff]  }
 0x36d   :  { %9916 = vmatprep.subr.bf16.mxu0 %v16179_v9  ;;  %v16232_v9 = vld [vmem:[%s21917_s1 + $0x1d10] ss:$12 sps:$4 sm:$0xff]   ;;  %v16236_v23 = vld [vmem:[%s21917_s1 + $0x1b68] ss:$12 sps:$4 sm:$0xff]  }
 0x36f   :  { %14553 = vmatpush3.bf16.msra.mxu1 %v16181_v0  ;;  %v16240_v0 = vld [vmem:[%s21917_s1 + $0x1c40] ss:$12 sps:$4 sm:$0xff]  }
 0x370   :  { %9917 = vmatpush1.bf16.msra.mxu0 %v16177_v5  ;;  %14554 = vmatprep.subr.bf16.mxu1 %v16185_v13  ;;  %v16239_v5 = vld [vmem:[%s21917_s1 + $0x1d2c] ss:$12 sps:$4 sm:$0xff]  }
 0x371   :  { %9918 = vmatprep.subr.bf16.mxu0 %v16184_v8  ;;  %v16237_v8 = vld [vmem:[%s21917_s1 + $0x1d28] ss:$12 sps:$4 sm:$0xff]   ;;  %v16241_v13 = vld [vmem:[%s21917_s1 + $0x1b80] ss:$12 sps:$4 sm:$0xff]  }
 0x373   :  { %14555 = vmatpush3.bf16.msra.mxu1 %v16186_v16  ;;  %v16245_v16 = vld [vmem:[%s21917_s1 + $0x1c58] ss:$12 sps:$4 sm:$0xff]  }
 0x374   :  { %9919 = vmatpush1.bf16.msra.mxu0 %v16182_v26  ;;  %14556 = vmatprep.subr.bf16.mxu1 %v16190_v34  ;;  %v16244_v26 = vld [vmem:[%s21917_s1 + $0x1d44] ss:$12 sps:$4 sm:$0xff]   ;;  %v16242_v34 = vld [vmem:[%s21917_s1 + $0x1d40] ss:$12 sps:$4 sm:$0xff]  }
 0x375   :  { %9920 = vmatprep.subr.bf16.mxu0 %v16189_v7 }
 0x377   :  { %14557 = vmatpush3.bf16.msra.mxu1 %v16191_v14 }
 0x378   :  { %9921 = vmatpush1.bf16.msra.mxu0 %v16187_v32  ;;  %14558 = vmatprep.subr.bf16.mxu1 %v16195_v45  ;;  %v16246_v32 = vld [vmem:[%s21917_s1 + $0x1b98] ss:$12 sps:$4 sm:$0xff]  }
 0x379   :  { %9922 = vmatprep.subr.bf16.mxu0 %v16194_v42 }
 0x37b   :  { %14559 = vmatpush3.bf16.msra.mxu1 %v16196_v17  ;;  %v16250_v17 = vld [vmem:[%s21917_s1 + $0x1c70] ss:$12 sps:$4 sm:$0xff]  }
 0x37c   :  { %9923 = vmatpush1.bf16.msra.mxu0 %v16192_v15  ;;  %14560 = vmatprep.subr.bf16.mxu1 %v16200_v18  ;;  %v16249_v15 = vld [vmem:[%s21917_s1 + $0x1d5c] ss:$12 sps:$4 sm:$0xff]  }
 0x37d   :  { %9924 = vmatprep.subr.bf16.mxu0 %v16199_v28  ;;  %v14412_v21 = vpop.f32.mrb[48].mxu1 }
 0x37e   :  { %v14413_v27 = vpop.f32.mrb[49].mxu1 }
 0x37f   :  { %v14414_v30 = vadd.f32 %v14413_v27, %v14412_v21  ;;  %14561 = vmatpush3.bf16.msra.mxu1 %v16201_v19  ;;  %v14415_v12 = vpop.f32.mrb[50].mxu1  ;;  %v16251_v19 = vld [vmem:[%s21917_s1 + $0x1bb0] ss:$12 sps:$4 sm:$0xff]   ;;  %v16256_v21 = vld [vmem:[%s21917_s1 + $0x1c88] ss:$12 sps:$4 sm:$0xff]  }
 0x380   :  { %9925 = vmatpush1.bf16.msra.mxu0 %v16197_v49  ;;  %14562 = vmatprep.subr.bf16.mxu1 %v16205_v59  ;;  %v14416_v39 = vpop.f32.mrb[51].mxu1  ;;  %v16247_v49 = vld [vmem:[%s21917_s1 + $0x1d58] ss:$12 sps:$4 sm:$0xff]   ;;  %v16252_v59 = vld [vmem:[%s21917_s1 + $0x1d70] ss:$12 sps:$4 sm:$0xff]  }
 0x381   :  { %9935 = vmatprep.subr.bf16.mxu0 %v16204_v20  ;;  %v20004_v43 = vadd.f32 %v14414_v30, %v19895_v60  ;;  %v16225_v60 = vld [vmem:[%s21917_s1 + $0x1bf8] ss:$12 sps:$4 sm:$0xff]   ;;  %v16255_v20 = vld [vmem:[%s21917_s1 + $0x1d48] ss:$12 sps:$4 sm:$0xff]   ;;  %v16261_v27 = vld [vmem:[%s21917_s1 + $0x1ca0] ss:$12 sps:$4 sm:$0xff]  }
 0x382   :  { %v16264_v30 = vld [vmem:[%s21917_s1 + $0x1da4] ss:$12 sps:$4 sm:$0xff]  }
 0x383   :  { %9927 = vmatmul.mubr.bf16.vlgmr.msra.gmra.mrb[0].mxu0 %v19995_v29  ;;  %14563 = vmatpush3.bf16.msra.mxu1 %v16206_v25  ;;  %v16260_v25 = vld [vmem:[%s21917_s1 + $0x1d60] ss:$12 sps:$4 sm:$0xff]   ;;  %v16265_v12 = vld [vmem:[%s21917_s1 + $0x1d78] ss:$12 sps:$4 sm:$0xff]   ;;  %v16270_v39 = vld [vmem:[%s21917_s1 + $0x1d90] ss:$12 sps:$4 sm:$0xff]  }
 0x384   :  { %9936 = vmatpush1.bf16.msra.mxu0 %v16202_v24  ;;  %14564 = vmatprep.subr.bf16.mxu1 %v16210_v37  ;;  %v16259_v24 = vld [vmem:[%s21917_s1 + $0x1d8c] ss:$12 sps:$4 sm:$0xff]   ;;  %v16269_v37 = vld [vmem:[%s21917_s1 + $0x1dbc] ss:$12 sps:$4 sm:$0xff]  }
 0x385   :  { %9937 = vmatprep.subr.bf16.mxu0 %v16209_v31  ;;  %9967 = vmatprep.mubr.bf16.mxu0 %v20009_v44  ;;  %v16266_v31 = vld [vmem:[%s21917_s1 + $0x1cb8] ss:$12 sps:$4 sm:$0xff]  }
 0x387   :  { %14565 = vmatpush3.bf16.msra.mxu1 %v16211_v10  ;;  %v16275_v10 = vld [vmem:[%s21917_s1 + $0x1da8] ss:$12 sps:$4 sm:$0xff]  }
 0x388   :  { %9938 = vmatpush1.bf16.msra.mxu0 %v16207_v40  ;;  %14572 = vmatprep.subr.bf16.mxu1 %v16215_v53  ;;  %v16271_v40 = vld [vmem:[%s21917_s1 + $0x1cd0] ss:$12 sps:$4 sm:$0xff]   ;;  %v16276_v53 = vld [vmem:[%s21917_s1 + $0x1ce8] ss:$12 sps:$4 sm:$0xff]  }
 0x389   :  { %9939 = vmatprep.subr.bf16.mxu0 %v16214_v61  ;;  %v16272_v61 = vld [vmem:[%s21917_s1 + $0x1dd0] ss:$12 sps:$4 sm:$0xff]  }
 0x38a   :  { %11058 = vmatmul.mubr.bf16.vlgmr.msra.gmra.mrb[76].mxu1 %v19781_v4  ;;  %v16222_v4 = vld [vmem:[%s21917_s1 + $0x1ce0] ss:$12 sps:$4 sm:$0xff]  }
 0x38b   :  { %14573 = vmatpush3.bf16.msra.mxu1 %v16216_v51  ;;  %11097 = vmatprep.mubr.bf16.mxu1 %v19795_v33  ;;  %v16227_v33 = vld [vmem:[%s21917_s1 + $0x1cf8] ss:$12 sps:$4 sm:$0xff]   ;;  %v16280_v51 = vld [vmem:[%s21917_s1 + $0x1dc0] ss:$12 sps:$4 sm:$0xff]  }
 0x38c   :  { %9940 = vmatpush1.bf16.msra.mxu0 %v16212_v47  ;;  %14574 = vmatprep.subr.bf16.mxu1 %v16220_v36  ;;  %v16279_v47 = vld [vmem:[%s21917_s1 + $0x1dec] ss:$12 sps:$4 sm:$0xff]  }
 0x38d   :  { %9941 = vmatprep.subr.bf16.mxu0 %v16219_v54  ;;  %v16277_v54 = vld [vmem:[%s21917_s1 + $0x1de8] ss:$12 sps:$4 sm:$0xff]   ;;  %v16281_v36 = vld [vmem:[%s21917_s1 + $0x1d00] ss:$12 sps:$4 sm:$0xff]  }
 0x38f   :  { %14575 = vmatpush3.bf16.msra.mxu1 %v16221_v58  ;;  %v16284_v58 = vld [vmem:[%s21917_s1 + $0x1e04] ss:$12 sps:$4 sm:$0xff]  }
 0x390   :  { %9942 = vmatpush1.bf16.msra.mxu0 %v16217_v57  ;;  %14576 = vmatprep.subr.bf16.mxu1 %v16225_v60  ;;  %v59_v57 = vld [vmem:[%s21918_s0 + $0x130] sm:$0xff] }
 0x391   :  { %9943 = vmatprep.subr.bf16.mxu0 %v16224_v50  ;;  %v16285_v50 = vld [vmem:[%s21917_s1 + $0x1dd8] ss:$12 sps:$4 sm:$0xff]  }
 0x393   :  { %14577 = vmatpush3.bf16.msra.mxu1 %v16226_v41  ;;  %v16286_v41 = vld [vmem:[%s21917_s1 + $0x1d18] ss:$12 sps:$4 sm:$0xff]  }
 0x394   :  { %9944 = vmatpush1.bf16.msra.mxu0 %v16222_v4  ;;  %14578 = vmatprep.subr.bf16.mxu1 %v16230_v2  ;;  %v16282_v4 = vld [vmem:[%s21917_s1 + $0x1e00] ss:$12 sps:$4 sm:$0xff]   ;;  %v116_v2 = vpack.c.bf16 %v59_v57, %v59_v57 }
 0x395   :  { %9945 = vmatprep.subr.bf16.mxu0 %v16229_v6  ;;  %v61_v57 = vld [vmem:[%s21918_s0 + $0x140] sm:$0xff] }
 0x397   :  { %14579 = vmatpush3.bf16.msra.mxu1 %v16231_v63 }
 0x398   :  { %9946 = vmatpush1.bf16.msra.mxu0 %v16227_v33  ;;  %14580 = vmatprep.subr.bf16.mxu1 %v16235_v1  ;;  %v16289_v33 = vld [vmem:[%s21917_s1 + $0x1e1c] ss:$12 sps:$4 sm:$0xff]  }
 0x399   :  { %9947 = vmatprep.subr.bf16.mxu0 %v16234_v38  ;;  %v16290_v1 = vld [vmem:[%s21917_s1 + $0x1df0] ss:$12 sps:$4 sm:$0xff]  }
 0x39b   :  { %14581 = vmatpush3.bf16.msra.mxu1 %v16236_v23  ;;  %v62_v23 = vld [vmem:[%s21918_s0 + $0x148] sm:$0xff] }
 0x39c   :  { %9948 = vmatpush1.bf16.msra.mxu0 %v16232_v9  ;;  %14582 = vmatprep.subr.bf16.mxu1 %v16240_v0  ;;  %v16287_v0 = vld [vmem:[%s21917_s1 + $0x1e18] ss:$12 sps:$4 sm:$0xff]  }
 0x39d   :  { %9949 = vmatprep.subr.bf16.mxu0 %v16239_v5  ;;  %v14434_v7 = vpop.f32.mrb[52].mxu1 }
 0x39e   :  { %v14435_v14 = vpop.f32.mrb[53].mxu1 }
 0x39f   :  { %v14436_v42 = vadd.f32 %v14435_v14, %v14434_v7  ;;  %14583 = vmatpush3.bf16.msra.mxu1 %v16241_v13  ;;  %v14437_v45 = vpop.f32.mrb[54].mxu1  ;;  %v16294_v13 = vld [vmem:[%s21917_s1 + $0x1e34] ss:$12 sps:$4 sm:$0xff]   ;;  %v16292_v7 = vld [vmem:[%s21917_s1 + $0x1e30] ss:$12 sps:$4 sm:$0xff]  }
 0x3a0   :  { %9950 = vmatpush1.bf16.msra.mxu0 %v16237_v8  ;;  %14584 = vmatprep.subr.bf16.mxu1 %v16245_v16  ;;  %v14438_v28 = vpop.f32.mrb[55].mxu1  ;;  %v16291_v8 = vld [vmem:[%s21917_s1 + $0x1d30] ss:$12 sps:$4 sm:$0xff]   ;;  %v16295_v16 = vld [vmem:[%s21917_s1 + $0x1ec8] ss:$12 sps:$4 sm:$0xff]  }
 0x3a1   :  { %9951 = vmatprep.subr.bf16.mxu0 %v16244_v26  ;;  %v20109_v18 = vadd.f32 %v14436_v42, %v20004_v43  ;;  %v16267_v43 = vld [vmem:[%s21917_s1 + $0x1db8] ss:$12 sps:$4 sm:$0xff]   ;;  %v119_v26 = vpack.c.bf16 %v62_v23, %v62_v23  ;;  %v16300_v14 = vld [vmem:[%s21917_s1 + $0x1ee0] ss:$12 sps:$4 sm:$0xff]   ;;  %v16297_v42 = vld [vmem:[%s21917_s1 + $0x1e48] ss:$12 sps:$4 sm:$0xff]  }
 0x3a2   :  { %v16301_v45 = vld [vmem:[%s21917_s1 + $0x1e20] ss:$12 sps:$4 sm:$0xff]   ;;  %v16345_v23 = vld [vmem:[%s21917_s1 + $0x2078] ss:$12 sps:$4 sm:$0xff]  }
 0x3a3   :  { %14585 = vmatpush3.bf16.msra.mxu1 %v16246_v32  ;;  %v16299_v32 = vld [vmem:[%s21917_s1 + $0x1e4c] ss:$12 sps:$4 sm:$0xff]  }
 0x3a4   :  { %9952 = vmatpush1.bf16.msra.mxu0 %v16242_v34  ;;  %14586 = vmatprep.subr.bf16.mxu1 %v16250_v17  ;;  %v16296_v34 = vld [vmem:[%s21917_s1 + $0x1e08] ss:$12 sps:$4 sm:$0xff]   ;;  %v16305_v17 = vld [vmem:[%s21917_s1 + $0x1ef8] ss:$12 sps:$4 sm:$0xff]   ;;  %v16302_v28 = vld [vmem:[%s21917_s1 + $0x1e60] ss:$12 sps:$4 sm:$0xff]  }
 0x3a5   :  { %9953 = vmatprep.subr.bf16.mxu0 %v16249_v15  ;;  %v16304_v15 = vld [vmem:[%s21917_s1 + $0x1e64] ss:$12 sps:$4 sm:$0xff]  }
 0x3a7   :  { %14587 = vmatpush3.bf16.msra.mxu1 %v16251_v19  ;;  %v16310_v19 = vld [vmem:[%s21917_s1 + $0x1f10] ss:$12 sps:$4 sm:$0xff]  }
 0x3a8   :  { %9954 = vmatpush1.bf16.msra.mxu0 %v16247_v49  ;;  %14594 = vmatprep.subr.bf16.mxu1 %v16255_v20  ;;  %v16309_v49 = vld [vmem:[%s21917_s1 + $0x1e7c] ss:$12 sps:$4 sm:$0xff]  }
 0x3a9   :  { %9955 = vmatprep.subr.bf16.mxu0 %v16254_v46  ;;  %v16307_v46 = vld [vmem:[%s21917_s1 + $0x1e78] ss:$12 sps:$4 sm:$0xff]   ;;  %v16311_v20 = vld [vmem:[%s21917_s1 + $0x1e50] ss:$12 sps:$4 sm:$0xff]  }
 0x3aa   :  { %11098 = vmatmul.mubr.bf16.vlgmr.msra.gmra.mrb[80].mxu1 %v19995_v29  ;;  %v16262_v29 = vld [vmem:[%s21917_s1 + $0x1da0] ss:$12 sps:$4 sm:$0xff]  }
 0x3ab   :  { %14595 = vmatpush3.bf16.msra.mxu1 %v16256_v21  ;;  %11137 = vmatprep.mubr.bf16.mxu1 %v20009_v44  ;;  %v16274_v44 = vld [vmem:[%s21917_s1 + $0x1dd4] ss:$12 sps:$4 sm:$0xff]  }
 0x3ac   :  { %9956 = vmatpush1.bf16.msra.mxu0 %v16252_v59  ;;  %14596 = vmatprep.subr.bf16.mxu1 %v16260_v25  ;;  %v16314_v59 = vld [vmem:[%s21917_s1 + $0x1e94] ss:$12 sps:$4 sm:$0xff]  }
 0x3ad   :  { %9957 = vmatprep.subr.bf16.mxu0 %v16259_v24  ;;  %v16315_v21 = vld [vmem:[%s21917_s1 + $0x1f28] ss:$12 sps:$4 sm:$0xff]   ;;  %v16312_v24 = vld [vmem:[%s21917_s1 + $0x1e90] ss:$12 sps:$4 sm:$0xff]  }
 0x3ae   :  { %v16316_v25 = vld [vmem:[%s21917_s1 + $0x1e68] ss:$12 sps:$4 sm:$0xff]  }
 0x3af   :  { %14597 = vmatpush3.bf16.msra.mxu1 %v16261_v27  ;;  %v16320_v27 = vld [vmem:[%s21917_s1 + $0x1f40] ss:$12 sps:$4 sm:$0xff]  }
 0x3b0   :  { %9958 = vmatpush1.bf16.msra.mxu0 %v16257_v48  ;;  %14598 = vmatprep.subr.bf16.mxu1 %v16265_v12  ;;  %v16319_v48 = vld [vmem:[%s21917_s1 + $0x1eac] ss:$12 sps:$4 sm:$0xff]  }
 0x3b1   :  { %9959 = vmatprep.subr.bf16.mxu0 %v16264_v30  ;;  %v16317_v30 = vld [vmem:[%s21917_s1 + $0x1ea8] ss:$12 sps:$4 sm:$0xff]   ;;  %v16321_v12 = vld [vmem:[%s21917_s1 + $0x1e80] ss:$12 sps:$4 sm:$0xff]  }
 0x3b3   :  { %14599 = vmatpush3.bf16.msra.mxu1 %v16266_v31  ;;  %v16325_v31 = vld [vmem:[%s21917_s1 + $0x1f58] ss:$12 sps:$4 sm:$0xff]  }
 0x3b4   :  { %9960 = vmatpush1.bf16.msra.mxu0 %v16262_v29  ;;  %14600 = vmatprep.subr.bf16.mxu1 %v16270_v39  ;;  %v16324_v29 = vld [vmem:[%s21917_s1 + $0x1ec4] ss:$12 sps:$4 sm:$0xff]  }
 0x3b5   :  { %9961 = vmatprep.subr.bf16.mxu0 %v16269_v37 }
 0x3b7   :  { %14601 = vmatpush3.bf16.msra.mxu1 %v16271_v40  ;;  %v16322_v40 = vld [vmem:[%s21917_s1 + $0x1ec0] ss:$12 sps:$4 sm:$0xff]  }
 0x3b8   :  { %9962 = vmatpush1.bf16.msra.mxu0 %v16267_v43  ;;  %14602 = vmatprep.subr.bf16.mxu1 %v16275_v10 }
 0x3b9   :  { %9963 = vmatprep.subr.bf16.mxu0 %v16274_v44  ;;  %v16326_v44 = vld [vmem:[%s21917_s1 + $0x1e98] ss:$12 sps:$4 sm:$0xff]  }
 0x3bb   :  { %14603 = vmatpush3.bf16.msra.mxu1 %v16276_v53  ;;  %v16330_v53 = vld [vmem:[%s21917_s1 + $0x1f70] ss:$12 sps:$4 sm:$0xff]  }
 0x3bc   :  { %9964 = vmatpush1.bf16.msra.mxu0 %v16272_v61  ;;  %14604 = vmatprep.subr.bf16.mxu1 %v16280_v51  ;;  %v16329_v61 = vld [vmem:[%s21917_s1 + $0x1edc] ss:$12 sps:$4 sm:$0xff]  }
 0x3bd   :  { %9965 = vmatprep.subr.bf16.mxu0 %v16279_v47  ;;  %v14456_v60 = vpop.f32.mrb[56].mxu1 }
 0x3be   :  { %v14457_v6 = vpop.f32.mrb[57].mxu1 }
 0x3bf   :  { %v14458_v63 = vadd.f32 %v14457_v6, %v14456_v60  ;;  %14605 = vmatpush3.bf16.msra.mxu1 %v16281_v36  ;;  %v14459_v38 = vpop.f32.mrb[58].mxu1  ;;  %v16331_v36 = vld [vmem:[%s21917_s1 + $0x1eb0] ss:$12 sps:$4 sm:$0xff]   ;;  %v20332_v60 = vpack.c.bf16 %v61_v57, %v61_v57  ;;  %v16336_v6 = vld [vmem:[%s21917_s1 + $0x1f88] ss:$12 sps:$4 sm:$0xff]  }
 0x3c0   :  { %9966 = vmatpush1.bf16.msra.mxu0 %v16277_v54  ;;  %14606 = vmatprep.subr.bf16.mxu1 %v16285_v50  ;;  %v14460_v9 = vpop.f32.mrb[59].mxu1  ;;  %v16327_v54 = vld [vmem:[%s21917_s1 + $0x1ed8] ss:$12 sps:$4 sm:$0xff]   ;;  %v16335_v50 = vld [vmem:[%s21917_s1 + $0x2048] ss:$12 sps:$4 sm:$0xff]  }
 0x3c1   :  { %9976 = vmatprep.subr.bf16.mxu0 %v16284_v58  ;;  %v20216_v5 = vadd.f32 %v14458_v63, %v20109_v18  ;;  %v16306_v18 = vld [vmem:[%s21917_s1 + $0x1e38] ss:$12 sps:$4 sm:$0xff]   ;;  %v16334_v58 = vld [vmem:[%s21917_s1 + $0x1ef4] ss:$12 sps:$4 sm:$0xff]  }
 0x3c2   :  { %v16337_v38 = vld [vmem:[%s21917_s1 + $0x1f08] ss:$12 sps:$4 sm:$0xff]   ;;  %v16344_v9 = vld [vmem:[%s21917_s1 + $0x1f24] ss:$12 sps:$4 sm:$0xff]   ;;  %v16382_v57 = vld [vmem:[%s21917_s1 + $0x1fe0] ss:$12 sps:$4 sm:$0xff]  }
 0x3c3   :  { %9968 = vmatmul.mubr.bf16.vlgmr.msra.gmra.mrb[0].mxu0 %v116_v2  ;;  %14607 = vmatpush3.bf16.msra.mxu1 %v16286_v41  ;;  %v16332_v41 = vld [vmem:[%s21917_s1 + $0x1ef0] ss:$12 sps:$4 sm:$0xff]  }
 0x3c4   :  { %9977 = vmatpush1.bf16.msra.mxu0 %v16282_v4  ;;  %14608 = vmatprep.subr.bf16.mxu1 %v16290_v1  ;;  %v64_v4 = vld [vmem:[%s21918_s0 + $0x158] sm:$0xff]  ;;  %v16341_v1 = vld [vmem:[%s21917_s1 + $0x1fa0] ss:$12 sps:$4 sm:$0xff]  }
 0x3c5   :  { %9978 = vmatprep.subr.bf16.mxu0 %v16289_v33  ;;  %10008 = vmatprep.mubr.bf16.mxu0 %v119_v26  ;;  %v16340_v33 = vld [vmem:[%s21917_s1 + $0x2060] ss:$12 sps:$4 sm:$0xff]   ;;  %v20349_v63 = vpack.c.bf16 %v64_v4, %v64_v4  ;;  %v16387_v4 = vld [vmem:[%s21917_s1 + $0x1ff8] ss:$12 sps:$4 sm:$0xff]  }
 0x3c7   :  { %14609 = vmatpush3.bf16.msra.mxu1 %v16291_v8  ;;  %v16349_v8 = vld [vmem:[%s21917_s1 + $0x1f3c] ss:$12 sps:$4 sm:$0xff]  }
 0x3c8   :  { %9979 = vmatpush1.bf16.msra.mxu0 %v16287_v0  ;;  %14616 = vmatprep.subr.bf16.mxu1 %v16295_v16  ;;  %v16346_v0 = vld [vmem:[%s21917_s1 + $0x1fb8] ss:$12 sps:$4 sm:$0xff]   ;;  %v16351_v16 = vld [vmem:[%s21917_s1 + $0x1fd0] ss:$12 sps:$4 sm:$0xff]  }
 0x3c9   :  { %9980 = vmatprep.subr.bf16.mxu0 %v16294_v13  ;;  %v16350_v13 = vld [vmem:[%s21917_s1 + $0x2090] ss:$12 sps:$4 sm:$0xff]  }
 0x3ca   :  { %11138 = vmatmul.mubr.bf16.vlgmr.msra.gmra.mrb[84].mxu1 %v116_v2  ;;  %v16339_v2 = vld [vmem:[%s21917_s1 + $0x1f0c] ss:$12 sps:$4 sm:$0xff]  }
 0x3cb   :  { %14617 = vmatpush3.bf16.msra.mxu1 %v16296_v34  ;;  %11177 = vmatprep.mubr.bf16.mxu1 %v119_v26  ;;  %v16347_v26 = vld [vmem:[%s21917_s1 + $0x1f38] ss:$12 sps:$4 sm:$0xff]   ;;  %v16355_v34 = vld [vmem:[%s21917_s1 + $0x20a8] ss:$12 sps:$4 sm:$0xff]  }
 0x3cc   :  { %9981 = vmatpush1.bf16.msra.mxu0 %v16292_v7  ;;  %14618 = vmatprep.subr.bf16.mxu1 %v16300_v14  ;;  %v16354_v7 = vld [vmem:[%s21917_s1 + $0x1f54] ss:$12 sps:$4 sm:$0xff]  }
 0x3cd   :  { %9982 = vmatprep.subr.bf16.mxu0 %v16299_v32  ;;  %v16352_v32 = vld [vmem:[%s21917_s1 + $0x1f50] ss:$12 sps:$4 sm:$0xff]   ;;  %v16356_v14 = vld [vmem:[%s21917_s1 + $0x1fe8] ss:$12 sps:$4 sm:$0xff]  }
 0x3cf   :  { %14619 = vmatpush3.bf16.msra.mxu1 %v16301_v45  ;;  %v16360_v45 = vld [vmem:[%s21917_s1 + $0x20c0] ss:$12 sps:$4 sm:$0xff]  }
 0x3d0   :  { %9983 = vmatpush1.bf16.msra.mxu0 %v16297_v42  ;;  %14620 = vmatprep.subr.bf16.mxu1 %v16305_v17  ;;  %v16359_v42 = vld [vmem:[%s21917_s1 + $0x1f6c] ss:$12 sps:$4 sm:$0xff]  }
 0x3d1   :  { %9984 = vmatprep.subr.bf16.mxu0 %v16304_v15  ;;  %v16357_v15 = vld [vmem:[%s21917_s1 + $0x1f68] ss:$12 sps:$4 sm:$0xff]   ;;  %v16361_v17 = vld [vmem:[%s21917_s1 + $0x2000] ss:$12 sps:$4 sm:$0xff]  }
 0x3d3   :  { %14621 = vmatpush3.bf16.msra.mxu1 %v16306_v18  ;;  %v16365_v18 = vld [vmem:[%s21917_s1 + $0x20d8] ss:$12 sps:$4 sm:$0xff]  }
 0x3d4   :  { %9985 = vmatpush1.bf16.msra.mxu0 %v16302_v28  ;;  %14622 = vmatprep.subr.bf16.mxu1 %v16310_v19  ;;  %v16364_v28 = vld [vmem:[%s21917_s1 + $0x1f84] ss:$12 sps:$4 sm:$0xff]  }
 0x3d5   :  { %9986 = vmatprep.subr.bf16.mxu0 %v16309_v49 }
 0x3d7   :  { %14623 = vmatpush3.bf16.msra.mxu1 %v16311_v20  ;;  %v16362_v20 = vld [vmem:[%s21917_s1 + $0x1f80] ss:$12 sps:$4 sm:$0xff]  }
 0x3d8   :  { %9987 = vmatpush1.bf16.msra.mxu0 %v16307_v46  ;;  %14624 = vmatprep.subr.bf16.mxu1 %v16315_v21 }
 0x3d9   :  { %9988 = vmatprep.subr.bf16.mxu0 %v16314_v59  ;;  %v16366_v59 = vld [vmem:[%s21917_s1 + $0x2018] ss:$12 sps:$4 sm:$0xff]  }
 0x3db   :  { %14625 = vmatpush3.bf16.msra.mxu1 %v16316_v25  ;;  %v16370_v25 = vld [vmem:[%s21917_s1 + $0x20f0] ss:$12 sps:$4 sm:$0xff]  }
 0x3dc   :  { %9989 = vmatpush1.bf16.msra.mxu0 %v16312_v24  ;;  %14626 = vmatprep.subr.bf16.mxu1 %v16320_v27  ;;  %v16369_v24 = vld [vmem:[%s21917_s1 + $0x1f9c] ss:$12 sps:$4 sm:$0xff]  }
 0x3dd   :  { %9990 = vmatprep.subr.bf16.mxu0 %v16319_v48  ;;  %v14478_v37 = vpop.f32.mrb[60].mxu1 }
 0x3de   :  { %v14479_v39 = vpop.f32.mrb[61].mxu1 }
 0x3df   :  { %v14480_v43 = vadd.f32 %v14479_v39, %v14478_v37  ;;  %14627 = vmatpush3.bf16.msra.mxu1 %v16321_v12  ;;  %v14481_v10 = vpop.f32.mrb[62].mxu1  ;;  %v16371_v12 = vld [vmem:[%s21917_s1 + $0x2030] ss:$12 sps:$4 sm:$0xff]   ;;  %v16375_v37 = vld [vmem:[%s21917_s1 + $0x21c8] ss:$12 sps:$4 sm:$0xff]  }
 0x3e0   :  { %9991 = vmatpush1.bf16.msra.mxu0 %v16317_v30  ;;  %14628 = vmatprep.subr.bf16.mxu1 %v16325_v31  ;;  %v14482_v47 = vpop.f32.mrb[63].mxu1  ;;  %v16367_v30 = vld [vmem:[%s21917_s1 + $0x1f98] ss:$12 sps:$4 sm:$0xff]   ;;  %v16374_v31 = vld [vmem:[%s21917_s1 + $0x1fb4] ss:$12 sps:$4 sm:$0xff]  }
 0x3e1   :  { %9992 = vmatprep.subr.bf16.mxu0 %v16324_v29  ;;  %v20315_v51 = vadd.f32 %v14480_v43, %v20216_v5  ;;  %v16342_v5 = vld [vmem:[%s21917_s1 + $0x1f20] ss:$12 sps:$4 sm:$0xff]   ;;  %v63_v29 = vld [vmem:[%s21918_s0 + $0x150] sm:$0xff] }
 0x3e2   :  { %v20445_v39 = vpack.c.bf16 %v63_v29, %v63_v29  ;;  %v66_v43 = vld [vmem:[%s21918_s0 + $0x168] sm:$0xff] }
 0x3e3   :  { %14629 = vmatpush3.bf16.msra.mxu1 %v16326_v44  ;;  %v16376_v44 = vld [vmem:[%s21917_s1 + $0x2108] ss:$12 sps:$4 sm:$0xff]   ;;  %v16379_v10 = vld [vmem:[%s21917_s1 + $0x1fcc] ss:$12 sps:$4 sm:$0xff]  }
 0x3e4   :  { %9993 = vmatpush1.bf16.msra.mxu0 %v16322_v40  ;;  %14630 = vmatprep.subr.bf16.mxu1 %v16330_v53  ;;  %v16372_v40 = vld [vmem:[%s21917_s1 + $0x1fb0] ss:$12 sps:$4 sm:$0xff]   ;;  %v20462_v53 = vpack.c.bf16 %v66_v43, %v66_v43  ;;  %v16377_v47 = vld [vmem:[%s21917_s1 + $0x1fc8] ss:$12 sps:$4 sm:$0xff]   ;;  %v16422_v29 = vld [vmem:[%s21917_s1 + $0x20a0] ss:$12 sps:$4 sm:$0xff]  }
 0x3e5   :  { %9994 = vmatprep.subr.bf16.mxu0 %v16329_v61  ;;  %v16380_v61 = vld [vmem:[%s21917_s1 + $0x21e0] ss:$12 sps:$4 sm:$0xff]   ;;  %v16430_v43 = vld [vmem:[%s21917_s1 + $0x2390] ss:$12 sps:$4 sm:$0xff]  }
 0x3e7   :  { %14631 = vmatpush3.bf16.msra.mxu1 %v16331_v36  ;;  %v16385_v36 = vld [vmem:[%s21917_s1 + $0x21f8] ss:$12 sps:$4 sm:$0xff]  }
 0x3e8   :  { %9995 = vmatpush1.bf16.msra.mxu0 %v16327_v54  ;;  %14638 = vmatprep.subr.bf16.mxu1 %v16335_v50  ;;  %v16384_v54 = vld [vmem:[%s21917_s1 + $0x1fe4] ss:$12 sps:$4 sm:$0xff]   ;;  %v16389_v50 = vld [vmem:[%s21917_s1 + $0x1ffc] ss:$12 sps:$4 sm:$0xff]  }
 0x3e9   :  { %9996 = vmatprep.subr.bf16.mxu0 %v16334_v58  ;;  %v16386_v58 = vld [vmem:[%s21917_s1 + $0x2138] ss:$12 sps:$4 sm:$0xff]  }
 0x3ea   :  { %11178 = vmatmul.mubr.bf16.vlgmr.msra.gmra.mrb[88].mxu1 %v20332_v60 }
 0x3eb   :  { %14639 = vmatpush3.bf16.msra.mxu1 %v16336_v6  ;;  %11217 = vmatprep.mubr.bf16.mxu1 %v20349_v63  ;;  %v16394_v6 = vld [vmem:[%s21917_s1 + $0x2014] ss:$12 sps:$4 sm:$0xff]  }
 0x3ec   :  { %9997 = vmatpush1.bf16.msra.mxu0 %v16332_v41  ;;  %14640 = vmatprep.subr.bf16.mxu1 %v16340_v33  ;;  %v16391_v41 = vld [vmem:[%s21917_s1 + $0x2150] ss:$12 sps:$4 sm:$0xff]  }
 0x3ed   :  { %9998 = vmatprep.subr.bf16.mxu0 %v16339_v2  ;;  %v16395_v2 = vld [vmem:[%s21917_s1 + $0x2228] ss:$12 sps:$4 sm:$0xff]   ;;  %v16392_v33 = vld [vmem:[%s21917_s1 + $0x2010] ss:$12 sps:$4 sm:$0xff]  }
 0x3ef   :  { %14641 = vmatpush3.bf16.msra.mxu1 %v16341_v1  ;;  %v16400_v1 = vld [vmem:[%s21917_s1 + $0x2240] ss:$12 sps:$4 sm:$0xff]  }
 0x3f0   :  { %9999 = vmatpush1.bf16.msra.mxu0 %v16337_v38  ;;  %14642 = vmatprep.subr.bf16.mxu1 %v16345_v23  ;;  %v16399_v38 = vld [vmem:[%s21917_s1 + $0x202c] ss:$12 sps:$4 sm:$0xff]  }
 0x3f1   :  { %10000 = vmatprep.subr.bf16.mxu0 %v16344_v9  ;;  %v16397_v9 = vld [vmem:[%s21917_s1 + $0x2028] ss:$12 sps:$4 sm:$0xff]   ;;  %v16401_v23 = vld [vmem:[%s21917_s1 + $0x2180] ss:$12 sps:$4 sm:$0xff]  }
 0x3f3   :  { %14643 = vmatpush3.bf16.msra.mxu1 %v16346_v0  ;;  %v16405_v0 = vld [vmem:[%s21917_s1 + $0x2258] ss:$12 sps:$4 sm:$0xff]  }
 0x3f4   :  { %10001 = vmatpush1.bf16.msra.mxu0 %v16342_v5  ;;  %14644 = vmatprep.subr.bf16.mxu1 %v16350_v13  ;;  %v16404_v5 = vld [vmem:[%s21917_s1 + $0x2044] ss:$12 sps:$4 sm:$0xff]  }
 0x3f5   :  { %10002 = vmatprep.subr.bf16.mxu0 %v16349_v8 }
 0x3f7   :  { %14645 = vmatpush3.bf16.msra.mxu1 %v16351_v16  ;;  %v16402_v16 = vld [vmem:[%s21917_s1 + $0x2040] ss:$12 sps:$4 sm:$0xff]  }
 0x3f8   :  { %10003 = vmatpush1.bf16.msra.mxu0 %v16347_v26  ;;  %14646 = vmatprep.subr.bf16.mxu1 %v16355_v34 }
 0x3f9   :  { %10004 = vmatprep.subr.bf16.mxu0 %v16354_v7  ;;  %v16406_v7 = vld [vmem:[%s21917_s1 + $0x2198] ss:$12 sps:$4 sm:$0xff]  }
 0x3fb   :  { %14647 = vmatpush3.bf16.msra.mxu1 %v16356_v14  ;;  %v16410_v14 = vld [vmem:[%s21917_s1 + $0x2270] ss:$12 sps:$4 sm:$0xff]  }
 0x3fc   :  { %10005 = vmatpush1.bf16.msra.mxu0 %v16352_v32  ;;  %14648 = vmatprep.subr.bf16.mxu1 %v16360_v45  ;;  %v16409_v32 = vld [vmem:[%s21917_s1 + $0x205c] ss:$12 sps:$4 sm:$0xff]  }
 0x3fd   :  { %10006 = vmatprep.subr.bf16.mxu0 %v16359_v42  ;;  %v14500_v49 = vpop.f32.mrb[64].mxu1 }
 0x3fe   :  { %v14501_v19 = vpop.f32.mrb[65].mxu1 }
 0x3ff   :  { %v14502_v46 = vadd.f32 %v14501_v19, %v14500_v49  ;;  %14649 = vmatpush3.bf16.msra.mxu1 %v16361_v17  ;;  %v14503_v21 = vpop.f32.mrb[66].mxu1  ;;  %v16411_v17 = vld [vmem:[%s21917_s1 + $0x21b0] ss:$12 sps:$4 sm:$0xff]   ;;  %v16415_v49 = vld [vmem:[%s21917_s1 + $0x2348] ss:$12 sps:$4 sm:$0xff]  }
 0x400   :  { %10007 = vmatpush1.bf16.msra.mxu0 %v16357_v15  ;;  %14650 = vmatprep.subr.bf16.mxu1 %v16365_v18  ;;  %v14504_v48 = vpop.f32.mrb[67].mxu1  ;;  %v16407_v15 = vld [vmem:[%s21917_s1 + $0x2058] ss:$12 sps:$4 sm:$0xff]   ;;  %v16414_v18 = vld [vmem:[%s21917_s1 + $0x2074] ss:$12 sps:$4 sm:$0xff]  }
 0x401   :  { %10017 = vmatprep.subr.bf16.mxu0 %v16364_v28  ;;  %v20426_v27 = vadd.f32 %v14502_v46, %v20315_v51  ;;  %v16381_v51 = vld [vmem:[%s21917_s1 + $0x2120] ss:$12 sps:$4 sm:$0xff]   ;;  %v68_v46 = vld [vmem:[%s21918_s0 + $0x178] sm:$0xff]  ;;  %v16417_v48 = vld [vmem:[%s21917_s1 + $0x2088] ss:$12 sps:$4 sm:$0xff]  }
 0x402   :  { %v65_v28 = vld [vmem:[%s21918_s0 + $0x160] sm:$0xff]  ;;  %v16419_v21 = vld [vmem:[%s21917_s1 + $0x208c] ss:$12 sps:$4 sm:$0xff]  }
 0x403   :  { %10009 = vmatmul.mubr.bf16.vlgmr.msra.gmra.mrb[0].mxu0 %v20332_v60  ;;  %14651 = vmatpush3.bf16.msra.mxu1 %v16366_v59  ;;  %v16390_v60 = vld [vmem:[%s21917_s1 + $0x2210] ss:$12 sps:$4 sm:$0xff]   ;;  %v20556_v19 = vpack.c.bf16 %v65_v28, %v65_v28  ;;  %v16416_v59 = vld [vmem:[%s21917_s1 + $0x2288] ss:$12 sps:$4 sm:$0xff]   ;;  %v16462_v28 = vld [vmem:[%s21917_s1 + $0x2160] ss:$12 sps:$4 sm:$0xff]  }
 0x404   :  { %10018 = vmatpush1.bf16.msra.mxu0 %v16362_v20  ;;  %14652 = vmatprep.subr.bf16.mxu1 %v16370_v25  ;;  %v16412_v20 = vld [vmem:[%s21917_s1 + $0x2070] ss:$12 sps:$4 sm:$0xff]   ;;  %v20573_v25 = vpack.c.bf16 %v68_v46, %v68_v46 }
 0x405   :  { %10019 = vmatprep.subr.bf16.mxu0 %v16369_v24  ;;  %10049 = vmatprep.mubr.bf16.mxu0 %v20349_v63  ;;  %v16396_v63 = vld [vmem:[%s21917_s1 + $0x2168] ss:$12 sps:$4 sm:$0xff]   ;;  %v16420_v24 = vld [vmem:[%s21917_s1 + $0x2360] ss:$12 sps:$4 sm:$0xff]   ;;  %v16470_v46 = vld [vmem:[%s21917_s1 + $0x2510] ss:$12 sps:$4 sm:$0xff]  }
 0x407   :  { %14653 = vmatpush3.bf16.msra.mxu1 %v16371_v12  ;;  %v16425_v12 = vld [vmem:[%s21917_s1 + $0x2378] ss:$12 sps:$4 sm:$0xff]  }
 0x408   :  { %10020 = vmatpush1.bf16.msra.mxu0 %v16367_v30  ;;  %14660 = vmatprep.subr.bf16.mxu1 %v16375_v37  ;;  %v16424_v30 = vld [vmem:[%s21917_s1 + $0x20a4] ss:$12 sps:$4 sm:$0xff]   ;;  %v16429_v37 = vld [vmem:[%s21917_s1 + $0x20bc] ss:$12 sps:$4 sm:$0xff]  }
 0x409   :  { %10021 = vmatprep.subr.bf16.mxu0 %v16374_v31  ;;  %v16426_v31 = vld [vmem:[%s21917_s1 + $0x22b8] ss:$12 sps:$4 sm:$0xff]  }
 0x40a   :  { %11218 = vmatmul.mubr.bf16.vlgmr.msra.gmra.mrb[92].mxu1 %v20445_v39 }
 0x40b   :  { %14661 = vmatpush3.bf16.msra.mxu1 %v16376_v44  ;;  %11257 = vmatprep.mubr.bf16.mxu1 %v20462_v53  ;;  %v16431_v44 = vld [vmem:[%s21917_s1 + $0x22d0] ss:$12 sps:$4 sm:$0xff]  }
 0x40c   :  { %10022 = vmatpush1.bf16.msra.mxu0 %v16372_v40  ;;  %14662 = vmatprep.subr.bf16.mxu1 %v16380_v61  ;;  %v16427_v40 = vld [vmem:[%s21917_s1 + $0x20b8] ss:$12 sps:$4 sm:$0xff]   ;;  %v16435_v61 = vld [vmem:[%s21917_s1 + $0x23a8] ss:$12 sps:$4 sm:$0xff]  }
 0x40d   :  { %10023 = vmatprep.subr.bf16.mxu0 %v16379_v10  ;;  %v16434_v10 = vld [vmem:[%s21917_s1 + $0x20d4] ss:$12 sps:$4 sm:$0xff]  }
 0x40f   :  { %14663 = vmatpush3.bf16.msra.mxu1 %v16381_v51  ;;  %v16436_v51 = vld [vmem:[%s21917_s1 + $0x22e8] ss:$12 sps:$4 sm:$0xff]  }
 0x410   :  { %10024 = vmatpush1.bf16.msra.mxu0 %v16377_v47  ;;  %14664 = vmatprep.subr.bf16.mxu1 %v16385_v36  ;;  %v16432_v47 = vld [vmem:[%s21917_s1 + $0x20d0] ss:$12 sps:$4 sm:$0xff]   ;;  %v16440_v36 = vld [vmem:[%s21917_s1 + $0x23c0] ss:$12 sps:$4 sm:$0xff]  }
 0x411   :  { %10025 = vmatprep.subr.bf16.mxu0 %v16384_v54  ;;  %v16439_v54 = vld [vmem:[%s21917_s1 + $0x20ec] ss:$12 sps:$4 sm:$0xff]  }
 0x413   :  { %14665 = vmatpush3.bf16.msra.mxu1 %v16386_v58  ;;  %v16441_v58 = vld [vmem:[%s21917_s1 + $0x2300] ss:$12 sps:$4 sm:$0xff]  }
 0x414   :  { %10026 = vmatpush1.bf16.msra.mxu0 %v16382_v57  ;;  %14666 = vmatprep.subr.bf16.mxu1 %v16390_v60  ;;  %v16437_v57 = vld [vmem:[%s21917_s1 + $0x20e8] ss:$12 sps:$4 sm:$0xff]   ;;  %v16445_v60 = vld [vmem:[%s21917_s1 + $0x23d8] ss:$12 sps:$4 sm:$0xff]  }
 0x415   :  { %10027 = vmatprep.subr.bf16.mxu0 %v16389_v50  ;;  %v16444_v50 = vld [vmem:[%s21917_s1 + $0x2104] ss:$12 sps:$4 sm:$0xff]  }
 0x417   :  { %14667 = vmatpush3.bf16.msra.mxu1 %v16391_v41 }
 0x418   :  { %10028 = vmatpush1.bf16.msra.mxu0 %v16387_v4  ;;  %14668 = vmatprep.subr.bf16.mxu1 %v16395_v2  ;;  %v16442_v2 = vld [vmem:[%s21917_s1 + $0x2100] ss:$12 sps:$4 sm:$0xff]  }
 0x419   :  { %10029 = vmatprep.subr.bf16.mxu0 %v16394_v6 }
 0x41b   :  { %14669 = vmatpush3.bf16.msra.mxu1 %v16396_v63 }
 0x41c   :  { %10030 = vmatpush1.bf16.msra.mxu0 %v16392_v33  ;;  %14670 = vmatprep.subr.bf16.mxu1 %v16400_v1  ;;  %v16446_v33 = vld [vmem:[%s21917_s1 + $0x2318] ss:$12 sps:$4 sm:$0xff]   ;;  %v16450_v1 = vld [vmem:[%s21917_s1 + $0x23f0] ss:$12 sps:$4 sm:$0xff]  }
 0x41d   :  { %10031 = vmatprep.subr.bf16.mxu0 %v16399_v38  ;;  %v14522_v8 = vpop.f32.mrb[68].mxu1  ;;  %v16449_v38 = vld [vmem:[%s21917_s1 + $0x211c] ss:$12 sps:$4 sm:$0xff]  }
 0x41e   :  { %v14523_v13 = vpop.f32.mrb[69].mxu1 }
 0x41f   :  { %v14524_v26 = vadd.f32 %v14523_v13, %v14522_v8  ;;  %14671 = vmatpush3.bf16.msra.mxu1 %v16401_v23  ;;  %v14525_v34 = vpop.f32.mrb[70].mxu1  ;;  %v67_v8 = vld [vmem:[%s21918_s0 + $0x170] sm:$0xff] }
 0x420   :  { %10032 = vmatpush1.bf16.msra.mxu0 %v16397_v9  ;;  %14672 = vmatprep.subr.bf16.mxu1 %v16405_v0  ;;  %v14526_v42 = vpop.f32.mrb[71].mxu1  ;;  %v16451_v0 = vld [vmem:[%s21917_s1 + $0x2330] ss:$12 sps:$4 sm:$0xff]   ;;  %v16455_v13 = vld [vmem:[%s21917_s1 + $0x24c8] ss:$12 sps:$4 sm:$0xff]  }
 0x421   :  { %10033 = vmatprep.subr.bf16.mxu0 %v16404_v5  ;;  %v20539_v45 = vadd.f32 %v14524_v26, %v20426_v27  ;;  %v16421_v27 = vld [vmem:[%s21917_s1 + $0x22a0] ss:$12 sps:$4 sm:$0xff]   ;;  %v16447_v5 = vld [vmem:[%s21917_s1 + $0x2118] ss:$12 sps:$4 sm:$0xff]   ;;  %v20669_v26 = vpack.c.bf16 %v67_v8, %v67_v8  ;;  %v16456_v34 = vld [vmem:[%s21917_s1 + $0x2408] ss:$12 sps:$4 sm:$0xff]  }
 0x422   :  { %v16457_v42 = vld [vmem:[%s21917_s1 + $0x2148] ss:$12 sps:$4 sm:$0xff]   ;;  %v16504_v8 = vld [vmem:[%s21917_s1 + $0x2224] ss:$12 sps:$4 sm:$0xff]  }
 0x423   :  { %14673 = vmatpush3.bf16.msra.mxu1 %v16406_v7  ;;  %v16452_v7 = vld [vmem:[%s21917_s1 + $0x2130] ss:$12 sps:$4 sm:$0xff]  }
 0x424   :  { %10034 = vmatpush1.bf16.msra.mxu0 %v16402_v16  ;;  %14674 = vmatprep.subr.bf16.mxu1 %v16410_v14  ;;  %v70_v16 = vld [vmem:[%s21918_s0 + $0x188] sm:$0xff] }
 0x425   :  { %10035 = vmatprep.subr.bf16.mxu0 %v16409_v32  ;;  %v16460_v32 = vld [vmem:[%s21917_s1 + $0x24e0] ss:$12 sps:$4 sm:$0xff]   ;;  %v20686_v14 = vpack.c.bf16 %v70_v16, %v70_v16  ;;  %v16506_v16 = vld [vmem:[%s21917_s1 + $0x25b8] ss:$12 sps:$4 sm:$0xff]  }
 0x427   :  { %14675 = vmatpush3.bf16.msra.mxu1 %v16411_v17  ;;  %v16465_v17 = vld [vmem:[%s21917_s1 + $0x24f8] ss:$12 sps:$4 sm:$0xff]  }
 0x428   :  { %10036 = vmatpush1.bf16.msra.mxu0 %v16407_v15  ;;  %14682 = vmatprep.subr.bf16.mxu1 %v16415_v49  ;;  %v16464_v15 = vld [vmem:[%s21917_s1 + $0x2164] ss:$12 sps:$4 sm:$0xff]   ;;  %v16469_v49 = vld [vmem:[%s21917_s1 + $0x217c] ss:$12 sps:$4 sm:$0xff]  }
 0x429   :  { %10037 = vmatprep.subr.bf16.mxu0 %v16414_v18  ;;  %v16466_v18 = vld [vmem:[%s21917_s1 + $0x2438] ss:$12 sps:$4 sm:$0xff]  }
 0x42a   :  { %11258 = vmatmul.mubr.bf16.vlgmr.msra.gmra.mrb[96].mxu1 %v20556_v19 }
 0x42b   :  { %14683 = vmatpush3.bf16.msra.mxu1 %v16416_v59  ;;  %11297 = vmatprep.mubr.bf16.mxu1 %v20573_v25  ;;  %v16471_v59 = vld [vmem:[%s21917_s1 + $0x2450] ss:$12 sps:$4 sm:$0xff]  }
 0x42c   :  { %10038 = vmatpush1.bf16.msra.mxu0 %v16412_v20  ;;  %14684 = vmatprep.subr.bf16.mxu1 %v16420_v24  ;;  %v16467_v20 = vld [vmem:[%s21917_s1 + $0x2178] ss:$12 sps:$4 sm:$0xff]   ;;  %v16475_v24 = vld [vmem:[%s21917_s1 + $0x2528] ss:$12 sps:$4 sm:$0xff]  }
 0x42d   :  { %10039 = vmatprep.subr.bf16.mxu0 %v16419_v21  ;;  %v16474_v21 = vld [vmem:[%s21917_s1 + $0x2194] ss:$12 sps:$4 sm:$0xff]  }
 0x42f   :  { %14685 = vmatpush3.bf16.msra.mxu1 %v16421_v27  ;;  %v16476_v27 = vld [vmem:[%s21917_s1 + $0x2468] ss:$12 sps:$4 sm:$0xff]  }
 0x430   :  { %10040 = vmatpush1.bf16.msra.mxu0 %v16417_v48  ;;  %14686 = vmatprep.subr.bf16.mxu1 %v16425_v12  ;;  %v16472_v48 = vld [vmem:[%s21917_s1 + $0x2190] ss:$12 sps:$4 sm:$0xff]   ;;  %v16480_v12 = vld [vmem:[%s21917_s1 + $0x2540] ss:$12 sps:$4 sm:$0xff]  }
 0x431   :  { %10041 = vmatprep.subr.bf16.mxu0 %v16424_v30  ;;  %v16479_v30 = vld [vmem:[%s21917_s1 + $0x21ac] ss:$12 sps:$4 sm:$0xff]  }
 0x433   :  { %14687 = vmatpush3.bf16.msra.mxu1 %v16426_v31  ;;  %v16481_v31 = vld [vmem:[%s21917_s1 + $0x2480] ss:$12 sps:$4 sm:$0xff]  }
 0x434   :  { %10042 = vmatpush1.bf16.msra.mxu0 %v16422_v29  ;;  %14688 = vmatprep.subr.bf16.mxu1 %v16430_v43  ;;  %v16477_v29 = vld [vmem:[%s21917_s1 + $0x21a8] ss:$12 sps:$4 sm:$0xff]   ;;  %v16485_v43 = vld [vmem:[%s21917_s1 + $0x2558] ss:$12 sps:$4 sm:$0xff]  }
 0x435   :  { %10043 = vmatprep.subr.bf16.mxu0 %v16429_v37  ;;  %v16484_v37 = vld [vmem:[%s21917_s1 + $0x21c4] ss:$12 sps:$4 sm:$0xff]  }
 0x437   :  { %14689 = vmatpush3.bf16.msra.mxu1 %v16431_v44 }
 0x438   :  { %10044 = vmatpush1.bf16.msra.mxu0 %v16427_v40  ;;  %14690 = vmatprep.subr.bf16.mxu1 %v16435_v61  ;;  %v16482_v61 = vld [vmem:[%s21917_s1 + $0x21c0] ss:$12 sps:$4 sm:$0xff]  }
 0x439   :  { %10045 = vmatprep.subr.bf16.mxu0 %v16434_v10 }
 0x43b   :  { %14691 = vmatpush3.bf16.msra.mxu1 %v16436_v51 }
 0x43c   :  { %10046 = vmatpush1.bf16.msra.mxu0 %v16432_v47  ;;  %14692 = vmatprep.subr.bf16.mxu1 %v16440_v36  ;;  %v16486_v47 = vld [vmem:[%s21917_s1 + $0x2498] ss:$12 sps:$4 sm:$0xff]   ;;  %v16490_v36 = vld [vmem:[%s21917_s1 + $0x2570] ss:$12 sps:$4 sm:$0xff]  }
 0x43d   :  { %10047 = vmatprep.subr.bf16.mxu0 %v16439_v54  ;;  %v14544_v4 = vpop.f32.mrb[72].mxu1  ;;  %v16489_v54 = vld [vmem:[%s21917_s1 + $0x21dc] ss:$12 sps:$4 sm:$0xff]  }
 0x43e   :  { %v14545_v41 = vpop.f32.mrb[73].mxu1 }
 0x43f   :  { %v14546_v6 = vadd.f32 %v14545_v41, %v14544_v4  ;;  %14693 = vmatpush3.bf16.msra.mxu1 %v16441_v58  ;;  %v14547_v63 = vpop.f32.mrb[74].mxu1  ;;  %v69_v4 = vld [vmem:[%s21918_s0 + $0x180] sm:$0xff] }
 0x440   :  { %10048 = vmatpush1.bf16.msra.mxu0 %v16437_v57  ;;  %14694 = vmatprep.subr.bf16.mxu1 %v16445_v60  ;;  %v14548_v9 = vpop.f32.mrb[75].mxu1  ;;  %v16491_v60 = vld [vmem:[%s21917_s1 + $0x24b0] ss:$12 sps:$4 sm:$0xff]   ;;  %v16494_v41 = vld [vmem:[%s21917_s1 + $0x21f4] ss:$12 sps:$4 sm:$0xff]  }
 0x441   :  { %10058 = vmatprep.subr.bf16.mxu0 %v16444_v50  ;;  %v20650_v23 = vadd.f32 %v14546_v6, %v20539_v45  ;;  %v16461_v45 = vld [vmem:[%s21917_s1 + $0x2420] ss:$12 sps:$4 sm:$0xff]   ;;  %v16487_v50 = vld [vmem:[%s21917_s1 + $0x21d8] ss:$12 sps:$4 sm:$0xff]   ;;  %v16495_v6 = vld [vmem:[%s21917_s1 + $0x2648] ss:$12 sps:$4 sm:$0xff]  }
 0x442   :  { %v16492_v63 = vld [vmem:[%s21917_s1 + $0x21f0] ss:$12 sps:$4 sm:$0xff]   ;;  %v16500_v9 = vld [vmem:[%s21917_s1 + $0x2660] ss:$12 sps:$4 sm:$0xff]  }
 0x443   :  { %10050 = vmatmul.mubr.bf16.vlgmr.msra.gmra.mrb[0].mxu0 %v20445_v39  ;;  %14695 = vmatpush3.bf16.msra.mxu1 %v16446_v33  ;;  %v16454_v39 = vld [vmem:[%s21917_s1 + $0x2134] ss:$12 sps:$4 sm:$0xff]   ;;  %v72_v33 = vld [vmem:[%s21918_s0 + $0x198] sm:$0xff] }
 0x444   :  { %10059 = vmatpush1.bf16.msra.mxu0 %v16442_v2  ;;  %14696 = vmatprep.subr.bf16.mxu1 %v16450_v1  ;;  %v20780_v2 = vpack.c.bf16 %v69_v4, %v69_v4  ;;  %v16499_v1 = vld [vmem:[%s21917_s1 + $0x220c] ss:$12 sps:$4 sm:$0xff]   ;;  %v16544_v4 = vld [vmem:[%s21917_s1 + $0x22e4] ss:$12 sps:$4 sm:$0xff]  }
 0x445   :  { %10060 = vmatprep.subr.bf16.mxu0 %v16449_v38  ;;  %10090 = vmatprep.mubr.bf16.mxu0 %v20462_v53  ;;  %v16459_v53 = vld [vmem:[%s21917_s1 + $0x214c] ss:$12 sps:$4 sm:$0xff]   ;;  %v16496_v38 = vld [vmem:[%s21917_s1 + $0x2588] ss:$12 sps:$4 sm:$0xff]  }
 0x447   :  { %14697 = vmatpush3.bf16.msra.mxu1 %v16451_v0  ;;  %v16501_v0 = vld [vmem:[%s21917_s1 + $0x25a0] ss:$12 sps:$4 sm:$0xff]  }
 0x448   :  { %10061 = vmatpush1.bf16.msra.mxu0 %v16447_v5  ;;  %14704 = vmatprep.subr.bf16.mxu1 %v16455_v13  ;;  %v16497_v5 = vld [vmem:[%s21917_s1 + $0x2208] ss:$12 sps:$4 sm:$0xff]   ;;  %v16502_v13 = vld [vmem:[%s21917_s1 + $0x2220] ss:$12 sps:$4 sm:$0xff]  }
 0x449   :  { %10062 = vmatprep.subr.bf16.mxu0 %v16454_v39  ;;  %v16505_v39 = vld [vmem:[%s21917_s1 + $0x2678] ss:$12 sps:$4 sm:$0xff]  }
 0x44a   :  { %11298 = vmatmul.mubr.bf16.vlgmr.msra.gmra.mrb[100].mxu1 %v20669_v26 }
 0x44b   :  { %14705 = vmatpush3.bf16.msra.mxu1 %v16456_v34  ;;  %11337 = vmatprep.mubr.bf16.mxu1 %v20686_v14  ;;  %v16510_v34 = vld [vmem:[%s21917_s1 + $0x2690] ss:$12 sps:$4 sm:$0xff]  }
 0x44c   :  { %10063 = vmatpush1.bf16.msra.mxu0 %v16452_v7  ;;  %14706 = vmatprep.subr.bf16.mxu1 %v16460_v32  ;;  %v16509_v7 = vld [vmem:[%s21917_s1 + $0x223c] ss:$12 sps:$4 sm:$0xff]  }
 0x44d   :  { %10064 = vmatprep.subr.bf16.mxu0 %v16459_v53  ;;  %v16507_v53 = vld [vmem:[%s21917_s1 + $0x2238] ss:$12 sps:$4 sm:$0xff]   ;;  %v16511_v32 = vld [vmem:[%s21917_s1 + $0x25d0] ss:$12 sps:$4 sm:$0xff]  }
 0x44f   :  { %14707 = vmatpush3.bf16.msra.mxu1 %v16461_v45  ;;  %v16515_v45 = vld [vmem:[%s21917_s1 + $0x26a8] ss:$12 sps:$4 sm:$0xff]  }
 0x450   :  { %10065 = vmatpush1.bf16.msra.mxu0 %v16457_v42  ;;  %14708 = vmatprep.subr.bf16.mxu1 %v16465_v17  ;;  %v16514_v42 = vld [vmem:[%s21917_s1 + $0x2254] ss:$12 sps:$4 sm:$0xff]  }
 0x451   :  { %10066 = vmatprep.subr.bf16.mxu0 %v16464_v15  ;;  %v16512_v15 = vld [vmem:[%s21917_s1 + $0x2250] ss:$12 sps:$4 sm:$0xff]   ;;  %v16516_v17 = vld [vmem:[%s21917_s1 + $0x25e8] ss:$12 sps:$4 sm:$0xff]  }
 0x453   :  { %14709 = vmatpush3.bf16.msra.mxu1 %v16466_v18  ;;  %v16520_v18 = vld [vmem:[%s21917_s1 + $0x26c0] ss:$12 sps:$4 sm:$0xff]  }
 0x454   :  { %10067 = vmatpush1.bf16.msra.mxu0 %v16462_v28  ;;  %14710 = vmatprep.subr.bf16.mxu1 %v16470_v46  ;;  %v16519_v28 = vld [vmem:[%s21917_s1 + $0x226c] ss:$12 sps:$4 sm:$0xff]  }
 0x455   :  { %10068 = vmatprep.subr.bf16.mxu0 %v16469_v49  ;;  %v16517_v49 = vld [vmem:[%s21917_s1 + $0x2268] ss:$12 sps:$4 sm:$0xff]   ;;  %v16521_v46 = vld [vmem:[%s21917_s1 + $0x2600] ss:$12 sps:$4 sm:$0xff]  }
 0x457   :  { %14711 = vmatpush3.bf16.msra.mxu1 %v16471_v59  ;;  %v16525_v59 = vld [vmem:[%s21917_s1 + $0x26d8] ss:$12 sps:$4 sm:$0xff]  }
 0x458   :  { %10069 = vmatpush1.bf16.msra.mxu0 %v16467_v20  ;;  %14712 = vmatprep.subr.bf16.mxu1 %v16475_v24  ;;  %v16524_v20 = vld [vmem:[%s21917_s1 + $0x2284] ss:$12 sps:$4 sm:$0xff]  }
 0x459   :  { %10070 = vmatprep.subr.bf16.mxu0 %v16474_v21 }
 0x45b   :  { %14713 = vmatpush3.bf16.msra.mxu1 %v16476_v27  ;;  %v16522_v27 = vld [vmem:[%s21917_s1 + $0x2280] ss:$12 sps:$4 sm:$0xff]  }
 0x45c   :  { %10071 = vmatpush1.bf16.msra.mxu0 %v16472_v48  ;;  %14714 = vmatprep.subr.bf16.mxu1 %v16480_v12 }
 0x45d   :  { %10072 = vmatprep.subr.bf16.mxu0 %v16479_v30  ;;  %v14566_v40 = vpop.f32.mrb[76].mxu1  ;;  %v16526_v30 = vld [vmem:[%s21917_s1 + $0x2618] ss:$12 sps:$4 sm:$0xff]  }
 0x45e   :  { %v14567_v44 = vpop.f32.mrb[77].mxu1 }
 0x45f   :  { %v14568_v10 = vadd.f32 %v14567_v44, %v14566_v40  ;;  %14715 = vmatpush3.bf16.msra.mxu1 %v16481_v31  ;;  %v14569_v51 = vpop.f32.mrb[78].mxu1  ;;  %v16530_v31 = vld [vmem:[%s21917_s1 + $0x26f0] ss:$12 sps:$4 sm:$0xff]   ;;  %v16527_v40 = vld [vmem:[%s21917_s1 + $0x2298] ss:$12 sps:$4 sm:$0xff]  }
 0x460   :  { %10073 = vmatpush1.bf16.msra.mxu0 %v16477_v29  ;;  %14716 = vmatprep.subr.bf16.mxu1 %v16485_v43  ;;  %v14570_v57 = vpop.f32.mrb[79].mxu1  ;;  %v16529_v29 = vld [vmem:[%s21917_s1 + $0x229c] ss:$12 sps:$4 sm:$0xff]  }
 0x461   :  { %10074 = vmatprep.subr.bf16.mxu0 %v16484_v37  ;;  %v20763_v58 = vadd.f32 %v14568_v10, %v20650_v23  ;;  %v20797_v23 = vpack.c.bf16 %v72_v33, %v72_v33  ;;  %v16531_v44 = vld [vmem:[%s21917_s1 + $0x2630] ss:$12 sps:$4 sm:$0xff]   ;;  %v74_v51 = vld [vmem:[%s21918_s0 + $0x1a8] sm:$0xff]  ;;  %v16546_v33 = vld [vmem:[%s21917_s1 + $0x2738] ss:$12 sps:$4 sm:$0xff]  }
 0x462   :  { %v71_v10 = vld [vmem:[%s21918_s0 + $0x190] sm:$0xff]  ;;  %v16540_v57 = vld [vmem:[%s21917_s1 + $0x27e0] ss:$12 sps:$4 sm:$0xff]  }
 0x463   :  { %14717 = vmatpush3.bf16.msra.mxu1 %v16486_v47  ;;  %v20893_v47 = vpack.c.bf16 %v71_v10, %v71_v10  ;;  %v16577_v10 = vld [vmem:[%s21917_s1 + $0x2388] ss:$12 sps:$4 sm:$0xff]  }
 0x464   :  { %10075 = vmatpush1.bf16.msra.mxu0 %v16482_v61  ;;  %14718 = vmatprep.subr.bf16.mxu1 %v16490_v36  ;;  %v16535_v61 = vld [vmem:[%s21917_s1 + $0x27c8] ss:$12 sps:$4 sm:$0xff]  }
 0x465   :  { %10076 = vmatprep.subr.bf16.mxu0 %v16489_v54  ;;  %v16532_v54 = vld [vmem:[%s21917_s1 + $0x22b0] ss:$12 sps:$4 sm:$0xff]   ;;  %v16536_v36 = vld [vmem:[%s21917_s1 + $0x2708] ss:$12 sps:$4 sm:$0xff]  }
 0x467   :  { %14719 = vmatpush3.bf16.msra.mxu1 %v16491_v60  ;;  %v16541_v60 = vld [vmem:[%s21917_s1 + $0x2720] ss:$12 sps:$4 sm:$0xff]  }
 0x468   :  { %10077 = vmatpush1.bf16.msra.mxu0 %v16487_v50  ;;  %14726 = vmatprep.subr.bf16.mxu1 %v16495_v6  ;;  %v16537_v50 = vld [vmem:[%s21917_s1 + $0x22c8] ss:$12 sps:$4 sm:$0xff]   ;;  %v16542_v6 = vld [vmem:[%s21917_s1 + $0x22e0] ss:$12 sps:$4 sm:$0xff]  }
 0x469   :  { %10078 = vmatprep.subr.bf16.mxu0 %v16494_v41  ;;  %v16545_v41 = vld [vmem:[%s21917_s1 + $0x27f8] ss:$12 sps:$4 sm:$0xff]  }
 0x46a   :  { %11338 = vmatmul.mubr.bf16.vlgmr.msra.gmra.mrb[104].mxu1 %v20780_v2 }
 0x46b   :  { %14727 = vmatpush3.bf16.msra.mxu1 %v16496_v38  ;;  %11377 = vmatprep.mubr.bf16.mxu1 %v20797_v23  ;;  %v16550_v38 = vld [vmem:[%s21917_s1 + $0x2810] ss:$12 sps:$4 sm:$0xff]  }
 0x46c   :  { %10079 = vmatpush1.bf16.msra.mxu0 %v16492_v63  ;;  %14728 = vmatprep.subr.bf16.mxu1 %v16500_v9  ;;  %v16549_v63 = vld [vmem:[%s21917_s1 + $0x22fc] ss:$12 sps:$4 sm:$0xff]  }
 0x46d   :  { %10080 = vmatprep.subr.bf16.mxu0 %v16499_v1  ;;  %v16547_v1 = vld [vmem:[%s21917_s1 + $0x22f8] ss:$12 sps:$4 sm:$0xff]   ;;  %v16551_v9 = vld [vmem:[%s21917_s1 + $0x2750] ss:$12 sps:$4 sm:$0xff]  }
 0x46f   :  { %14729 = vmatpush3.bf16.msra.mxu1 %v16501_v0  ;;  %v16555_v0 = vld [vmem:[%s21917_s1 + $0x2828] ss:$12 sps:$4 sm:$0xff]  }
 0x470   :  { %10081 = vmatpush1.bf16.msra.mxu0 %v16497_v5  ;;  %14730 = vmatprep.subr.bf16.mxu1 %v16505_v39  ;;  %v16554_v5 = vld [vmem:[%s21917_s1 + $0x2314] ss:$12 sps:$4 sm:$0xff]  }
 0x471   :  { %10082 = vmatprep.subr.bf16.mxu0 %v16504_v8  ;;  %v16552_v8 = vld [vmem:[%s21917_s1 + $0x2310] ss:$12 sps:$4 sm:$0xff]   ;;  %v16556_v39 = vld [vmem:[%s21917_s1 + $0x2768] ss:$12 sps:$4 sm:$0xff]  }
 0x473   :  { %14731 = vmatpush3.bf16.msra.mxu1 %v16506_v16  ;;  %v16560_v16 = vld [vmem:[%s21917_s1 + $0x2840] ss:$12 sps:$4 sm:$0xff]  }
 0x474   :  { %10083 = vmatpush1.bf16.msra.mxu0 %v16502_v13  ;;  %14732 = vmatprep.subr.bf16.mxu1 %v16510_v34  ;;  %v16559_v13 = vld [vmem:[%s21917_s1 + $0x232c] ss:$12 sps:$4 sm:$0xff]  }
 0x475   :  { %10084 = vmatprep.subr.bf16.mxu0 %v16509_v7  ;;  %v16557_v7 = vld [vmem:[%s21917_s1 + $0x2328] ss:$12 sps:$4 sm:$0xff]   ;;  %v16561_v34 = vld [vmem:[%s21917_s1 + $0x2780] ss:$12 sps:$4 sm:$0xff]  }
 0x477   :  { %14733 = vmatpush3.bf16.msra.mxu1 %v16511_v32  ;;  %v16565_v32 = vld [vmem:[%s21917_s1 + $0x2858] ss:$12 sps:$4 sm:$0xff]  }
 0x478   :  { %10085 = vmatpush1.bf16.msra.mxu0 %v16507_v53  ;;  %14734 = vmatprep.subr.bf16.mxu1 %v16515_v45  ;;  %v16564_v53 = vld [vmem:[%s21917_s1 + $0x2344] ss:$12 sps:$4 sm:$0xff]  }
 0x479   :  { %10086 = vmatprep.subr.bf16.mxu0 %v16514_v42 }
 0x47b   :  { %14735 = vmatpush3.bf16.msra.mxu1 %v16516_v17  ;;  %v16562_v17 = vld [vmem:[%s21917_s1 + $0x2340] ss:$12 sps:$4 sm:$0xff]  }
 0x47c   :  { %10087 = vmatpush1.bf16.msra.mxu0 %v16512_v15  ;;  %14736 = vmatprep.subr.bf16.mxu1 %v16520_v18 }
 0x47d   :  { %10088 = vmatprep.subr.bf16.mxu0 %v16519_v28  ;;  %v14588_v21 = vpop.f32.mrb[80].mxu1  ;;  %v16566_v28 = vld [vmem:[%s21917_s1 + $0x2798] ss:$12 sps:$4 sm:$0xff]  }
 0x47e   :  { %v14589_v24 = vpop.f32.mrb[81].mxu1 }
 0x47f   :  { %v14590_v48 = vadd.f32 %v14589_v24, %v14588_v21  ;;  %14737 = vmatpush3.bf16.msra.mxu1 %v16521_v46  ;;  %v14591_v12 = vpop.f32.mrb[82].mxu1  ;;  %v16570_v46 = vld [vmem:[%s21917_s1 + $0x2870] ss:$12 sps:$4 sm:$0xff]   ;;  %v16567_v21 = vld [vmem:[%s21917_s1 + $0x2358] ss:$12 sps:$4 sm:$0xff]  }
 0x480   :  { %10089 = vmatpush1.bf16.msra.mxu0 %v16517_v49  ;;  %14738 = vmatprep.subr.bf16.mxu1 %v16525_v59  ;;  %v14592_v37 = vpop.f32.mrb[83].mxu1  ;;  %v16569_v49 = vld [vmem:[%s21917_s1 + $0x235c] ss:$12 sps:$4 sm:$0xff]  }
 0x481   :  { %10099 = vmatprep.subr.bf16.mxu0 %v16524_v20  ;;  %v20874_v43 = vadd.f32 %v14590_v48, %v20763_v58  ;;  %v20910_v58 = vpack.c.bf16 %v74_v51, %v74_v51  ;;  %v16571_v24 = vld [vmem:[%s21917_s1 + $0x27b0] ss:$12 sps:$4 sm:$0xff]   ;;  %v73_v48 = vld [vmem:[%s21918_s0 + $0x1a0] sm:$0xff]  ;;  %v16576_v37 = vld [vmem:[%s21917_s1 + $0x2888] ss:$12 sps:$4 sm:$0xff]  }
 0x482   :  { %v21004_v12 = vpack.c.bf16 %v73_v48, %v73_v48  ;;  %v16585_v51 = vld [vmem:[%s21917_s1 + $0x2978] ss:$12 sps:$4 sm:$0xff]   ;;  %v16620_v48 = vld [vmem:[%s21917_s1 + $0x2460] ss:$12 sps:$4 sm:$0xff]  }
 0x483   :  { %10091 = vmatmul.mubr.bf16.vlgmr.msra.gmra.mrb[0].mxu0 %v20556_v19  ;;  %14739 = vmatpush3.bf16.msra.mxu1 %v16526_v30  ;;  %v16534_v19 = vld [vmem:[%s21917_s1 + $0x22b4] ss:$12 sps:$4 sm:$0xff]  }
 0x484   :  { %10100 = vmatpush1.bf16.msra.mxu0 %v16522_v27  ;;  %14740 = vmatprep.subr.bf16.mxu1 %v16530_v31  ;;  %v16574_v27 = vld [vmem:[%s21917_s1 + $0x2374] ss:$12 sps:$4 sm:$0xff]   ;;  %v16572_v31 = vld [vmem:[%s21917_s1 + $0x2370] ss:$12 sps:$4 sm:$0xff]  }
 0x485   :  { %10101 = vmatprep.subr.bf16.mxu0 %v16529_v29  ;;  %10131 = vmatprep.mubr.bf16.mxu0 %v20573_v25  ;;  %v16539_v25 = vld [vmem:[%s21917_s1 + $0x22cc] ss:$12 sps:$4 sm:$0xff]   ;;  %v16575_v30 = vld [vmem:[%s21917_s1 + $0x2948] ss:$12 sps:$4 sm:$0xff]  }
 0x486   :  { %v76_v29 = vld [vmem:[%s21918_s0 + $0x1b8] sm:$0xff] }
 0x487   :  { %14741 = vmatpush3.bf16.msra.mxu1 %v16531_v44  ;;  %v21021_v44 = vpack.c.bf16 %v76_v29, %v76_v29  ;;  %v16628_v29 = vld [vmem:[%s21917_s1 + $0x2494] ss:$12 sps:$4 sm:$0xff]  }
 0x488   :  { %10102 = vmatpush1.bf16.msra.mxu0 %v16527_v40  ;;  %14748 = vmatprep.subr.bf16.mxu1 %v16535_v61  ;;  %v16580_v40 = vld [vmem:[%s21917_s1 + $0x2960] ss:$12 sps:$4 sm:$0xff]   ;;  %v16584_v61 = vld [vmem:[%s21917_s1 + $0x23a4] ss:$12 sps:$4 sm:$0xff]  }
 0x489   :  { %10103 = vmatprep.subr.bf16.mxu0 %v16534_v19  ;;  %v16581_v19 = vld [vmem:[%s21917_s1 + $0x28a0] ss:$12 sps:$4 sm:$0xff]  }
 0x48a   :  { %11378 = vmatmul.mubr.bf16.vlgmr.msra.gmra.mrb[108].mxu1 %v20893_v47 }
 0x48b   :  { %14749 = vmatpush3.bf16.msra.mxu1 %v16536_v36  ;;  %11417 = vmatprep.mubr.bf16.mxu1 %v20910_v58  ;;  %v16586_v36 = vld [vmem:[%s21917_s1 + $0x28b8] ss:$12 sps:$4 sm:$0xff]  }
 0x48c   :  { %10104 = vmatpush1.bf16.msra.mxu0 %v16532_v54  ;;  %14750 = vmatprep.subr.bf16.mxu1 %v16540_v57  ;;  %v16582_v54 = vld [vmem:[%s21917_s1 + $0x23a0] ss:$12 sps:$4 sm:$0xff]   ;;  %v16590_v57 = vld [vmem:[%s21917_s1 + $0x2990] ss:$12 sps:$4 sm:$0xff]  }
 0x48d   :  { %10105 = vmatprep.subr.bf16.mxu0 %v16539_v25  ;;  %v16589_v25 = vld [vmem:[%s21917_s1 + $0x23bc] ss:$12 sps:$4 sm:$0xff]  }
 0x48f   :  { %14751 = vmatpush3.bf16.msra.mxu1 %v16541_v60  ;;  %v16591_v60 = vld [vmem:[%s21917_s1 + $0x28d0] ss:$12 sps:$4 sm:$0xff]  }
 0x490   :  { %10106 = vmatpush1.bf16.msra.mxu0 %v16537_v50  ;;  %14752 = vmatprep.subr.bf16.mxu1 %v16545_v41  ;;  %v16587_v50 = vld [vmem:[%s21917_s1 + $0x23b8] ss:$12 sps:$4 sm:$0xff]   ;;  %v16595_v41 = vld [vmem:[%s21917_s1 + $0x29a8] ss:$12 sps:$4 sm:$0xff]  }
 0x491   :  { %10107 = vmatprep.subr.bf16.mxu0 %v16544_v4  ;;  %v16594_v4 = vld [vmem:[%s21917_s1 + $0x23d4] ss:$12 sps:$4 sm:$0xff]  }
 0x493   :  { %14753 = vmatpush3.bf16.msra.mxu1 %v16546_v33  ;;  %v16596_v33 = vld [vmem:[%s21917_s1 + $0x28e8] ss:$12 sps:$4 sm:$0xff]  }
 0x494   :  { %10108 = vmatpush1.bf16.msra.mxu0 %v16542_v6  ;;  %14754 = vmatprep.subr.bf16.mxu1 %v16550_v38  ;;  %v16592_v6 = vld [vmem:[%s21917_s1 + $0x23d0] ss:$12 sps:$4 sm:$0xff]   ;;  %v16600_v38 = vld [vmem:[%s21917_s1 + $0x29c0] ss:$12 sps:$4 sm:$0xff]  }
 0x495   :  { %10109 = vmatprep.subr.bf16.mxu0 %v16549_v63  ;;  %v16599_v63 = vld [vmem:[%s21917_s1 + $0x23ec] ss:$12 sps:$4 sm:$0xff]  }
 0x497   :  { %14755 = vmatpush3.bf16.msra.mxu1 %v16551_v9  ;;  %v16601_v9 = vld [vmem:[%s21917_s1 + $0x2900] ss:$12 sps:$4 sm:$0xff]  }
 0x498   :  { %10110 = vmatpush1.bf16.msra.mxu0 %v16547_v1  ;;  %14756 = vmatprep.subr.bf16.mxu1 %v16555_v0  ;;  %v16597_v1 = vld [vmem:[%s21917_s1 + $0x23e8] ss:$12 sps:$4 sm:$0xff]   ;;  %v16605_v0 = vld [vmem:[%s21917_s1 + $0x29d8] ss:$12 sps:$4 sm:$0xff]  }
 0x499   :  { %10111 = vmatprep.subr.bf16.mxu0 %v16554_v5  ;;  %v16604_v5 = vld [vmem:[%s21917_s1 + $0x2404] ss:$12 sps:$4 sm:$0xff]  }
 0x49b   :  { %14757 = vmatpush3.bf16.msra.mxu1 %v16556_v39 }
 0x49c   :  { %10112 = vmatpush1.bf16.msra.mxu0 %v16552_v8  ;;  %14758 = vmatprep.subr.bf16.mxu1 %v16560_v16  ;;  %v16602_v16 = vld [vmem:[%s21917_s1 + $0x2400] ss:$12 sps:$4 sm:$0xff]  }
 0x49d   :  { %10113 = vmatprep.subr.bf16.mxu0 %v16559_v13  ;;  %v14610_v42 = vpop.f32.mrb[84].mxu1 }
 0x49e   :  { %v14611_v45 = vpop.f32.mrb[85].mxu1 }
 0x49f   :  { %v14612_v15 = vadd.f32 %v14611_v45, %v14610_v42  ;;  %14759 = vmatpush3.bf16.msra.mxu1 %v16561_v34  ;;  %v14613_v18 = vpop.f32.mrb[86].mxu1 }
 0x4a0   :  { %10114 = vmatpush1.bf16.msra.mxu0 %v16557_v7  ;;  %14760 = vmatprep.subr.bf16.mxu1 %v16565_v32  ;;  %v14614_v20 = vpop.f32.mrb[87].mxu1  ;;  %v16606_v7 = vld [vmem:[%s21917_s1 + $0x2918] ss:$12 sps:$4 sm:$0xff]   ;;  %v16610_v32 = vld [vmem:[%s21917_s1 + $0x29f0] ss:$12 sps:$4 sm:$0xff]  }
 0x4a1   :  { %10115 = vmatprep.subr.bf16.mxu0 %v16564_v53  ;;  %v20987_v59 = vadd.f32 %v14612_v15, %v20874_v43  ;;  %v16579_v43 = vld [vmem:[%s21917_s1 + $0x238c] ss:$12 sps:$4 sm:$0xff]   ;;  %v16609_v53 = vld [vmem:[%s21917_s1 + $0x241c] ss:$12 sps:$4 sm:$0xff]   ;;  %v16958_v20 = vmov 0.0  }
 0x4a2   :  { %v16607_v15 = vld [vmem:[%s21917_s1 + $0x2418] ss:$12 sps:$4 sm:$0xff]  }
 0x4a3   :  { %14761 = vmatpush3.bf16.msra.mxu1 %v16566_v28  ;;  %v75_v28 = vld [vmem:[%s21918_s0 + $0x1b0] sm:$0xff] }
 0x4a4   :  { %10116 = vmatpush1.bf16.msra.mxu0 %v16562_v17  ;;  %14762 = vmatprep.subr.bf16.mxu1 %v16570_v46  ;;  %v16611_v17 = vld [vmem:[%s21917_s1 + $0x2930] ss:$12 sps:$4 sm:$0xff]   ;;  %v21112_v18 = vpack.c.bf16 %v75_v28, %v75_v28  ;;  %v16615_v46 = vld [vmem:[%s21917_s1 + $0x2a08] ss:$12 sps:$4 sm:$0xff]  }
 0x4a5   :  { %10117 = vmatprep.subr.bf16.mxu0 %v16569_v49  ;;  %v16612_v49 = vld [vmem:[%s21917_s1 + $0x2430] ss:$12 sps:$4 sm:$0xff]  }
 0x4a6   :  { %v16670_v28 = vld [vmem:[%s21917_s1 + $0x25e4] ss:$12 sps:$4 sm:$0xff]  }
 0x4a7   :  { %14763 = vmatpush3.bf16.msra.mxu1 %v16571_v24  ;;  %v16622_v24 = vld [vmem:[%s21917_s1 + $0x2464] ss:$12 sps:$4 sm:$0xff]  }
 0x4a8   :  { %10118 = vmatpush1.bf16.msra.mxu0 %v16567_v21  ;;  %14770 = vmatprep.subr.bf16.mxu1 %v16575_v30  ;;  %v16619_v21 = vld [vmem:[%s21917_s1 + $0x2a20] ss:$12 sps:$4 sm:$0xff]   ;;  %v16623_v30 = vld [vmem:[%s21917_s1 + $0x2478] ss:$12 sps:$4 sm:$0xff]  }
 0x4a9   :  { %10119 = vmatprep.subr.bf16.mxu0 %v16574_v27  ;;  %v16625_v27 = vld [vmem:[%s21917_s1 + $0x247c] ss:$12 sps:$4 sm:$0xff]  }
 0x4aa   :  { %11418 = vmatmul.mubr.bf16.vlgmr.msra.gmra.mrb[112].mxu1 %v21004_v12 }
 0x4ab   :  { %14771 = vmatpush3.bf16.msra.mxu1 %v16576_v37  ;;  %11457 = vmatprep.mubr.bf16.mxu1 %v21021_v44  ;;  %v16629_v37 = vld [vmem:[%s21917_s1 + $0x24a8] ss:$12 sps:$4 sm:$0xff]  }
 0x4ac   :  { %10120 = vmatpush1.bf16.msra.mxu0 %v16572_v31  ;;  %14772 = vmatprep.subr.bf16.mxu1 %v16580_v40  ;;  %v16626_v31 = vld [vmem:[%s21917_s1 + $0x2490] ss:$12 sps:$4 sm:$0xff]  }
 0x4ad   :  { %10121 = vmatprep.subr.bf16.mxu0 %v16579_v43  ;;  %v16634_v43 = vld [vmem:[%s21917_s1 + $0x24c4] ss:$12 sps:$4 sm:$0xff]  }
 0x4af   :  { %14773 = vmatpush3.bf16.msra.mxu1 %v16581_v19 }
 0x4b0   :  { %10122 = vmatpush1.bf16.msra.mxu0 %v16577_v10  ;;  %14774 = vmatprep.subr.bf16.mxu1 %v16585_v51 }
 0x4b1   :  { %10123 = vmatprep.subr.bf16.mxu0 %v16584_v61  ;;  %v16632_v61 = vld [vmem:[%s21917_s1 + $0x24c0] ss:$12 sps:$4 sm:$0xff]  }
 0x4b3   :  { %14775 = vmatpush3.bf16.msra.mxu1 %v16586_v36 }
 0x4b4   :  { %10124 = vmatpush1.bf16.msra.mxu0 %v16582_v54  ;;  %14776 = vmatprep.subr.bf16.mxu1 %v16590_v57  ;;  %v16637_v54 = vld [vmem:[%s21917_s1 + $0x24dc] ss:$12 sps:$4 sm:$0xff]   ;;  %v16635_v57 = vld [vmem:[%s21917_s1 + $0x24d8] ss:$12 sps:$4 sm:$0xff]  }
 0x4b5   :  { %10125 = vmatprep.subr.bf16.mxu0 %v16589_v25 }
 0x4b7   :  { %14777 = vmatpush3.bf16.msra.mxu1 %v16591_v60  ;;  %v16638_v60 = vld [vmem:[%s21917_s1 + $0x24f0] ss:$12 sps:$4 sm:$0xff]  }
 0x4b8   :  { %10126 = vmatpush1.bf16.msra.mxu0 %v16587_v50  ;;  %14778 = vmatprep.subr.bf16.mxu1 %v16595_v41  ;;  %v16640_v50 = vld [vmem:[%s21917_s1 + $0x24f4] ss:$12 sps:$4 sm:$0xff]  }
 0x4b9   :  { %10127 = vmatprep.subr.bf16.mxu0 %v16594_v4  ;;  %v16643_v4 = vld [vmem:[%s21917_s1 + $0x250c] ss:$12 sps:$4 sm:$0xff]   ;;  %v16641_v41 = vld [vmem:[%s21917_s1 + $0x2508] ss:$12 sps:$4 sm:$0xff]  }
 0x4bb   :  { %14779 = vmatpush3.bf16.msra.mxu1 %v16596_v33  ;;  %v16644_v33 = vld [vmem:[%s21917_s1 + $0x2520] ss:$12 sps:$4 sm:$0xff]  }
 0x4bc   :  { %10128 = vmatpush1.bf16.msra.mxu0 %v16592_v6  ;;  %14780 = vmatprep.subr.bf16.mxu1 %v16600_v38  ;;  %v16646_v6 = vld [vmem:[%s21917_s1 + $0x2524] ss:$12 sps:$4 sm:$0xff]  }
 0x4bd   :  { %10129 = vmatprep.subr.bf16.mxu0 %v16599_v63  ;;  %v14632_v8 = vpop.f32.mrb[88].mxu1  ;;  %v16649_v63 = vld [vmem:[%s21917_s1 + $0x253c] ss:$12 sps:$4 sm:$0xff]   ;;  %v16647_v38 = vld [vmem:[%s21917_s1 + $0x2538] ss:$12 sps:$4 sm:$0xff]  }
 0x4be   :  { %v14633_v39 = vpop.f32.mrb[89].mxu1 }
 0x4bf   :  { %v14634_v13 = vadd.f32 %v14633_v39, %v14632_v8  ;;  %14781 = vmatpush3.bf16.msra.mxu1 %v16601_v9  ;;  %v14635_v34 = vpop.f32.mrb[90].mxu1  ;;  %v16650_v9 = vld [vmem:[%s21917_s1 + $0x2550] ss:$12 sps:$4 sm:$0xff]  }
 0x4c0   :  { %10130 = vmatpush1.bf16.msra.mxu0 %v16597_v1  ;;  %14782 = vmatprep.subr.bf16.mxu1 %v16605_v0  ;;  %v14636_v42 = vpop.f32.mrb[91].mxu1  ;;  %v16652_v1 = vld [vmem:[%s21917_s1 + $0x2554] ss:$12 sps:$4 sm:$0xff]   ;;  %v16658_v8 = vld [vmem:[%s21917_s1 + $0x2584] ss:$12 sps:$4 sm:$0xff]  }
 0x4c1   :  { %10140 = vmatprep.subr.bf16.mxu0 %v16604_v5  ;;  %v11180_v45 = vadd.f32 %v14634_v13, %v20987_v59  ;;  %v16616_v59 = vld [vmem:[%s21917_s1 + $0x2448] ss:$12 sps:$4 sm:$0xff]   ;;  %v16655_v5 = vld [vmem:[%s21917_s1 + $0x256c] ss:$12 sps:$4 sm:$0xff]  }
 0x4c2   :  { %v16653_v0 = vld [vmem:[%s21917_s1 + $0x2568] ss:$12 sps:$4 sm:$0xff]  }
 0x4c3   :  { %10132 = vmatmul.mubr.bf16.vlgmr.msra.gmra.mrb[0].mxu0 %v20669_v26  ;;  %14783 = vmatpush3.bf16.msra.mxu1 %v16606_v7  ;;  %v16614_v26 = vld [vmem:[%s21917_s1 + $0x2434] ss:$12 sps:$4 sm:$0xff]  }
 0x4c4   :  { %10141 = vmatpush1.bf16.msra.mxu0 %v16602_v16  ;;  %14784 = vmatprep.subr.bf16.mxu1 %v16610_v32  ;;  %v16656_v7 = vld [vmem:[%s21917_s1 + $0x2580] ss:$12 sps:$4 sm:$0xff]  }
 0x4c5   :  { %10142 = vmatprep.subr.bf16.mxu0 %v16609_v53  ;;  %10172 = vmatprep.mubr.bf16.mxu0 %v20686_v14  ;;  %v16618_v14 = vld [vmem:[%s21917_s1 + $0x244c] ss:$12 sps:$4 sm:$0xff]   ;;  %v16661_v53 = vld [vmem:[%s21917_s1 + $0x259c] ss:$12 sps:$4 sm:$0xff]  }
 0x4c7   :  { %14785 = vmatpush3.bf16.msra.mxu1 %v16611_v17  ;;  %v16662_v17 = vld [vmem:[%s21917_s1 + $0x25b0] ss:$12 sps:$4 sm:$0xff]  }
 0x4c8   :  { %10143 = vmatpush1.bf16.msra.mxu0 %v16607_v15  ;;  %14847 = vmatprep.subr.bf16.mxu1 %v16958_v20  ;;  %v16664_v15 = vld [vmem:[%s21917_s1 + $0x25b4] ss:$12 sps:$4 sm:$0xff]  }
 0x4c9   :  { %10144 = vmatprep.subr.bf16.mxu0 %v16614_v26  ;;  %v16668_v26 = vld [vmem:[%s21917_s1 + $0x25e0] ss:$12 sps:$4 sm:$0xff]  }
 0x4ca   :  { %11458 = vmatmul.mubr.bf16.vlgmr.msra.gmra.mrb[116].mxu1 %v21112_v18 }
 0x4cb   :  { %14848 = vmatpush3.bf16.msra.mxu1 %v16615_v46  ;;  %14851 = vmatprep.mubr.msk.bf16.mxu1 %vm16959_vm1, %v16958_v20  ;;  %v16671_v46 = vld [vmem:[%s21917_s1 + $0x25f8] ss:$12 sps:$4 sm:$0xff]  }
 0x4cc   :  { %10145 = vmatpush1.bf16.msra.mxu0 %v16612_v49  ;;  %14849 = vmatprep.subr.bf16.mxu1 %v16958_v20  ;;  %v16673_v49 = vld [vmem:[%s21917_s1 + $0x25fc] ss:$12 sps:$4 sm:$0xff]  }
 0x4cd   :  { %10146 = vmatprep.subr.bf16.mxu0 %v16618_v14  ;;  %v16676_v14 = vld [vmem:[%s21917_s1 + $0x2614] ss:$12 sps:$4 sm:$0xff]  }
 0x4cf   :  { %14850 = vmatpush3.bf16.msra.mxu1 %v16619_v21  ;;  %v16679_v21 = vld [vmem:[%s21917_s1 + $0x262c] ss:$12 sps:$4 sm:$0xff]  }
 0x4d0   :  { %10147 = vmatpush1.bf16.msra.mxu0 %v16616_v59  ;;  %v16674_v59 = vld [vmem:[%s21917_s1 + $0x2610] ss:$12 sps:$4 sm:$0xff]  }
 0x4d1   :  { %10148 = vmatprep.subr.bf16.mxu0 %v16622_v24  ;;  %v16677_v24 = vld [vmem:[%s21917_s1 + $0x2628] ss:$12 sps:$4 sm:$0xff]  }
 0x4d2   :  { %14852 = vmatmul.mubr.msk.bf16.vlgmr.msra.gmra.mrb[120].mxu1 %vm9152_vm0, %v18113_v55  ;;  %v16631_v55 = vld [vmem:[%s21917_s1 + $0x24ac] ss:$12 sps:$4 sm:$0xff]  }
 0x4d4   :  { %10149 = vmatpush1.bf16.msra.mxu0 %v16620_v48  ;;  %v16682_v48 = vld [vmem:[%s21917_s1 + $0x2644] ss:$12 sps:$4 sm:$0xff]  }
 0x4d5   :  { %10150 = vmatprep.subr.bf16.mxu0 %v16625_v27 }
 0x4d8   :  { %10151 = vmatpush1.bf16.msra.mxu0 %v16623_v30 }
 0x4d9   :  { %10152 = vmatprep.subr.bf16.mxu0 %v16628_v29 }
 0x4dc   :  { %10153 = vmatpush1.bf16.msra.mxu0 %v16626_v31  ;;  %v16680_v31 = vld [vmem:[%s21917_s1 + $0x2640] ss:$12 sps:$4 sm:$0xff]  }
 0x4dd   :  { %10154 = vmatprep.subr.bf16.mxu0 %v16631_v55  ;;  %v14654_v40 = vpop.f32.mrb[92].mxu1 }
 0x4de   :  { %v14655_v10 = vpop.f32.mrb[93].mxu1 }
 0x4df   :  { %v14656_v19 = vadd.f32 %v14655_v10, %v14654_v40  ;;  %v14657_v51 = vpop.f32.mrb[94].mxu1  ;;  %v16683_v10 = vld [vmem:[%s21917_s1 + $0x2658] ss:$12 sps:$4 sm:$0xff]  }
 0x4e0   :  { %10155 = vmatpush1.bf16.msra.mxu0 %v16629_v37  ;;  %v14658_v36 = vpop.f32.mrb[95].mxu1  ;;  %v16685_v37 = vld [vmem:[%s21917_s1 + $0x265c] ss:$12 sps:$4 sm:$0xff]   ;;  %v16691_v51 = vld [vmem:[%s21917_s1 + $0x268c] ss:$12 sps:$4 sm:$0xff]  }
 0x4e1   :  { %10156 = vmatprep.subr.bf16.mxu0 %v16634_v43  ;;  %v11220_v25 = vadd.f32 %v14656_v19, %v11180_v45  ;;  %v16659_v45 = vld [vmem:[%s21917_s1 + $0x2598] ss:$12 sps:$4 sm:$0xff]   ;;  %v16688_v19 = vld [vmem:[%s21917_s1 + $0x2674] ss:$12 sps:$4 sm:$0xff]  }
 0x4e2   :  { %v16694_v36 = vld [vmem:[%s21917_s1 + $0x26a4] ss:$12 sps:$4 sm:$0xff]  }
 0x4e4   :  { %10157 = vmatpush1.bf16.msra.mxu0 %v16632_v61  ;;  %v16686_v61 = vld [vmem:[%s21917_s1 + $0x2670] ss:$12 sps:$4 sm:$0xff]  }
 0x4e5   :  { %10158 = vmatprep.subr.bf16.mxu0 %v16637_v54  ;;  %v16689_v54 = vld [vmem:[%s21917_s1 + $0x2688] ss:$12 sps:$4 sm:$0xff]  }
 0x4e8   :  { %10159 = vmatpush1.bf16.msra.mxu0 %v16635_v57  ;;  %v16697_v57 = vld [vmem:[%s21917_s1 + $0x26bc] ss:$12 sps:$4 sm:$0xff]  }
 0x4e9   :  { %10160 = vmatprep.subr.bf16.mxu0 %v16640_v50  ;;  %v16695_v50 = vld [vmem:[%s21917_s1 + $0x26b8] ss:$12 sps:$4 sm:$0xff]  }
 0x4ec   :  { %10161 = vmatpush1.bf16.msra.mxu0 %v16638_v60  ;;  %v16700_v60 = vld [vmem:[%s21917_s1 + $0x26d4] ss:$12 sps:$4 sm:$0xff]  }
 0x4ed   :  { %10162 = vmatprep.subr.bf16.mxu0 %v16643_v4  ;;  %v16698_v4 = vld [vmem:[%s21917_s1 + $0x26d0] ss:$12 sps:$4 sm:$0xff]  }
 0x4f0   :  { %10163 = vmatpush1.bf16.msra.mxu0 %v16641_v41  ;;  %v16703_v41 = vld [vmem:[%s21917_s1 + $0x26ec] ss:$12 sps:$4 sm:$0xff]  }
 0x4f1   :  { %10164 = vmatprep.subr.bf16.mxu0 %v16646_v6  ;;  %v16701_v6 = vld [vmem:[%s21917_s1 + $0x26e8] ss:$12 sps:$4 sm:$0xff]  }
 0x4f4   :  { %10165 = vmatpush1.bf16.msra.mxu0 %v16644_v33  ;;  %v16706_v33 = vld [vmem:[%s21917_s1 + $0x2704] ss:$12 sps:$4 sm:$0xff]  }
 0x4f5   :  { %10166 = vmatprep.subr.bf16.mxu0 %v16649_v63 }
 0x4f8   :  { %10167 = vmatpush1.bf16.msra.mxu0 %v16647_v38 }
 0x4f9   :  { %10168 = vmatprep.subr.bf16.mxu0 %v16652_v1 }
 0x4fc   :  { %10169 = vmatpush1.bf16.msra.mxu0 %v16650_v9  ;;  %v16704_v9 = vld [vmem:[%s21917_s1 + $0x2700] ss:$12 sps:$4 sm:$0xff]  }
 0x4fd   :  { %10170 = vmatprep.subr.bf16.mxu0 %v16655_v5  ;;  %v14676_v39 = vpop.f32.mrb[96].mxu1 }
 0x4fe   :  { %v14677_v13 = vpop.f32.mrb[97].mxu1 }
 0x4ff   :  { %v14678_v16 = vadd.f32 %v14677_v13, %v14676_v39  ;;  %v14679_v34 = vpop.f32.mrb[98].mxu1  ;;  %v16707_v13 = vld [vmem:[%s21917_s1 + $0x2718] ss:$12 sps:$4 sm:$0xff]  }
 0x500   :  { %10171 = vmatpush1.bf16.msra.mxu0 %v16653_v0  ;;  %v14680_v32 = vpop.f32.mrb[99].mxu1  ;;  %v16709_v0 = vld [vmem:[%s21917_s1 + $0x271c] ss:$12 sps:$4 sm:$0xff]  }
 0x501   :  { %10181 = vmatprep.subr.bf16.mxu0 %v16658_v8  ;;  %v11260_v42 = vadd.f32 %v14678_v16, %v11220_v25  ;;  %v16692_v25 = vld [vmem:[%s21917_s1 + $0x26a0] ss:$12 sps:$4 sm:$0xff]   ;;  %v16805_v34 = vld [vmem:[%s21920_s2 + $0x1c] ss:$12 sps:$4 sm:$0xff]   ;;  %v16803_v32 = vld [vmem:[%s21920_s2 + $0x18] ss:$12 sps:$4 sm:$0xff]  }
 0x502   :  { %v16712_v16 = vld [vmem:[%s21917_s1 + $0x2734] ss:$12 sps:$4 sm:$0xff]  }
 0x503   :  { %10173 = vmatmul.mubr.bf16.vlgmr.msra.gmra.mrb[0].mxu0 %v20780_v2  ;;  %v16667_v2 = vld [vmem:[%s21917_s1 + $0x25cc] ss:$12 sps:$4 sm:$0xff]  }
 0x504   :  { %10182 = vmatpush1.bf16.msra.mxu0 %v16656_v7  ;;  %10213 = vmatprep.mubr.bf16.mxu0 %v20797_v23  ;;  %v16665_v23 = vld [vmem:[%s21917_s1 + $0x25c8] ss:$12 sps:$4 sm:$0xff]   ;;  %v16800_v7 = vld [vmem:[%s21920_s2] ss:$12 sps:$4 sm:$0xff]  }
 0x505   :  { %10183 = vmatprep.subr.bf16.mxu0 %v16661_v53  ;;  %v16710_v53 = vld [vmem:[%s21917_s1 + $0x2730] ss:$12 sps:$4 sm:$0xff]  }
 0x508   :  { %10184 = vmatpush1.bf16.msra.mxu0 %v16659_v45  ;;  %v16713_v45 = vld [vmem:[%s21917_s1 + $0x2748] ss:$12 sps:$4 sm:$0xff]  }
 0x509   :  { %10185 = vmatprep.subr.bf16.mxu0 %v16664_v15  ;;  %v16718_v15 = vld [vmem:[%s21917_s1 + $0x2764] ss:$12 sps:$4 sm:$0xff]  }
 0x50c   :  { %10186 = vmatpush1.bf16.msra.mxu0 %v16662_v17  ;;  %v16806_v17 = vld [vmem:[%s21920_s2 + $0x30] ss:$12 sps:$4 sm:$0xff]  }
 0x50d   :  { %10187 = vmatprep.subr.bf16.mxu0 %v16667_v2  ;;  %v16811_v2 = vld [vmem:[%s21920_s2 + $0x4c] ss:$12 sps:$4 sm:$0xff]  }
 0x510   :  { %10188 = vmatpush1.bf16.msra.mxu0 %v16665_v23  ;;  %v16716_v23 = vld [vmem:[%s21917_s1 + $0x2760] ss:$12 sps:$4 sm:$0xff]  }
 0x511   :  { %10189 = vmatprep.subr.bf16.mxu0 %v16670_v28  ;;  %v16721_v28 = vld [vmem:[%s21917_s1 + $0x277c] ss:$12 sps:$4 sm:$0xff]  }
 0x514   :  { %10190 = vmatpush1.bf16.msra.mxu0 %v16668_v26  ;;  %v16809_v26 = vld [vmem:[%s21920_s2 + $0x48] ss:$12 sps:$4 sm:$0xff]  }
 0x515   :  { %10191 = vmatprep.subr.bf16.mxu0 %v16673_v49  ;;  %v16814_v49 = vld [vmem:[%s21920_s2 + $0x64] ss:$12 sps:$4 sm:$0xff]  }
 0x518   :  { %10192 = vmatpush1.bf16.msra.mxu0 %v16671_v46  ;;  %v16719_v46 = vld [vmem:[%s21917_s1 + $0x2778] ss:$12 sps:$4 sm:$0xff]  }
 0x519   :  { %10193 = vmatprep.subr.bf16.mxu0 %v16676_v14  ;;  %v16724_v14 = vld [vmem:[%s21917_s1 + $0x2794] ss:$12 sps:$4 sm:$0xff]  }
 0x51c   :  { %10194 = vmatpush1.bf16.msra.mxu0 %v16674_v59  ;;  %v16812_v59 = vld [vmem:[%s21920_s2 + $0x60] ss:$12 sps:$4 sm:$0xff]  }
 0x51d   :  { %10195 = vmatprep.subr.bf16.mxu0 %v16679_v21  ;;  %v14698_v27 = vpop.f32.mrb[100].mxu1  ;;  %v16817_v21 = vld [vmem:[%s21920_s2 + $0x7c] ss:$12 sps:$4 sm:$0xff]  }
 0x51e   :  { %v14699_v30 = vpop.f32.mrb[101].mxu1 }
 0x51f   :  { %v14700_v29 = vadd.f32 %v14699_v30, %v14698_v27  ;;  %v14701_v55 = vpop.f32.mrb[102].mxu1  ;;  %v16727_v27 = vld [vmem:[%s21917_s1 + $0x27ac] ss:$12 sps:$4 sm:$0xff]   ;;  %v16820_v30 = vld [vmem:[%s21920_s2 + $0x94] ss:$12 sps:$4 sm:$0xff]  }
 0x520   :  { %10196 = vmatpush1.bf16.msra.mxu0 %v16677_v24  ;;  %v14702_v43 = vpop.f32.mrb[103].mxu1  ;;  %v16722_v24 = vld [vmem:[%s21917_s1 + $0x2790] ss:$12 sps:$4 sm:$0xff]  }
 0x521   :  { %10197 = vmatprep.subr.bf16.mxu0 %v16682_v48  ;;  %v11300_v40 = vadd.f32 %v14700_v29, %v11260_v42  ;;  %v16808_v42 = vld [vmem:[%s21920_s2 + $0x34] ss:$12 sps:$4 sm:$0xff]   ;;  %v16815_v48 = vld [vmem:[%s21920_s2 + $0x78] ss:$12 sps:$4 sm:$0xff]  }
 0x522   :  { %v16725_v29 = vld [vmem:[%s21917_s1 + $0x27a8] ss:$12 sps:$4 sm:$0xff]   ;;  %v16730_v55 = vld [vmem:[%s21917_s1 + $0x27c4] ss:$12 sps:$4 sm:$0xff]  }
 0x524   :  { %10198 = vmatpush1.bf16.msra.mxu0 %v16680_v31  ;;  %v16818_v31 = vld [vmem:[%s21920_s2 + $0x90] ss:$12 sps:$4 sm:$0xff]  }
 0x525   :  { %10199 = vmatprep.subr.bf16.mxu0 %v16685_v37  ;;  %v16823_v37 = vld [vmem:[%s21920_s2 + $0xac] ss:$12 sps:$4 sm:$0xff]  }
 0x528   :  { %10200 = vmatpush1.bf16.msra.mxu0 %v16683_v10  ;;  %v16821_v10 = vld [vmem:[%s21920_s2 + $0xa8] ss:$12 sps:$4 sm:$0xff]  }
 0x529   :  { %10201 = vmatprep.subr.bf16.mxu0 %v16688_v19 }
 0x52c   :  { %10202 = vmatpush1.bf16.msra.mxu0 %v16686_v61  ;;  %v16733_v61 = vld [vmem:[%s21917_s1 + $0x27dc] ss:$12 sps:$4 sm:$0xff]  }
 0x52d   :  { %10203 = vmatprep.subr.bf16.mxu0 %v16691_v51  ;;  %v16826_v51 = vld [vmem:[%s21920_s2 + $0xc4] ss:$12 sps:$4 sm:$0xff]  }
 0x530   :  { %10204 = vmatpush1.bf16.msra.mxu0 %v16689_v54 }
 0x531   :  { %10205 = vmatprep.subr.bf16.mxu0 %v16694_v36 }
 0x534   :  { %10206 = vmatpush1.bf16.msra.mxu0 %v16692_v25 }
 0x535   :  { %10207 = vmatprep.subr.bf16.mxu0 %v16697_v57 }
 0x538   :  { %10208 = vmatpush1.bf16.msra.mxu0 %v16695_v50  ;;  %v16731_v50 = vld [vmem:[%s21917_s1 + $0x27d8] ss:$12 sps:$4 sm:$0xff]  }
 0x539   :  { %10209 = vmatprep.subr.bf16.mxu0 %v16700_v60  ;;  %v16824_v60 = vld [vmem:[%s21920_s2 + $0xc0] ss:$12 sps:$4 sm:$0xff]  }
 0x53c   :  { %10210 = vmatpush1.bf16.msra.mxu0 %v16698_v4  ;;  %v16736_v4 = vld [vmem:[%s21917_s1 + $0x27f4] ss:$12 sps:$4 sm:$0xff]  }
 0x53d   :  { %10211 = vmatprep.subr.bf16.mxu0 %v16703_v41  ;;  %v14720_v63 = vpop.f32.mrb[104].mxu1  ;;  %v16829_v41 = vld [vmem:[%s21920_s2 + $0xdc] ss:$12 sps:$4 sm:$0xff]  }
 0x53e   :  { %v14721_v38 = vpop.f32.mrb[105].mxu1 }
 0x53f   :  { %v14722_v1 = vadd.f32 %v14721_v38, %v14720_v63  ;;  %v14723_v5 = vpop.f32.mrb[106].mxu1  ;;  %v16739_v63 = vld [vmem:[%s21917_s1 + $0x280c] ss:$12 sps:$4 sm:$0xff]   ;;  %v16832_v38 = vld [vmem:[%s21920_s2 + $0xf4] ss:$12 sps:$4 sm:$0xff]  }
 0x540   :  { %10212 = vmatpush1.bf16.msra.mxu0 %v16701_v6  ;;  %v14724_v8 = vpop.f32.mrb[107].mxu1  ;;  %v16734_v6 = vld [vmem:[%s21917_s1 + $0x27f0] ss:$12 sps:$4 sm:$0xff]  }
 0x541   :  { %10222 = vmatprep.subr.bf16.mxu0 %v16706_v33  ;;  %v21315_v39 = vadd.f32 %v14722_v1, %v11300_v40  ;;  %v16728_v40 = vld [vmem:[%s21917_s1 + $0x27c0] ss:$12 sps:$4 sm:$0xff]   ;;  %v16827_v33 = vld [vmem:[%s21920_s2 + $0xd8] ss:$12 sps:$4 sm:$0xff]   ;;  %v16737_v1 = vld [vmem:[%s21917_s1 + $0x2808] ss:$12 sps:$4 sm:$0xff]  }
 0x542   :  { %v16742_v5 = vld [vmem:[%s21917_s1 + $0x2824] ss:$12 sps:$4 sm:$0xff]   ;;  %v16740_v8 = vld [vmem:[%s21917_s1 + $0x2820] ss:$12 sps:$4 sm:$0xff]  }
 0x543   :  { %10214 = vmatmul.mubr.bf16.vlgmr.msra.gmra.mrb[0].mxu0 %v20893_v47  ;;  %v16802_v47 = vld [vmem:[%s21920_s2 + $0x4] ss:$12 sps:$4 sm:$0xff]  }
 0x544   :  { %10223 = vmatpush1.bf16.msra.mxu0 %v16704_v9  ;;  %10254 = vmatprep.mubr.bf16.mxu0 %v20910_v58  ;;  %v16715_v58 = vld [vmem:[%s21917_s1 + $0x274c] ss:$12 sps:$4 sm:$0xff]   ;;  %v16830_v9 = vld [vmem:[%s21920_s2 + $0xf0] ss:$12 sps:$4 sm:$0xff]  }
 0x545   :  { %10224 = vmatprep.subr.bf16.mxu0 %v16709_v0  ;;  %11920 = vmatprep.subr.bf16.mxu1 %v16802_v47  ;;  %v16835_v0 = vld [vmem:[%s21920_s2 + $0x10c] ss:$12 sps:$4 sm:$0xff]  }
 0x546   :  { %11921 = vmatpush1.bf16.msra.mxu1 %v16800_v7  ;;  %v16743_v7 = vld [vmem:[%s21917_s1 + $0x2838] ss:$12 sps:$4 sm:$0xff]   ;;  %v16836_v47 = vld [vmem:[%s21920_s2 + $0x120] ss:$12 sps:$4 sm:$0xff]  }
 0x547   :  { %11922 = vmatprep.subr.bf16.mxu1 %v16805_v34  ;;  %v16748_v34 = vld [vmem:[%s21917_s1 + $0x2854] ss:$12 sps:$4 sm:$0xff]  }
 0x548   :  { %10225 = vmatpush1.bf16.msra.mxu0 %v16707_v13  ;;  %v16745_v13 = vld [vmem:[%s21917_s1 + $0x283c] ss:$12 sps:$4 sm:$0xff]  }
 0x549   :  { %10226 = vmatprep.subr.bf16.mxu0 %v16712_v16  ;;  %v16838_v16 = vld [vmem:[%s21920_s2 + $0x124] ss:$12 sps:$4 sm:$0xff]  }
 0x54a   :  { %11923 = vmatpush1.bf16.msra.mxu1 %v16803_v32  ;;  %v16839_v32 = vld [vmem:[%s21920_s2 + $0x138] ss:$12 sps:$4 sm:$0xff]  }
 0x54b   :  { %11924 = vmatprep.subr.bf16.mxu1 %v16808_v42  ;;  %v16751_v42 = vld [vmem:[%s21917_s1 + $0x286c] ss:$12 sps:$4 sm:$0xff]  }
 0x54c   :  { %10227 = vmatpush1.bf16.msra.mxu0 %v16710_v53  ;;  %v16841_v53 = vld [vmem:[%s21920_s2 + $0x13c] ss:$12 sps:$4 sm:$0xff]  }
 0x54d   :  { %10228 = vmatprep.subr.bf16.mxu0 %v16715_v58  ;;  %v16746_v58 = vld [vmem:[%s21917_s1 + $0x2850] ss:$12 sps:$4 sm:$0xff]  }
 0x54e   :  { %11925 = vmatpush1.bf16.msra.mxu1 %v16806_v17 }
 0x54f   :  { %11926 = vmatprep.subr.bf16.mxu1 %v16811_v2 }
 0x550   :  { %10229 = vmatpush1.bf16.msra.mxu0 %v16713_v45  ;;  %v16749_v45 = vld [vmem:[%s21917_s1 + $0x2868] ss:$12 sps:$4 sm:$0xff]  }
 0x551   :  { %10230 = vmatprep.subr.bf16.mxu0 %v16718_v15  ;;  %v16754_v15 = vld [vmem:[%s21917_s1 + $0x2884] ss:$12 sps:$4 sm:$0xff]  }
 0x552   :  { %11927 = vmatpush1.bf16.msra.mxu1 %v16809_v26 }
 0x553   :  { %11928 = vmatprep.subr.bf16.mxu1 %v16814_v49  ;;  %v16757_v49 = vld [vmem:[%s21917_s1 + $0x289c] ss:$12 sps:$4 sm:$0xff]  }
 0x554   :  { %10231 = vmatpush1.bf16.msra.mxu0 %v16716_v23 }
 0x555   :  { %10232 = vmatprep.subr.bf16.mxu0 %v16721_v28  ;;  %v16752_v28 = vld [vmem:[%s21917_s1 + $0x2880] ss:$12 sps:$4 sm:$0xff]  }
 0x556   :  { %11929 = vmatpush1.bf16.msra.mxu1 %v16812_v59  ;;  %v16755_v59 = vld [vmem:[%s21917_s1 + $0x2898] ss:$12 sps:$4 sm:$0xff]  }
 0x557   :  { %11930 = vmatprep.subr.bf16.mxu1 %v16817_v21  ;;  %v16760_v21 = vld [vmem:[%s21917_s1 + $0x28b4] ss:$12 sps:$4 sm:$0xff]  }
 0x558   :  { %10233 = vmatpush1.bf16.msra.mxu0 %v16719_v46 }
 0x559   :  { %10234 = vmatprep.subr.bf16.mxu0 %v16724_v14 }
 0x55a   :  { %11931 = vmatpush1.bf16.msra.mxu1 %v16815_v48  ;;  %v16766_v48 = vld [vmem:[%s21917_s1 + $0x28e4] ss:$12 sps:$4 sm:$0xff]  }
 0x55b   :  { %11932 = vmatprep.subr.bf16.mxu1 %v16820_v30  ;;  %v16769_v30 = vld [vmem:[%s21917_s1 + $0x28fc] ss:$12 sps:$4 sm:$0xff]  }
 0x55c   :  { %10235 = vmatpush1.bf16.msra.mxu0 %v16722_v24  ;;  %v16758_v24 = vld [vmem:[%s21917_s1 + $0x28b0] ss:$12 sps:$4 sm:$0xff]  }
 0x55d   :  { %10236 = vmatprep.subr.bf16.mxu0 %v16727_v27  ;;  %v14742_v43 = vpop.f32.mrb[108].mxu1  ;;  %v16764_v27 = vld [vmem:[%s21917_s1 + $0x28e0] ss:$12 sps:$4 sm:$0xff]  }
 0x55e   :  { %v14743_v19 = vpop.f32.mrb[109].mxu1  ;;  %11933 = vmatpush1.bf16.msra.mxu1 %v16818_v31  ;;  %v16772_v31 = vld [vmem:[%s21917_s1 + $0x2914] ss:$12 sps:$4 sm:$0xff]  }
 0x55f   :  { %v14744_v54 = vadd.f32 %v14743_v19, %v14742_v43  ;;  %v14745_v36 = vpop.f32.mrb[110].mxu1  ;;  %11934 = vmatprep.subr.bf16.mxu1 %v16823_v37  ;;  %v16775_v37 = vld [vmem:[%s21917_s1 + $0x292c] ss:$12 sps:$4 sm:$0xff]   ;;  %v16773_v43 = vld [vmem:[%s21917_s1 + $0x2928] ss:$12 sps:$4 sm:$0xff]  }
 0x560   :  { %10237 = vmatpush1.bf16.msra.mxu0 %v16725_v29  ;;  %v14746_v25 = vpop.f32.mrb[111].mxu1  ;;  %v16767_v29 = vld [vmem:[%s21917_s1 + $0x28f8] ss:$12 sps:$4 sm:$0xff]  }
 0x561   :  { %10238 = vmatprep.subr.bf16.mxu0 %v16730_v55  ;;  %v11380_v57 = vadd.f32 %v14744_v54, %v21315_v39  ;;  %v16833_v39 = vld [vmem:[%s21920_s2 + $0x108] ss:$12 sps:$4 sm:$0xff]   ;;  %v16770_v55 = vld [vmem:[%s21917_s1 + $0x2910] ss:$12 sps:$4 sm:$0xff]  }
 0x562   :  { %11935 = vmatpush1.bf16.msra.mxu1 %v16821_v10  ;;  %v16781_v25 = vld [vmem:[%s21917_s1 + $0x295c] ss:$12 sps:$4 sm:$0xff]  }
 0x563   :  { %11936 = vmatprep.subr.bf16.mxu1 %v16826_v51  ;;  %v16776_v51 = vld [vmem:[%s21917_s1 + $0x2940] ss:$12 sps:$4 sm:$0xff]  }
 0x564   :  { %10239 = vmatpush1.bf16.msra.mxu0 %v16728_v40  ;;  %v16778_v40 = vld [vmem:[%s21917_s1 + $0x2944] ss:$12 sps:$4 sm:$0xff]  }
 0x565   :  { %10240 = vmatprep.subr.bf16.mxu0 %v16733_v61 }
 0x566   :  { %11937 = vmatpush1.bf16.msra.mxu1 %v16824_v60  ;;  %v16784_v60 = vld [vmem:[%s21917_s1 + $0x2974] ss:$12 sps:$4 sm:$0xff]  }
 0x567   :  { %11938 = vmatprep.subr.bf16.mxu1 %v16829_v41 }
 0x568   :  { %10241 = vmatpush1.bf16.msra.mxu0 %v16731_v50  ;;  %v16779_v50 = vld [vmem:[%s21917_s1 + $0x2958] ss:$12 sps:$4 sm:$0xff]  }
 0x569   :  { %10242 = vmatprep.subr.bf16.mxu0 %v16736_v4 }
 0x56a   :  { %11939 = vmatpush1.bf16.msra.mxu1 %v16827_v33  ;;  %v16782_v33 = vld [vmem:[%s21917_s1 + $0x2970] ss:$12 sps:$4 sm:$0xff]  }
 0x56b   :  { %11940 = vmatprep.subr.bf16.mxu1 %v16832_v38  ;;  %v16787_v38 = vld [vmem:[%s21917_s1 + $0x298c] ss:$12 sps:$4 sm:$0xff]  }
 0x56c   :  { %10243 = vmatpush1.bf16.msra.mxu0 %v16734_v6 }
 0x56d   :  { %10244 = vmatprep.subr.bf16.mxu0 %v16739_v63 }
 0x56e   :  { %11941 = vmatpush1.bf16.msra.mxu1 %v16830_v9  ;;  %v16785_v9 = vld [vmem:[%s21917_s1 + $0x2988] ss:$12 sps:$4 sm:$0xff]  }
 0x56f   :  { %11942 = vmatprep.subr.bf16.mxu1 %v16835_v0  ;;  %v16788_v0 = vld [vmem:[%s21917_s1 + $0x29a0] ss:$12 sps:$4 sm:$0xff]  }
 0x570   :  { %10245 = vmatpush1.bf16.msra.mxu0 %v16737_v1 }
 0x571   :  { %10246 = vmatprep.subr.bf16.mxu0 %v16742_v5  ;;  %v16790_v5 = vld [vmem:[%s21917_s1 + $0x29a4] ss:$12 sps:$4 sm:$0xff]  }
 0x572   :  { %11943 = vmatpush1.bf16.msra.mxu1 %v16833_v39  ;;  %v16791_v39 = vld [vmem:[%s21917_s1 + $0x29b8] ss:$12 sps:$4 sm:$0xff]  }
 0x573   :  { %11944 = vmatprep.subr.bf16.mxu1 %v16838_v16  ;;  %v16794_v16 = vld [vmem:[%s21917_s1 + $0x29d0] ss:$12 sps:$4 sm:$0xff]  }
 0x574   :  { %10247 = vmatpush1.bf16.msra.mxu0 %v16740_v8  ;;  %v16793_v8 = vld [vmem:[%s21917_s1 + $0x29bc] ss:$12 sps:$4 sm:$0xff]  }
 0x575   :  { %10248 = vmatprep.subr.bf16.mxu0 %v16745_v13  ;;  %v16796_v13 = vld [vmem:[%s21917_s1 + $0x29d4] ss:$12 sps:$4 sm:$0xff]  }
 0x576   :  { %11945 = vmatpush1.bf16.msra.mxu1 %v16836_v47  ;;  %v16797_v47 = vld [vmem:[%s21917_s1 + $0x29e8] ss:$12 sps:$4 sm:$0xff]  }
 0x577   :  { %11946 = vmatprep.subr.bf16.mxu1 %v16841_v53  ;;  %v16842_v53 = vld [vmem:[%s21920_s2 + $0x150] ss:$12 sps:$4 sm:$0xff]  }
 0x578   :  { %10249 = vmatpush1.bf16.msra.mxu0 %v16743_v7  ;;  %v16799_v7 = vld [vmem:[%s21917_s1 + $0x29ec] ss:$12 sps:$4 sm:$0xff]  }
 0x579   :  { %10250 = vmatprep.subr.bf16.mxu0 %v16748_v34  ;;  %v16844_v34 = vld [vmem:[%s21920_s2 + $0x154] ss:$12 sps:$4 sm:$0xff]  }
 0x57a   :  { %11947 = vmatpush1.bf16.msra.mxu1 %v16839_v32  ;;  %v16845_v32 = vld [vmem:[%s21920_s2 + $0x168] ss:$12 sps:$4 sm:$0xff]  }
 0x57b   :  { %11948 = vmatprep.subr.bf16.mxu1 %v16844_v34  ;;  %v16888_v34 = vld [vmem:[%s21921_s3 + $0x60] ss:$12 sps:$4 sm:$0xff]  }
 0x57c   :  { %10251 = vmatpush1.bf16.msra.mxu0 %v16746_v58  ;;  %v16847_v58 = vld [vmem:[%s21920_s2 + $0x16c] ss:$12 sps:$4 sm:$0xff]  }
 0x57d   :  { %10252 = vmatprep.subr.bf16.mxu0 %v16751_v42  ;;  %v14764_v17 = vpop.f32.mrb[112].mxu1  ;;  %v21608_v42 = vsub.s32 0, %v19271_v56 }
 0x57e   :  { %v14765_v2 = vpop.f32.mrb[113].mxu1  ;;  %11949 = vmatpush1.bf16.msra.mxu1 %v16842_v53  ;;  %v16893_v53 = vld [vmem:[%s21921_s3 + $0x7c] ss:$12 sps:$4 sm:$0xff]  }
 0x57f   :  { %v14766_v23 = vadd.f32 %v14765_v2, %v14764_v17  ;;  %v14767_v26 = vpop.f32.mrb[114].mxu1  ;;  %11950 = vmatprep.subr.bf16.mxu1 %v16847_v58  ;;  %v16891_v58 = vld [vmem:[%s21921_s3 + $0x78] ss:$12 sps:$4 sm:$0xff]  }
 0x580   :  { %10253 = vmatpush1.bf16.msra.mxu0 %v16749_v45  ;;  %v14768_v46 = vpop.f32.mrb[115].mxu1  ;;  %v21611_v45 = vsub.s32 1, %v19271_v56 }
 0x581   :  { %10263 = vmatprep.subr.bf16.mxu0 %v16754_v15  ;;  %v11420_v14 = vadd.f32 %v14766_v23, %v11380_v57  ;;  %v16956_v15 = vld [vmem:[%s21919_s4] ss:$8 sm:$0x7] }
 0x582   :  { %11951 = vmatpush1.bf16.msra.mxu1 %v16845_v32  ;;  %v1940_v17 = vrot.slane %v16956_v15, %v21608_v42  ;;  %v1944_v2 = vrot.slane %v16956_v15, %v21611_v45  ;;  %v16896_v32 = vld [vmem:[%s21921_s3 + $0x94] ss:$12 sps:$4 sm:$0xff]   ;;  %v16899_v15 = vld [vmem:[%s21921_s3 + $0xac] ss:$12 sps:$4 sm:$0xff]  }
 0x583   :  { %10255 = vmatmul.mubr.bf16.vlgmr.msra.gmra.mrb[0].mxu0 %v21004_v12  ;;  %v16763_v12 = vld [vmem:[%s21917_s1 + $0x28cc] ss:$12 sps:$4 sm:$0xff]  }
 0x584   :  { %10264 = vmatpush1.bf16.msra.mxu0 %v16752_v28  ;;  %10295 = vmatprep.mubr.bf16.mxu0 %v21021_v44  ;;  %v16761_v44 = vld [vmem:[%s21917_s1 + $0x28c8] ss:$12 sps:$4 sm:$0xff]   ;;  %v14875_v23 = vadd.f32 %v18787_v22, %v1940_v17  ;;  %v14878_v28 = vadd.f32 %v18792_v35, %v1944_v2  ;;  %v16902_v2 = vld [vmem:[%s21921_s3 + $0xc4] ss:$12 sps:$4 sm:$0xff]  }
 0x585   :  { %10265 = vmatprep.subr.bf16.mxu0 %v16757_v49  ;;  %v16853_v35 = vld [vmem:[%s21920_s2 + $0x19c] ss:$12 sps:$4 sm:$0xff]  }
 0x586   :  { %v16897_v17 = vld [vmem:[%s21921_s3 + $0xa8] ss:$12 sps:$4 sm:$0xff]  }
 0x588   :  { %10266 = vmatpush1.bf16.msra.mxu0 %v16755_v59 }
 0x589   :  { %10267 = vmatprep.subr.bf16.mxu0 %v16760_v21 }
 0x58c   :  { %10268 = vmatpush1.bf16.msra.mxu0 %v16758_v24 }
 0x58d   :  { %10269 = vmatprep.subr.bf16.mxu0 %v16763_v12 }
 0x590   :  { %10270 = vmatpush1.bf16.msra.mxu0 %v16761_v44 }
 0x591   :  { %10271 = vmatprep.subr.bf16.mxu0 %v16766_v48 }
 0x594   :  { %10272 = vmatpush1.bf16.msra.mxu0 %v16764_v27  ;;  %v16848_v27 = vld [vmem:[%s21920_s2 + $0x180] ss:$12 sps:$4 sm:$0xff]  }
 0x595   :  { %10273 = vmatprep.subr.bf16.mxu0 %v16769_v30  ;;  %v16856_v30 = vld [vmem:[%s21920_s2 + $0x1b0] ss:$12 sps:$4 sm:$0x3f]  }
 0x598   :  { %10274 = vmatpush1.bf16.msra.mxu0 %v16767_v29 }
 0x599   :  { %10275 = vmatprep.subr.bf16.mxu0 %v16772_v31  ;;  %v11912_v31 = vsel %vm11910_vm2, %v16856_v30, 0 }
 0x59c   :  { %10276 = vmatpush1.bf16.msra.mxu0 %v16770_v55  ;;  %v16857_v55 = vld [vmem:[%s21920_s2 + $0xc8] ss:$12 sps:$4 sm:$0xff]  }
 0x59d   :  { %10277 = vmatprep.subr.bf16.mxu0 %v16775_v37  ;;  %v14786_v10 = vpop.f32.mrb[116].mxu1  ;;  %v16858_v37 = vld [vmem:[%s21920_s2 + $0x8] ss:$12 sps:$4 sm:$0xff]  }
 0x59e   :  { %v14787_v19 = vpop.f32.mrb[117].mxu1 }
 0x59f   :  { %v14788_v61 = vadd.f32 %v14787_v19, %v14786_v10  ;;  %v14789_v54 = vpop.f32.mrb[118].mxu1  ;;  %v16860_v10 = vld [vmem:[%s21920_s2 + $0x20] ss:$12 sps:$4 sm:$0xff]   ;;  %v16861_v19 = vld [vmem:[%s21920_s2 + $0xf8] ss:$12 sps:$4 sm:$0xff]  }
 0x5a0   :  { %10278 = vmatpush1.bf16.msra.mxu0 %v16773_v43  ;;  %v14790_v36 = vpop.f32.mrb[119].mxu1  ;;  %v16864_v54 = vld [vmem:[%s21920_s2 + $0x50] ss:$12 sps:$4 sm:$0xff]  }
 0x5a1   :  { %10279 = vmatprep.subr.bf16.mxu0 %v16778_v40  ;;  %v11460_v57 = vadd.f32 %v14788_v61, %v11420_v14  ;;  %v16859_v40 = vld [vmem:[%s21920_s2 + $0xe0] ss:$12 sps:$4 sm:$0xff]   ;;  %v16862_v61 = vld [vmem:[%s21920_s2 + $0x38] ss:$12 sps:$4 sm:$0xff]   ;;  %v16865_v36 = vld [vmem:[%s21920_s2 + $0x128] ss:$12 sps:$4 sm:$0xff]  }
 0x5a4   :  { %10280 = vmatpush1.bf16.msra.mxu0 %v16776_v51  ;;  %v16863_v51 = vld [vmem:[%s21920_s2 + $0x110] ss:$12 sps:$4 sm:$0xff]  }
 0x5a5   :  { %10281 = vmatprep.subr.bf16.mxu0 %v16781_v25  ;;  %v11499_v4 = vpop.f32.mrb[120].mxu1  ;;  %v16866_v25 = vld [vmem:[%s21920_s2 + $0x68] ss:$12 sps:$4 sm:$0xff]  }
 0x5a6   :  { %v21556_v41 = vadd.f32 %v11499_v4, %v11460_v57  ;;  %v14853_v6 = vpop.f32.mrb[121].mxu1  ;;  %v16867_v57 = vld [vmem:[%s21920_s2 + $0x140] ss:$12 sps:$4 sm:$0xff]   ;;  %v16870_v4 = vld [vmem:[%s21920_s2 + $0x98] ss:$12 sps:$4 sm:$0xff]  }
 0x5a7   :  { %v11502_v63 = vpop.f32.mrb[122].mxu1  ;;  %v16872_v6 = vld [vmem:[%s21920_s2 + $0xb0] ss:$12 sps:$4 sm:$0xff]  }
 0x5a8   :  { %10282 = vmatpush1.bf16.msra.mxu0 %v16779_v50  ;;  %v14854_v1 = vpop.f32.mrb[123].mxu1  ;;  %v11507_v29 = vmax.f32 %v21556_v41, 0.0  ;;  %v16868_v50 = vld [vmem:[%s21920_s2 + $0x80] ss:$12 sps:$4 sm:$0xff]   ;;  %v16871_v41 = vld [vmem:[%s21920_s2 + $0x170] ss:$12 sps:$4 sm:$0xff]  }
 0x5a9   :  { %10283 = vmatprep.subr.bf16.mxu0 %v16784_v60  ;;  %v16869_v60 = vld [vmem:[%s21920_s2 + $0x158] ss:$12 sps:$4 sm:$0xff]   ;;  %v16874_v63 = vld [vmem:[%s21920_s2 + $0x1a0] ss:$12 sps:$4 sm:$0xff]  }
 0x5aa   :  { %v11510_v43 = vpack.c.bf16 %v11507_v29, %v11507_v29 }
 0x5ac   :  { %10284 = vmatpush1.bf16.msra.mxu0 %v16782_v33  ;;  %v16873_v33 = vld [vmem:[%s21920_s2 + $0x188] ss:$12 sps:$4 sm:$0xff]  }
 0x5ad   :  { %10285 = vmatprep.subr.bf16.mxu0 %v16787_v38  ;;  %v16875_v38 = vld [vmem:[%s21920_s2 + $0x1b8] ss:$12 sps:$4 sm:$0x3f]  }
 0x5ae   :  { %v11918_v1 = vsel %vm11910_vm2, %v16875_v38, 0 }
 0x5b0   :  { %10286 = vmatpush1.bf16.msra.mxu0 %v16785_v9  ;;  %v16878_v9 = vld [vmem:[%s21921_s3 + $0x4] ss:$12 sps:$4 sm:$0xff]  }
 0x5b1   :  { %10287 = vmatprep.subr.bf16.mxu0 %v16790_v5  ;;  %v16876_v5 = vld [vmem:[%s21921_s3] ss:$12 sps:$4 sm:$0xff]  }
 0x5b4   :  { %10288 = vmatpush1.bf16.msra.mxu0 %v16788_v0  ;;  %v16881_v0 = vld [vmem:[%s21921_s3 + $0x1c] ss:$12 sps:$4 sm:$0xff]  }
 0x5b5   :  { %10289 = vmatprep.subr.bf16.mxu0 %v16793_v8  ;;  %v16879_v8 = vld [vmem:[%s21921_s3 + $0x18] ss:$12 sps:$4 sm:$0xff]  }
 0x5b8   :  { %10290 = vmatpush1.bf16.msra.mxu0 %v16791_v39  ;;  %v16884_v39 = vld [vmem:[%s21921_s3 + $0x34] ss:$12 sps:$4 sm:$0xff]  }
 0x5b9   :  { %10291 = vmatprep.subr.bf16.mxu0 %v16796_v13  ;;  %v16882_v13 = vld [vmem:[%s21921_s3 + $0x30] ss:$12 sps:$4 sm:$0xff]  }
 0x5bc   :  { %10292 = vmatpush1.bf16.msra.mxu0 %v16794_v16  ;;  %v16887_v16 = vld [vmem:[%s21921_s3 + $0x4c] ss:$12 sps:$4 sm:$0xff]  }
 0x5bd   :  { %10293 = vmatprep.subr.bf16.mxu0 %v16799_v7  ;;  %v16885_v7 = vld [vmem:[%s21921_s3 + $0x48] ss:$12 sps:$4 sm:$0xff]  }
 0x5c0   :  { %10294 = vmatpush1.bf16.msra.mxu0 %v16797_v47  ;;  %v16890_v47 = vld [vmem:[%s21921_s3 + $0x64] ss:$12 sps:$4 sm:$0xff]  }
 0x5c3   :  { %10296 = vmatmul.mubr.bf16.vlgmr.msra.gmra.mrb[0].mxu0 %v21112_v18  ;;  %v16850_v18 = vld [vmem:[%s21920_s2 + $0x184] ss:$12 sps:$4 sm:$0xff]  }
 0x5c4   :  { %11961 = vmatprep.subr.bf16.mxu1 %v16850_v18  ;;  %v16894_v18 = vld [vmem:[%s21921_s3 + $0x90] ss:$12 sps:$4 sm:$0xff]  }
 0x696   :  { %v10297_v26 = vpop.f32.mrb[0].mxu0 }
 0x697   :  { %v14876_v49 = vadd.f32 %v14875_v23, %v10297_v26  ;;  %v10299_v46 = vpop.f32.mrb[1].mxu0  ;;  %v16900_v23 = vld [vmem:[%s21921_s3 + $0xc0] ss:$12 sps:$4 sm:$0xff]   ;;  %v16903_v26 = vld [vmem:[%s21921_s3 + $0xd8] ss:$12 sps:$4 sm:$0xff]  }
 0x698   :  { %v14879_v14 = vadd.f32 %v14878_v28, %v10299_v46  ;;  %v10301_v59 = vpop.f32.mrb[2].mxu0  ;;  %v16905_v28 = vld [vmem:[%s21921_s3 + $0xdc] ss:$12 sps:$4 sm:$0xff]  }
 0x699   :  { %v14877_v56 = vadd.f32 %v14876_v49, %v19219_v11  ;;  %v10302_v21 = vpop.f32.mrb[3].mxu0  ;;  %v16851_v11 = vld [vmem:[%s21920_s2 + $0x198] ss:$12 sps:$4 sm:$0xff]   ;;  %v16908_v49 = vld [vmem:[%s21921_s3 + $0xf4] ss:$12 sps:$4 sm:$0xff]  }
 0x69a   :  { %v14880_v24 = vadd.f32 %v14879_v14, %v19230_v3  ;;  %v16854_v3 = vld [vmem:[%s21920_s2 + $0x1b4] ss:$12 sps:$4 sm:$0x3f]   ;;  %v16906_v46 = vld [vmem:[%s21921_s3 + $0xf0] ss:$12 sps:$4 sm:$0xff]  }
 0x69b   :  { %v11505_v12 = vmax.f32 %v14877_v56, 0.0  ;;  %v16911_v14 = vld [vmem:[%s21921_s3 + $0x10c] ss:$12 sps:$4 sm:$0xff]   ;;  %v16909_v59 = vld [vmem:[%s21921_s3 + $0x108] ss:$12 sps:$4 sm:$0xff]  }
 0x69c   :  { %v11506_v44 = vmax.f32 %v14880_v24, 0.0  ;;  %v16914_v56 = vld [vmem:[%s21921_s3 + $0x124] ss:$12 sps:$4 sm:$0xff]   ;;  %v16912_v21 = vld [vmem:[%s21921_s3 + $0x120] ss:$12 sps:$4 sm:$0xff]  }
 0x69d   :  { %v11508_v22 = vpack.c.bf16 %v11505_v12, %v11505_v12  ;;  %v16917_v24 = vld [vmem:[%s21921_s3 + $0x13c] ss:$12 sps:$4 sm:$0xff]   ;;  %v16915_v12 = vld [vmem:[%s21921_s3 + $0x138] ss:$12 sps:$4 sm:$0xff]  }
 0x69e   :  { %v11509_v48 = vpack.c.bf16 %v11506_v44, %v11506_v44  ;;  %v16920_v44 = vld [vmem:[%s21921_s3 + $0x154] ss:$12 sps:$4 sm:$0xff]  }
 0x6a0   :  { %11952 = vmatprep.mubr.bf16.mxu1 %v11509_v48 }
 0x6a1   :  { %11953 = vmatmul.mubr.bf16.vlgmr.msra.gmra.mrb[124].mxu1 %v11508_v22 }
 0x6a2   :  { %11962 = vmatpush1.bf16.msra.mxu1 %v16848_v27  ;;  %11993 = vmatprep.mubr.bf16.mxu1 %v16957_v52  ;;  %v16923_v27 = vld [vmem:[%s21921_s3 + $0x16c] ss:$12 sps:$4 sm:$0xff]  }
 0x6a3   :  { %11963 = vmatprep.subr.bf16.mxu1 %v16853_v35  ;;  %v16926_v35 = vld [vmem:[%s21921_s3 + $0x184] ss:$12 sps:$4 sm:$0xff]  }
 0x6a6   :  { %11964 = vmatpush1.bf16.msra.mxu1 %v16851_v11  ;;  %v14052_v11 = vld [vmem:[%s21919_s4 + $0x1] ss:$8 sm:$0x7] }
 0x6a7   :  { %14110 = vmatprep.subr.msk.bf16.mxu1 %vm11910_vm2, %v16854_v3  ;;  %v11593_v3 = vrot.slane %v14052_v11, %v21608_v42  ;;  %v11597_v30 = vrot.slane %v14052_v11, %v21611_v45  ;;  %v11601_v38 = vrot.slane %v14052_v11, %v19287_v62 }
 0x6aa   :  { %11966 = vmatpush1.bf16.msra.mxu1 %v11912_v31 }
 0x6ab   :  { %14795 = vmatprep.subr.bf16.mxu1 %v16857_v55 }
 0x6ad   :  { %14111 = vmatmul.mubr.msk.bf16.vlgmr.msra.gmra.mrb[124].mxu1 %vm11906_vm3, %v11510_v43 }
 0x6ae   :  { %14796 = vmatpush3.bf16.msra.mxu1 %v16858_v37  ;;  %12034 = vmatprep.mubr.bf16.mxu1 %v11509_v48  ;;  %v16918_v48 = vld [vmem:[%s21921_s3 + $0x150] ss:$12 sps:$4 sm:$0xff]  }
 0x6af   :  { %14797 = vmatprep.subr.bf16.mxu1 %v16859_v40 }
 0x6b2   :  { %14798 = vmatpush3.bf16.msra.mxu1 %v16860_v10 }
 0x6b3   :  { %14799 = vmatprep.subr.bf16.mxu1 %v16861_v19 }
 0x6b6   :  { %14800 = vmatpush3.bf16.msra.mxu1 %v16862_v61 }
 0x6b7   :  { %14801 = vmatprep.subr.bf16.mxu1 %v16863_v51  ;;  %v16924_v51 = vld [vmem:[%s21921_s3 + $0x180] ss:$12 sps:$4 sm:$0xff]  }
 0x6ba   :  { %14802 = vmatpush3.bf16.msra.mxu1 %v16864_v54 }
 0x6bb   :  { %14803 = vmatprep.subr.bf16.mxu1 %v16865_v36  ;;  %v16929_v36 = vld [vmem:[%s21921_s3 + $0x19c] ss:$12 sps:$4 sm:$0xff]  }
 0x6be   :  { %14804 = vmatpush3.bf16.msra.mxu1 %v16866_v25  ;;  %v16927_v25 = vld [vmem:[%s21921_s3 + $0x198] ss:$12 sps:$4 sm:$0xff]  }
 0x6bf   :  { %14805 = vmatprep.subr.bf16.mxu1 %v16867_v57  ;;  %v16930_v57 = vld [vmem:[%s21921_s3 + $0x1b4] ss:$12 sps:$4 sm:$0x3f]  }
 0x6c2   :  { %14806 = vmatpush3.bf16.msra.mxu1 %v16868_v50  ;;  %v16932_v50 = vld [vmem:[%s21921_s3 + $0x1b0] ss:$12 sps:$4 sm:$0x3f]  }
 0x6c3   :  { %14807 = vmatprep.subr.bf16.mxu1 %v16869_v60  ;;  %v12487_v60 = vsel %vm11910_vm2, %v16932_v50, 0 }
 0x6c6   :  { %14808 = vmatpush3.bf16.msra.mxu1 %v16870_v4  ;;  %v16933_v4 = vld [vmem:[%s21921_s3 + $0xc8] ss:$12 sps:$4 sm:$0xff]  }
 0x6c7   :  { %14809 = vmatprep.subr.bf16.mxu1 %v16871_v41 }
 0x6ca   :  { %14810 = vmatpush3.bf16.msra.mxu1 %v16872_v6 }
 0x6cb   :  { %14855 = vmatprep.subr.bf16.mxu1 %v16958_v20 }
 0x6cd   :  { %12035 = vmatmul.mubr.bf16.vlgmr.msra.gmra.mrb[128].mxu1 %v11508_v22  ;;  %v16921_v22 = vld [vmem:[%s21921_s3 + $0x168] ss:$12 sps:$4 sm:$0xff]  }
 0x6ce   :  { %14856 = vmatpush3.bf16.msra.mxu1 %v16873_v33  ;;  %14861 = vmatprep.mubr.msk.bf16.mxu1 %vm16959_vm1, %v16958_v20 }
 0x6cf   :  { %14857 = vmatprep.subr.bf16.mxu1 %v16958_v20 }
 0x6d2   :  { %14858 = vmatpush3.bf16.msra.mxu1 %v16874_v63 }
 0x6d3   :  { %14859 = vmatprep.subr.bf16.mxu1 %v16958_v20 }
 0x6d6   :  { %14860 = vmatpush3.bf16.msra.mxu1 %v11918_v1 }
 0x6d7   :  { %12495 = vmatprep.subr.bf16.mxu1 %v16878_v9 }
 0x6d9   :  { %14862 = vmatmul.mubr.msk.bf16.vlgmr.msra.gmra.mrb[132].mxu1 %vm11906_vm3, %v11510_v43 }
 0x6da   :  { %12496 = vmatpush1.bf16.msra.mxu1 %v16876_v5 }
 0x6db   :  { %12497 = vmatprep.subr.bf16.mxu1 %v16881_v0 }
 0x6de   :  { %12498 = vmatpush1.bf16.msra.mxu1 %v16879_v8 }
 0x6df   :  { %12499 = vmatprep.subr.bf16.mxu1 %v16884_v39 }
 0x6e2   :  { %12500 = vmatpush1.bf16.msra.mxu1 %v16882_v13 }
 0x6e3   :  { %12501 = vmatprep.subr.bf16.mxu1 %v16887_v16  ;;  %v16934_v16 = vld [vmem:[%s21921_s3 + $0x8] ss:$12 sps:$4 sm:$0xff]  }
 0x6e6   :  { %12502 = vmatpush1.bf16.msra.mxu1 %v16885_v7 }
 0x6e7   :  { %12503 = vmatprep.subr.bf16.mxu1 %v16890_v47  ;;  %v16935_v47 = vld [vmem:[%s21921_s3 + $0xe0] ss:$12 sps:$4 sm:$0xff]  }
 0x6ea   :  { %12504 = vmatpush1.bf16.msra.mxu1 %v16888_v34  ;;  %v16936_v34 = vld [vmem:[%s21921_s3 + $0x20] ss:$12 sps:$4 sm:$0xff]  }
 0x6eb   :  { %12505 = vmatprep.subr.bf16.mxu1 %v16893_v53  ;;  %v16937_v53 = vld [vmem:[%s21921_s3 + $0xf8] ss:$12 sps:$4 sm:$0xff]  }
 0x6ee   :  { %12506 = vmatpush1.bf16.msra.mxu1 %v16891_v58  ;;  %v16938_v58 = vld [vmem:[%s21921_s3 + $0x38] ss:$12 sps:$4 sm:$0xff]  }
 0x6ef   :  { %12507 = vmatprep.subr.bf16.mxu1 %v16896_v32  ;;  %v16939_v32 = vld [vmem:[%s21921_s3 + $0x110] ss:$12 sps:$4 sm:$0xff]  }
 0x6f2   :  { %12508 = vmatpush1.bf16.msra.mxu1 %v16894_v18  ;;  %v16940_v18 = vld [vmem:[%s21921_s3 + $0x50] ss:$12 sps:$4 sm:$0xff]  }
 0x6f3   :  { %12509 = vmatprep.subr.bf16.mxu1 %v16899_v15  ;;  %v16941_v15 = vld [vmem:[%s21921_s3 + $0x128] ss:$12 sps:$4 sm:$0xff]  }
 0x6f6   :  { %12510 = vmatpush1.bf16.msra.mxu1 %v16897_v17  ;;  %v16942_v17 = vld [vmem:[%s21921_s3 + $0x68] ss:$12 sps:$4 sm:$0xff]  }
 0x6f7   :  { %12511 = vmatprep.subr.bf16.mxu1 %v16902_v2  ;;  %v16943_v2 = vld [vmem:[%s21921_s3 + $0x140] ss:$12 sps:$4 sm:$0xff]  }
 0x6fa   :  { %12512 = vmatpush1.bf16.msra.mxu1 %v16900_v23  ;;  %v16944_v23 = vld [vmem:[%s21921_s3 + $0x80] ss:$12 sps:$4 sm:$0xff]  }
 0x6fb   :  { %12513 = vmatprep.subr.bf16.mxu1 %v16905_v28  ;;  %v16945_v28 = vld [vmem:[%s21921_s3 + $0x158] ss:$12 sps:$4 sm:$0xff]  }
 0x6fe   :  { %12514 = vmatpush1.bf16.msra.mxu1 %v16903_v26  ;;  %v16946_v26 = vld [vmem:[%s21921_s3 + $0x98] ss:$12 sps:$4 sm:$0xff]  }
 0x6ff   :  { %12515 = vmatprep.subr.bf16.mxu1 %v16908_v49  ;;  %v16947_v49 = vld [vmem:[%s21921_s3 + $0x170] ss:$12 sps:$4 sm:$0xff]  }
 0x702   :  { %12516 = vmatpush1.bf16.msra.mxu1 %v16906_v46  ;;  %v16948_v46 = vld [vmem:[%s21921_s3 + $0xb0] ss:$12 sps:$4 sm:$0xff]  }
 0x703   :  { %12517 = vmatprep.subr.bf16.mxu1 %v16911_v14  ;;  %v16949_v14 = vld [vmem:[%s21921_s3 + $0x188] ss:$12 sps:$4 sm:$0xff]  }
 0x706   :  { %12518 = vmatpush1.bf16.msra.mxu1 %v16909_v59  ;;  %v16950_v59 = vld [vmem:[%s21921_s3 + $0x1a0] ss:$12 sps:$4 sm:$0xff]  }
 0x707   :  { %12519 = vmatprep.subr.bf16.mxu1 %v16914_v56  ;;  %v16951_v56 = vld [vmem:[%s21921_s3 + $0x1b8] ss:$12 sps:$4 sm:$0x3f]  }
 0x70a   :  { %12520 = vmatpush1.bf16.msra.mxu1 %v16912_v21  ;;  %v12493_v21 = vsel %vm11910_vm2, %v16951_v56, 0 }
 0x70b   :  { %12521 = vmatprep.subr.bf16.mxu1 %v16917_v24  ;;  %v14113_v24 = vld [vmem:[%s21919_s4 + $0x2] ss:$8 sm:$0x7] }
 0x70e   :  { %12522 = vmatpush1.bf16.msra.mxu1 %v16915_v12  ;;  %v12170_v12 = vrot.slane %v14113_v24, %v21608_v42 }
 0x70f   :  { %12523 = vmatprep.subr.bf16.mxu1 %v16920_v44  ;;  %v14174_v44 = vld [vmem:[%s21919_s4 + $0x3] ss:$8 sm:$0x7] }
 0x712   :  { %12524 = vmatpush1.bf16.msra.mxu1 %v16918_v48  ;;  %v12174_v48 = vrot.slane %v14113_v24, %v21611_v45 }
 0x713   :  { %12525 = vmatprep.subr.bf16.mxu1 %v16923_v27 }
 0x716   :  { %12526 = vmatpush1.bf16.msra.mxu1 %v16921_v22 }
 0x717   :  { %12536 = vmatprep.subr.bf16.mxu1 %v16926_v35 }
 0x780   :  { %v11995_v29 = vpop.f32.mrb[124].mxu1 }
 0x781   :  { %v14881_v31 = vadd.f32 %v11995_v29, %v11593_v3  ;;  %v11997_v55 = vpop.f32.mrb[125].mxu1  ;;  %v12670_v3 = vrot.slane %v14174_v44, %v21611_v45  ;;  %v12674_v45 = vrot.slane %v14174_v44, %v19287_v62 }
 0x782   :  { %v14882_v37 = vadd.f32 %v11997_v55, %v11597_v30  ;;  %v11999_v43 = vpop.f32.mrb[126].mxu1 }
 0x783   :  { %v12082_v40 = vmax.f32 %v14881_v31, 0.0  ;;  %v12000_v10 = vpop.f32.mrb[127].mxu1 }
 0x784   :  { %v12083_v19 = vmax.f32 %v14882_v37, 0.0 }
 0x785   :  { %v21813_v54 = vpack.c.bf16 %v12082_v40, %v12082_v40 }
 0x786   :  { %v12086_v61 = vpack.c.bf16 %v12083_v19, %v12083_v19 }
 0x788   :  { %12527 = vmatprep.mubr.bf16.mxu1 %v12086_v61 }
 0x789   :  { %12528 = vmatmul.mubr.bf16.vlgmr.msra.gmra.mrb[136].mxu1 %v21813_v54 }
 0x78a   :  { %12537 = vmatpush1.bf16.msra.mxu1 %v16924_v51  ;;  %12568 = vmatprep.mubr.bf16.mxu1 %v16957_v52 }
 0x78b   :  { %12538 = vmatprep.subr.bf16.mxu1 %v16929_v36  ;;  %v12178_v36 = vrot.slane %v14113_v24, %v19287_v62 }
 0x78e   :  { %12539 = vmatpush1.bf16.msra.mxu1 %v16927_v25 }
 0x78f   :  { %14171 = vmatprep.subr.msk.bf16.mxu1 %vm11910_vm2, %v16930_v57 }
 0x792   :  { %12541 = vmatpush1.bf16.msra.mxu1 %v12487_v60 }
 0x793   :  { %14821 = vmatprep.subr.bf16.mxu1 %v16933_v4 }
 0x7a0   :  { %v14811_v52 = vpop.f32.mrb[128].mxu1 }
 0x7a1   :  { %v14812_v41 = vpop.f32.mrb[129].mxu1 }
 0x7a2   :  { %v14813_v6 = vadd.f32 %v14812_v41, %v14811_v52  ;;  %v14814_v33 = vpop.f32.mrb[130].mxu1 }
 0x7a3   :  { %v14815_v63 = vpop.f32.mrb[131].mxu1 }
 0x7a4   :  { %v12037_v1 = vadd.f32 %v14813_v6, %v11601_v38  ;;  %v12686_v63 = vld [vmem:[%s21919_s4 + $0x4] ss:$0 sm:$0xff] }
 0x7ac   :  { %v12076_v9 = vpop.f32.mrb[132].mxu1 }
 0x7ad   :  { %v12077_v5 = vadd.f32 %v12076_v9, %v12037_v1  ;;  %v14863_v0 = vpop.f32.mrb[133].mxu1 }
 0x7ae   :  { %v12079_v8 = vpop.f32.mrb[134].mxu1 }
 0x7af   :  { %v12084_v39 = vmax.f32 %v12077_v5, 0.0  ;;  %v14864_v13 = vpop.f32.mrb[135].mxu1 }
 0x7b1   :  { %v12087_v7 = vpack.c.bf16 %v12084_v39, %v12084_v39 }
 0x7b3   :  { %14172 = vmatmul.mubr.msk.bf16.vlgmr.msra.gmra.mrb[136].mxu1 %vm11906_vm3, %v12087_v7 }
 0x7b4   :  { %14822 = vmatpush3.bf16.msra.mxu1 %v16934_v16  ;;  %12609 = vmatprep.mubr.bf16.mxu1 %v12086_v61 }
 0x7b5   :  { %14823 = vmatprep.subr.bf16.mxu1 %v16935_v47 }
 0x7b8   :  { %14824 = vmatpush3.bf16.msra.mxu1 %v16936_v34 }
 0x7b9   :  { %14825 = vmatprep.subr.bf16.mxu1 %v16937_v53 }
 0x7bc   :  { %14826 = vmatpush3.bf16.msra.mxu1 %v16938_v58 }
 0x7bd   :  { %14827 = vmatprep.subr.bf16.mxu1 %v16939_v32 }
 0x7c0   :  { %14828 = vmatpush3.bf16.msra.mxu1 %v16940_v18 }
 0x7c1   :  { %14829 = vmatprep.subr.bf16.mxu1 %v16941_v15 }
 0x7c4   :  { %14830 = vmatpush3.bf16.msra.mxu1 %v16942_v17 }
 0x7c5   :  { %14831 = vmatprep.subr.bf16.mxu1 %v16943_v2 }
 0x7c8   :  { %14832 = vmatpush3.bf16.msra.mxu1 %v16944_v23 }
 0x7c9   :  { %14833 = vmatprep.subr.bf16.mxu1 %v16945_v28 }
 0x7cc   :  { %14834 = vmatpush3.bf16.msra.mxu1 %v16946_v26 }
 0x7cd   :  { %14835 = vmatprep.subr.bf16.mxu1 %v16947_v49 }
 0x7d0   :  { %14836 = vmatpush3.bf16.msra.mxu1 %v16948_v46 }
 0x7d1   :  { %14865 = vmatprep.subr.bf16.mxu1 %v16958_v20 }
 0x7d3   :  { %12610 = vmatmul.mubr.bf16.vlgmr.msra.gmra.mrb[140].mxu1 %v21813_v54 }
 0x7d4   :  { %14866 = vmatpush3.bf16.msra.mxu1 %v16949_v14  ;;  %14871 = vmatprep.mubr.msk.bf16.mxu1 %vm16959_vm1, %v16958_v20 }
 0x7d5   :  { %14867 = vmatprep.subr.bf16.mxu1 %v16958_v20 }
 0x7d8   :  { %14868 = vmatpush3.bf16.msra.mxu1 %v16950_v59 }
 0x7d9   :  { %14869 = vmatprep.subr.bf16.mxu1 %v16958_v20  ;;  %v12666_v20 = vrot.slane %v14174_v44, %v21608_v42 }
 0x7dc   :  { %14870 = vmatpush3.bf16.msra.mxu1 %v12493_v21 }
 0x7df   :  { %14872 = vmatmul.mubr.msk.bf16.vlgmr.msra.gmra.mrb[144].mxu1 %vm11906_vm3, %v12087_v7 }
 0x886   :  { %v12570_v27 = vpop.f32.mrb[136].mxu1 }
 0x887   :  { %v14883_v22 = vadd.f32 %v12570_v27, %v12170_v12  ;;  %v12572_v35 = vpop.f32.mrb[137].mxu1 }
 0x888   :  { %v14884_v11 = vadd.f32 %v12572_v35, %v12174_v48  ;;  %v12574_v30 = vpop.f32.mrb[138].mxu1 }
 0x889   :  { %v12657_v29 = vmax.f32 %v14883_v22, 0.0  ;;  %v12575_v31 = vpop.f32.mrb[139].mxu1 }
 0x88a   :  { %v12658_v55 = vmax.f32 %v14884_v11, 0.0 }
 0x88b   :  { %v12678_v37 = vmul.f32 %v12666_v20, %v12657_v29 }
 0x88c   :  { %v12679_v43 = vmul.f32 %v12670_v3, %v12658_v55 }
 0x88e   :  { %v12681_v40 = vadd.f32 %v12679_v43, %v12678_v37 }
 0x8a6   :  { %v14837_v10 = vpop.f32.mrb[140].mxu1 }
 0x8a7   :  { %v14838_v19 = vpop.f32.mrb[141].mxu1 }
 0x8a8   :  { %v14839_v61 = vadd.f32 %v14838_v19, %v14837_v10  ;;  %v14840_v51 = vpop.f32.mrb[142].mxu1 }
 0x8a9   :  { %v14841_v54 = vpop.f32.mrb[143].mxu1 }
 0x8aa   :  { %v12612_v25 = vadd.f32 %v14839_v61, %v12178_v36 }
 0x8b2   :  { %v12651_v42 = vpop.f32.mrb[144].mxu1 }
 0x8b3   :  { %v12652_v57 = vadd.f32 %v12651_v42, %v12612_v25  ;;  %v14873_v50 = vpop.f32.mrb[145].mxu1 }
 0x8b4   :  { %v12654_v60 = vpop.f32.mrb[146].mxu1 }
 0x8b5   :  { %v12659_v4 = vmax.f32 %v12652_v57, 0.0  ;;  %v14874_v52 = vpop.f32.mrb[147].mxu1 }
 0x8b7   :  { %v12680_v41 = vmul.f32 %v12674_v45, %v12659_v4 }
 0x8b9   :  { %v12682_v6 = vsel %vm11906_vm3, %v12680_v41, 0.0 }
 0x8ba   :  { %v12683_v33 = vadd.f32 %v12682_v6, %v12681_v40 }
 0x8bc   :  { %12684 = vadd.xlane.f32.xlu0 %v12683_v33 }
 0x949   :  { %v12685_v38 = vpop.xlane.xlu0 %12684 }
 0x94a   :  { %v12687_v1 = vadd.f32 %v12686_v63, %v12685_v38 }
 0x94c   :  { %v14175_v9 = vmul.f32 -1.442695, %v12687_v1 }
 0x94e   :  { %16952 = vpow2.f32 %v14175_v9 }
 0x958   :  { %v16953_v5 = vpop.eup %16952 }
 0x959   :  { %v12691_v0 = vadd.f32 1.0, %v16953_v5 }
 0x95b   :  { %16954 = vrcp.f32 %v12691_v0 }
 0x965   :  { %v16955_v62 = vpop.eup %16954 }
 0x966   :  { %12695 = vst.msk [vmem:[%s21922_s5] sm:$0xff] %vm12694_vm4, %v16955_v62 }

</bundles_post_ra>
